<compile_context>
chip_gen: v7x
topology: tpu7x:2x2x1
jax: 0.10.0
libtpu: 0.0.40
codegen_flags: <defaults>
</compile_context>

<pallas_src>
import numpy as np
import jax
import jax.numpy as jnp
from jax import lax
from jax.experimental import pallas as pl
from jax.experimental.pallas import tpu as pltpu


_EPS = 1e-5                  # PyTorch BatchNorm2d default
_LRELU_SLOPE = 0.2
_LANES = 128                 # lane-dense channel padding target
MATMUL_OPERAND_DTYPE = jnp.bfloat16   # MXU operand dtype (accumulation is f32)


# -----------------------------------------------------------------------------
# Layer configuration (matches the nn.Sequential in Discriminator):
#   (cout, cin, kh, kw, stride, pad, has_bn, has_lrelu, has_bias)
# -----------------------------------------------------------------------------
_CONV_CFG = [
    (64,   1,   4, 4, 2, 1, False, True,  False),
    (128,  64,  4, 4, 2, 1, True,  True,  False),
    (256,  128, 4, 4, 2, 1, True,  True,  False),
    (512,  256, 3, 3, 1, 1, True,  True,  False),
    (1,    512, 1, 1, 1, 0, False, False, True),   # nn.Conv2d default bias=True
]


def _out_hw(h, w, kh, kw, stride, pad):
    return ((h + 2 * pad - kh) // stride + 1,
            (w + 2 * pad - kw) // stride + 1)


# -----------------------------------------------------------------------------
# In-kernel helpers (traced into the single fused kernel body)
# -----------------------------------------------------------------------------
def _lrelu(y):
    return jnp.where(y >= 0.0, y, _LRELU_SLOPE * y)


def _bn_lrelu(y, gamma, beta):
    """Training-mode BatchNorm (biased var, two-pass) + LeakyReLU(0.2), f32."""
    inv_m = 1.0 / y.shape[0]                       # static
    mean = jnp.sum(y, axis=0, keepdims=True) * inv_m
    c = y - mean
    var = jnp.sum(c * c, axis=0, keepdims=True) * inv_m
    z = c * (gamma * lax.rsqrt(var + _EPS)) + beta
    return jnp.where(z >= 0.0, z, _LRELU_SLOPE * z)


def _tap_conv(x_op, s_ref, w_ref):
    """Implicit-GEMM conv: one-hot row gather (MXU) + per-tap accumulation.

    x_op  : (M_in, Cin)          activation, MATMUL_OPERAND_DTYPE
    s_ref : (taps*M_out, M_in)   one-hot tap-selection matrix (zero rows = pad)
    w_ref : (taps, Cin, Cout)    tap-major conv weights
    returns (M_out, Cout) f32
    """
    taps, _, cout = w_ref.shape
    m_out = s_ref.shape[0] // taps
    # Gather every shifted row in one matmul; entries are exact copies of x_op.
    p = jnp.dot(s_ref[...], x_op, preferred_element_type=jnp.float32)
    acc = jnp.zeros((m_out, cout), jnp.float32)
    for t in range(taps):                           # static unroll (<= 16)
        p_t = p[t * m_out:(t + 1) * m_out, :].astype(x_op.dtype)
        acc = acc + jnp.dot(p_t, w_ref[t], preferred_element_type=jnp.float32)
    return acc


def _discriminator_kernel(a1p_ref, w1_ref,
                          s2_ref, w2_ref, g2_ref, b2_ref,
                          s3_ref, w3_ref, g3_ref, b3_ref,
                          s4_ref, w4_ref, g4_ref, b4_ref,
                          w5_ref, bias5_ref, o_ref):
    op = MATMUL_OPERAND_DTYPE
    # Layer 1: Conv(1->64, 4x4, s2) as a plain matmul on tiny Cin=1 patches.
    y1 = jnp.dot(a1p_ref[...], w1_ref[...], preferred_element_type=jnp.float32)
    a1 = _lrelu(y1).astype(op)                                        # (M1,128)
    # Layer 2: Conv(64->128, 4x4, s2) + BN + LeakyReLU
    a2 = _bn_lrelu(_tap_conv(a1, s2_ref, w2_ref),
                   g2_ref[...], b2_ref[...]).astype(op)               # (M2,128)
    # Layer 3: Conv(128->256, 4x4, s2) + BN + LeakyReLU
    a3 = _bn_lrelu(_tap_conv(a2, s3_ref, w3_ref),
                   g3_ref[...], b3_ref[...]).astype(op)               # (M3,256)
    # Layer 4: Conv(256->512, 3x3, s1) + BN + LeakyReLU
    a4 = _bn_lrelu(_tap_conv(a3, s4_ref, w4_ref),
                   g4_ref[...], b4_ref[...]).astype(op)               # (M4,512)
    # Layer 5: Conv(512->1, 1x1) with bias; Cout zero-padded to 128 lanes.
    o_ref[...] = (jnp.dot(a4, w5_ref[...], preferred_element_type=jnp.float32)
                  + bias5_ref[...])


# -----------------------------------------------------------------------------
# Wrapper-side (plain JAX / numpy) glue: tiny layer-1 im2col, static one-hot
# selection matrices, parameter packing, forward pass.
# -----------------------------------------------------------------------------
def _layer1_patches(x_nchw):
    """im2col for the Cin=1 first conv (4x4, stride 2, pad 1).  Negligible bytes."""
    n, c, h, w = x_nchw.shape
    assert c == 1
    kh, kw, s, p = 4, 4, 2, 1
    ho, wo = _out_hw(h, w, kh, kw, s, p)
    xp = jnp.pad(x_nchw[:, 0], ((0, 0), (p, p), (p, p)))
    cols = [xp[:, i:i + s * ho:s, j:j + s * wo:s]
            for i in range(kh) for j in range(kw)]
    patches = jnp.stack(cols, axis=-1)                 # (N, Ho, Wo, kh*kw)
    return patches.reshape(n * ho * wo, kh * kw)


def _build_selection(n, h_in, w_in, kh, kw, stride, pad):
    """One-hot tap-selection matrix (taps*M_out, M_in); all-zero rows = padding."""
    h_out, w_out = _out_hw(h_in, w_in, kh, kw, stride, pad)
    m_in, m_out = n * h_in * w_in, n * h_out * w_out
    sel = np.zeros((kh * kw * m_out, m_in), dtype=np.float32)
    for b in range(n):
        for ho in range(h_out):
            for wo in range(w_out):
                r = (b * h_out + ho) * w_out + wo
                for i in range(kh):
                    for j in range(kw):
                        hi = ho * stride + i - pad
                        wi = wo * stride + j - pad
                        if 0 <= hi < h_in and 0 <= wi < w_in:
                            t = i * kw + j
                            sel[t * m_out + r, (b * h_in + hi) * w_in + wi] = 1.0
    return sel


def _pack_conv_taps(w, cin_pad=None, cout_pad=None):
    """PyTorch conv weight (Cout, Cin, kh, kw) -> tap-major (kh*kw, Cin, Cout)."""
    cout, cin, kh, kw = w.shape
    wt = jnp.transpose(w, (2, 3, 1, 0)).reshape(kh * kw, cin, cout)
    if cin_pad is not None and cin_pad > cin:
        wt = jnp.pad(wt, ((0, 0), (0, cin_pad - cin), (0, 0)))
    if cout_pad is not None and cout_pad > cout:
        wt = jnp.pad(wt, ((0, 0), (0, 0), (0, cout_pad - cout)))
    return wt


def init_params(key):
    """Deterministic init matching Discriminator.init_params()."""
    keys = iter(jax.random.split(key, 16))
    op = MATMUL_OPERAND_DTYPE
    p = {}

    # Layer 1: Conv(1->64, 4x4, s2, p1, bias=False); Cout padded to 128 lanes.
    w1 = 0.02 * jax.random.normal(next(keys), (64, 1, 4, 4), jnp.float32)
    p["w1"] = _pack_conv_taps(w1, cout_pad=_LANES).reshape(16, _LANES).astype(op)

    # Layers 2-4: Conv(bias=False) + BatchNorm (gamma~N(1,0.02), beta=0).
    w2 = 0.02 * jax.random.normal(next(keys), (128, 64, 4, 4), jnp.float32)
    p["w2"] = _pack_conv_taps(w2, cin_pad=_LANES).astype(op)        # (16,128,128)
    p["g2"] = 1.0 + 0.02 * jax.random.normal(next(keys), (1, 128), jnp.float32)
    p["b2"] = jnp.zeros((1, 128), jnp.float32)

    w3 = 0.02 * jax.random.normal(next(keys), (256, 128, 4, 4), jnp.float32)
    p["w3"] = _pack_conv_taps(w3).astype(op)                        # (16,128,256)
    p["g3"] = 1.0 + 0.02 * jax.random.normal(next(keys), (1, 256), jnp.float32)
    p["b3"] = jnp.zeros((1, 256), jnp.float32)

    w4 = 0.02 * jax.random.normal(next(keys), (512, 256, 3, 3), jnp.float32)
    p["w4"] = _pack_conv_taps(w4).astype(op)                        # (9,256,512)
    p["g4"] = 1.0 + 0.02 * jax.random.normal(next(keys), (1, 512), jnp.float32)
    p["b4"] = jnp.zeros((1, 512), jnp.float32)

    # Layer 5: Conv(512->1, 1x1) with PyTorch-default bias=True; Cout padded.
    w5 = 0.02 * jax.random.normal(next(keys), (1, 512, 1, 1), jnp.float32)
    p["w5"] = jnp.pad(w5[:, :, 0, 0].T, ((0, 0), (0, _LANES - 1))).astype(op)
    bound = 1.0 / np.sqrt(512.0)            # PyTorch default conv-bias init range
    b5 = jax.random.uniform(next(keys), (1,), jnp.float32, -bound, bound)
    p["b5"] = jnp.zeros((1, _LANES), jnp.float32).at[0, 0].set(b5[0])
    return p


def discriminator_forward(x_nchw, params):
    n, c, h, w = x_nchw.shape
    assert c == 1
    op = MATMUL_OPERAND_DTYPE

    # Spatial sizes through the network (static).
    h1, w1 = _out_hw(h,  w,  4, 4, 2, 1)
    h2, w2 = _out_hw(h1, w1, 4, 4, 2, 1)
    h3, w3 = _out_hw(h2, w2, 4, 4, 2, 1)
    h4, w4 = _out_hw(h3, w3, 3, 3, 1, 1)
    m4 = n * h4 * w4

    # Layer-1 patches (Cin=1 -> tiny) and static one-hot gather matrices.
    a1p = _layer1_patches(x_nchw.astype(jnp.float32)).astype(op)
    s2 = jnp.asarray(_build_selection(n, h1, w1, 4, 4, 2, 1), dtype=op)
    s3 = jnp.asarray(_build_selection(n, h2, w2, 4, 4, 2, 1), dtype=op)
    s4 = jnp.asarray(_build_selection(n, h3, w3, 3, 3, 1, 1), dtype=op)

    vmem = pl.BlockSpec(memory_space=pltpu.MemorySpace.VMEM)
    out_padded = pl.pallas_call(
        _discriminator_kernel,
        out_shape=jax.ShapeDtypeStruct((m4, _LANES), jnp.float32),
        in_specs=[vmem] * 16,
        out_specs=vmem,
    )(a1p, params["w1"],
      s2, params["w2"], params["g2"], params["b2"],
      s3, params["w3"], params["g3"], params["b3"],
      s4, params["w4"], params["g4"], params["b4"],
      params["w5"], params["b5"])

    out = out_padded[:, :1].reshape(n, h4, w4, 1)      # drop lane padding
    return jnp.transpose(out, (0, 3, 1, 2))            # NHWC -> NCHW


# -----------------------------------------------------------------------------
if __name__ == "__main__":
    root = jax.random.PRNGKey(0)
    k_in, k_par = jax.random.split(root)

    # PyTorch input layout: NCHW, single-channel Hi-C patch.
    x = jax.random.normal(k_in, (2, 1, 16, 16), dtype=jnp.float32)
    params = init_params(k_par)

    fwd = jax.jit(discriminator_forward)
    out = jax.block_until_ready(fwd(x, params))

    # 16x16 -> 8 -> 4 -> 2 -> 2 -> 2 spatial; 1 output channel.
    assert out.shape == (2, 1, 2, 2), out.shape
    assert out.dtype == jnp.float32
    assert bool(jnp.all(jnp.isfinite(out)))
    print("KERNEL_OK")
</pallas_src>

<mosaic_0001>
module attributes {stable_mosaic.version = 11 : i64} {
  func.func @_discriminator_kernel(%arg0: memref<128x16xbf16, #tpu.memory_space<vmem>>, %arg1: memref<16x128xbf16, #tpu.memory_space<vmem>>, %arg2: memref<512x128xbf16, #tpu.memory_space<vmem>>, %arg3: memref<16x128x128xbf16, #tpu.memory_space<vmem>>, %arg4: memref<1x128xf32, #tpu.memory_space<vmem>>, %arg5: memref<1x128xf32, #tpu.memory_space<vmem>>, %arg6: memref<128x32xbf16, #tpu.memory_space<vmem>>, %arg7: memref<16x128x256xbf16, #tpu.memory_space<vmem>>, %arg8: memref<1x256xf32, #tpu.memory_space<vmem>>, %arg9: memref<1x256xf32, #tpu.memory_space<vmem>>, %arg10: memref<72x8xbf16, #tpu.memory_space<vmem>>, %arg11: memref<9x256x512xbf16, #tpu.memory_space<vmem>>, %arg12: memref<1x512xf32, #tpu.memory_space<vmem>>, %arg13: memref<1x512xf32, #tpu.memory_space<vmem>>, %arg14: memref<512x128xbf16, #tpu.memory_space<vmem>>, %arg15: memref<1x128xf32, #tpu.memory_space<vmem>>, %arg16: memref<8x128xf32, #tpu.memory_space<vmem>>) attributes {dimension_semantics = [], scalar_prefetch = 0 : i64, scratch_operands = 0 : i64, tpu.core_type = #tpu.core_type<tc>} {
    %c0 = arith.constant 0 : index
    %c0_0 = arith.constant 0 : index
    %0 = vector.load %arg0[%c0, %c0_0] : memref<128x16xbf16, #tpu.memory_space<vmem>>, vector<128x16xbf16>
    %c0_1 = arith.constant 0 : index
    %c0_2 = arith.constant 0 : index
    %1 = vector.load %arg1[%c0_1, %c0_2] : memref<16x128xbf16, #tpu.memory_space<vmem>>, vector<16x128xbf16>
    %cst = arith.constant dense<0.000000e+00> : vector<128x128xf32>
    %2 = tpu.matmul %0, %1, %cst {dimension_numbers = #tpu.dot_dimension_numbers<[1], [0], [0], [1], [0, 0, 1, 1], [], []>} : vector<128x16xbf16>, vector<16x128xbf16>, vector<128x128xf32> -> vector<128x128xf32>
    %cst_3 = arith.constant 0.000000e+00 : f32
    %3 = vector.broadcast %cst_3 : f32 to vector<128x128xf32>
    %4 = arith.cmpf oge, %2, %3 : vector<128x128xf32>
    %cst_4 = arith.constant 2.000000e-01 : f32
    %5 = vector.broadcast %cst_4 : f32 to vector<128x128xf32>
    %6 = arith.mulf %5, %2 : vector<128x128xf32>
    %7 = arith.select %4, %2, %6 : vector<128x128xi1>, vector<128x128xf32>
    %8 = arith.truncf %7 : vector<128x128xf32> to vector<128x128xbf16>
    %c0_5 = arith.constant 0 : index
    %c0_6 = arith.constant 0 : index
    %9 = vector.load %arg2[%c0_5, %c0_6] : memref<512x128xbf16, #tpu.memory_space<vmem>>, vector<512x128xbf16>
    %cst_7 = arith.constant dense<0.000000e+00> : vector<512x128xf32>
    %10 = tpu.matmul %9, %8, %cst_7 {dimension_numbers = #tpu.dot_dimension_numbers<[1], [0], [0], [1], [0, 0, 1, 1], [], []>} : vector<512x128xbf16>, vector<128x128xbf16>, vector<512x128xf32> -> vector<512x128xf32>
    %cst_8 = arith.constant 0.000000e+00 : f32
    %11 = vector.broadcast %cst_8 : f32 to vector<32x128xf32>
    %12 = vector.extract_strided_slice %10 {offsets = [0, 0], sizes = [32, 128], strides = [1, 1]} : vector<512x128xf32> to vector<32x128xf32>
    %13 = arith.truncf %12 : vector<32x128xf32> to vector<32x128xbf16>
    %c0_9 = arith.constant 0 : index
    %c0_10 = arith.constant 0 : index
    %c0_11 = arith.constant 0 : index
    %14 = vector.load %arg3[%c0_9, %c0_10, %c0_11] : memref<16x128x128xbf16, #tpu.memory_space<vmem>>, vector<1x128x128xbf16>
    %15 = vector.shape_cast %14 : vector<1x128x128xbf16> to vector<128x128xbf16>
    %cst_12 = arith.constant dense<0.000000e+00> : vector<32x128xf32>
    %16 = tpu.matmul %13, %15, %cst_12 {dimension_numbers = #tpu.dot_dimension_numbers<[1], [0], [0], [1], [0, 0, 1, 1], [], []>} : vector<32x128xbf16>, vector<128x128xbf16>, vector<32x128xf32> -> vector<32x128xf32>
    %17 = arith.addf %11, %16 : vector<32x128xf32>
    %18 = vector.extract_strided_slice %10 {offsets = [32, 0], sizes = [32, 128], strides = [1, 1]} : vector<512x128xf32> to vector<32x128xf32>
    %19 = arith.truncf %18 : vector<32x128xf32> to vector<32x128xbf16>
    %c1 = arith.constant 1 : index
    %c0_13 = arith.constant 0 : index
    %c0_14 = arith.constant 0 : index
    %20 = vector.load %arg3[%c1, %c0_13, %c0_14] : memref<16x128x128xbf16, #tpu.memory_space<vmem>>, vector<1x128x128xbf16>
    %21 = vector.shape_cast %20 : vector<1x128x128xbf16> to vector<128x128xbf16>
    %cst_15 = arith.constant dense<0.000000e+00> : vector<32x128xf32>
    %22 = tpu.matmul %19, %21, %cst_15 {dimension_numbers = #tpu.dot_dimension_numbers<[1], [0], [0], [1], [0, 0, 1, 1], [], []>} : vector<32x128xbf16>, vector<128x128xbf16>, vector<32x128xf32> -> vector<32x128xf32>
    %23 = arith.addf %17, %22 : vector<32x128xf32>
    %24 = vector.extract_strided_slice %10 {offsets = [64, 0], sizes = [32, 128], strides = [1, 1]} : vector<512x128xf32> to vector<32x128xf32>
    %25 = arith.truncf %24 : vector<32x128xf32> to vector<32x128xbf16>
    %c2 = arith.constant 2 : index
    %c0_16 = arith.constant 0 : index
    %c0_17 = arith.constant 0 : index
    %26 = vector.load %arg3[%c2, %c0_16, %c0_17] : memref<16x128x128xbf16, #tpu.memory_space<vmem>>, vector<1x128x128xbf16>
    %27 = vector.shape_cast %26 : vector<1x128x128xbf16> to vector<128x128xbf16>
    %cst_18 = arith.constant dense<0.000000e+00> : vector<32x128xf32>
    %28 = tpu.matmul %25, %27, %cst_18 {dimension_numbers = #tpu.dot_dimension_numbers<[1], [0], [0], [1], [0, 0, 1, 1], [], []>} : vector<32x128xbf16>, vector<128x128xbf16>, vector<32x128xf32> -> vector<32x128xf32>
    %29 = arith.addf %23, %28 : vector<32x128xf32>
    %30 = vector.extract_strided_slice %10 {offsets = [96, 0], sizes = [32, 128], strides = [1, 1]} : vector<512x128xf32> to vector<32x128xf32>
    %31 = arith.truncf %30 : vector<32x128xf32> to vector<32x128xbf16>
    %c3 = arith.constant 3 : index
    %c0_19 = arith.constant 0 : index
    %c0_20 = arith.constant 0 : index
    %32 = vector.load %arg3[%c3, %c0_19, %c0_20] : memref<16x128x128xbf16, #tpu.memory_space<vmem>>, vector<1x128x128xbf16>
    %33 = vector.shape_cast %32 : vector<1x128x128xbf16> to vector<128x128xbf16>
    %cst_21 = arith.constant dense<0.000000e+00> : vector<32x128xf32>
    %34 = tpu.matmul %31, %33, %cst_21 {dimension_numbers = #tpu.dot_dimension_numbers<[1], [0], [0], [1], [0, 0, 1, 1], [], []>} : vector<32x128xbf16>, vector<128x128xbf16>, vector<32x128xf32> -> vector<32x128xf32>
    %35 = arith.addf %29, %34 : vector<32x128xf32>
    %36 = vector.extract_strided_slice %10 {offsets = [128, 0], sizes = [32, 128], strides = [1, 1]} : vector<512x128xf32> to vector<32x128xf32>
    %37 = arith.truncf %36 : vector<32x128xf32> to vector<32x128xbf16>
    %c4 = arith.constant 4 : index
    %c0_22 = arith.constant 0 : index
    %c0_23 = arith.constant 0 : index
    %38 = vector.load %arg3[%c4, %c0_22, %c0_23] : memref<16x128x128xbf16, #tpu.memory_space<vmem>>, vector<1x128x128xbf16>
    %39 = vector.shape_cast %38 : vector<1x128x128xbf16> to vector<128x128xbf16>
    %cst_24 = arith.constant dense<0.000000e+00> : vector<32x128xf32>
    %40 = tpu.matmul %37, %39, %cst_24 {dimension_numbers = #tpu.dot_dimension_numbers<[1], [0], [0], [1], [0, 0, 1, 1], [], []>} : vector<32x128xbf16>, vector<128x128xbf16>, vector<32x128xf32> -> vector<32x128xf32>
    %41 = arith.addf %35, %40 : vector<32x128xf32>
    %42 = vector.extract_strided_slice %10 {offsets = [160, 0], sizes = [32, 128], strides = [1, 1]} : vector<512x128xf32> to vector<32x128xf32>
    %43 = arith.truncf %42 : vector<32x128xf32> to vector<32x128xbf16>
    %c5 = arith.constant 5 : index
    %c0_25 = arith.constant 0 : index
    %c0_26 = arith.constant 0 : index
    %44 = vector.load %arg3[%c5, %c0_25, %c0_26] : memref<16x128x128xbf16, #tpu.memory_space<vmem>>, vector<1x128x128xbf16>
    %45 = vector.shape_cast %44 : vector<1x128x128xbf16> to vector<128x128xbf16>
    %cst_27 = arith.constant dense<0.000000e+00> : vector<32x128xf32>
    %46 = tpu.matmul %43, %45, %cst_27 {dimension_numbers = #tpu.dot_dimension_numbers<[1], [0], [0], [1], [0, 0, 1, 1], [], []>} : vector<32x128xbf16>, vector<128x128xbf16>, vector<32x128xf32> -> vector<32x128xf32>
    %47 = arith.addf %41, %46 : vector<32x128xf32>
    %48 = vector.extract_strided_slice %10 {offsets = [192, 0], sizes = [32, 128], strides = [1, 1]} : vector<512x128xf32> to vector<32x128xf32>
    %49 = arith.truncf %48 : vector<32x128xf32> to vector<32x128xbf16>
    %c6 = arith.constant 6 : index
    %c0_28 = arith.constant 0 : index
    %c0_29 = arith.constant 0 : index
    %50 = vector.load %arg3[%c6, %c0_28, %c0_29] : memref<16x128x128xbf16, #tpu.memory_space<vmem>>, vector<1x128x128xbf16>
    %51 = vector.shape_cast %50 : vector<1x128x128xbf16> to vector<128x128xbf16>
    %cst_30 = arith.constant dense<0.000000e+00> : vector<32x128xf32>
    %52 = tpu.matmul %49, %51, %cst_30 {dimension_numbers = #tpu.dot_dimension_numbers<[1], [0], [0], [1], [0, 0, 1, 1], [], []>} : vector<32x128xbf16>, vector<128x128xbf16>, vector<32x128xf32> -> vector<32x128xf32>
    %53 = arith.addf %47, %52 : vector<32x128xf32>
    %54 = vector.extract_strided_slice %10 {offsets = [224, 0], sizes = [32, 128], strides = [1, 1]} : vector<512x128xf32> to vector<32x128xf32>
    %55 = arith.truncf %54 : vector<32x128xf32> to vector<32x128xbf16>
    %c7 = arith.constant 7 : index
    %c0_31 = arith.constant 0 : index
    %c0_32 = arith.constant 0 : index
    %56 = vector.load %arg3[%c7, %c0_31, %c0_32] : memref<16x128x128xbf16, #tpu.memory_space<vmem>>, vector<1x128x128xbf16>
    %57 = vector.shape_cast %56 : vector<1x128x128xbf16> to vector<128x128xbf16>
    %cst_33 = arith.constant dense<0.000000e+00> : vector<32x128xf32>
    %58 = tpu.matmul %55, %57, %cst_33 {dimension_numbers = #tpu.dot_dimension_numbers<[1], [0], [0], [1], [0, 0, 1, 1], [], []>} : vector<32x128xbf16>, vector<128x128xbf16>, vector<32x128xf32> -> vector<32x128xf32>
    %59 = arith.addf %53, %58 : vector<32x128xf32>
    %60 = vector.extract_strided_slice %10 {offsets = [256, 0], sizes = [32, 128], strides = [1, 1]} : vector<512x128xf32> to vector<32x128xf32>
    %61 = arith.truncf %60 : vector<32x128xf32> to vector<32x128xbf16>
    %c8 = arith.constant 8 : index
    %c0_34 = arith.constant 0 : index
    %c0_35 = arith.constant 0 : index
    %62 = vector.load %arg3[%c8, %c0_34, %c0_35] : memref<16x128x128xbf16, #tpu.memory_space<vmem>>, vector<1x128x128xbf16>
    %63 = vector.shape_cast %62 : vector<1x128x128xbf16> to vector<128x128xbf16>
    %cst_36 = arith.constant dense<0.000000e+00> : vector<32x128xf32>
    %64 = tpu.matmul %61, %63, %cst_36 {dimension_numbers = #tpu.dot_dimension_numbers<[1], [0], [0], [1], [0, 0, 1, 1], [], []>} : vector<32x128xbf16>, vector<128x128xbf16>, vector<32x128xf32> -> vector<32x128xf32>
    %65 = arith.addf %59, %64 : vector<32x128xf32>
    %66 = vector.extract_strided_slice %10 {offsets = [288, 0], sizes = [32, 128], strides = [1, 1]} : vector<512x128xf32> to vector<32x128xf32>
    %67 = arith.truncf %66 : vector<32x128xf32> to vector<32x128xbf16>
    %c9 = arith.constant 9 : index
    %c0_37 = arith.constant 0 : index
    %c0_38 = arith.constant 0 : index
    %68 = vector.load %arg3[%c9, %c0_37, %c0_38] : memref<16x128x128xbf16, #tpu.memory_space<vmem>>, vector<1x128x128xbf16>
    %69 = vector.shape_cast %68 : vector<1x128x128xbf16> to vector<128x128xbf16>
    %cst_39 = arith.constant dense<0.000000e+00> : vector<32x128xf32>
    %70 = tpu.matmul %67, %69, %cst_39 {dimension_numbers = #tpu.dot_dimension_numbers<[1], [0], [0], [1], [0, 0, 1, 1], [], []>} : vector<32x128xbf16>, vector<128x128xbf16>, vector<32x128xf32> -> vector<32x128xf32>
    %71 = arith.addf %65, %70 : vector<32x128xf32>
    %72 = vector.extract_strided_slice %10 {offsets = [320, 0], sizes = [32, 128], strides = [1, 1]} : vector<512x128xf32> to vector<32x128xf32>
    %73 = arith.truncf %72 : vector<32x128xf32> to vector<32x128xbf16>
    %c10 = arith.constant 10 : index
    %c0_40 = arith.constant 0 : index
    %c0_41 = arith.constant 0 : index
    %74 = vector.load %arg3[%c10, %c0_40, %c0_41] : memref<16x128x128xbf16, #tpu.memory_space<vmem>>, vector<1x128x128xbf16>
    %75 = vector.shape_cast %74 : vector<1x128x128xbf16> to vector<128x128xbf16>
    %cst_42 = arith.constant dense<0.000000e+00> : vector<32x128xf32>
    %76 = tpu.matmul %73, %75, %cst_42 {dimension_numbers = #tpu.dot_dimension_numbers<[1], [0], [0], [1], [0, 0, 1, 1], [], []>} : vector<32x128xbf16>, vector<128x128xbf16>, vector<32x128xf32> -> vector<32x128xf32>
    %77 = arith.addf %71, %76 : vector<32x128xf32>
    %78 = vector.extract_strided_slice %10 {offsets = [352, 0], sizes = [32, 128], strides = [1, 1]} : vector<512x128xf32> to vector<32x128xf32>
    %79 = arith.truncf %78 : vector<32x128xf32> to vector<32x128xbf16>
    %c11 = arith.constant 11 : index
    %c0_43 = arith.constant 0 : index
    %c0_44 = arith.constant 0 : index
    %80 = vector.load %arg3[%c11, %c0_43, %c0_44] : memref<16x128x128xbf16, #tpu.memory_space<vmem>>, vector<1x128x128xbf16>
    %81 = vector.shape_cast %80 : vector<1x128x128xbf16> to vector<128x128xbf16>
    %cst_45 = arith.constant dense<0.000000e+00> : vector<32x128xf32>
    %82 = tpu.matmul %79, %81, %cst_45 {dimension_numbers = #tpu.dot_dimension_numbers<[1], [0], [0], [1], [0, 0, 1, 1], [], []>} : vector<32x128xbf16>, vector<128x128xbf16>, vector<32x128xf32> -> vector<32x128xf32>
    %83 = arith.addf %77, %82 : vector<32x128xf32>
    %84 = vector.extract_strided_slice %10 {offsets = [384, 0], sizes = [32, 128], strides = [1, 1]} : vector<512x128xf32> to vector<32x128xf32>
    %85 = arith.truncf %84 : vector<32x128xf32> to vector<32x128xbf16>
    %c12 = arith.constant 12 : index
    %c0_46 = arith.constant 0 : index
    %c0_47 = arith.constant 0 : index
    %86 = vector.load %arg3[%c12, %c0_46, %c0_47] : memref<16x128x128xbf16, #tpu.memory_space<vmem>>, vector<1x128x128xbf16>
    %87 = vector.shape_cast %86 : vector<1x128x128xbf16> to vector<128x128xbf16>
    %cst_48 = arith.constant dense<0.000000e+00> : vector<32x128xf32>
    %88 = tpu.matmul %85, %87, %cst_48 {dimension_numbers = #tpu.dot_dimension_numbers<[1], [0], [0], [1], [0, 0, 1, 1], [], []>} : vector<32x128xbf16>, vector<128x128xbf16>, vector<32x128xf32> -> vector<32x128xf32>
    %89 = arith.addf %83, %88 : vector<32x128xf32>
    %90 = vector.extract_strided_slice %10 {offsets = [416, 0], sizes = [32, 128], strides = [1, 1]} : vector<512x128xf32> to vector<32x128xf32>
    %91 = arith.truncf %90 : vector<32x128xf32> to vector<32x128xbf16>
    %c13 = arith.constant 13 : index
    %c0_49 = arith.constant 0 : index
    %c0_50 = arith.constant 0 : index
    %92 = vector.load %arg3[%c13, %c0_49, %c0_50] : memref<16x128x128xbf16, #tpu.memory_space<vmem>>, vector<1x128x128xbf16>
    %93 = vector.shape_cast %92 : vector<1x128x128xbf16> to vector<128x128xbf16>
    %cst_51 = arith.constant dense<0.000000e+00> : vector<32x128xf32>
    %94 = tpu.matmul %91, %93, %cst_51 {dimension_numbers = #tpu.dot_dimension_numbers<[1], [0], [0], [1], [0, 0, 1, 1], [], []>} : vector<32x128xbf16>, vector<128x128xbf16>, vector<32x128xf32> -> vector<32x128xf32>
    %95 = arith.addf %89, %94 : vector<32x128xf32>
    %96 = vector.extract_strided_slice %10 {offsets = [448, 0], sizes = [32, 128], strides = [1, 1]} : vector<512x128xf32> to vector<32x128xf32>
    %97 = arith.truncf %96 : vector<32x128xf32> to vector<32x128xbf16>
    %c14 = arith.constant 14 : index
    %c0_52 = arith.constant 0 : index
    %c0_53 = arith.constant 0 : index
    %98 = vector.load %arg3[%c14, %c0_52, %c0_53] : memref<16x128x128xbf16, #tpu.memory_space<vmem>>, vector<1x128x128xbf16>
    %99 = vector.shape_cast %98 : vector<1x128x128xbf16> to vector<128x128xbf16>
    %cst_54 = arith.constant dense<0.000000e+00> : vector<32x128xf32>
    %100 = tpu.matmul %97, %99, %cst_54 {dimension_numbers = #tpu.dot_dimension_numbers<[1], [0], [0], [1], [0, 0, 1, 1], [], []>} : vector<32x128xbf16>, vector<128x128xbf16>, vector<32x128xf32> -> vector<32x128xf32>
    %101 = arith.addf %95, %100 : vector<32x128xf32>
    %102 = vector.extract_strided_slice %10 {offsets = [480, 0], sizes = [32, 128], strides = [1, 1]} : vector<512x128xf32> to vector<32x128xf32>
    %103 = arith.truncf %102 : vector<32x128xf32> to vector<32x128xbf16>
    %c15 = arith.constant 15 : index
    %c0_55 = arith.constant 0 : index
    %c0_56 = arith.constant 0 : index
    %104 = vector.load %arg3[%c15, %c0_55, %c0_56] : memref<16x128x128xbf16, #tpu.memory_space<vmem>>, vector<1x128x128xbf16>
    %105 = vector.shape_cast %104 : vector<1x128x128xbf16> to vector<128x128xbf16>
    %cst_57 = arith.constant dense<0.000000e+00> : vector<32x128xf32>
    %106 = tpu.matmul %103, %105, %cst_57 {dimension_numbers = #tpu.dot_dimension_numbers<[1], [0], [0], [1], [0, 0, 1, 1], [], []>} : vector<32x128xbf16>, vector<128x128xbf16>, vector<32x128xf32> -> vector<32x128xf32>
    %107 = arith.addf %101, %106 : vector<32x128xf32>
    %c0_58 = arith.constant 0 : index
    %c0_59 = arith.constant 0 : index
    %108 = vector.load %arg4[%c0_58, %c0_59] : memref<1x128xf32, #tpu.memory_space<vmem>>, vector<1x128xf32>
    %c0_60 = arith.constant 0 : index
    %c0_61 = arith.constant 0 : index
    %109 = vector.load %arg5[%c0_60, %c0_61] : memref<1x128xf32, #tpu.memory_space<vmem>>, vector<1x128xf32>
    %cst_62 = arith.constant dense<0.000000e+00> : vector<128xf32>
    %110 = vector.multi_reduction <add>, %107, %cst_62 [0] : vector<32x128xf32> to vector<128xf32>
    %111 = vector.shape_cast %110 : vector<128xf32> to vector<1x128xf32>
    %cst_63 = arith.constant 3.125000e-02 : f32
    %112 = vector.broadcast %cst_63 : f32 to vector<1x128xf32>
    %113 = arith.mulf %111, %112 : vector<1x128xf32>
    %114 = vector.broadcast %113 : vector<1x128xf32> to vector<32x128xf32>
    %115 = arith.subf %107, %114 : vector<32x128xf32>
    %116 = arith.mulf %115, %115 : vector<32x128xf32>
    %cst_64 = arith.constant dense<0.000000e+00> : vector<128xf32>
    %117 = vector.multi_reduction <add>, %116, %cst_64 [0] : vector<32x128xf32> to vector<128xf32>
    %118 = vector.shape_cast %117 : vector<128xf32> to vector<1x128xf32>
    %cst_65 = arith.constant 3.125000e-02 : f32
    %119 = vector.broadcast %cst_65 : f32 to vector<1x128xf32>
    %120 = arith.mulf %118, %119 : vector<1x128xf32>
    %cst_66 = arith.constant 9.99999974E-6 : f32
    %121 = vector.broadcast %cst_66 : f32 to vector<1x128xf32>
    %122 = arith.addf %120, %121 : vector<1x128xf32>
    %123 = math.rsqrt %122 : vector<1x128xf32>
    %124 = arith.mulf %108, %123 : vector<1x128xf32>
    %125 = vector.broadcast %124 : vector<1x128xf32> to vector<32x128xf32>
    %126 = arith.mulf %115, %125 : vector<32x128xf32>
    %127 = vector.broadcast %109 : vector<1x128xf32> to vector<32x128xf32>
    %128 = arith.addf %126, %127 : vector<32x128xf32>
    %cst_67 = arith.constant 0.000000e+00 : f32
    %129 = vector.broadcast %cst_67 : f32 to vector<32x128xf32>
    %130 = arith.cmpf oge, %128, %129 : vector<32x128xf32>
    %cst_68 = arith.constant 2.000000e-01 : f32
    %131 = vector.broadcast %cst_68 : f32 to vector<32x128xf32>
    %132 = arith.mulf %131, %128 : vector<32x128xf32>
    %133 = arith.select %130, %128, %132 : vector<32x128xi1>, vector<32x128xf32>
    %134 = arith.truncf %133 : vector<32x128xf32> to vector<32x128xbf16>
    %c0_69 = arith.constant 0 : index
    %c0_70 = arith.constant 0 : index
    %135 = vector.load %arg6[%c0_69, %c0_70] : memref<128x32xbf16, #tpu.memory_space<vmem>>, vector<128x32xbf16>
    %cst_71 = arith.constant dense<0.000000e+00> : vector<128x128xf32>
    %136 = tpu.matmul %135, %134, %cst_71 {dimension_numbers = #tpu.dot_dimension_numbers<[1], [0], [0], [1], [0, 0, 1, 1], [], []>} : vector<128x32xbf16>, vector<32x128xbf16>, vector<128x128xf32> -> vector<128x128xf32>
    %cst_72 = arith.constant 0.000000e+00 : f32
    %137 = vector.broadcast %cst_72 : f32 to vector<8x256xf32>
    %138 = vector.extract_strided_slice %136 {offsets = [0, 0], sizes = [8, 128], strides = [1, 1]} : vector<128x128xf32> to vector<8x128xf32>
    %139 = arith.truncf %138 : vector<8x128xf32> to vector<8x128xbf16>
    %c0_73 = arith.constant 0 : index
    %c0_74 = arith.constant 0 : index
    %c0_75 = arith.constant 0 : index
    %140 = vector.load %arg7[%c0_73, %c0_74, %c0_75] : memref<16x128x256xbf16, #tpu.memory_space<vmem>>, vector<1x128x256xbf16>
    %141 = vector.shape_cast %140 : vector<1x128x256xbf16> to vector<128x256xbf16>
    %cst_76 = arith.constant dense<0.000000e+00> : vector<8x256xf32>
    %142 = tpu.matmul %139, %141, %cst_76 {dimension_numbers = #tpu.dot_dimension_numbers<[1], [0], [0], [1], [0, 0, 1, 1], [], []>} : vector<8x128xbf16>, vector<128x256xbf16>, vector<8x256xf32> -> vector<8x256xf32>
    %143 = arith.addf %137, %142 : vector<8x256xf32>
    %144 = vector.extract_strided_slice %136 {offsets = [8, 0], sizes = [8, 128], strides = [1, 1]} : vector<128x128xf32> to vector<8x128xf32>
    %145 = arith.truncf %144 : vector<8x128xf32> to vector<8x128xbf16>
    %c1_77 = arith.constant 1 : index
    %c0_78 = arith.constant 0 : index
    %c0_79 = arith.constant 0 : index
    %146 = vector.load %arg7[%c1_77, %c0_78, %c0_79] : memref<16x128x256xbf16, #tpu.memory_space<vmem>>, vector<1x128x256xbf16>
    %147 = vector.shape_cast %146 : vector<1x128x256xbf16> to vector<128x256xbf16>
    %cst_80 = arith.constant dense<0.000000e+00> : vector<8x256xf32>
    %148 = tpu.matmul %145, %147, %cst_80 {dimension_numbers = #tpu.dot_dimension_numbers<[1], [0], [0], [1], [0, 0, 1, 1], [], []>} : vector<8x128xbf16>, vector<128x256xbf16>, vector<8x256xf32> -> vector<8x256xf32>
    %149 = arith.addf %143, %148 : vector<8x256xf32>
    %150 = vector.extract_strided_slice %136 {offsets = [16, 0], sizes = [8, 128], strides = [1, 1]} : vector<128x128xf32> to vector<8x128xf32>
    %151 = arith.truncf %150 : vector<8x128xf32> to vector<8x128xbf16>
    %c2_81 = arith.constant 2 : index
    %c0_82 = arith.constant 0 : index
    %c0_83 = arith.constant 0 : index
    %152 = vector.load %arg7[%c2_81, %c0_82, %c0_83] : memref<16x128x256xbf16, #tpu.memory_space<vmem>>, vector<1x128x256xbf16>
    %153 = vector.shape_cast %152 : vector<1x128x256xbf16> to vector<128x256xbf16>
    %cst_84 = arith.constant dense<0.000000e+00> : vector<8x256xf32>
    %154 = tpu.matmul %151, %153, %cst_84 {dimension_numbers = #tpu.dot_dimension_numbers<[1], [0], [0], [1], [0, 0, 1, 1], [], []>} : vector<8x128xbf16>, vector<128x256xbf16>, vector<8x256xf32> -> vector<8x256xf32>
    %155 = arith.addf %149, %154 : vector<8x256xf32>
    %156 = vector.extract_strided_slice %136 {offsets = [24, 0], sizes = [8, 128], strides = [1, 1]} : vector<128x128xf32> to vector<8x128xf32>
    %157 = arith.truncf %156 : vector<8x128xf32> to vector<8x128xbf16>
    %c3_85 = arith.constant 3 : index
    %c0_86 = arith.constant 0 : index
    %c0_87 = arith.constant 0 : index
    %158 = vector.load %arg7[%c3_85, %c0_86, %c0_87] : memref<16x128x256xbf16, #tpu.memory_space<vmem>>, vector<1x128x256xbf16>
    %159 = vector.shape_cast %158 : vector<1x128x256xbf16> to vector<128x256xbf16>
    %cst_88 = arith.constant dense<0.000000e+00> : vector<8x256xf32>
    %160 = tpu.matmul %157, %159, %cst_88 {dimension_numbers = #tpu.dot_dimension_numbers<[1], [0], [0], [1], [0, 0, 1, 1], [], []>} : vector<8x128xbf16>, vector<128x256xbf16>, vector<8x256xf32> -> vector<8x256xf32>
    %161 = arith.addf %155, %160 : vector<8x256xf32>
    %162 = vector.extract_strided_slice %136 {offsets = [32, 0], sizes = [8, 128], strides = [1, 1]} : vector<128x128xf32> to vector<8x128xf32>
    %163 = arith.truncf %162 : vector<8x128xf32> to vector<8x128xbf16>
    %c4_89 = arith.constant 4 : index
    %c0_90 = arith.constant 0 : index
    %c0_91 = arith.constant 0 : index
    %164 = vector.load %arg7[%c4_89, %c0_90, %c0_91] : memref<16x128x256xbf16, #tpu.memory_space<vmem>>, vector<1x128x256xbf16>
    %165 = vector.shape_cast %164 : vector<1x128x256xbf16> to vector<128x256xbf16>
    %cst_92 = arith.constant dense<0.000000e+00> : vector<8x256xf32>
    %166 = tpu.matmul %163, %165, %cst_92 {dimension_numbers = #tpu.dot_dimension_numbers<[1], [0], [0], [1], [0, 0, 1, 1], [], []>} : vector<8x128xbf16>, vector<128x256xbf16>, vector<8x256xf32> -> vector<8x256xf32>
    %167 = arith.addf %161, %166 : vector<8x256xf32>
    %168 = vector.extract_strided_slice %136 {offsets = [40, 0], sizes = [8, 128], strides = [1, 1]} : vector<128x128xf32> to vector<8x128xf32>
    %169 = arith.truncf %168 : vector<8x128xf32> to vector<8x128xbf16>
    %c5_93 = arith.constant 5 : index
    %c0_94 = arith.constant 0 : index
    %c0_95 = arith.constant 0 : index
    %170 = vector.load %arg7[%c5_93, %c0_94, %c0_95] : memref<16x128x256xbf16, #tpu.memory_space<vmem>>, vector<1x128x256xbf16>
    %171 = vector.shape_cast %170 : vector<1x128x256xbf16> to vector<128x256xbf16>
    %cst_96 = arith.constant dense<0.000000e+00> : vector<8x256xf32>
    %172 = tpu.matmul %169, %171, %cst_96 {dimension_numbers = #tpu.dot_dimension_numbers<[1], [0], [0], [1], [0, 0, 1, 1], [], []>} : vector<8x128xbf16>, vector<128x256xbf16>, vector<8x256xf32> -> vector<8x256xf32>
    %173 = arith.addf %167, %172 : vector<8x256xf32>
    %174 = vector.extract_strided_slice %136 {offsets = [48, 0], sizes = [8, 128], strides = [1, 1]} : vector<128x128xf32> to vector<8x128xf32>
    %175 = arith.truncf %174 : vector<8x128xf32> to vector<8x128xbf16>
    %c6_97 = arith.constant 6 : index
    %c0_98 = arith.constant 0 : index
    %c0_99 = arith.constant 0 : index
    %176 = vector.load %arg7[%c6_97, %c0_98, %c0_99] : memref<16x128x256xbf16, #tpu.memory_space<vmem>>, vector<1x128x256xbf16>
    %177 = vector.shape_cast %176 : vector<1x128x256xbf16> to vector<128x256xbf16>
    %cst_100 = arith.constant dense<0.000000e+00> : vector<8x256xf32>
    %178 = tpu.matmul %175, %177, %cst_100 {dimension_numbers = #tpu.dot_dimension_numbers<[1], [0], [0], [1], [0, 0, 1, 1], [], []>} : vector<8x128xbf16>, vector<128x256xbf16>, vector<8x256xf32> -> vector<8x256xf32>
    %179 = arith.addf %173, %178 : vector<8x256xf32>
    %180 = vector.extract_strided_slice %136 {offsets = [56, 0], sizes = [8, 128], strides = [1, 1]} : vector<128x128xf32> to vector<8x128xf32>
    %181 = arith.truncf %180 : vector<8x128xf32> to vector<8x128xbf16>
    %c7_101 = arith.constant 7 : index
    %c0_102 = arith.constant 0 : index
    %c0_103 = arith.constant 0 : index
    %182 = vector.load %arg7[%c7_101, %c0_102, %c0_103] : memref<16x128x256xbf16, #tpu.memory_space<vmem>>, vector<1x128x256xbf16>
    %183 = vector.shape_cast %182 : vector<1x128x256xbf16> to vector<128x256xbf16>
    %cst_104 = arith.constant dense<0.000000e+00> : vector<8x256xf32>
    %184 = tpu.matmul %181, %183, %cst_104 {dimension_numbers = #tpu.dot_dimension_numbers<[1], [0], [0], [1], [0, 0, 1, 1], [], []>} : vector<8x128xbf16>, vector<128x256xbf16>, vector<8x256xf32> -> vector<8x256xf32>
    %185 = arith.addf %179, %184 : vector<8x256xf32>
    %186 = vector.extract_strided_slice %136 {offsets = [64, 0], sizes = [8, 128], strides = [1, 1]} : vector<128x128xf32> to vector<8x128xf32>
    %187 = arith.truncf %186 : vector<8x128xf32> to vector<8x128xbf16>
    %c8_105 = arith.constant 8 : index
    %c0_106 = arith.constant 0 : index
    %c0_107 = arith.constant 0 : index
    %188 = vector.load %arg7[%c8_105, %c0_106, %c0_107] : memref<16x128x256xbf16, #tpu.memory_space<vmem>>, vector<1x128x256xbf16>
    %189 = vector.shape_cast %188 : vector<1x128x256xbf16> to vector<128x256xbf16>
    %cst_108 = arith.constant dense<0.000000e+00> : vector<8x256xf32>
    %190 = tpu.matmul %187, %189, %cst_108 {dimension_numbers = #tpu.dot_dimension_numbers<[1], [0], [0], [1], [0, 0, 1, 1], [], []>} : vector<8x128xbf16>, vector<128x256xbf16>, vector<8x256xf32> -> vector<8x256xf32>
    %191 = arith.addf %185, %190 : vector<8x256xf32>
    %192 = vector.extract_strided_slice %136 {offsets = [72, 0], sizes = [8, 128], strides = [1, 1]} : vector<128x128xf32> to vector<8x128xf32>
    %193 = arith.truncf %192 : vector<8x128xf32> to vector<8x128xbf16>
    %c9_109 = arith.constant 9 : index
    %c0_110 = arith.constant 0 : index
    %c0_111 = arith.constant 0 : index
    %194 = vector.load %arg7[%c9_109, %c0_110, %c0_111] : memref<16x128x256xbf16, #tpu.memory_space<vmem>>, vector<1x128x256xbf16>
    %195 = vector.shape_cast %194 : vector<1x128x256xbf16> to vector<128x256xbf16>
    %cst_112 = arith.constant dense<0.000000e+00> : vector<8x256xf32>
    %196 = tpu.matmul %193, %195, %cst_112 {dimension_numbers = #tpu.dot_dimension_numbers<[1], [0], [0], [1], [0, 0, 1, 1], [], []>} : vector<8x128xbf16>, vector<128x256xbf16>, vector<8x256xf32> -> vector<8x256xf32>
    %197 = arith.addf %191, %196 : vector<8x256xf32>
    %198 = vector.extract_strided_slice %136 {offsets = [80, 0], sizes = [8, 128], strides = [1, 1]} : vector<128x128xf32> to vector<8x128xf32>
    %199 = arith.truncf %198 : vector<8x128xf32> to vector<8x128xbf16>
    %c10_113 = arith.constant 10 : index
    %c0_114 = arith.constant 0 : index
    %c0_115 = arith.constant 0 : index
    %200 = vector.load %arg7[%c10_113, %c0_114, %c0_115] : memref<16x128x256xbf16, #tpu.memory_space<vmem>>, vector<1x128x256xbf16>
    %201 = vector.shape_cast %200 : vector<1x128x256xbf16> to vector<128x256xbf16>
    %cst_116 = arith.constant dense<0.000000e+00> : vector<8x256xf32>
    %202 = tpu.matmul %199, %201, %cst_116 {dimension_numbers = #tpu.dot_dimension_numbers<[1], [0], [0], [1], [0, 0, 1, 1], [], []>} : vector<8x128xbf16>, vector<128x256xbf16>, vector<8x256xf32> -> vector<8x256xf32>
    %203 = arith.addf %197, %202 : vector<8x256xf32>
    %204 = vector.extract_strided_slice %136 {offsets = [88, 0], sizes = [8, 128], strides = [1, 1]} : vector<128x128xf32> to vector<8x128xf32>
    %205 = arith.truncf %204 : vector<8x128xf32> to vector<8x128xbf16>
    %c11_117 = arith.constant 11 : index
    %c0_118 = arith.constant 0 : index
    %c0_119 = arith.constant 0 : index
    %206 = vector.load %arg7[%c11_117, %c0_118, %c0_119] : memref<16x128x256xbf16, #tpu.memory_space<vmem>>, vector<1x128x256xbf16>
    %207 = vector.shape_cast %206 : vector<1x128x256xbf16> to vector<128x256xbf16>
    %cst_120 = arith.constant dense<0.000000e+00> : vector<8x256xf32>
    %208 = tpu.matmul %205, %207, %cst_120 {dimension_numbers = #tpu.dot_dimension_numbers<[1], [0], [0], [1], [0, 0, 1, 1], [], []>} : vector<8x128xbf16>, vector<128x256xbf16>, vector<8x256xf32> -> vector<8x256xf32>
    %209 = arith.addf %203, %208 : vector<8x256xf32>
    %210 = vector.extract_strided_slice %136 {offsets = [96, 0], sizes = [8, 128], strides = [1, 1]} : vector<128x128xf32> to vector<8x128xf32>
    %211 = arith.truncf %210 : vector<8x128xf32> to vector<8x128xbf16>
    %c12_121 = arith.constant 12 : index
    %c0_122 = arith.constant 0 : index
    %c0_123 = arith.constant 0 : index
    %212 = vector.load %arg7[%c12_121, %c0_122, %c0_123] : memref<16x128x256xbf16, #tpu.memory_space<vmem>>, vector<1x128x256xbf16>
    %213 = vector.shape_cast %212 : vector<1x128x256xbf16> to vector<128x256xbf16>
    %cst_124 = arith.constant dense<0.000000e+00> : vector<8x256xf32>
    %214 = tpu.matmul %211, %213, %cst_124 {dimension_numbers = #tpu.dot_dimension_numbers<[1], [0], [0], [1], [0, 0, 1, 1], [], []>} : vector<8x128xbf16>, vector<128x256xbf16>, vector<8x256xf32> -> vector<8x256xf32>
    %215 = arith.addf %209, %214 : vector<8x256xf32>
    %216 = vector.extract_strided_slice %136 {offsets = [104, 0], sizes = [8, 128], strides = [1, 1]} : vector<128x128xf32> to vector<8x128xf32>
    %217 = arith.truncf %216 : vector<8x128xf32> to vector<8x128xbf16>
    %c13_125 = arith.constant 13 : index
    %c0_126 = arith.constant 0 : index
    %c0_127 = arith.constant 0 : index
    %218 = vector.load %arg7[%c13_125, %c0_126, %c0_127] : memref<16x128x256xbf16, #tpu.memory_space<vmem>>, vector<1x128x256xbf16>
    %219 = vector.shape_cast %218 : vector<1x128x256xbf16> to vector<128x256xbf16>
    %cst_128 = arith.constant dense<0.000000e+00> : vector<8x256xf32>
    %220 = tpu.matmul %217, %219, %cst_128 {dimension_numbers = #tpu.dot_dimension_numbers<[1], [0], [0], [1], [0, 0, 1, 1], [], []>} : vector<8x128xbf16>, vector<128x256xbf16>, vector<8x256xf32> -> vector<8x256xf32>
    %221 = arith.addf %215, %220 : vector<8x256xf32>
    %222 = vector.extract_strided_slice %136 {offsets = [112, 0], sizes = [8, 128], strides = [1, 1]} : vector<128x128xf32> to vector<8x128xf32>
    %223 = arith.truncf %222 : vector<8x128xf32> to vector<8x128xbf16>
    %c14_129 = arith.constant 14 : index
    %c0_130 = arith.constant 0 : index
    %c0_131 = arith.constant 0 : index
    %224 = vector.load %arg7[%c14_129, %c0_130, %c0_131] : memref<16x128x256xbf16, #tpu.memory_space<vmem>>, vector<1x128x256xbf16>
    %225 = vector.shape_cast %224 : vector<1x128x256xbf16> to vector<128x256xbf16>
    %cst_132 = arith.constant dense<0.000000e+00> : vector<8x256xf32>
    %226 = tpu.matmul %223, %225, %cst_132 {dimension_numbers = #tpu.dot_dimension_numbers<[1], [0], [0], [1], [0, 0, 1, 1], [], []>} : vector<8x128xbf16>, vector<128x256xbf16>, vector<8x256xf32> -> vector<8x256xf32>
    %227 = arith.addf %221, %226 : vector<8x256xf32>
    %228 = vector.extract_strided_slice %136 {offsets = [120, 0], sizes = [8, 128], strides = [1, 1]} : vector<128x128xf32> to vector<8x128xf32>
    %229 = arith.truncf %228 : vector<8x128xf32> to vector<8x128xbf16>
    %c15_133 = arith.constant 15 : index
    %c0_134 = arith.constant 0 : index
    %c0_135 = arith.constant 0 : index
    %230 = vector.load %arg7[%c15_133, %c0_134, %c0_135] : memref<16x128x256xbf16, #tpu.memory_space<vmem>>, vector<1x128x256xbf16>
    %231 = vector.shape_cast %230 : vector<1x128x256xbf16> to vector<128x256xbf16>
    %cst_136 = arith.constant dense<0.000000e+00> : vector<8x256xf32>
    %232 = tpu.matmul %229, %231, %cst_136 {dimension_numbers = #tpu.dot_dimension_numbers<[1], [0], [0], [1], [0, 0, 1, 1], [], []>} : vector<8x128xbf16>, vector<128x256xbf16>, vector<8x256xf32> -> vector<8x256xf32>
    %233 = arith.addf %227, %232 : vector<8x256xf32>
    %c0_137 = arith.constant 0 : index
    %c0_138 = arith.constant 0 : index
    %234 = vector.load %arg8[%c0_137, %c0_138] : memref<1x256xf32, #tpu.memory_space<vmem>>, vector<1x256xf32>
    %c0_139 = arith.constant 0 : index
    %c0_140 = arith.constant 0 : index
    %235 = vector.load %arg9[%c0_139, %c0_140] : memref<1x256xf32, #tpu.memory_space<vmem>>, vector<1x256xf32>
    %cst_141 = arith.constant dense<0.000000e+00> : vector<256xf32>
    %236 = vector.multi_reduction <add>, %233, %cst_141 [0] : vector<8x256xf32> to vector<256xf32>
    %237 = vector.shape_cast %236 : vector<256xf32> to vector<1x256xf32>
    %cst_142 = arith.constant 1.250000e-01 : f32
    %238 = vector.broadcast %cst_142 : f32 to vector<1x256xf32>
    %239 = arith.mulf %237, %238 : vector<1x256xf32>
    %240 = vector.broadcast %239 : vector<1x256xf32> to vector<8x256xf32>
    %241 = arith.subf %233, %240 : vector<8x256xf32>
    %242 = arith.mulf %241, %241 : vector<8x256xf32>
    %cst_143 = arith.constant dense<0.000000e+00> : vector<256xf32>
    %243 = vector.multi_reduction <add>, %242, %cst_143 [0] : vector<8x256xf32> to vector<256xf32>
    %244 = vector.shape_cast %243 : vector<256xf32> to vector<1x256xf32>
    %cst_144 = arith.constant 1.250000e-01 : f32
    %245 = vector.broadcast %cst_144 : f32 to vector<1x256xf32>
    %246 = arith.mulf %244, %245 : vector<1x256xf32>
    %cst_145 = arith.constant 9.99999974E-6 : f32
    %247 = vector.broadcast %cst_145 : f32 to vector<1x256xf32>
    %248 = arith.addf %246, %247 : vector<1x256xf32>
    %249 = math.rsqrt %248 : vector<1x256xf32>
    %250 = arith.mulf %234, %249 : vector<1x256xf32>
    %251 = vector.broadcast %250 : vector<1x256xf32> to vector<8x256xf32>
    %252 = arith.mulf %241, %251 : vector<8x256xf32>
    %253 = vector.broadcast %235 : vector<1x256xf32> to vector<8x256xf32>
    %254 = arith.addf %252, %253 : vector<8x256xf32>
    %cst_146 = arith.constant 0.000000e+00 : f32
    %255 = vector.broadcast %cst_146 : f32 to vector<8x256xf32>
    %256 = arith.cmpf oge, %254, %255 : vector<8x256xf32>
    %cst_147 = arith.constant 2.000000e-01 : f32
    %257 = vector.broadcast %cst_147 : f32 to vector<8x256xf32>
    %258 = arith.mulf %257, %254 : vector<8x256xf32>
    %259 = arith.select %256, %254, %258 : vector<8x256xi1>, vector<8x256xf32>
    %260 = arith.truncf %259 : vector<8x256xf32> to vector<8x256xbf16>
    %c0_148 = arith.constant 0 : index
    %c0_149 = arith.constant 0 : index
    %261 = vector.load %arg10[%c0_148, %c0_149] : memref<72x8xbf16, #tpu.memory_space<vmem>>, vector<72x8xbf16>
    %cst_150 = arith.constant dense<0.000000e+00> : vector<72x256xf32>
    %262 = tpu.matmul %261, %260, %cst_150 {dimension_numbers = #tpu.dot_dimension_numbers<[1], [0], [0], [1], [0, 0, 1, 1], [], []>} : vector<72x8xbf16>, vector<8x256xbf16>, vector<72x256xf32> -> vector<72x256xf32>
    %cst_151 = arith.constant 0.000000e+00 : f32
    %263 = vector.broadcast %cst_151 : f32 to vector<8x512xf32>
    %264 = vector.extract_strided_slice %262 {offsets = [0, 0], sizes = [8, 256], strides = [1, 1]} : vector<72x256xf32> to vector<8x256xf32>
    %265 = arith.truncf %264 : vector<8x256xf32> to vector<8x256xbf16>
    %c0_152 = arith.constant 0 : index
    %c0_153 = arith.constant 0 : index
    %c0_154 = arith.constant 0 : index
    %266 = vector.load %arg11[%c0_152, %c0_153, %c0_154] : memref<9x256x512xbf16, #tpu.memory_space<vmem>>, vector<1x256x512xbf16>
    %267 = vector.shape_cast %266 : vector<1x256x512xbf16> to vector<256x512xbf16>
    %cst_155 = arith.constant dense<0.000000e+00> : vector<8x512xf32>
    %268 = tpu.matmul %265, %267, %cst_155 {dimension_numbers = #tpu.dot_dimension_numbers<[1], [0], [0], [1], [0, 0, 1, 1], [], []>} : vector<8x256xbf16>, vector<256x512xbf16>, vector<8x512xf32> -> vector<8x512xf32>
    %269 = arith.addf %263, %268 : vector<8x512xf32>
    %270 = vector.extract_strided_slice %262 {offsets = [8, 0], sizes = [8, 256], strides = [1, 1]} : vector<72x256xf32> to vector<8x256xf32>
    %271 = arith.truncf %270 : vector<8x256xf32> to vector<8x256xbf16>
    %c1_156 = arith.constant 1 : index
    %c0_157 = arith.constant 0 : index
    %c0_158 = arith.constant 0 : index
    %272 = vector.load %arg11[%c1_156, %c0_157, %c0_158] : memref<9x256x512xbf16, #tpu.memory_space<vmem>>, vector<1x256x512xbf16>
    %273 = vector.shape_cast %272 : vector<1x256x512xbf16> to vector<256x512xbf16>
    %cst_159 = arith.constant dense<0.000000e+00> : vector<8x512xf32>
    %274 = tpu.matmul %271, %273, %cst_159 {dimension_numbers = #tpu.dot_dimension_numbers<[1], [0], [0], [1], [0, 0, 1, 1], [], []>} : vector<8x256xbf16>, vector<256x512xbf16>, vector<8x512xf32> -> vector<8x512xf32>
    %275 = arith.addf %269, %274 : vector<8x512xf32>
    %276 = vector.extract_strided_slice %262 {offsets = [16, 0], sizes = [8, 256], strides = [1, 1]} : vector<72x256xf32> to vector<8x256xf32>
    %277 = arith.truncf %276 : vector<8x256xf32> to vector<8x256xbf16>
    %c2_160 = arith.constant 2 : index
    %c0_161 = arith.constant 0 : index
    %c0_162 = arith.constant 0 : index
    %278 = vector.load %arg11[%c2_160, %c0_161, %c0_162] : memref<9x256x512xbf16, #tpu.memory_space<vmem>>, vector<1x256x512xbf16>
    %279 = vector.shape_cast %278 : vector<1x256x512xbf16> to vector<256x512xbf16>
    %cst_163 = arith.constant dense<0.000000e+00> : vector<8x512xf32>
    %280 = tpu.matmul %277, %279, %cst_163 {dimension_numbers = #tpu.dot_dimension_numbers<[1], [0], [0], [1], [0, 0, 1, 1], [], []>} : vector<8x256xbf16>, vector<256x512xbf16>, vector<8x512xf32> -> vector<8x512xf32>
    %281 = arith.addf %275, %280 : vector<8x512xf32>
    %282 = vector.extract_strided_slice %262 {offsets = [24, 0], sizes = [8, 256], strides = [1, 1]} : vector<72x256xf32> to vector<8x256xf32>
    %283 = arith.truncf %282 : vector<8x256xf32> to vector<8x256xbf16>
    %c3_164 = arith.constant 3 : index
    %c0_165 = arith.constant 0 : index
    %c0_166 = arith.constant 0 : index
    %284 = vector.load %arg11[%c3_164, %c0_165, %c0_166] : memref<9x256x512xbf16, #tpu.memory_space<vmem>>, vector<1x256x512xbf16>
    %285 = vector.shape_cast %284 : vector<1x256x512xbf16> to vector<256x512xbf16>
    %cst_167 = arith.constant dense<0.000000e+00> : vector<8x512xf32>
    %286 = tpu.matmul %283, %285, %cst_167 {dimension_numbers = #tpu.dot_dimension_numbers<[1], [0], [0], [1], [0, 0, 1, 1], [], []>} : vector<8x256xbf16>, vector<256x512xbf16>, vector<8x512xf32> -> vector<8x512xf32>
    %287 = arith.addf %281, %286 : vector<8x512xf32>
    %288 = vector.extract_strided_slice %262 {offsets = [32, 0], sizes = [8, 256], strides = [1, 1]} : vector<72x256xf32> to vector<8x256xf32>
    %289 = arith.truncf %288 : vector<8x256xf32> to vector<8x256xbf16>
    %c4_168 = arith.constant 4 : index
    %c0_169 = arith.constant 0 : index
    %c0_170 = arith.constant 0 : index
    %290 = vector.load %arg11[%c4_168, %c0_169, %c0_170] : memref<9x256x512xbf16, #tpu.memory_space<vmem>>, vector<1x256x512xbf16>
    %291 = vector.shape_cast %290 : vector<1x256x512xbf16> to vector<256x512xbf16>
    %cst_171 = arith.constant dense<0.000000e+00> : vector<8x512xf32>
    %292 = tpu.matmul %289, %291, %cst_171 {dimension_numbers = #tpu.dot_dimension_numbers<[1], [0], [0], [1], [0, 0, 1, 1], [], []>} : vector<8x256xbf16>, vector<256x512xbf16>, vector<8x512xf32> -> vector<8x512xf32>
    %293 = arith.addf %287, %292 : vector<8x512xf32>
    %294 = vector.extract_strided_slice %262 {offsets = [40, 0], sizes = [8, 256], strides = [1, 1]} : vector<72x256xf32> to vector<8x256xf32>
    %295 = arith.truncf %294 : vector<8x256xf32> to vector<8x256xbf16>
    %c5_172 = arith.constant 5 : index
    %c0_173 = arith.constant 0 : index
    %c0_174 = arith.constant 0 : index
    %296 = vector.load %arg11[%c5_172, %c0_173, %c0_174] : memref<9x256x512xbf16, #tpu.memory_space<vmem>>, vector<1x256x512xbf16>
    %297 = vector.shape_cast %296 : vector<1x256x512xbf16> to vector<256x512xbf16>
    %cst_175 = arith.constant dense<0.000000e+00> : vector<8x512xf32>
    %298 = tpu.matmul %295, %297, %cst_175 {dimension_numbers = #tpu.dot_dimension_numbers<[1], [0], [0], [1], [0, 0, 1, 1], [], []>} : vector<8x256xbf16>, vector<256x512xbf16>, vector<8x512xf32> -> vector<8x512xf32>
    %299 = arith.addf %293, %298 : vector<8x512xf32>
    %300 = vector.extract_strided_slice %262 {offsets = [48, 0], sizes = [8, 256], strides = [1, 1]} : vector<72x256xf32> to vector<8x256xf32>
    %301 = arith.truncf %300 : vector<8x256xf32> to vector<8x256xbf16>
    %c6_176 = arith.constant 6 : index
    %c0_177 = arith.constant 0 : index
    %c0_178 = arith.constant 0 : index
    %302 = vector.load %arg11[%c6_176, %c0_177, %c0_178] : memref<9x256x512xbf16, #tpu.memory_space<vmem>>, vector<1x256x512xbf16>
    %303 = vector.shape_cast %302 : vector<1x256x512xbf16> to vector<256x512xbf16>
    %cst_179 = arith.constant dense<0.000000e+00> : vector<8x512xf32>
    %304 = tpu.matmul %301, %303, %cst_179 {dimension_numbers = #tpu.dot_dimension_numbers<[1], [0], [0], [1], [0, 0, 1, 1], [], []>} : vector<8x256xbf16>, vector<256x512xbf16>, vector<8x512xf32> -> vector<8x512xf32>
    %305 = arith.addf %299, %304 : vector<8x512xf32>
    %306 = vector.extract_strided_slice %262 {offsets = [56, 0], sizes = [8, 256], strides = [1, 1]} : vector<72x256xf32> to vector<8x256xf32>
    %307 = arith.truncf %306 : vector<8x256xf32> to vector<8x256xbf16>
    %c7_180 = arith.constant 7 : index
    %c0_181 = arith.constant 0 : index
    %c0_182 = arith.constant 0 : index
    %308 = vector.load %arg11[%c7_180, %c0_181, %c0_182] : memref<9x256x512xbf16, #tpu.memory_space<vmem>>, vector<1x256x512xbf16>
    %309 = vector.shape_cast %308 : vector<1x256x512xbf16> to vector<256x512xbf16>
    %cst_183 = arith.constant dense<0.000000e+00> : vector<8x512xf32>
    %310 = tpu.matmul %307, %309, %cst_183 {dimension_numbers = #tpu.dot_dimension_numbers<[1], [0], [0], [1], [0, 0, 1, 1], [], []>} : vector<8x256xbf16>, vector<256x512xbf16>, vector<8x512xf32> -> vector<8x512xf32>
    %311 = arith.addf %305, %310 : vector<8x512xf32>
    %312 = vector.extract_strided_slice %262 {offsets = [64, 0], sizes = [8, 256], strides = [1, 1]} : vector<72x256xf32> to vector<8x256xf32>
    %313 = arith.truncf %312 : vector<8x256xf32> to vector<8x256xbf16>
    %c8_184 = arith.constant 8 : index
    %c0_185 = arith.constant 0 : index
    %c0_186 = arith.constant 0 : index
    %314 = vector.load %arg11[%c8_184, %c0_185, %c0_186] : memref<9x256x512xbf16, #tpu.memory_space<vmem>>, vector<1x256x512xbf16>
    %315 = vector.shape_cast %314 : vector<1x256x512xbf16> to vector<256x512xbf16>
    %cst_187 = arith.constant dense<0.000000e+00> : vector<8x512xf32>
    %316 = tpu.matmul %313, %315, %cst_187 {dimension_numbers = #tpu.dot_dimension_numbers<[1], [0], [0], [1], [0, 0, 1, 1], [], []>} : vector<8x256xbf16>, vector<256x512xbf16>, vector<8x512xf32> -> vector<8x512xf32>
    %317 = arith.addf %311, %316 : vector<8x512xf32>
    %c0_188 = arith.constant 0 : index
    %c0_189 = arith.constant 0 : index
    %318 = vector.load %arg12[%c0_188, %c0_189] : memref<1x512xf32, #tpu.memory_space<vmem>>, vector<1x512xf32>
    %c0_190 = arith.constant 0 : index
    %c0_191 = arith.constant 0 : index
    %319 = vector.load %arg13[%c0_190, %c0_191] : memref<1x512xf32, #tpu.memory_space<vmem>>, vector<1x512xf32>
    %cst_192 = arith.constant dense<0.000000e+00> : vector<512xf32>
    %320 = vector.multi_reduction <add>, %317, %cst_192 [0] : vector<8x512xf32> to vector<512xf32>
    %321 = vector.shape_cast %320 : vector<512xf32> to vector<1x512xf32>
    %cst_193 = arith.constant 1.250000e-01 : f32
    %322 = vector.broadcast %cst_193 : f32 to vector<1x512xf32>
    %323 = arith.mulf %321, %322 : vector<1x512xf32>
    %324 = vector.broadcast %323 : vector<1x512xf32> to vector<8x512xf32>
    %325 = arith.subf %317, %324 : vector<8x512xf32>
    %326 = arith.mulf %325, %325 : vector<8x512xf32>
    %cst_194 = arith.constant dense<0.000000e+00> : vector<512xf32>
    %327 = vector.multi_reduction <add>, %326, %cst_194 [0] : vector<8x512xf32> to vector<512xf32>
    %328 = vector.shape_cast %327 : vector<512xf32> to vector<1x512xf32>
    %cst_195 = arith.constant 1.250000e-01 : f32
    %329 = vector.broadcast %cst_195 : f32 to vector<1x512xf32>
    %330 = arith.mulf %328, %329 : vector<1x512xf32>
    %cst_196 = arith.constant 9.99999974E-6 : f32
    %331 = vector.broadcast %cst_196 : f32 to vector<1x512xf32>
    %332 = arith.addf %330, %331 : vector<1x512xf32>
    %333 = math.rsqrt %332 : vector<1x512xf32>
    %334 = arith.mulf %318, %333 : vector<1x512xf32>
    %335 = vector.broadcast %334 : vector<1x512xf32> to vector<8x512xf32>
    %336 = arith.mulf %325, %335 : vector<8x512xf32>
    %337 = vector.broadcast %319 : vector<1x512xf32> to vector<8x512xf32>
    %338 = arith.addf %336, %337 : vector<8x512xf32>
    %cst_197 = arith.constant 0.000000e+00 : f32
    %339 = vector.broadcast %cst_197 : f32 to vector<8x512xf32>
    %340 = arith.cmpf oge, %338, %339 : vector<8x512xf32>
    %cst_198 = arith.constant 2.000000e-01 : f32
    %341 = vector.broadcast %cst_198 : f32 to vector<8x512xf32>
    %342 = arith.mulf %341, %338 : vector<8x512xf32>
    %343 = arith.select %340, %338, %342 : vector<8x512xi1>, vector<8x512xf32>
    %344 = arith.truncf %343 : vector<8x512xf32> to vector<8x512xbf16>
    %c0_199 = arith.constant 0 : index
    %c0_200 = arith.constant 0 : index
    %345 = vector.load %arg14[%c0_199, %c0_200] : memref<512x128xbf16, #tpu.memory_space<vmem>>, vector<512x128xbf16>
    %cst_201 = arith.constant dense<0.000000e+00> : vector<8x128xf32>
    %346 = tpu.matmul %344, %345, %cst_201 {dimension_numbers = #tpu.dot_dimension_numbers<[1], [0], [0], [1], [0, 0, 1, 1], [], []>} : vector<8x512xbf16>, vector<512x128xbf16>, vector<8x128xf32> -> vector<8x128xf32>
    %c0_202 = arith.constant 0 : index
    %c0_203 = arith.constant 0 : index
    %347 = vector.load %arg15[%c0_202, %c0_203] : memref<1x128xf32, #tpu.memory_space<vmem>>, vector<1x128xf32>
    %348 = vector.broadcast %347 : vector<1x128xf32> to vector<8x128xf32>
    %349 = arith.addf %346, %348 : vector<8x128xf32>
    %c0_204 = arith.constant 0 : index
    %c0_205 = arith.constant 0 : index
    %350 = vector.load %arg16[%c0_204, %c0_205] : memref<8x128xf32, #tpu.memory_space<vmem>>, vector<8x128xf32>
    tpu.vector_store %arg16[%c0_204, %c0_205], %349 {strides = array<i32>} : memref<8x128xf32, #tpu.memory_space<vmem>>, vector<8x128xf32>,
    return
  }
}

</mosaic_0001>

<bundles_post_ra>
// kernel: discriminator_forward.1
= control target key start
LH: loop header
LB: loop body
LE: loop exit
PB: predicated region body
PF: predicated region fallthrough
CT: control target
= control target key end

     0   :  { %s15074_s0 = inlined_call_operand.vmem [shape: bf16[128,16], index: 0, kind: input, shape index: {}]   ;;  %s15075_s1 = inlined_call_operand.hbm [shape: bf16[16,128], index: 1, kind: input, shape index: {}]   ;;  %s15076_s2 = inlined_call_operand.hbm [shape: bf16[512,128], index: 2, kind: input, shape index: {}]   ;;  %s15077_s3 = inlined_call_operand.hbm [shape: bf16[16,128,128], index: 3, kind: input, shape index: {}]   ;;  %s15078_s4 = inlined_call_operand.hbm [shape: f32[1,128], index: 4, kind: input, shape index: {}]   ;;  %s15079_s5 = inlined_call_operand.hbm [shape: f32[1,128], index: 5, kind: input, shape index: {}]   ;;  %s15080_s6 = inlined_call_operand.hbm [shape: bf16[128,32], index: 6, kind: input, shape index: {}]   ;;  %s15081_s7 = inlined_call_operand.hbm [shape: bf16[16,128,256], index: 7, kind: input, shape index: {}]   ;;  %s15082_s8 = inlined_call_operand.hbm [shape: f32[1,256], index: 8, kind: input, shape index: {}]   ;;  %s15083_s9 = inlined_call_operand.hbm [shape: f32[1,256], index: 9, kind: input, shape index: {}]   ;;  %s15084_s10 = inlined_call_operand.hbm [shape: bf16[72,8], index: 10, kind: input, shape index: {}]   ;;  %s15085_s11 = inlined_call_operand.hbm [shape: bf16[9,256,512], index: 11, kind: input, shape index: {}]   ;;  %s15086_s12 = inlined_call_operand.hbm [shape: f32[1,512], index: 12, kind: input, shape index: {}]   ;;  %s15087_s13 = inlined_call_operand.hbm [shape: f32[1,512], index: 13, kind: input, shape index: {}]   ;;  %s15088_s14 = inlined_call_operand.hbm [shape: bf16[512,128], index: 14, kind: input, shape index: {}]   ;;  %s15089_s15 = inlined_call_operand.hbm [shape: f32[1,128], index: 15, kind: input, shape index: {}]   ;;  %s15090_s16 = inlined_call_operand.vmem [shape: f32[8,128], index: 16, kind: output, shape index: {}]  }
   0x1   :  { %15092 = sst [smem:[#allocation33_spill]] %s15074_s0 }
   0x2   :  { %21 = vsyncpa [#allocation3], 0 }
   0x3   :  { %22 = vsyncpa [#allocation5], 0 }
   0x4   :  { %23 = vsyncpa [#allocation8], 0 }
   0x5   :  { %24 = vsyncpa [#allocation11], 0 }
   0x6   :  { %25 = vsyncpa [#allocation14], 0 }
   0x7   :  { %26 = vsyncpa [#allocation17], 0 }
   0x8   :  { %27 = vsyncpa [#allocation20], 0 }
   0x9   :  { %28 = vsyncpa [#allocation23], 0  ;;  %s14234_s21 = smov [#allocation4]   ;;  %s14235_s23 = smov [#allocation7]  }
   0xa   :  { %s48_s22 = sshll.u32 %s14234_s21, 4  ;;  %s73_s24 = sshll.u32 %s14235_s23, 4  ;;  %s49_s22 = int_to_ptr.vmem [resolvable:$true] %s48_s22  ;;  %s14342_s24 = int_to_ptr.vmem [resolvable:$true] %s73_s24 }
   0xb   :  { %s13888_s27 = scalar_lea.hbm %s15076_s2, 4096 }
   0xc   :  { %p13889_p0 = scmp.ne.s32.totalorder %s15076_s2, %s13888_s27  ;;  %p13892_p1 = scmp.lt.u32.totalorder %s13888_s27, %s15076_s2 }
   0xe   :  { %p13894_p2 = pnand %p13892_p1, %p13889_p0 }
  0x10   :  { %13897 = shalt.err (!%p13894_p2)
}
  0x11   :  { %s13898_s17 = scalar_lea.vmem %s49_s22, 4096  ;;  %p13903_p4 = scmp.lt.s32.totalorder %s49_s22, %s49_s22 }
  0x12   :  { %p13899_p3 = scmp.ne.s32.totalorder %s49_s22, %s13898_s17  ;;  %p13904_p5 = scmp.lt.s32.totalorder %s13898_s17, %s13898_s17 }
  0x14   :  { %p13905_p6 = por %p13904_p5, %p13903_p4 }
  0x16   :  { %p13906_p7 = pnand %p13905_p6, %p13899_p3 }
  0x18   :  { %13909 = shalt.err (!%p13906_p7)
}
  0x19   :  { %s14236_s18 = smov 64   ;;  %s14237_s19 = smov 4  }
  0x1a   :  { %54 = dma.hbm_to_vmem [thread:$0]  %s15076_s2, 4096, %s49_s22, [#allocation5], %s14236_s18, %s14236_s18, %s14237_s19  }
  0x1b   :  { %s13910_s26 = scalar_lea.hbm %s15078_s4, 16 }
  0x1c   :  { %p13911_p8 = scmp.ne.s32.totalorder %s15078_s4, %s13910_s26  ;;  %p13914_p9 = scmp.lt.u32.totalorder %s13910_s26, %s15078_s4 }
  0x1e   :  { %p13916_p10 = pnand %p13914_p9, %p13911_p8 }
  0x20   :  { %13919 = shalt.err (!%p13916_p10)
}
  0x21   :  { %s13920_s0 = scalar_lea.vmem %s14342_s24, 16  ;;  %s13924_s2 = scalar_lea.vmem %s14342_s24, 32 }
  0x22   :  { %p13921_p11 = scmp.ne.s32.totalorder %s14342_s24, %s13920_s0  ;;  %p13925_p12 = scmp.lt.s32.totalorder %s14342_s24, %s14342_s24 }
  0x23   :  { %p13926_p13 = scmp.lt.s32.totalorder %s13924_s2, %s13920_s0 }
  0x25   :  { %p13927_p0 = por %p13926_p13, %p13925_p12 }
  0x27   :  { %p13928_p1 = pnand %p13927_p0, %p13921_p11 }
  0x29   :  { %13931 = shalt.err (!%p13928_p1)
}
  0x2a   :  { %76 = dma.hbm_to_vmem [thread:$0]  %s15078_s4, 16, %s14342_s24, [#allocation8]  }
  0x2b   :  { %s14238_s20 = smov [#allocation10]   ;;  %s14239_s23 = smov [#allocation13]  }
  0x2c   :  { %s92_s21 = sshll.u32 %s14238_s20, 4  ;;  %s117_s25 = sshll.u32 %s14239_s23, 4  ;;  %s93_s21 = int_to_ptr.vmem [resolvable:$true] %s92_s21  ;;  %s118_s25 = int_to_ptr.vmem [resolvable:$true] %s117_s25 }
  0x2d   :  { %s13932_s28 = scalar_lea.hbm %s15080_s6, 1024 }
  0x2e   :  { %p13933_p2 = scmp.ne.s32.totalorder %s15080_s6, %s13932_s28  ;;  %p13936_p3 = scmp.lt.u32.totalorder %s13932_s28, %s15080_s6 }
  0x30   :  { %p13938_p4 = pnand %p13936_p3, %p13933_p2 }
  0x32   :  { %13941 = shalt.err (!%p13938_p4)
}
  0x33   :  { %s13942_s4 = scalar_lea.vmem %s93_s21, 1024  ;;  %p13947_p6 = scmp.lt.s32.totalorder %s93_s21, %s93_s21 }
  0x34   :  { %p13943_p5 = scmp.ne.s32.totalorder %s93_s21, %s13942_s4  ;;  %p13948_p7 = scmp.lt.s32.totalorder %s13942_s4, %s13942_s4 }
  0x36   :  { %p13949_p8 = por %p13948_p7, %p13947_p6 }
  0x38   :  { %p13950_p9 = pnand %p13949_p8, %p13943_p5 }
  0x3a   :  { %13953 = shalt.err (!%p13950_p9)
}
  0x3b   :  { %98 = dma.hbm_to_vmem [thread:$0]  %s15080_s6, 1024, %s93_s21, [#allocation11], %s14236_s18, %s14236_s18, %s14237_s19  }
  0x3c   :  { %s13954_s23 = scalar_lea.hbm %s15082_s8, 32 }
  0x3d   :  { %p13955_p10 = scmp.ne.s32.totalorder %s15082_s8, %s13954_s23  ;;  %p13958_p11 = scmp.lt.u32.totalorder %s13954_s23, %s15082_s8 }
  0x3f   :  { %p13960_p12 = pnand %p13958_p11, %p13955_p10 }
  0x41   :  { %13963 = shalt.err (!%p13960_p12)
}
  0x42   :  { %s13964_s30 = scalar_lea.vmem %s118_s25, 32  ;;  %p13969_p0 = scmp.lt.s32.totalorder %s118_s25, %s118_s25 }
  0x43   :  { %p13965_p13 = scmp.ne.s32.totalorder %s118_s25, %s13964_s30  ;;  %p13970_p1 = scmp.lt.s32.totalorder %s13964_s30, %s13964_s30 }
  0x45   :  { %p13971_p2 = por %p13970_p1, %p13969_p0 }
  0x47   :  { %p13972_p3 = pnand %p13971_p2, %p13965_p13 }
  0x49   :  { %13975 = shalt.err (!%p13972_p3)
}
  0x4a   :  { %120 = dma.hbm_to_vmem [thread:$0]  %s15082_s8, 32, %s118_s25, [#allocation14]  }
  0x4b   :  { %s14240_s0 = smov [#allocation16]   ;;  %s14241_s4 = smov [#allocation19]  }
  0x4c   :  { %s136_s2 = sshll.u32 %s14240_s0, 4  ;;  %s161_s24 = sshll.u32 %s14241_s4, 4  ;;  %s137_s2 = int_to_ptr.vmem [resolvable:$true] %s136_s2  ;;  %s162_s24 = int_to_ptr.vmem [resolvable:$true] %s161_s24 }
  0x4d   :  { %s13976_s20 = scalar_lea.hbm %s15084_s10, 576 }
  0x4e   :  { %p13977_p4 = scmp.ne.s32.totalorder %s15084_s10, %s13976_s20  ;;  %p13980_p5 = scmp.lt.u32.totalorder %s13976_s20, %s15084_s10 }
  0x50   :  { %p13982_p6 = pnand %p13980_p5, %p13977_p4 }
  0x52   :  { %13985 = shalt.err (!%p13982_p6)
}
  0x53   :  { %s13986_s8 = scalar_lea.vmem %s137_s2, 576  ;;  %p13991_p8 = scmp.lt.s32.totalorder %s137_s2, %s137_s2 }
  0x54   :  { %p13987_p7 = scmp.ne.s32.totalorder %s137_s2, %s13986_s8  ;;  %p13992_p9 = scmp.lt.s32.totalorder %s13986_s8, %s13986_s8 }
  0x56   :  { %p13993_p10 = por %p13992_p9, %p13991_p8 }
  0x58   :  { %p13994_p11 = pnand %p13993_p10, %p13987_p7 }
  0x5a   :  { %13997 = shalt.err (!%p13994_p11)
}
  0x5b   :  { %142 = dma.hbm_to_vmem [thread:$0]  %s15084_s10, 576, %s137_s2, [#allocation17], %s14236_s18, %s14236_s18, %s14237_s19  }
  0x5c   :  { %s13998_s21 = scalar_lea.hbm %s15086_s12, 64 }
  0x5d   :  { %p13999_p12 = scmp.ne.s32.totalorder %s15086_s12, %s13998_s21  ;;  %p14002_p13 = scmp.lt.u32.totalorder %s13998_s21, %s15086_s12 }
  0x5f   :  { %p14004_p0 = pnand %p14002_p13, %p13999_p12 }
  0x61   :  { %14007 = shalt.err (!%p14004_p0)
}
  0x62   :  { %s14008_s20 = scalar_lea.vmem %s162_s24, 64  ;;  %p14013_p2 = scmp.lt.s32.totalorder %s162_s24, %s162_s24 }
  0x63   :  { %p14009_p1 = scmp.ne.s32.totalorder %s162_s24, %s14008_s20  ;;  %p14014_p3 = scmp.lt.s32.totalorder %s14008_s20, %s14008_s20 }
  0x65   :  { %p14015_p4 = por %p14014_p3, %p14013_p2 }
  0x67   :  { %p14016_p5 = pnand %p14015_p4, %p14009_p1 }
  0x69   :  { %14019 = shalt.err (!%p14016_p5)
}
  0x6a   :  { %164 = dma.hbm_to_vmem [thread:$0]  %s15086_s12, 64, %s162_s24, [#allocation20]  }
  0x6b   :  { %s14242_s23 = smov [#allocation22]   ;;  %s14243_s27 = smov [#allocation2]  }
  0x6c   :  { %s180_s26 = sshll.u32 %s14242_s23, 4  ;;  %s36_s28 = sshll.u32 %s14243_s27, 4  ;;  %s181_s26 = int_to_ptr.vmem [resolvable:$true] %s180_s26  ;;  %s14431_s28 = int_to_ptr.vmem [resolvable:$true] %s36_s28 }
  0x6d   :  { %s14020_s29 = scalar_lea.hbm %s15088_s14, 4096 }
  0x6e   :  { %p14021_p6 = scmp.ne.s32.totalorder %s15088_s14, %s14020_s29  ;;  %p14024_p7 = scmp.lt.u32.totalorder %s14020_s29, %s15088_s14 }
  0x70   :  { %p14026_p8 = pnand %p14024_p7, %p14021_p6 }
  0x72   :  { %14029 = shalt.err (!%p14026_p8)
}
  0x73   :  { %s14030_s12 = scalar_lea.vmem %s181_s26, 4096  ;;  %p14035_p10 = scmp.lt.s32.totalorder %s181_s26, %s181_s26 }
  0x74   :  { %p14031_p9 = scmp.ne.s32.totalorder %s181_s26, %s14030_s12  ;;  %p14036_p11 = scmp.lt.s32.totalorder %s14030_s12, %s14030_s12 }
  0x76   :  { %p14037_p12 = por %p14036_p11, %p14035_p10 }
  0x78   :  { %p14038_p13 = pnand %p14037_p12, %p14031_p9 }
  0x7a   :  { %14041 = shalt.err (!%p14038_p13)
}
  0x7b   :  { %186 = dma.hbm_to_vmem [thread:$0]  %s15088_s14, 4096, %s181_s26, [#allocation23], %s14236_s18, %s14236_s18, %s14237_s19  }
  0x7c   :  { %s14042_s20 = scalar_lea.hbm %s15075_s1, 128 }
  0x7d   :  { %p14043_p0 = scmp.ne.s32.totalorder %s15075_s1, %s14042_s20  ;;  %p14046_p1 = scmp.lt.u32.totalorder %s14042_s20, %s15075_s1 }
  0x7f   :  { %p14048_p2 = pnand %p14046_p1, %p14043_p0 }
  0x81   :  { %14051 = shalt.err (!%p14048_p2)
}
  0x82   :  { %s14052_s8 = scalar_lea.vmem %s14431_s28, 128  ;;  %p14057_p4 = scmp.lt.s32.totalorder %s14431_s28, %s14431_s28 }
  0x83   :  { %p14053_p3 = scmp.ne.s32.totalorder %s14431_s28, %s14052_s8  ;;  %p14058_p5 = scmp.lt.s32.totalorder %s14052_s8, %s14052_s8 }
  0x85   :  { %p14059_p6 = por %p14058_p5, %p14057_p4 }
  0x87   :  { %p14060_p7 = pnand %p14059_p6, %p14053_p3 }
  0x89   :  { %14063 = shalt.err (!%p14060_p7)
}
  0x8a   :  { %42 = dma.hbm_to_vmem [thread:$0]  %s15075_s1, 128, %s14431_s28, [#allocation3], %s14236_s18, %s14236_s18, %s14237_s19  }
  0x8b   :  { %s14244_s25 = smov [#allocation6]   ;;  %s14245_s30 = smov [#allocation9]  }
  0x8c   :  { %s60_s29 = sshll.u32 %s14244_s25, 4  ;;  %s83_s6 = sshll.u32 %s14245_s30, 4  ;;  %s61_s29 = int_to_ptr.vmem [resolvable:$true] %s60_s29  ;;  %s84_s6 = int_to_ptr.vmem [resolvable:$true] %s83_s6 }
  0x8d   :  { %s14064_s12 = scalar_lea.hbm %s15077_s3, 16384 }
  0x8e   :  { %p14065_p8 = scmp.ne.s32.totalorder %s15077_s3, %s14064_s12  ;;  %p14068_p9 = scmp.lt.u32.totalorder %s14064_s12, %s15077_s3 }
  0x90   :  { %p14070_p10 = pnand %p14068_p9, %p14065_p8 }
  0x92   :  { %14073 = shalt.err (!%p14070_p10)
}
  0x93   :  { %s14074_s1 = scalar_lea.vmem %s61_s29, 16384  ;;  %p14079_p12 = scmp.lt.s32.totalorder %s61_s29, %s61_s29 }
  0x94   :  { %p14075_p11 = scmp.ne.s32.totalorder %s61_s29, %s14074_s1  ;;  %p14080_p13 = scmp.lt.s32.totalorder %s14074_s1, %s14074_s1 }
  0x96   :  { %p14081_p0 = por %p14080_p13, %p14079_p12 }
  0x98   :  { %p14082_p1 = pnand %p14081_p0, %p14075_p11 }
  0x9a   :  { %14085 = shalt.err (!%p14082_p1)
}
  0x9b   :  { %66 = dma.hbm_to_vmem [thread:$0]  %s15077_s3, 16384, %s61_s29, [#allocation5], %s14236_s18, %s14236_s18, %s14237_s19  }
  0x9c   :  { %s14086_s23 = scalar_lea.hbm %s15079_s5, 16 }
  0x9d   :  { %p14087_p2 = scmp.ne.s32.totalorder %s15079_s5, %s14086_s23  ;;  %p14090_p3 = scmp.lt.u32.totalorder %s14086_s23, %s15079_s5 }
  0x9f   :  { %p14092_p4 = pnand %p14090_p3, %p14087_p2 }
  0xa1   :  { %14095 = shalt.err (!%p14092_p4)
}
  0xa2   :  { %s14096_s25 = scalar_lea.vmem %s84_s6, 16  ;;  %s14100_s30 = scalar_lea.vmem %s84_s6, 32 }
  0xa3   :  { %p14097_p5 = scmp.ne.s32.totalorder %s84_s6, %s14096_s25  ;;  %p14101_p6 = scmp.lt.s32.totalorder %s84_s6, %s84_s6 }
  0xa4   :  { %p14102_p7 = scmp.lt.s32.totalorder %s14100_s30, %s14096_s25 }
  0xa6   :  { %p14103_p8 = por %p14102_p7, %p14101_p6 }
  0xa8   :  { %p14104_p9 = pnand %p14103_p8, %p14097_p5 }
  0xaa   :  { %14107 = shalt.err (!%p14104_p9)
}
  0xab   :  { %86 = dma.hbm_to_vmem [thread:$0]  %s15079_s5, 16, %s84_s6, [#allocation8]  }
  0xac   :  { %s14246_s19 = smov [#allocation12]   ;;  %s14108_s12 = scalar_lea.hbm %s15081_s7, 32768 }
  0xad   :  { %s104_s29 = sshll.u32 %s14246_s19, 4  ;;  %p14109_p10 = scmp.ne.s32.totalorder %s15081_s7, %s14108_s12  ;;  %s105_s29 = int_to_ptr.vmem [resolvable:$true] %s104_s29 }
  0xae   :  { %p14112_p11 = scmp.lt.u32.totalorder %s14108_s12, %s15081_s7 }
  0xb0   :  { %p14114_p12 = pnand %p14112_p11, %p14109_p10 }
  0xb2   :  { %14117 = shalt.err (!%p14114_p12)
}
  0xb3   :  { %s14118_s1 = scalar_lea.vmem %s105_s29, 32768  ;;  %p14123_p0 = scmp.lt.s32.totalorder %s105_s29, %s105_s29 }
  0xb4   :  { %p14119_p13 = scmp.ne.s32.totalorder %s105_s29, %s14118_s1  ;;  %p14124_p1 = scmp.lt.s32.totalorder %s14118_s1, %s14118_s1 }
  0xb6   :  { %p14125_p2 = por %p14124_p1, %p14123_p0 }
  0xb8   :  { %p14126_p3 = pnand %p14125_p2, %p14119_p13 }
  0xba   :  { %14129 = shalt.err (!%p14126_p3)
}
  0xbb   :  { %s14247_s5 = smov 128   ;;  %s14248_s6 = smov 8  }
  0xbc   :  { %110 = dma.hbm_to_vmem [thread:$0]  %s15081_s7, 32768, %s105_s29, [#allocation11], %s14247_s5, %s14247_s5, %s14248_s6  }
  0xbd   :  { %s14249_s10 = smov [#allocation15]   ;;  %s14250_s23 = smov [#allocation18]  }
  0xbe   :  { %s127_s2 = sshll.u32 %s14249_s10, 4  ;;  %s148_s27 = sshll.u32 %s14250_s23, 4  ;;  %s128_s2 = int_to_ptr.vmem [resolvable:$true] %s127_s2  ;;  %s149_s27 = int_to_ptr.vmem [resolvable:$true] %s148_s27 }
  0xbf   :  { %s14130_s26 = scalar_lea.hbm %s15083_s9, 32 }
  0xc0   :  { %p14131_p4 = scmp.ne.s32.totalorder %s15083_s9, %s14130_s26  ;;  %p14134_p5 = scmp.lt.u32.totalorder %s14130_s26, %s15083_s9 }
  0xc2   :  { %p14136_p6 = pnand %p14134_p5, %p14131_p4 }
  0xc4   :  { %14139 = shalt.err (!%p14136_p6)
}
  0xc5   :  { %s14140_s7 = scalar_lea.vmem %s128_s2, 32  ;;  %p14145_p8 = scmp.lt.s32.totalorder %s128_s2, %s128_s2 }
  0xc6   :  { %p14141_p7 = scmp.ne.s32.totalorder %s128_s2, %s14140_s7  ;;  %p14146_p9 = scmp.lt.s32.totalorder %s14140_s7, %s14140_s7 }
  0xc8   :  { %p14147_p10 = por %p14146_p9, %p14145_p8 }
  0xca   :  { %p14148_p11 = pnand %p14147_p10, %p14141_p7 }
  0xcc   :  { %14151 = shalt.err (!%p14148_p11)
}
  0xcd   :  { %130 = dma.hbm_to_vmem [thread:$0]  %s15083_s9, 32, %s128_s2, [#allocation14]  }
  0xce   :  { %s14152_s12 = scalar_lea.hbm %s15085_s11, 73728 }
  0xcf   :  { %p14153_p12 = scmp.ne.s32.totalorder %s15085_s11, %s14152_s12  ;;  %p14156_p13 = scmp.lt.u32.totalorder %s14152_s12, %s15085_s11 }
  0xd1   :  { %p14158_p0 = pnand %p14156_p13, %p14153_p12 }
  0xd3   :  { %14161 = shalt.err (!%p14158_p0)
}
  0xd4   :  { %s14162_s1 = scalar_lea.vmem %s149_s27, 73728  ;;  %p14167_p2 = scmp.lt.s32.totalorder %s149_s27, %s149_s27 }
  0xd5   :  { %p14163_p1 = scmp.ne.s32.totalorder %s149_s27, %s14162_s1  ;;  %p14168_p3 = scmp.lt.s32.totalorder %s14162_s1, %s14162_s1 }
  0xd7   :  { %p14169_p4 = por %p14168_p3, %p14167_p2 }
  0xd9   :  { %p14170_p5 = pnand %p14169_p4, %p14163_p1 }
  0xdb   :  { %14173 = shalt.err (!%p14170_p5)
}
  0xdc   :  { %s14251_s9 = smov 256   ;;  %s14252_s5 = smov 16  }
  0xdd   :  { %154 = dma.hbm_to_vmem [thread:$0]  %s15085_s11, 73728, %s149_s27, [#allocation17], %s14251_s9, %s14251_s9, %s14252_s5  }
  0xde   :  { %s14253_s20 = smov [#allocation21]   ;;  %s14254_s2 = smov [#allocation24]  }
  0xdf   :  { %s171_s10 = sshll.u32 %s14253_s20, 4  ;;  %s193_s23 = sshll.u32 %s14254_s2, 4  ;;  %s172_s10 = int_to_ptr.vmem [resolvable:$true] %s171_s10  ;;  %s194_s23 = int_to_ptr.vmem [resolvable:$true] %s193_s23 }
  0xe0   :  { %s14174_s26 = scalar_lea.hbm %s15087_s13, 64 }
  0xe1   :  { %p14175_p6 = scmp.ne.s32.totalorder %s15087_s13, %s14174_s26  ;;  %p14178_p7 = scmp.lt.u32.totalorder %s14174_s26, %s15087_s13 }
  0xe3   :  { %p14180_p8 = pnand %p14178_p7, %p14175_p6 }
  0xe5   :  { %14183 = shalt.err (!%p14180_p8)
}
  0xe6   :  { %s14184_s11 = scalar_lea.vmem %s172_s10, 64  ;;  %p14189_p10 = scmp.lt.s32.totalorder %s172_s10, %s172_s10 }
  0xe7   :  { %p14185_p9 = scmp.ne.s32.totalorder %s172_s10, %s14184_s11  ;;  %p14190_p11 = scmp.lt.s32.totalorder %s14184_s11, %s14184_s11 }
  0xe9   :  { %p14191_p12 = por %p14190_p11, %p14189_p10 }
  0xeb   :  { %p14192_p13 = pnand %p14191_p12, %p14185_p9 }
  0xed   :  { %14195 = shalt.err (!%p14192_p13)
}
  0xee   :  { %174 = dma.hbm_to_vmem [thread:$0]  %s15087_s13, 64, %s172_s10, [#allocation20]  }
  0xef   :  { %s14196_s21 = scalar_lea.hbm %s15089_s15, 16 }
  0xf0   :  { %p14197_p0 = scmp.ne.s32.totalorder %s15089_s15, %s14196_s21  ;;  %p14200_p1 = scmp.lt.u32.totalorder %s14196_s21, %s15089_s15 }
  0xf2   :  { %p14202_p2 = pnand %p14200_p1, %p14197_p0 }
  0xf4   :  { %14205 = shalt.err (!%p14202_p2)
}
  0xf5   :  { %s14206_s22 = scalar_lea.vmem %s194_s23, 16  ;;  %s14210_s17 = scalar_lea.vmem %s194_s23, 32 }
  0xf6   :  { %p14207_p3 = scmp.ne.s32.totalorder %s194_s23, %s14206_s22  ;;  %p14211_p4 = scmp.lt.s32.totalorder %s194_s23, %s194_s23 }
  0xf7   :  { %p14212_p5 = scmp.lt.s32.totalorder %s14210_s17, %s14206_s22 }
  0xf9   :  { %p14213_p6 = por %p14212_p5, %p14211_p4 }
  0xfb   :  { %p14214_p7 = pnand %p14213_p6, %p14207_p3 }
  0xfd   :  { %14217 = shalt.err (!%p14214_p7)
}
  0xfe   :  { %196 = dma.hbm_to_vmem [thread:$0]  %s15089_s15, 16, %s194_s23, [#allocation23]  }
  0xff   :  { %14218 = dma.done.wait [#allocation3], 128  }
 0x100   :  { %14219 = vsyncadd [#allocation3], 4294967168 }
 0x101   :  { %14220 = dma.done.wait [#allocation5], 20480  }
 0x102   :  { %14221 = vsyncadd [#allocation5], 4294946816 }
 0x103   :  { %14222 = dma.done.wait [#allocation8], 32  }
 0x104   :  { %14223 = vsyncadd [#allocation8], 4294967264 }
 0x105   :  { %14224 = dma.done.wait [#allocation11], 33792  }
 0x106   :  { %14225 = vsyncadd [#allocation11], 4294933504 }
 0x107   :  { %14226 = dma.done.wait [#allocation14], 64  }
 0x108   :  { %14227 = vsyncadd [#allocation14], 4294967232 }
 0x109   :  { %14228 = dma.done.wait [#allocation17], 74304  }
 0x10a   :  { %14229 = vsyncadd [#allocation17], 4294892992 }
 0x10b   :  { %14230 = dma.done.wait [#allocation20], 128  }
 0x10c   :  { %14231 = vsyncadd [#allocation20], 4294967168 }
 0x10d   :  { %14232 = dma.done.wait [#allocation23], 4112  }
 0x10e   :  { %14233 = vsyncadd [#allocation23], 4294963184  ;;  %v12412_v0 = vld [vmem:[#allocation2] sm:$0xff]   ;;  %vm307_vm0 = vcmask 130048   ;;  %s15093_s5 = sld [smem:[#allocation33_spill]]  ;;  %v12421_v9 = vld [vmem:[#allocation4] sm:$0xff]  }
 0x10f   :  { %11771 = vmatprep.subr.bf16.mxu0 %v12412_v0  ;;  %11805 = vmatprep.mubr.bf16.mxu1 %v12421_v9  ;;  %v12441_v10 = vld [vmem:[#allocation6] sm:$0xff]   ;;  %v12444_v11 = vld [vmem:[#allocation6 + $0x8] sm:$0xff]   ;;  %v12445_v12 = vld [vmem:[#allocation6 + $0x10] sm:$0xff]  }
 0x110   :  { %11772 = vmatpush3.bf16.msra.mxu0 %v12412_v0  ;;  %v12448_v16 = vld [vmem:[#allocation6 + $0x18] sm:$0xff]   ;;  %v12449_v17 = vld [vmem:[#allocation6 + $0x20] sm:$0xff]   ;;  %v12453_v32 = vld [vmem:[#allocation6 + $0x28] sm:$0xff]  }
 0x111   :  { %11889 = vmatprep.subr.bf16.mxu0 %v12441_v10  ;;  %v12455_v35 = vld [vmem:[#allocation6 + $0x30] sm:$0xff]   ;;  %v12452_v9 = vld [vmem:[#allocation6 + $0x40] sm:$0xff]  }
 0x114   :  { %v12413_v1 = vld [vmem:[%s15093_s5] sm:$0xff]   ;;  %v12414_v2 = vld [vmem:[%s15093_s5 + $0x8] sm:$0xff]   ;;  %v12415_v3 = vld [vmem:[%s15093_s5 + $0x10] sm:$0xff]  }
 0x115   :  { %11773 = vmatprep.mubr.msk.bf16.mxu0 %vm307_vm0, %v12413_v1  ;;  %v12416_v4 = vld [vmem:[%s15093_s5 + $0x18] sm:$0xff]   ;;  %v12417_v5 = vld [vmem:[%s15093_s5 + $0x20] sm:$0xff]   ;;  %v12418_v6 = vld [vmem:[%s15093_s5 + $0x28] sm:$0xff]  }
 0x116   :  { %11774 = vmatmul.mubr.msk.bf16.vlgmr.msra.gmra.mrb[0].mxu0 %vm307_vm0, %v12414_v2  ;;  %v12419_v7 = vld [vmem:[%s15093_s5 + $0x30] sm:$0xff]   ;;  %v12420_v8 = vld [vmem:[%s15093_s5 + $0x38] sm:$0xff]  }
 0x117   :  { %11777 = vmatprep.mubr.msk.bf16.mxu0 %vm307_vm0, %v12415_v3  ;;  %11890 = vmatpush3.bf16.msra.mxu0 %v12441_v10  ;;  %v12422_v10 = vld [vmem:[#allocation4 + $0x8] sm:$0xff]  }
 0x118   :  { %11891 = vmatprep.subr.bf16.mxu0 %v12444_v11 }
 0x11b   :  { %11892 = vmatpush3.bf16.msra.mxu0 %v12444_v11  ;;  %v12423_v11 = vld [vmem:[#allocation4 + $0x10] sm:$0xff]  }
 0x11c   :  { %11893 = vmatprep.subr.bf16.mxu0 %v12445_v12 }
 0x11e   :  { %11778 = vmatmul.mubr.msk.bf16.gmra.mrb[4].mxu0 %vm307_vm0, %v12416_v4 }
 0x11f   :  { %11781 = vmatprep.mubr.msk.bf16.mxu0 %vm307_vm0, %v12417_v5  ;;  %11894 = vmatpush3.bf16.msra.mxu0 %v12445_v12  ;;  %v12454_v12 = vld [vmem:[#allocation6 + $0x48] sm:$0xff]  }
 0x120   :  { %11895 = vmatprep.subr.bf16.mxu0 %v12448_v16 }
 0x123   :  { %11896 = vmatpush3.bf16.msra.mxu0 %v12448_v16  ;;  %v12427_v16 = vld [vmem:[#allocation4 + $0x30] sm:$0xff]  }
 0x124   :  { %11897 = vmatprep.subr.bf16.mxu0 %v12449_v17 }
 0x126   :  { %11782 = vmatmul.mubr.msk.bf16.gmra.mrb[8].mxu0 %vm307_vm0, %v12418_v6 }
 0x127   :  { %11785 = vmatprep.mubr.msk.bf16.mxu0 %vm307_vm0, %v12419_v7  ;;  %11898 = vmatpush3.bf16.msra.mxu0 %v12449_v17  ;;  %v12428_v17 = vld [vmem:[#allocation4 + $0x38] sm:$0xff]  }
 0x128   :  { %11899 = vmatprep.subr.bf16.mxu0 %v12453_v32 }
 0x12b   :  { %11900 = vmatpush3.bf16.msra.mxu0 %v12453_v32  ;;  %v12446_v32 = vld [vmem:[#allocation4 + $0xb0] sm:$0xff]  }
 0x12c   :  { %11901 = vmatprep.subr.bf16.mxu0 %v12455_v35 }
 0x12e   :  { %11786 = vmatmul.mubr.msk.bf16.gmra.mrb[12].mxu0 %vm307_vm0, %v12420_v8 }
 0x12f   :  { %11902 = vmatpush3.bf16.msra.mxu0 %v12455_v35  ;;  %v12450_v35 = vld [vmem:[#allocation4 + $0xc0] sm:$0xff]  }
 0x1e9   :  { %v11775_v13 = vpop.f32.mrb[0].mxu0 }
 0x1ea   :  { %v447_v14 = vmul.f32 0.2, %v11775_v13  ;;  %v366_v15 = vpop.f32.mrb[1].mxu0  ;;  %vm431_vm1 = vcmp.ge.f32.partialorder %v11775_v13, 0.0 }
 0x1eb   :  { %vm429_vm2 = vcmp.ge.f32.partialorder %v366_v15, 0.0  ;;  %v445_v18 = vmul.f32 0.2, %v366_v15  ;;  %v11776_v19 = vpop.f32.mrb[2].mxu0 }
 0x1ec   :  { %vm432_vm3 = vcmp.ge.f32.partialorder %v11776_v19, 0.0  ;;  %v448_v20 = vmul.f32 0.2, %v11776_v19  ;;  %v369_v21 = vpop.f32.mrb[3].mxu0  ;;  %v463_v23 = vsel %vm431_vm1, %v11775_v13, %v447_v14  ;;  %v12424_v13 = vld [vmem:[#allocation4 + $0x18] sm:$0xff]   ;;  %v12425_v14 = vld [vmem:[#allocation4 + $0x20] sm:$0xff]  }
 0x1ed   :  { %vm430_vm4 = vcmp.ge.f32.partialorder %v369_v21, 0.0  ;;  %v446_v22 = vmul.f32 0.2, %v369_v21  ;;  %v461_v25 = vsel %vm429_vm2, %v366_v15, %v445_v18  ;;  %v12426_v15 = vld [vmem:[#allocation4 + $0x28] sm:$0xff]   ;;  %v12429_v18 = vld [vmem:[#allocation4 + $0x40] sm:$0xff]   ;;  %vm3064_vm1 = vcmask 261120  }
 0x1ee   :  { %v464_v24 = vsel %vm432_vm3, %v11776_v19, %v448_v20  ;;  %v12430_v19 = vld [vmem:[#allocation4 + $0x48] sm:$0xff]   ;;  %v12431_v20 = vld [vmem:[#allocation4 + $0x50] sm:$0xff]  }
 0x1ef   :  { %v462_v26 = vsel %vm430_vm4, %v369_v21, %v446_v22  ;;  %v478_v27 = vpack.c.bf16 %v464_v24, %v463_v23  ;;  %v12432_v21 = vld [vmem:[#allocation4 + $0x58] sm:$0xff]   ;;  %v12433_v22 = vld [vmem:[#allocation4 + $0x60] sm:$0xff]   ;;  %v12434_v23 = vld [vmem:[#allocation4 + $0x68] sm:$0xff]  }
 0x1f0   :  { %v477_v28 = vpack.c.bf16 %v462_v26, %v461_v25  ;;  %v12435_v24 = vld [vmem:[#allocation4 + $0x70] sm:$0xff]   ;;  %v12436_v25 = vld [vmem:[#allocation4 + $0x78] sm:$0xff]   ;;  %v12437_v26 = vld [vmem:[#allocation4 + $0x80] sm:$0xff]  }
 0x1f1   :  { %v11779_v29 = vpop.f32.mrb[4].mxu0 }
 0x1f2   :  { %v451_v30 = vmul.f32 0.2, %v11779_v29  ;;  %v382_v31 = vpop.f32.mrb[5].mxu0  ;;  %11789 = vmatprep.subr.bf16.mxu1 %v477_v28  ;;  %vm435_vm5 = vcmp.ge.f32.partialorder %v11779_v29, 0.0 }
 0x1f3   :  { %v449_v33 = vmul.f32 0.2, %v382_v31  ;;  %v11780_v34 = vpop.f32.mrb[6].mxu0  ;;  %11790 = vmatpush3.bf16.msra.mxu1 %v477_v28  ;;  %vm433_vm6 = vcmp.ge.f32.partialorder %v382_v31, 0.0  ;;  %v12439_v28 = vld [vmem:[#allocation4 + $0x90] sm:$0xff]  }
 0x1f4   :  { %vm436_vm7 = vcmp.ge.f32.partialorder %v11780_v34, 0.0  ;;  %v452_v36 = vmul.f32 0.2, %v11780_v34  ;;  %v385_v37 = vpop.f32.mrb[7].mxu0  ;;  %11791 = vmatprep.subr.bf16.mxu1 %v478_v27  ;;  %v467_v39 = vsel %vm435_vm5, %v11779_v29, %v451_v30  ;;  %v12440_v29 = vld [vmem:[#allocation4 + $0x98] sm:$0xff]   ;;  %v12442_v30 = vld [vmem:[#allocation4 + $0xa0] sm:$0xff]  }
 0x1f5   :  { %vm434_vm8 = vcmp.ge.f32.partialorder %v385_v37, 0.0  ;;  %v450_v38 = vmul.f32 0.2, %v385_v37  ;;  %v465_v41 = vsel %vm433_vm6, %v382_v31, %v449_v33  ;;  %v12443_v31 = vld [vmem:[#allocation4 + $0xa8] sm:$0xff]   ;;  %v12458_v33 = vld [vmem:[#allocation6 + $0x50] sm:$0xff]  }
 0x1f6   :  { %v468_v40 = vsel %vm436_vm7, %v11780_v34, %v452_v36  ;;  %v12447_v34 = vld [vmem:[#allocation4 + $0xb8] sm:$0xff]  }
 0x1f7   :  { %v466_v42 = vsel %vm434_vm8, %v385_v37, %v450_v38  ;;  %11792 = vmatpush3.bf16.msra.mxu1 %v478_v27  ;;  %v480_v43 = vpack.c.bf16 %v468_v40, %v467_v39  ;;  %v12438_v27 = vld [vmem:[#allocation4 + $0x88] sm:$0xff]   ;;  %v12459_v36 = vld [vmem:[#allocation6 + $0x38] sm:$0xff]   ;;  %v12461_v38 = vld [vmem:[#allocation6 + $0x80] sm:$0xff]   ;;  %vm5576_vm8 = vcmask 1043456  }
 0x1f8   :  { %v479_v44 = vpack.c.bf16 %v466_v42, %v465_v41  ;;  %11903 = vmatprep.subr.bf16.mxu0 %v12459_v36  ;;  %v12460_v37 = vld [vmem:[#allocation6 + $0x58] sm:$0xff]   ;;  %v12451_v39 = vld [vmem:[#allocation4 + $0xc8] sm:$0xff]   ;;  %v12464_v40 = vld [vmem:[#allocation6 + $0x60] sm:$0xff]  }
 0x1f9   :  { %v11783_v45 = vpop.f32.mrb[8].mxu0  ;;  %11904 = vmatpush3.bf16.msra.mxu0 %v12459_v36  ;;  %v12456_v41 = vld [vmem:[#allocation4 + $0xd0] sm:$0xff]   ;;  %v12466_v42 = vld [vmem:[#allocation6 + $0x68] sm:$0xff]  }
 0x1fa   :  { %vm439_vm9 = vcmp.ge.f32.partialorder %v11783_v45, 0.0  ;;  %v455_v46 = vmul.f32 0.2, %v11783_v45  ;;  %v398_v47 = vpop.f32.mrb[9].mxu0  ;;  %11793 = vmatprep.subr.bf16.mxu1 %v479_v44  ;;  %11909 = vmatprep.subr.bf16.mxu0 %v12461_v38 }
 0x1fb   :  { %vm437_vm10 = vcmp.ge.f32.partialorder %v398_v47, 0.0  ;;  %v453_v48 = vmul.f32 0.2, %v398_v47  ;;  %v11784_v49 = vpop.f32.mrb[10].mxu0  ;;  %11794 = vmatpush3.bf16.msra.mxu1 %v479_v44  ;;  %v12470_v44 = vld [vmem:[#allocation6 + $0x70] sm:$0xff]  }
 0x1fc   :  { %vm440_vm11 = vcmp.ge.f32.partialorder %v11784_v49, 0.0  ;;  %v456_v50 = vmul.f32 0.2, %v11784_v49  ;;  %v401_v51 = vpop.f32.mrb[11].mxu0  ;;  %11795 = vmatprep.subr.bf16.mxu1 %v480_v43  ;;  %v471_v53 = vsel %vm439_vm9, %v11783_v45, %v455_v46  ;;  %v12462_v45 = vld [vmem:[#allocation4 + $0xe0] sm:$0xff]   ;;  %v12472_v46 = vld [vmem:[#allocation6 + $0x78] sm:$0xff]  }
 0x1fd   :  { %vm438_vm12 = vcmp.ge.f32.partialorder %v401_v51, 0.0  ;;  %v454_v52 = vmul.f32 0.2, %v401_v51  ;;  %v469_v55 = vsel %vm437_vm10, %v398_v47, %v453_v48  ;;  %v12463_v47 = vld [vmem:[#allocation4 + $0xe8] sm:$0xff]   ;;  %v12468_v48 = vld [vmem:[#allocation4 + $0xf0] sm:$0xff]   ;;  %vm5560_vm9 = vcmask 64512  }
 0x1fe   :  { %v472_v54 = vsel %vm440_vm11, %v11784_v49, %v456_v50  ;;  %v12469_v49 = vld [vmem:[#allocation4 + $0xf8] sm:$0xff]  }
 0x1ff   :  { %v470_v56 = vsel %vm438_vm12, %v401_v51, %v454_v52  ;;  %11796 = vmatpush3.bf16.msra.mxu1 %v480_v43  ;;  %v482_v57 = vpack.c.bf16 %v472_v54, %v471_v53  ;;  %v12457_v43 = vld [vmem:[#allocation4 + $0xd8] sm:$0xff]  }
 0x200   :  { %v481_v58 = vpack.c.bf16 %v470_v56, %v469_v55  ;;  %v12465_v56 = vld [vmem:[#allocation6 + $0x88] sm:$0xff]  }
 0x201   :  { %v11787_v59 = vpop.f32.mrb[12].mxu0 }
 0x202   :  { %vm443_vm13 = vcmp.ge.f32.partialorder %v11787_v59, 0.0  ;;  %v459_v60 = vmul.f32 0.2, %v11787_v59  ;;  %v414_v61 = vpop.f32.mrb[13].mxu0  ;;  %11797 = vmatprep.subr.bf16.mxu1 %v481_v58 }
 0x203   :  { %vm441_vm14 = vcmp.ge.f32.partialorder %v414_v61, 0.0  ;;  %v457_v62 = vmul.f32 0.2, %v414_v61  ;;  %v11788_v63 = vpop.f32.mrb[14].mxu0  ;;  %11798 = vmatpush3.bf16.msra.mxu1 %v481_v58  ;;  %v12467_v58 = vld [vmem:[#allocation6 + $0x90] sm:$0xff]  }
 0x204   :  { %vm444_vm15 = vcmp.ge.f32.partialorder %v11788_v63, 0.0  ;;  %v460_v0 = vmul.f32 0.2, %v11788_v63  ;;  %v417_v1 = vpop.f32.mrb[15].mxu0  ;;  %11799 = vmatprep.subr.bf16.mxu1 %v482_v57  ;;  %v475_v3 = vsel %vm443_vm13, %v11787_v59, %v459_v60 }
 0x205   :  { %vm442_vm0 = vcmp.ge.f32.partialorder %v417_v1, 0.0  ;;  %v458_v2 = vmul.f32 0.2, %v417_v1  ;;  %v473_v5 = vsel %vm441_vm14, %v414_v61, %v457_v62 }
 0x206   :  { %v476_v4 = vsel %vm444_vm15, %v11788_v63, %v460_v0  ;;  %v12471_v0 = vld [vmem:[#allocation6 + $0x98] sm:$0xff]  }
 0x207   :  { %v474_v6 = vsel %vm442_vm0, %v417_v1, %v458_v2  ;;  %11800 = vmatpush3.bf16.msra.mxu1 %v482_v57  ;;  %v484_v7 = vpack.c.bf16 %v476_v4, %v475_v3  ;;  %v12473_v2 = vld [vmem:[#allocation6 + $0xa0] sm:$0xff]  }
 0x208   :  { %v483_v8 = vpack.c.bf16 %v474_v6, %v473_v5 }
 0x20a   :  { %11801 = vmatprep.subr.bf16.mxu1 %v483_v8 }
 0x20b   :  { %11802 = vmatpush3.bf16.msra.mxu1 %v483_v8  ;;  %v12474_v8 = vld [vmem:[#allocation6 + $0xa8] sm:$0xff]  }
 0x20c   :  { %11803 = vmatprep.subr.bf16.mxu1 %v484_v7 }
 0x20f   :  { %11804 = vmatpush3.bf16.msra.mxu1 %v484_v7 }
 0x210   :  { %11869 = vmatprep.subr.bf16.mxu1 %v12452_v9 }
 0x212   :  { %11806 = vmatmul.mubr.bf16.vlgmr.msra.gmra.mrb[0].mxu1 %v12422_v10  ;;  %v12475_v10 = vld [vmem:[#allocation6 + $0xb0] sm:$0xff]  }
 0x213   :  { %11809 = vmatprep.mubr.bf16.mxu1 %v12423_v11  ;;  %11870 = vmatpush3.bf16.msra.mxu1 %v12452_v9 }
 0x214   :  { %11871 = vmatprep.subr.bf16.mxu1 %v12454_v12 }
 0x217   :  { %11872 = vmatpush3.bf16.msra.mxu1 %v12454_v12 }
 0x218   :  { %11873 = vmatprep.subr.bf16.mxu1 %v12458_v33 }
 0x21a   :  { %11810 = vmatmul.mubr.bf16.gmra.mrb[4].mxu1 %v12424_v13 }
 0x21b   :  { %11813 = vmatprep.mubr.bf16.mxu1 %v12425_v14  ;;  %11874 = vmatpush3.bf16.msra.mxu1 %v12458_v33 }
 0x21c   :  { %11875 = vmatprep.subr.bf16.mxu1 %v12460_v37 }
 0x21f   :  { %11876 = vmatpush3.bf16.msra.mxu1 %v12460_v37 }
 0x220   :  { %11877 = vmatprep.subr.bf16.mxu1 %v12464_v40 }
 0x222   :  { %11814 = vmatmul.mubr.bf16.gmra.mrb[8].mxu1 %v12426_v15 }
 0x223   :  { %11817 = vmatprep.mubr.bf16.mxu1 %v12427_v16  ;;  %11878 = vmatpush3.bf16.msra.mxu1 %v12464_v40  ;;  %v12476_v16 = vld [vmem:[#allocation6 + $0xb8] sm:$0xff]   ;;  %v12482_v40 = vld [vmem:[#allocation6 + $0xe8] sm:$0xff]  }
 0x224   :  { %11879 = vmatprep.subr.bf16.mxu1 %v12466_v42 }
 0x227   :  { %11880 = vmatpush3.bf16.msra.mxu1 %v12466_v42 }
 0x228   :  { %11881 = vmatprep.subr.bf16.mxu1 %v12470_v44 }
 0x22a   :  { %11818 = vmatmul.mubr.bf16.gmra.mrb[12].mxu1 %v12428_v17 }
 0x22b   :  { %11821 = vmatprep.mubr.bf16.mxu1 %v12429_v18  ;;  %11882 = vmatpush3.bf16.msra.mxu1 %v12470_v44  ;;  %v12477_v18 = vld [vmem:[#allocation6 + $0xc0] sm:$0xff]  }
 0x22c   :  { %11883 = vmatprep.subr.bf16.mxu1 %v12472_v46 }
 0x22f   :  { %11884 = vmatpush3.bf16.msra.mxu1 %v12472_v46 }
 0x232   :  { %11822 = vmatmul.mubr.bf16.gmra.mrb[16].mxu1 %v12430_v19 }
 0x233   :  { %11825 = vmatprep.mubr.bf16.mxu1 %v12431_v20 }
 0x23a   :  { %11826 = vmatmul.mubr.bf16.gmra.mrb[20].mxu1 %v12432_v21 }
 0x23b   :  { %11829 = vmatprep.mubr.bf16.mxu1 %v12433_v22 }
 0x242   :  { %11830 = vmatmul.mubr.bf16.gmra.mrb[24].mxu1 %v12434_v23 }
 0x243   :  { %11833 = vmatprep.mubr.bf16.mxu1 %v12435_v24  ;;  %v12478_v24 = vld [vmem:[#allocation6 + $0xc8] sm:$0xff]  }
 0x24a   :  { %11834 = vmatmul.mubr.bf16.gmra.mrb[28].mxu1 %v12436_v25 }
 0x24b   :  { %11837 = vmatprep.mubr.bf16.mxu1 %v12437_v26  ;;  %v12479_v26 = vld [vmem:[#allocation6 + $0xd0] sm:$0xff]  }
 0x252   :  { %11838 = vmatmul.mubr.bf16.gmra.mrb[32].mxu1 %v12438_v27 }
 0x253   :  { %11841 = vmatprep.mubr.bf16.mxu1 %v12439_v28 }
 0x25a   :  { %11842 = vmatmul.mubr.bf16.gmra.mrb[36].mxu1 %v12440_v29 }
 0x25b   :  { %11845 = vmatprep.mubr.bf16.mxu1 %v12442_v30 }
 0x262   :  { %11846 = vmatmul.mubr.bf16.gmra.mrb[40].mxu1 %v12443_v31 }
 0x263   :  { %11849 = vmatprep.mubr.bf16.mxu1 %v12446_v32  ;;  %v12480_v32 = vld [vmem:[#allocation6 + $0xd8] sm:$0xff]  }
 0x26a   :  { %11850 = vmatmul.mubr.bf16.gmra.mrb[44].mxu1 %v12447_v34  ;;  %v12481_v34 = vld [vmem:[#allocation6 + $0xe0] sm:$0xff]  }
 0x26b   :  { %11853 = vmatprep.mubr.bf16.mxu1 %v12450_v35 }
 0x272   :  { %11854 = vmatmul.mubr.bf16.gmra.mrb[48].mxu1 %v12451_v39 }
 0x273   :  { %11857 = vmatprep.mubr.bf16.mxu1 %v12456_v41  ;;  %v12483_v41 = vld [vmem:[#allocation6 + $0xf0] sm:$0xff]  }
 0x27a   :  { %11858 = vmatmul.mubr.bf16.gmra.mrb[52].mxu1 %v12457_v43  ;;  %v12484_v43 = vld [vmem:[#allocation6 + $0xf8] sm:$0xff]  }
 0x27b   :  { %11861 = vmatprep.mubr.bf16.mxu1 %v12462_v45 }
 0x282   :  { %11862 = vmatmul.mubr.bf16.gmra.mrb[56].mxu1 %v12463_v47 }
 0x283   :  { %11865 = vmatprep.mubr.bf16.mxu1 %v12468_v48  ;;  %v12485_v48 = vld [vmem:[#allocation6 + $0x100] sm:$0xff]  }
 0x28a   :  { %11866 = vmatmul.mubr.bf16.gmra.mrb[60].mxu1 %v12469_v49 }
 0x2e5   :  { %v11807_v50 = vpop.f32.mrb[0].mxu1 }
 0x2e6   :  { %v775_v51 = vpop.f32.mrb[1].mxu1 }
 0x2e7   :  { %v11808_v52 = vpop.f32.mrb[2].mxu1 }
 0x2e8   :  { %v1031_v53 = vpack.c.bf16 %v11808_v52, %v11807_v50  ;;  %v778_v54 = vpop.f32.mrb[3].mxu1  ;;  %v12486_v50 = vld [vmem:[#allocation6 + $0x108] sm:$0xff]  }
 0x2e9   :  { %v1030_v55 = vpack.c.bf16 %v778_v54, %v775_v51  ;;  %v12487_v51 = vld [vmem:[#allocation6 + $0x110] sm:$0xff]   ;;  %v12488_v54 = vld [vmem:[#allocation6 + $0x118] sm:$0xff]  }
 0x2eb   :  { %11905 = vmatprep.mubr.bf16.mxu0 %v1030_v55 }
 0x2ec   :  { %11906 = vmatmul.mubr.bf16.vlgmr.msra.gmra.mrb[16].mxu0 %v1031_v53 }
 0x2ed   :  { %11910 = vmatpush3.bf16.msra.mxu0 %v12461_v38  ;;  %v11811_v57 = vpop.f32.mrb[4].mxu1 }
 0x2ee   :  { %11911 = vmatprep.subr.bf16.mxu0 %v12465_v56  ;;  %v791_v59 = vpop.f32.mrb[5].mxu1 }
 0x2ef   :  { %v11812_v60 = vpop.f32.mrb[6].mxu1 }
 0x2f0   :  { %v1049_v61 = vpack.c.bf16 %v11812_v60, %v11811_v57  ;;  %v794_v62 = vpop.f32.mrb[7].mxu1 }
 0x2f1   :  { %11912 = vmatpush3.bf16.msra.mxu0 %v12465_v56  ;;  %v1048_v63 = vpack.c.bf16 %v794_v62, %v791_v59 }
 0x2f2   :  { %11913 = vmatprep.subr.bf16.mxu0 %v12467_v58 }
 0x2f3   :  { %11885 = vmatprep.mubr.bf16.mxu1 %v1048_v63 }
 0x2f4   :  { %11886 = vmatmul.mubr.bf16.vlgmr.msra.gmra.mrb[64].mxu1 %v1049_v61  ;;  %v12489_v61 = vld [vmem:[#allocation6 + $0x120] sm:$0xff]  }
 0x2f5   :  { %11914 = vmatpush3.bf16.msra.mxu0 %v12467_v58  ;;  %v11815_v1 = vpop.f32.mrb[8].mxu1 }
 0x2f6   :  { %11915 = vmatprep.subr.bf16.mxu0 %v12471_v0  ;;  %v807_v3 = vpop.f32.mrb[9].mxu1 }
 0x2f7   :  { %v11816_v4 = vpop.f32.mrb[10].mxu1 }
 0x2f8   :  { %v1262_v5 = vpack.c.bf16 %v11816_v4, %v11815_v1  ;;  %v810_v6 = vpop.f32.mrb[11].mxu1  ;;  %v12490_v4 = vld [vmem:[#allocation6 + $0x128] sm:$0xff]  }
 0x2f9   :  { %11916 = vmatpush3.bf16.msra.mxu0 %v12471_v0  ;;  %v1261_v7 = vpack.c.bf16 %v810_v6, %v807_v3 }
 0x2fa   :  { %11917 = vmatprep.subr.bf16.mxu0 %v12473_v2 }
 0x2fb   :  { %11925 = vmatprep.mubr.bf16.mxu0 %v1261_v7 }
 0x2fd   :  { %11918 = vmatpush3.bf16.msra.mxu0 %v12473_v2  ;;  %v14587_v9 = vpop.f32.mrb[12].mxu1 }
 0x2fe   :  { %11919 = vmatprep.subr.bf16.mxu0 %v12474_v8  ;;  %v823_v11 = vpop.f32.mrb[13].mxu1 }
 0x2ff   :  { %v14589_v12 = vpop.f32.mrb[14].mxu1 }
 0x300   :  { %v1382_v13 = vpack.c.bf16 %v14589_v12, %v14587_v9  ;;  %v826_v14 = vpop.f32.mrb[15].mxu1 }
 0x301   :  { %11920 = vmatpush3.bf16.msra.mxu0 %v12474_v8  ;;  %v1381_v15 = vpack.c.bf16 %v826_v14, %v823_v11 }
 0x302   :  { %11921 = vmatprep.subr.bf16.mxu0 %v12475_v10 }
 0x305   :  { %11922 = vmatpush3.bf16.msra.mxu0 %v12475_v10  ;;  %v14593_v17 = vpop.f32.mrb[16].mxu1  ;;  %v12491_v10 = vld [vmem:[#allocation6 + $0x130] sm:$0xff]  }
 0x306   :  { %11923 = vmatprep.subr.bf16.mxu0 %v12476_v16  ;;  %v839_v19 = vpop.f32.mrb[17].mxu1 }
 0x307   :  { %v14595_v20 = vpop.f32.mrb[18].mxu1 }
 0x308   :  { %v1502_v21 = vpack.c.bf16 %v14595_v20, %v14593_v17  ;;  %v842_v22 = vpop.f32.mrb[19].mxu1  ;;  %v12496_v20 = vld [vmem:[#allocation6 + $0x158] sm:$0xff]   ;;  %v12502_v17 = vld [vmem:[#allocation6 + $0x188] sm:$0xff]  }
 0x309   :  { %11924 = vmatpush3.bf16.msra.mxu0 %v12476_v16  ;;  %v1501_v23 = vpack.c.bf16 %v842_v22, %v839_v19  ;;  %v12492_v16 = vld [vmem:[#allocation6 + $0x138] sm:$0xff]   ;;  %v12493_v19 = vld [vmem:[#allocation6 + $0x140] sm:$0xff]  }
 0x30a   :  { %11929 = vmatprep.subr.bf16.mxu0 %v12477_v18 }
 0x30c   :  { %11926 = vmatmul.mubr.bf16.vlgmr.msra.gmra.mrb[16].mxu0 %v1262_v5 }
 0x30d   :  { %11930 = vmatpush3.bf16.msra.mxu0 %v12477_v18  ;;  %11945 = vmatprep.mubr.bf16.mxu0 %v1381_v15  ;;  %v14599_v25 = vpop.f32.mrb[20].mxu1 }
 0x30e   :  { %11931 = vmatprep.subr.bf16.mxu0 %v12478_v24  ;;  %v14601_v27 = vpop.f32.mrb[21].mxu1 }
 0x30f   :  { %v14603_v28 = vpop.f32.mrb[22].mxu1 }
 0x310   :  { %v1622_v29 = vpack.c.bf16 %v14603_v28, %v14599_v25  ;;  %v14607_v30 = vpop.f32.mrb[23].mxu1  ;;  %v12507_v25 = vld [vmem:[#allocation6 + $0x1b0] sm:$0xff]   ;;  %v12508_v28 = vld [vmem:[#allocation6 + $0x1b8] sm:$0xff]  }
 0x311   :  { %11932 = vmatpush3.bf16.msra.mxu0 %v12478_v24  ;;  %v1621_v31 = vpack.c.bf16 %v14607_v30, %v14601_v27  ;;  %v12497_v27 = vld [vmem:[#allocation6 + $0x160] sm:$0xff]  }
 0x312   :  { %11933 = vmatprep.subr.bf16.mxu0 %v12479_v26 }
 0x315   :  { %11934 = vmatpush3.bf16.msra.mxu0 %v12479_v26  ;;  %v14611_v33 = vpop.f32.mrb[24].mxu1 }
 0x316   :  { %11935 = vmatprep.subr.bf16.mxu0 %v12480_v32  ;;  %v14613_v35 = vpop.f32.mrb[25].mxu1 }
 0x317   :  { %v14615_v36 = vpop.f32.mrb[26].mxu1 }
 0x318   :  { %v1742_v37 = vpack.c.bf16 %v14615_v36, %v14611_v33  ;;  %v14619_v38 = vpop.f32.mrb[27].mxu1  ;;  %v12515_v33 = vld [vmem:[#allocation6 + $0x1f0] sm:$0xff]   ;;  %v12516_v36 = vld [vmem:[#allocation6 + $0x1f8] sm:$0xff]  }
 0x319   :  { %11936 = vmatpush3.bf16.msra.mxu0 %v12480_v32  ;;  %v1741_v39 = vpack.c.bf16 %v14619_v38, %v14613_v35  ;;  %v12510_v35 = vld [vmem:[#allocation6 + $0x1c8] sm:$0xff]   ;;  %v12511_v38 = vld [vmem:[#allocation6 + $0x1d0] sm:$0xff]  }
 0x31a   :  { %11937 = vmatprep.subr.bf16.mxu0 %v12481_v34 }
 0x31d   :  { %11938 = vmatpush3.bf16.msra.mxu0 %v12481_v34  ;;  %v14623_v42 = vpop.f32.mrb[28].mxu1  ;;  %v12494_v34 = vld [vmem:[#allocation6 + $0x148] sm:$0xff]  }
 0x31e   :  { %11939 = vmatprep.subr.bf16.mxu0 %v12482_v40  ;;  %v14625_v44 = vpop.f32.mrb[29].mxu1 }
 0x31f   :  { %v14627_v45 = vpop.f32.mrb[30].mxu1 }
 0x320   :  { %v1862_v46 = vpack.c.bf16 %v14627_v45, %v14623_v42  ;;  %v14631_v47 = vpop.f32.mrb[31].mxu1  ;;  %v12523_v42 = vld [vmem:[#allocation6 + $0x230] sm:$0xff]   ;;  %v12524_v45 = vld [vmem:[#allocation6 + $0x238] sm:$0xff]  }
 0x321   :  { %11940 = vmatpush3.bf16.msra.mxu0 %v12482_v40  ;;  %v1861_v49 = vpack.c.bf16 %v14631_v47, %v14625_v44  ;;  %v12518_v44 = vld [vmem:[#allocation6 + $0x208] sm:$0xff]   ;;  %v12519_v47 = vld [vmem:[#allocation6 + $0x210] sm:$0xff]  }
 0x322   :  { %11941 = vmatprep.subr.bf16.mxu0 %v12483_v41 }
 0x325   :  { %11942 = vmatpush3.bf16.msra.mxu0 %v12483_v41  ;;  %v14635_v52 = vpop.f32.mrb[32].mxu1  ;;  %v12495_v41 = vld [vmem:[#allocation6 + $0x150] sm:$0xff]  }
 0x326   :  { %11943 = vmatprep.subr.bf16.mxu0 %v12484_v43  ;;  %v14637_v53 = vpop.f32.mrb[33].mxu1 }
 0x327   :  { %v14639_v55 = vpop.f32.mrb[34].mxu1 }
 0x328   :  { %v1982_v56 = vpack.c.bf16 %v14639_v55, %v14635_v52  ;;  %v14643_v57 = vpop.f32.mrb[35].mxu1  ;;  %v12531_v52 = vld [vmem:[#allocation6 + $0x270] sm:$0xff]   ;;  %v12532_v55 = vld [vmem:[#allocation6 + $0x278] sm:$0xff]  }
 0x329   :  { %11944 = vmatpush3.bf16.msra.mxu0 %v12484_v43  ;;  %v1981_v58 = vpack.c.bf16 %v14643_v57, %v14637_v53 }
 0x32a   :  { %11949 = vmatprep.subr.bf16.mxu0 %v12485_v48 }
 0x32c   :  { %11946 = vmatmul.mubr.bf16.vlgmr.msra.gmra.mrb[16].mxu0 %v1382_v13 }
 0x32d   :  { %11950 = vmatpush3.bf16.msra.mxu0 %v12485_v48  ;;  %11965 = vmatprep.mubr.bf16.mxu0 %v1501_v23  ;;  %v14647_v59 = vpop.f32.mrb[36].mxu1 }
 0x32e   :  { %11951 = vmatprep.subr.bf16.mxu0 %v12486_v50  ;;  %v14649_v60 = vpop.f32.mrb[37].mxu1 }
 0x32f   :  { %v14651_v62 = vpop.f32.mrb[38].mxu1 }
 0x330   :  { %v2102_v63 = vpack.c.bf16 %v14651_v62, %v14647_v59  ;;  %v14655_v0 = vpop.f32.mrb[39].mxu1  ;;  %v12539_v59 = vld [vmem:[#allocation6 + $0x2b0] sm:$0xff]   ;;  %v12540_v62 = vld [vmem:[#allocation6 + $0x2b8] sm:$0xff]  }
 0x331   :  { %11952 = vmatpush3.bf16.msra.mxu0 %v12486_v50  ;;  %v2101_v1 = vpack.c.bf16 %v14655_v0, %v14649_v60  ;;  %v12534_v60 = vld [vmem:[#allocation6 + $0x288] sm:$0xff]   ;;  %v12535_v0 = vld [vmem:[#allocation6 + $0x290] sm:$0xff]  }
 0x332   :  { %11953 = vmatprep.subr.bf16.mxu0 %v12487_v51 }
 0x335   :  { %11954 = vmatpush3.bf16.msra.mxu0 %v12487_v51  ;;  %v14659_v2 = vpop.f32.mrb[40].mxu1 }
 0x336   :  { %11955 = vmatprep.subr.bf16.mxu0 %v12488_v54  ;;  %v14661_v3 = vpop.f32.mrb[41].mxu1 }
 0x337   :  { %v14663_v5 = vpop.f32.mrb[42].mxu1 }
 0x338   :  { %v2222_v6 = vpack.c.bf16 %v14663_v5, %v14659_v2  ;;  %v14667_v7 = vpop.f32.mrb[43].mxu1  ;;  %v12547_v2 = vld [vmem:[#allocation6 + $0x2f0] sm:$0xff]   ;;  %v12548_v5 = vld [vmem:[#allocation6 + $0x2f8] sm:$0xff]  }
 0x339   :  { %11956 = vmatpush3.bf16.msra.mxu0 %v12488_v54  ;;  %v2221_v8 = vpack.c.bf16 %v14667_v7, %v14661_v3  ;;  %v12504_v54 = vld [vmem:[#allocation6 + $0x198] sm:$0xff]   ;;  %v12542_v3 = vld [vmem:[#allocation6 + $0x2c8] sm:$0xff]   ;;  %v12543_v7 = vld [vmem:[#allocation6 + $0x2d0] sm:$0xff]  }
 0x33a   :  { %11957 = vmatprep.subr.bf16.mxu0 %v12489_v61 }
 0x33d   :  { %11958 = vmatpush3.bf16.msra.mxu0 %v12489_v61  ;;  %v14671_v9 = vpop.f32.mrb[44].mxu1 }
 0x33e   :  { %11959 = vmatprep.subr.bf16.mxu0 %v12490_v4  ;;  %v14673_v11 = vpop.f32.mrb[45].mxu1 }
 0x33f   :  { %v14675_v12 = vpop.f32.mrb[46].mxu1 }
 0x340   :  { %v2342_v13 = vpack.c.bf16 %v14675_v12, %v14671_v9  ;;  %v14679_v14 = vpop.f32.mrb[47].mxu1  ;;  %v12555_v9 = vld [vmem:[#allocation6 + $0x330] sm:$0xff]   ;;  %v12556_v12 = vld [vmem:[#allocation6 + $0x338] sm:$0xff]  }
 0x341   :  { %11960 = vmatpush3.bf16.msra.mxu0 %v12490_v4  ;;  %v2341_v15 = vpack.c.bf16 %v14679_v14, %v14673_v11  ;;  %v12500_v4 = vld [vmem:[#allocation6 + $0x178] sm:$0xff]   ;;  %v12550_v11 = vld [vmem:[#allocation6 + $0x308] sm:$0xff]   ;;  %v12551_v14 = vld [vmem:[#allocation6 + $0x310] sm:$0xff]  }
 0x342   :  { %11961 = vmatprep.subr.bf16.mxu0 %v12491_v10 }
 0x345   :  { %11962 = vmatpush3.bf16.msra.mxu0 %v12491_v10  ;;  %v14683_v18 = vpop.f32.mrb[48].mxu1  ;;  %v12498_v10 = vld [vmem:[#allocation6 + $0x168] sm:$0xff]  }
 0x346   :  { %11963 = vmatprep.subr.bf16.mxu0 %v12492_v16  ;;  %v14685_v22 = vpop.f32.mrb[49].mxu1 }
 0x347   :  { %v14687_v23 = vpop.f32.mrb[50].mxu1 }
 0x348   :  { %v2462_v24 = vpack.c.bf16 %v14687_v23, %v14683_v18  ;;  %v14691_v26 = vpop.f32.mrb[51].mxu1  ;;  %v12563_v18 = vld [vmem:[#allocation6 + $0x370] sm:$0xff]   ;;  %v12564_v23 = vld [vmem:[#allocation6 + $0x378] sm:$0xff]  }
 0x349   :  { %11964 = vmatpush3.bf16.msra.mxu0 %v12492_v16  ;;  %v2461_v32 = vpack.c.bf16 %v14691_v26, %v14685_v22  ;;  %v12558_v22 = vld [vmem:[#allocation6 + $0x348] sm:$0xff]  }
 0x34a   :  { %11969 = vmatprep.subr.bf16.mxu0 %v12493_v19 }
 0x34c   :  { %11966 = vmatmul.mubr.bf16.vlgmr.msra.gmra.mrb[16].mxu0 %v1502_v21 }
 0x34d   :  { %11970 = vmatpush3.bf16.msra.mxu0 %v12493_v19  ;;  %11985 = vmatprep.mubr.bf16.mxu0 %v1621_v31  ;;  %v14701_v40 = vpop.f32.mrb[52].mxu1  ;;  %v12499_v19 = vld [vmem:[#allocation6 + $0x170] sm:$0xff]  }
 0x34e   :  { %11971 = vmatprep.subr.bf16.mxu0 %v12494_v34  ;;  %v14703_v43 = vpop.f32.mrb[53].mxu1 }
 0x34f   :  { %v14705_v48 = vpop.f32.mrb[54].mxu1 }
 0x350   :  { %v14709_v51 = vpop.f32.mrb[55].mxu1 }
 0x351   :  { %11972 = vmatpush3.bf16.msra.mxu0 %v12494_v34  ;;  %v15094_v26 = vpack.c.bf16 %v14709_v51, %v14703_v43  ;;  %v12566_v43 = vld [vmem:[#allocation6 + $0x388] sm:$0xff]   ;;  %v15095_v51 = vpack.c.bf16 %v14705_v48, %v14701_v40  ;;  %v12571_v40 = vld [vmem:[#allocation6 + $0x3b0] sm:$0xff]   ;;  %v12572_v48 = vld [vmem:[#allocation6 + $0x3b8] sm:$0xff]  }
 0x352   :  { %11973 = vmatprep.subr.bf16.mxu0 %v12495_v41 }
 0x355   :  { %11974 = vmatpush3.bf16.msra.mxu0 %v12495_v41  ;;  %v14713_v21 = vpop.f32.mrb[56].mxu1 }
 0x356   :  { %11975 = vmatprep.subr.bf16.mxu0 %v12496_v20  ;;  %v14715_v30 = vpop.f32.mrb[57].mxu1 }
 0x357   :  { %v14717_v31 = vpop.f32.mrb[58].mxu1 }
 0x358   :  { %v14721_v61 = vpop.f32.mrb[59].mxu1 }
 0x359   :  { %11976 = vmatpush3.bf16.msra.mxu0 %v12496_v20 }
 0x35a   :  { %11977 = vmatprep.subr.bf16.mxu0 %v12497_v27 }
 0x35d   :  { %11978 = vmatpush3.bf16.msra.mxu0 %v12497_v27  ;;  %v14725_v16 = vpop.f32.mrb[60].mxu1  ;;  %v12501_v27 = vld [vmem:[#allocation6 + $0x180] sm:$0xff]  }
 0x35e   :  { %11979 = vmatprep.subr.bf16.mxu0 %v12498_v10  ;;  %v14727_v34 = vpop.f32.mrb[61].mxu1 }
 0x35f   :  { %v14729_v41 = vpop.f32.mrb[62].mxu1 }
 0x360   :  { %v14733_v50 = vpop.f32.mrb[63].mxu1 }
 0x361   :  { %11980 = vmatpush3.bf16.msra.mxu0 %v12498_v10  ;;  %v2821_v20 = vpack.c.bf16 %v14733_v50, %v14727_v34  ;;  %v12503_v10 = vld [vmem:[#allocation6 + $0x190] sm:$0xff]   ;;  %v15098_v50 = vpack.c.bf16 %v14729_v41, %v14725_v16  ;;  %v12581_v34 = vld [vmem:[#allocation10] sm:$0xff]  }
 0x362   :  { %11981 = vmatprep.subr.bf16.mxu0 %v12499_v19  ;;  %12193 = vmatprep.mubr.msk.bf16.mxu1 %vm3064_vm1, %v12581_v34  ;;  %v12587_v34 = vld [vmem:[#allocation12 + $0x84] ss:$8 sps:$4 sm:$0xff]  }
 0x365   :  { %11982 = vmatpush3.bf16.msra.mxu0 %v12499_v19  ;;  %v12505_v19 = vld [vmem:[#allocation6 + $0x1a0] sm:$0xff]  }
 0x366   :  { %11983 = vmatprep.subr.bf16.mxu0 %v12500_v4 }
 0x369   :  { %11984 = vmatpush3.bf16.msra.mxu0 %v12500_v4  ;;  %v12506_v4 = vld [vmem:[#allocation6 + $0x1a8] sm:$0xff]  }
 0x36a   :  { %11989 = vmatprep.subr.bf16.mxu0 %v12501_v27 }
 0x36c   :  { %11986 = vmatmul.mubr.bf16.vlgmr.msra.gmra.mrb[16].mxu0 %v1622_v29  ;;  %v12509_v29 = vld [vmem:[#allocation6 + $0x1c0] sm:$0xff]  }
 0x36d   :  { %11990 = vmatpush3.bf16.msra.mxu0 %v12501_v27  ;;  %12005 = vmatprep.mubr.bf16.mxu0 %v1741_v39  ;;  %v12512_v39 = vld [vmem:[#allocation6 + $0x1d8] sm:$0xff]   ;;  %v12521_v27 = vld [vmem:[#allocation6 + $0x220] sm:$0xff]  }
 0x36e   :  { %11991 = vmatprep.subr.bf16.mxu0 %v12502_v17 }
 0x371   :  { %11992 = vmatpush3.bf16.msra.mxu0 %v12502_v17  ;;  %v12513_v17 = vld [vmem:[#allocation6 + $0x1e0] sm:$0xff]  }
 0x372   :  { %11993 = vmatprep.subr.bf16.mxu0 %v12503_v10 }
 0x375   :  { %11994 = vmatpush3.bf16.msra.mxu0 %v12503_v10  ;;  %v12522_v10 = vld [vmem:[#allocation6 + $0x228] sm:$0xff]  }
 0x376   :  { %11995 = vmatprep.subr.bf16.mxu0 %v12504_v54 }
 0x379   :  { %11996 = vmatpush3.bf16.msra.mxu0 %v12504_v54  ;;  %v12514_v54 = vld [vmem:[#allocation6 + $0x1e8] sm:$0xff]  }
 0x37a   :  { %11997 = vmatprep.subr.bf16.mxu0 %v12505_v19 }
 0x37d   :  { %11998 = vmatpush3.bf16.msra.mxu0 %v12505_v19  ;;  %v12526_v19 = vld [vmem:[#allocation6 + $0x248] sm:$0xff]  }
 0x37e   :  { %11999 = vmatprep.subr.bf16.mxu0 %v12506_v4 }
 0x381   :  { %12000 = vmatpush3.bf16.msra.mxu0 %v12506_v4 }
 0x382   :  { %12001 = vmatprep.subr.bf16.mxu0 %v12507_v25 }
 0x385   :  { %12002 = vmatpush3.bf16.msra.mxu0 %v12507_v25  ;;  %v12527_v25 = vld [vmem:[#allocation6 + $0x250] sm:$0xff]  }
 0x386   :  { %12003 = vmatprep.subr.bf16.mxu0 %v12508_v28 }
 0x389   :  { %12004 = vmatpush3.bf16.msra.mxu0 %v12508_v28  ;;  %v12528_v28 = vld [vmem:[#allocation6 + $0x258] sm:$0xff]  }
 0x38a   :  { %12009 = vmatprep.subr.bf16.mxu0 %v12509_v29 }
 0x38c   :  { %12006 = vmatmul.mubr.bf16.vlgmr.msra.gmra.mrb[16].mxu0 %v1742_v37  ;;  %v12517_v37 = vld [vmem:[#allocation6 + $0x200] sm:$0xff]  }
 0x38d   :  { %12010 = vmatpush3.bf16.msra.mxu0 %v12509_v29  ;;  %12025 = vmatprep.mubr.bf16.mxu0 %v1861_v49  ;;  %v12520_v49 = vld [vmem:[#allocation6 + $0x218] sm:$0xff]   ;;  %v12529_v29 = vld [vmem:[#allocation6 + $0x260] sm:$0xff]  }
 0x38e   :  { %12011 = vmatprep.subr.bf16.mxu0 %v12510_v35 }
 0x391   :  { %12012 = vmatpush3.bf16.msra.mxu0 %v12510_v35  ;;  %v12530_v35 = vld [vmem:[#allocation6 + $0x268] sm:$0xff]  }
 0x392   :  { %12013 = vmatprep.subr.bf16.mxu0 %v12511_v38 }
 0x395   :  { %12014 = vmatpush3.bf16.msra.mxu0 %v12511_v38  ;;  %v12537_v38 = vld [vmem:[#allocation6 + $0x2a0] sm:$0xff]  }
 0x396   :  { %12015 = vmatprep.subr.bf16.mxu0 %v12512_v39 }
 0x399   :  { %12016 = vmatpush3.bf16.msra.mxu0 %v12512_v39  ;;  %v12538_v39 = vld [vmem:[#allocation6 + $0x2a8] sm:$0xff]  }
 0x39a   :  { %12017 = vmatprep.subr.bf16.mxu0 %v12513_v17 }
 0x39d   :  { %12018 = vmatpush3.bf16.msra.mxu0 %v12513_v17  ;;  %v12545_v17 = vld [vmem:[#allocation6 + $0x2e0] sm:$0xff]  }
 0x39e   :  { %12019 = vmatprep.subr.bf16.mxu0 %v12514_v54 }
 0x3a1   :  { %12020 = vmatpush3.bf16.msra.mxu0 %v12514_v54  ;;  %v12546_v54 = vld [vmem:[#allocation6 + $0x2e8] sm:$0xff]  }
 0x3a2   :  { %12021 = vmatprep.subr.bf16.mxu0 %v12515_v33 }
 0x3a5   :  { %12022 = vmatpush3.bf16.msra.mxu0 %v12515_v33  ;;  %v12553_v33 = vld [vmem:[#allocation6 + $0x320] sm:$0xff]  }
 0x3a6   :  { %12023 = vmatprep.subr.bf16.mxu0 %v12516_v36 }
 0x3a9   :  { %12024 = vmatpush3.bf16.msra.mxu0 %v12516_v36  ;;  %v12554_v36 = vld [vmem:[#allocation6 + $0x328] sm:$0xff]  }
 0x3aa   :  { %12029 = vmatprep.subr.bf16.mxu0 %v12517_v37 }
 0x3ac   :  { %12026 = vmatmul.mubr.bf16.vlgmr.msra.gmra.mrb[16].mxu0 %v1862_v46  ;;  %v12525_v46 = vld [vmem:[#allocation6 + $0x240] sm:$0xff]  }
 0x3ad   :  { %12030 = vmatpush3.bf16.msra.mxu0 %v12517_v37  ;;  %12045 = vmatprep.mubr.bf16.mxu0 %v1981_v58  ;;  %v12560_v37 = vld [vmem:[#allocation6 + $0x358] sm:$0xff]  }
 0x3ae   :  { %12031 = vmatprep.subr.bf16.mxu0 %v12518_v44 }
 0x3b1   :  { %12032 = vmatpush3.bf16.msra.mxu0 %v12518_v44  ;;  %v12561_v44 = vld [vmem:[#allocation6 + $0x360] sm:$0xff]  }
 0x3b2   :  { %12033 = vmatprep.subr.bf16.mxu0 %v12519_v47 }
 0x3b5   :  { %12034 = vmatpush3.bf16.msra.mxu0 %v12519_v47  ;;  %v12562_v47 = vld [vmem:[#allocation6 + $0x368] sm:$0xff]  }
 0x3b6   :  { %12035 = vmatprep.subr.bf16.mxu0 %v12520_v49 }
 0x3b9   :  { %12036 = vmatpush3.bf16.msra.mxu0 %v12520_v49  ;;  %v15096_v49 = vpack.c.bf16 %v14721_v61, %v14715_v30  ;;  %v12573_v30 = vld [vmem:[#allocation6 + $0x3c0] sm:$0xff]   ;;  %v12574_v61 = vld [vmem:[#allocation6 + $0x3c8] sm:$0xff]  }
 0x3ba   :  { %12037 = vmatprep.subr.bf16.mxu0 %v12521_v27 }
 0x3bd   :  { %12038 = vmatpush3.bf16.msra.mxu0 %v12521_v27  ;;  %v12567_v27 = vld [vmem:[#allocation6 + $0x390] sm:$0xff]  }
 0x3be   :  { %12039 = vmatprep.subr.bf16.mxu0 %v12522_v10 }
 0x3c1   :  { %12040 = vmatpush3.bf16.msra.mxu0 %v12522_v10  ;;  %v12568_v10 = vld [vmem:[#allocation6 + $0x398] sm:$0xff]  }
 0x3c2   :  { %12041 = vmatprep.subr.bf16.mxu0 %v12523_v42 }
 0x3c5   :  { %12042 = vmatpush3.bf16.msra.mxu0 %v12523_v42  ;;  %v12569_v42 = vld [vmem:[#allocation6 + $0x3a0] sm:$0xff]  }
 0x3c6   :  { %12043 = vmatprep.subr.bf16.mxu0 %v12524_v45 }
 0x3c7   :  { %v14755_v53 = vpop.f32.mrb[64].mxu1 }
 0x3c8   :  { %v14757_v57 = vpop.f32.mrb[65].mxu1 }
 0x3c9   :  { %12044 = vmatpush3.bf16.msra.mxu0 %v12524_v45  ;;  %v14759_v58 = vpop.f32.mrb[66].mxu1  ;;  %v12570_v45 = vld [vmem:[#allocation6 + $0x3a8] sm:$0xff]  }
 0x3ca   :  { %12049 = vmatprep.subr.bf16.mxu0 %v12525_v46  ;;  %v14761_v4 = vpop.f32.mrb[67].mxu1 }
 0x3cc   :  { %12046 = vmatmul.mubr.bf16.vlgmr.msra.gmra.mrb[16].mxu0 %v1982_v56  ;;  %v12533_v56 = vld [vmem:[#allocation6 + $0x280] sm:$0xff]  }
 0x3cd   :  { %12050 = vmatpush3.bf16.msra.mxu0 %v12525_v46  ;;  %12065 = vmatprep.mubr.bf16.mxu0 %v2101_v1  ;;  %v12536_v1 = vld [vmem:[#allocation6 + $0x298] sm:$0xff]   ;;  %v15097_v46 = vpack.c.bf16 %v14717_v31, %v14713_v21  ;;  %v12579_v21 = vld [vmem:[#allocation6 + $0x3f0] sm:$0xff]  }
 0x3ce   :  { %12051 = vmatprep.subr.bf16.mxu0 %v12526_v19  ;;  %v12580_v31 = vld [vmem:[#allocation6 + $0x3f8] sm:$0xff]  }
 0x3d1   :  { %12052 = vmatpush3.bf16.msra.mxu0 %v12526_v19  ;;  %v12575_v19 = vld [vmem:[#allocation6 + $0x3d0] sm:$0xff]  }
 0x3d2   :  { %12053 = vmatprep.subr.bf16.mxu0 %v12527_v25 }
 0x3d5   :  { %12054 = vmatpush3.bf16.msra.mxu0 %v12527_v25  ;;  %v12576_v25 = vld [vmem:[#allocation6 + $0x3d8] sm:$0xff]  }
 0x3d6   :  { %12055 = vmatprep.subr.bf16.mxu0 %v12528_v28 }
 0x3d9   :  { %12056 = vmatpush3.bf16.msra.mxu0 %v12528_v28  ;;  %v12577_v28 = vld [vmem:[#allocation6 + $0x3e0] sm:$0xff]  }
 0x3da   :  { %12057 = vmatprep.subr.bf16.mxu0 %v12529_v29 }
 0x3dd   :  { %12058 = vmatpush3.bf16.msra.mxu0 %v12529_v29  ;;  %v12578_v29 = vld [vmem:[#allocation6 + $0x3e8] sm:$0xff]  }
 0x3de   :  { %12059 = vmatprep.subr.bf16.mxu0 %v12530_v35 }
 0x3e1   :  { %12060 = vmatpush3.bf16.msra.mxu0 %v12530_v35 }
 0x3e2   :  { %12061 = vmatprep.subr.bf16.mxu0 %v12531_v52 }
 0x3e5   :  { %12062 = vmatpush3.bf16.msra.mxu0 %v12531_v52 }
 0x3e6   :  { %12063 = vmatprep.subr.bf16.mxu0 %v12532_v55 }
 0x3e9   :  { %12064 = vmatpush3.bf16.msra.mxu0 %v12532_v55 }
 0x3ea   :  { %12069 = vmatprep.subr.bf16.mxu0 %v12533_v56 }
 0x3ec   :  { %12066 = vmatmul.mubr.bf16.vlgmr.msra.gmra.mrb[16].mxu0 %v2102_v63  ;;  %v12541_v63 = vld [vmem:[#allocation6 + $0x2c0] sm:$0xff]  }
 0x3ed   :  { %12070 = vmatpush3.bf16.msra.mxu0 %v12533_v56  ;;  %12085 = vmatprep.mubr.bf16.mxu0 %v2221_v8  ;;  %v12544_v8 = vld [vmem:[#allocation6 + $0x2d8] sm:$0xff]  }
 0x3ee   :  { %12071 = vmatprep.subr.bf16.mxu0 %v12534_v60 }
 0x3f1   :  { %12072 = vmatpush3.bf16.msra.mxu0 %v12534_v60 }
 0x3f2   :  { %12073 = vmatprep.subr.bf16.mxu0 %v12535_v0 }
 0x3f5   :  { %12074 = vmatpush3.bf16.msra.mxu0 %v12535_v0 }
 0x3f6   :  { %12075 = vmatprep.subr.bf16.mxu0 %v12536_v1 }
 0x3f9   :  { %12076 = vmatpush3.bf16.msra.mxu0 %v12536_v1 }
 0x3fa   :  { %12077 = vmatprep.subr.bf16.mxu0 %v12537_v38 }
 0x3fd   :  { %12078 = vmatpush3.bf16.msra.mxu0 %v12537_v38 }
 0x3fe   :  { %12079 = vmatprep.subr.bf16.mxu0 %v12538_v39 }
 0x401   :  { %12080 = vmatpush3.bf16.msra.mxu0 %v12538_v39 }
 0x402   :  { %12081 = vmatprep.subr.bf16.mxu0 %v12539_v59 }
 0x405   :  { %12082 = vmatpush3.bf16.msra.mxu0 %v12539_v59 }
 0x406   :  { %12083 = vmatprep.subr.bf16.mxu0 %v12540_v62 }
 0x409   :  { %12084 = vmatpush3.bf16.msra.mxu0 %v12540_v62 }
 0x40a   :  { %12089 = vmatprep.subr.bf16.mxu0 %v12541_v63 }
 0x40c   :  { %12086 = vmatmul.mubr.bf16.vlgmr.msra.gmra.mrb[16].mxu0 %v2222_v6  ;;  %v12549_v6 = vld [vmem:[#allocation6 + $0x300] sm:$0xff]  }
 0x40d   :  { %12090 = vmatpush3.bf16.msra.mxu0 %v12541_v63  ;;  %12105 = vmatprep.mubr.bf16.mxu0 %v2341_v15  ;;  %v12552_v15 = vld [vmem:[#allocation6 + $0x318] sm:$0xff]  }
 0x40e   :  { %12091 = vmatprep.subr.bf16.mxu0 %v12542_v3 }
 0x411   :  { %12092 = vmatpush3.bf16.msra.mxu0 %v12542_v3 }
 0x412   :  { %12093 = vmatprep.subr.bf16.mxu0 %v12543_v7 }
 0x415   :  { %12094 = vmatpush3.bf16.msra.mxu0 %v12543_v7 }
 0x416   :  { %12095 = vmatprep.subr.bf16.mxu0 %v12544_v8 }
 0x419   :  { %12096 = vmatpush3.bf16.msra.mxu0 %v12544_v8 }
 0x41a   :  { %12097 = vmatprep.subr.bf16.mxu0 %v12545_v17 }
 0x41d   :  { %12098 = vmatpush3.bf16.msra.mxu0 %v12545_v17 }
 0x41e   :  { %12099 = vmatprep.subr.bf16.mxu0 %v12546_v54 }
 0x421   :  { %12100 = vmatpush3.bf16.msra.mxu0 %v12546_v54 }
 0x422   :  { %12101 = vmatprep.subr.bf16.mxu0 %v12547_v2 }
 0x425   :  { %12102 = vmatpush3.bf16.msra.mxu0 %v12547_v2 }
 0x426   :  { %12103 = vmatprep.subr.bf16.mxu0 %v12548_v5 }
 0x429   :  { %12104 = vmatpush3.bf16.msra.mxu0 %v12548_v5 }
 0x42a   :  { %12109 = vmatprep.subr.bf16.mxu0 %v12549_v6 }
 0x42c   :  { %12106 = vmatmul.mubr.bf16.vlgmr.msra.gmra.mrb[16].mxu0 %v2342_v13  ;;  %v12557_v13 = vld [vmem:[#allocation6 + $0x340] sm:$0xff]  }
 0x42d   :  { %12110 = vmatpush3.bf16.msra.mxu0 %v12549_v6  ;;  %12125 = vmatprep.mubr.bf16.mxu0 %v2461_v32  ;;  %v12559_v32 = vld [vmem:[#allocation6 + $0x350] sm:$0xff]  }
 0x42e   :  { %12111 = vmatprep.subr.bf16.mxu0 %v12550_v11 }
 0x431   :  { %12112 = vmatpush3.bf16.msra.mxu0 %v12550_v11 }
 0x432   :  { %12113 = vmatprep.subr.bf16.mxu0 %v12551_v14 }
 0x435   :  { %12114 = vmatpush3.bf16.msra.mxu0 %v12551_v14 }
 0x436   :  { %12115 = vmatprep.subr.bf16.mxu0 %v12552_v15 }
 0x439   :  { %12116 = vmatpush3.bf16.msra.mxu0 %v12552_v15 }
 0x43a   :  { %12117 = vmatprep.subr.bf16.mxu0 %v12553_v33 }
 0x43d   :  { %12118 = vmatpush3.bf16.msra.mxu0 %v12553_v33 }
 0x43e   :  { %12119 = vmatprep.subr.bf16.mxu0 %v12554_v36 }
 0x441   :  { %12120 = vmatpush3.bf16.msra.mxu0 %v12554_v36 }
 0x442   :  { %12121 = vmatprep.subr.bf16.mxu0 %v12555_v9 }
 0x445   :  { %12122 = vmatpush3.bf16.msra.mxu0 %v12555_v9 }
 0x446   :  { %12123 = vmatprep.subr.bf16.mxu0 %v12556_v12 }
 0x449   :  { %12124 = vmatpush3.bf16.msra.mxu0 %v12556_v12 }
 0x44a   :  { %12129 = vmatprep.subr.bf16.mxu0 %v12557_v13 }
 0x44c   :  { %12126 = vmatmul.mubr.bf16.vlgmr.msra.gmra.mrb[16].mxu0 %v2462_v24  ;;  %v12565_v24 = vld [vmem:[#allocation6 + $0x380] sm:$0xff]  }
 0x44d   :  { %12130 = vmatpush3.bf16.msra.mxu0 %v12557_v13  ;;  %12145 = vmatprep.mubr.bf16.mxu0 %v15094_v26 }
 0x44e   :  { %12131 = vmatprep.subr.bf16.mxu0 %v12558_v22 }
 0x451   :  { %12132 = vmatpush3.bf16.msra.mxu0 %v12558_v22 }
 0x452   :  { %12133 = vmatprep.subr.bf16.mxu0 %v12559_v32 }
 0x455   :  { %12134 = vmatpush3.bf16.msra.mxu0 %v12559_v32  ;;  %v2975_v32 = vlaneseq }
 0x456   :  { %12135 = vmatprep.subr.bf16.mxu0 %v12560_v37 }
 0x459   :  { %12136 = vmatpush3.bf16.msra.mxu0 %v12560_v37  ;;  %v14813_v37 = vshrl.u32 %v2975_v32, 7 }
 0x45a   :  { %12137 = vmatprep.subr.bf16.mxu0 %v12561_v44 }
 0x45d   :  { %12138 = vmatpush3.bf16.msra.mxu0 %v12561_v44  ;;  %v2941_v44 = vld [vmem:[#allocation7] sm:$0x1] }
 0x45e   :  { %12139 = vmatprep.subr.bf16.mxu0 %v12562_v47 }
 0x461   :  { %12140 = vmatpush3.bf16.msra.mxu0 %v12562_v47  ;;  %v14816_v47 = vsub.s32 0, %v14813_v37 }
 0x462   :  { %12141 = vmatprep.subr.bf16.mxu0 %v12563_v18 }
 0x465   :  { %12142 = vmatpush3.bf16.msra.mxu0 %v12563_v18 }
 0x466   :  { %12143 = vmatprep.subr.bf16.mxu0 %v12564_v23 }
 0x469   :  { %12144 = vmatpush3.bf16.msra.mxu0 %v12564_v23 }
 0x46a   :  { %12149 = vmatprep.subr.bf16.mxu0 %v12565_v24 }
 0x46c   :  { %12146 = vmatmul.mubr.bf16.vlgmr.msra.gmra.mrb[16].mxu0 %v15095_v51 }
 0x46d   :  { %12150 = vmatpush3.bf16.msra.mxu0 %v12565_v24  ;;  %12165 = vmatprep.mubr.bf16.mxu0 %v15096_v49 }
 0x46e   :  { %12151 = vmatprep.subr.bf16.mxu0 %v12566_v43 }
 0x471   :  { %12152 = vmatpush3.bf16.msra.mxu0 %v12566_v43  ;;  %v10615_v43 = vld [vmem:[#allocation9] ss:$0 sm:$0xff] }
 0x472   :  { %12153 = vmatprep.subr.bf16.mxu0 %v12567_v27 }
 0x475   :  { %12154 = vmatpush3.bf16.msra.mxu0 %v12567_v27 }
 0x476   :  { %12155 = vmatprep.subr.bf16.mxu0 %v12568_v10 }
 0x479   :  { %12156 = vmatpush3.bf16.msra.mxu0 %v12568_v10 }
 0x47a   :  { %12157 = vmatprep.subr.bf16.mxu0 %v12569_v42 }
 0x47d   :  { %12158 = vmatpush3.bf16.msra.mxu0 %v12569_v42 }
 0x47e   :  { %12159 = vmatprep.subr.bf16.mxu0 %v12570_v45 }
 0x481   :  { %12160 = vmatpush3.bf16.msra.mxu0 %v12570_v45 }
 0x482   :  { %12161 = vmatprep.subr.bf16.mxu0 %v12571_v40 }
 0x485   :  { %12162 = vmatpush3.bf16.msra.mxu0 %v12571_v40 }
 0x486   :  { %12163 = vmatprep.subr.bf16.mxu0 %v12572_v48 }
 0x489   :  { %12164 = vmatpush3.bf16.msra.mxu0 %v12572_v48 }
 0x48a   :  { %12169 = vmatprep.subr.bf16.mxu0 %v12573_v30 }
 0x48c   :  { %12166 = vmatmul.mubr.bf16.vlgmr.msra.gmra.mrb[16].mxu0 %v15097_v46 }
 0x48d   :  { %12170 = vmatpush3.bf16.msra.mxu0 %v12573_v30  ;;  %12185 = vmatprep.mubr.bf16.mxu0 %v2821_v20 }
 0x48e   :  { %12171 = vmatprep.subr.bf16.mxu0 %v12574_v61 }
 0x491   :  { %12172 = vmatpush3.bf16.msra.mxu0 %v12574_v61 }
 0x492   :  { %12173 = vmatprep.subr.bf16.mxu0 %v12575_v19 }
 0x495   :  { %12174 = vmatpush3.bf16.msra.mxu0 %v12575_v19 }
 0x496   :  { %12175 = vmatprep.subr.bf16.mxu0 %v12576_v25 }
 0x499   :  { %12176 = vmatpush3.bf16.msra.mxu0 %v12576_v25 }
 0x49a   :  { %12177 = vmatprep.subr.bf16.mxu0 %v12577_v28 }
 0x49d   :  { %12178 = vmatpush3.bf16.msra.mxu0 %v12577_v28 }
 0x49e   :  { %12179 = vmatprep.subr.bf16.mxu0 %v12578_v29 }
 0x4a1   :  { %12180 = vmatpush3.bf16.msra.mxu0 %v12578_v29 }
 0x4a2   :  { %12181 = vmatprep.subr.bf16.mxu0 %v12579_v21 }
 0x4a5   :  { %12182 = vmatpush3.bf16.msra.mxu0 %v12579_v21 }
 0x4a6   :  { %12183 = vmatprep.subr.bf16.mxu0 %v12580_v31 }
 0x4a9   :  { %12184 = vmatpush3.bf16.msra.mxu0 %v12580_v31 }
 0x4ac   :  { %12186 = vmatmul.mubr.bf16.vlgmr.msra.gmra.mrb[16].mxu0 %v15098_v50 }
 0x57f   :  { %v12187_v20 = vpop.f32.mrb[16].mxu0 }
 0x580   :  { %v12209_v35 = vadd.f32 %v12187_v20, %v14755_v53  ;;  %v2922_v52 = vpop.f32.mrb[17].mxu0  ;;  %v12582_v20 = vld [vmem:[#allocation10 + $0x8] sm:$0xff]  }
 0x581   :  { %v12210_v55 = vadd.f32 %v2922_v52, %v14757_v57  ;;  %v12188_v56 = vpop.f32.mrb[18].mxu0  ;;  %v12585_v52 = vld [vmem:[#allocation12 + $0x80] ss:$8 sps:$4 sm:$0xff]  }
 0x582   :  { %v12211_v60 = vadd.f32 %v12188_v56, %v14759_v58  ;;  %v2925_v0 = vpop.f32.mrb[19].mxu0  ;;  %v12588_v56 = vld [vmem:[#allocation12 + $0x90] ss:$8 sps:$4 sm:$0xff]  }
 0x583   :  { %v12212_v1 = vadd.f32 %v2925_v0, %v14761_v4  ;;  %v12584_v0 = vld [vmem:[#allocation10 + $0x18] sm:$0xff]  }
 0x585   :  { %v2943_v38 = vadd.f32 %v12212_v1, %v12210_v55 }
 0x587   :  { %v2944_v39 = vadd.f32 %v12209_v35, %v2943_v38  ;;  %v12597_v38 = vld [vmem:[#allocation10 + $0x20] sm:$0xff]  }
 0x589   :  { %v2945_v16 = vadd.f32 %v12211_v60, %v2944_v39  ;;  %v12596_v39 = vld [vmem:[#allocation12 + $0xb4] ss:$8 sps:$4 sm:$0xff]  }
 0x58b   :  { %v2946_v41 = vrot.slane %v2945_v16, 4 }
 0x58d   :  { %v2947_v59 = vadd.f32 %v2946_v41, %v2945_v16  ;;  %v12594_v16 = vld [vmem:[#allocation12 + $0xb0] ss:$8 sps:$4 sm:$0xff]   ;;  %v12601_v41 = vld [vmem:[#allocation12 + $0xc4] ss:$8 sps:$4 sm:$0xff]  }
 0x58f   :  { %v2948_v62 = vrot.slane %v2947_v59, 2 }
 0x591   :  { %v2949_v63 = vadd.f32 %v2948_v62, %v2947_v59  ;;  %v12598_v59 = vld [vmem:[#allocation10 + $0x28] sm:$0xff]  }
 0x592   :  { %v12599_v62 = vld [vmem:[#allocation12 + $0xc0] ss:$8 sps:$4 sm:$0xff]  }
 0x593   :  { %v2950_v3 = vrot.slane %v2949_v63, 1 }
 0x595   :  { %v2951_v7 = vadd.f32 %v2950_v3, %v2949_v63  ;;  %v12605_v63 = vld [vmem:[#allocation10 + $0x30] sm:$0xff]  }
 0x596   :  { %v12604_v3 = vld [vmem:[#allocation12 + $0xd4] ss:$8 sps:$4 sm:$0xff]  }
 0x597   :  { %v2952_v8 = vmul.f32 0.03125, %v2951_v7  ;;  %v12602_v7 = vld [vmem:[#allocation12 + $0xd0] ss:$8 sps:$4 sm:$0xff]  }
 0x599   :  { %v2953_v53 = vsub.f32 %v12210_v55, %v2952_v8  ;;  %v2954_v17 = vsub.f32 %v12212_v1, %v2952_v8  ;;  %v2955_v54 = vsub.f32 %v12209_v35, %v2952_v8  ;;  %v2956_v57 = vsub.f32 %v12211_v60, %v2952_v8  ;;  %v12583_v35 = vld [vmem:[#allocation10 + $0x10] sm:$0xff]   ;;  %v12593_v60 = vld [vmem:[#allocation12 + $0xa4] ss:$8 sps:$4 sm:$0xff]   ;;  %v12591_v1 = vld [vmem:[#allocation12 + $0xa0] ss:$8 sps:$4 sm:$0xff]  }
 0x59a   :  { %v12590_v55 = vld [vmem:[#allocation12 + $0x94] ss:$8 sps:$4 sm:$0xff]   ;;  %v12609_v8 = vld [vmem:[#allocation12 + $0xe4] ss:$8 sps:$4 sm:$0xff]  }
 0x59b   :  { %v2957_v2 = vmul.f32 %v2953_v53, %v2953_v53  ;;  %v2958_v5 = vmul.f32 %v2954_v17, %v2954_v17  ;;  %v2959_v58 = vmul.f32 %v2955_v54, %v2955_v54  ;;  %v2960_v11 = vmul.f32 %v2956_v57, %v2956_v57 }
 0x59d   :  { %v2961_v6 = vadd.f32 %v2958_v5, %v2957_v2  ;;  %v12615_v2 = vld [vmem:[#allocation12 + $0x4] ss:$8 sps:$4 sm:$0xff]   ;;  %v14255_v5 = vmov 0  }
 0x59e   :  { %5615 = vmatprep.mubr.bf16.mxu0 %v14255_v5 }
 0x59f   :  { %v2962_v4 = vadd.f32 %v2961_v6, %v2959_v58 }
 0x5a1   :  { %v2963_v14 = vadd.f32 %v2962_v4, %v2960_v11 }
 0x5a3   :  { %v2964_v15 = vrot.slane %v2963_v14, 4 }
 0x5a5   :  { %v2965_v33 = vadd.f32 %v2964_v15, %v2963_v14  ;;  %v12613_v14 = vld [vmem:[#allocation12] ss:$8 sps:$4 sm:$0xff]  }
 0x5a7   :  { %v2966_v36 = vrot.slane %v2965_v33, 2 }
 0x5a9   :  { %v2967_v9 = vadd.f32 %v2966_v36, %v2965_v33  ;;  %v12618_v33 = vld [vmem:[#allocation12 + $0x14] ss:$8 sps:$4 sm:$0xff]   ;;  %v12616_v36 = vld [vmem:[#allocation12 + $0x10] ss:$8 sps:$4 sm:$0xff]  }
 0x5ab   :  { %v2968_v12 = vrot.slane %v2967_v9, 1 }
 0x5ad   :  { %v2969_v13 = vadd.f32 %v2968_v12, %v2967_v9  ;;  %v12621_v9 = vld [vmem:[#allocation12 + $0x24] ss:$8 sps:$4 sm:$0xff]  }
 0x5af   :  { %v2970_v22 = vmul.f32 0.03125, %v2969_v13 }
 0x5b1   :  { %v2971_v26 = vadd.f32 1e-05, %v2970_v22 }
 0x5b3   :  { %13874 = vrsqrt.f32 %v2971_v26  ;;  %v12619_v26 = vld [vmem:[#allocation12 + $0x20] ss:$8 sps:$4 sm:$0xff]  }
 0x5bd   :  { %v13875_v18 = vpop.eup %13874 }
 0x5be   :  { %v2973_v23 = vmul.f32 %v13875_v18, %v2941_v44  ;;  %v12624_v44 = vld [vmem:[#allocation12 + $0x34] ss:$8 sps:$4 sm:$0xff]   ;;  %v12622_v18 = vld [vmem:[#allocation12 + $0x30] ss:$8 sps:$4 sm:$0xff]  }
 0x5c0   :  { %v2978_v24 = vrot.slane %v2973_v23, %v14816_v47  ;;  %v12627_v23 = vld [vmem:[#allocation12 + $0x44] ss:$8 sps:$4 sm:$0xff]  }
 0x5c2   :  { %v2981_v51 = vmul.f32 %v2978_v24, %v2954_v17  ;;  %v2980_v49 = vmul.f32 %v2978_v24, %v2953_v53  ;;  %v2982_v27 = vmul.f32 %v2978_v24, %v2955_v54  ;;  %v2983_v10 = vmul.f32 %v2978_v24, %v2956_v57  ;;  %v12606_v53 = vld [vmem:[#allocation10 + $0x38] sm:$0xff]   ;;  %v12607_v17 = vld [vmem:[#allocation12 + $0xe0] ss:$8 sps:$4 sm:$0xff]  }
 0x5c3   :  { %v12612_v54 = vld [vmem:[#allocation12 + $0xf4] ss:$8 sps:$4 sm:$0xff]   ;;  %v12610_v57 = vld [vmem:[#allocation12 + $0xf0] ss:$8 sps:$4 sm:$0xff]   ;;  %v12625_v24 = vld [vmem:[#allocation12 + $0x40] ss:$8 sps:$4 sm:$0xff]  }
 0x5c4   :  { %v2991_v42 = vadd.f32 %v10615_v43, %v2981_v51  ;;  %v2990_v45 = vadd.f32 %v10615_v43, %v2980_v49  ;;  %v2992_v40 = vadd.f32 %v10615_v43, %v2982_v27  ;;  %v2993_v48 = vadd.f32 %v10615_v43, %v2983_v10  ;;  %v12630_v43 = vld [vmem:[#allocation12 + $0x54] ss:$8 sps:$4 sm:$0xff]   ;;  %v12628_v51 = vld [vmem:[#allocation12 + $0x50] ss:$8 sps:$4 sm:$0xff]   ;;  %v12633_v49 = vld [vmem:[#allocation12 + $0x64] ss:$8 sps:$4 sm:$0xff]  }
 0x5c5   :  { %v12631_v27 = vld [vmem:[#allocation12 + $0x60] ss:$8 sps:$4 sm:$0xff]   ;;  %v12636_v10 = vld [vmem:[#allocation12 + $0x74] ss:$8 sps:$4 sm:$0xff]  }
 0x5c6   :  { %vm2994_vm2 = vcmp.ge.f32.partialorder %v2990_v45, 0.0  ;;  %vm2995_vm3 = vcmp.ge.f32.partialorder %v2991_v42, 0.0  ;;  %v2998_v30 = vmul.f32 0.2, %v2990_v45  ;;  %v2999_v61 = vmul.f32 0.2, %v2991_v42 }
 0x5c7   :  { %vm2996_vm4 = vcmp.ge.f32.partialorder %v2992_v40, 0.0  ;;  %vm2997_vm5 = vcmp.ge.f32.partialorder %v2993_v48, 0.0  ;;  %v3000_v46 = vmul.f32 0.2, %v2992_v40  ;;  %v3001_v19 = vmul.f32 0.2, %v2993_v48 }
 0x5c8   :  { %v3002_v25 = vsel %vm2994_vm2, %v2990_v45, %v2998_v30  ;;  %v3003_v28 = vsel %vm2995_vm3, %v2991_v42, %v2999_v61  ;;  %v12634_v42 = vld [vmem:[#allocation12 + $0x70] ss:$8 sps:$4 sm:$0xff]   ;;  %v12639_v45 = vld [vmem:[#allocation12 + $0x104] ss:$8 sps:$4 sm:$0xff]   ;;  %v12642_v30 = vld [vmem:[#allocation12 + $0x114] ss:$8 sps:$4 sm:$0xff]  }
 0x5c9   :  { %v3006_v29 = vpack.c.bf16 %v3003_v28, %v3002_v25  ;;  %v3004_v21 = vsel %vm2996_vm4, %v2992_v40, %v3000_v46  ;;  %v3005_v31 = vsel %vm2997_vm5, %v2993_v48, %v3001_v19  ;;  %v12637_v40 = vld [vmem:[#allocation12 + $0x100] ss:$8 sps:$4 sm:$0xff]   ;;  %v12640_v61 = vld [vmem:[#allocation12 + $0x110] ss:$8 sps:$4 sm:$0xff]   ;;  %v12645_v46 = vld [vmem:[#allocation12 + $0x124] ss:$8 sps:$4 sm:$0xff]  }
 0x5ca   :  { %v3007_v50 = vpack.c.bf16 %v3005_v31, %v3004_v21  ;;  %v12643_v19 = vld [vmem:[#allocation12 + $0x120] ss:$8 sps:$4 sm:$0xff]   ;;  %v12648_v25 = vld [vmem:[#allocation12 + $0x134] ss:$8 sps:$4 sm:$0xff]   ;;  %v12646_v28 = vld [vmem:[#allocation12 + $0x130] ss:$8 sps:$4 sm:$0xff]  }
 0x5cb   :  { %12189 = vmatprep.subr.bf16.mxu1 %v3006_v29  ;;  %v12649_v21 = vld [vmem:[#allocation12 + $0x140] ss:$8 sps:$4 sm:$0xff]   ;;  %v12654_v31 = vld [vmem:[#allocation12 + $0x154] ss:$8 sps:$4 sm:$0xff]  }
 0x5cc   :  { %12190 = vmatpush3.bf16.msra.mxu1 %v3006_v29  ;;  %v12651_v29 = vld [vmem:[#allocation12 + $0x144] ss:$8 sps:$4 sm:$0xff]  }
 0x5cd   :  { %12191 = vmatprep.subr.bf16.mxu1 %v3007_v50 }
 0x5d0   :  { %12192 = vmatpush3.bf16.msra.mxu1 %v3007_v50  ;;  %v12652_v50 = vld [vmem:[#allocation12 + $0x150] ss:$8 sps:$4 sm:$0xff]  }
 0x5d1   :  { %3301 = vmatprep.subr.bf16.mxu1 %v12587_v34  ;;  %v12657_v34 = vld [vmem:[#allocation12 + $0x164] ss:$8 sps:$4 sm:$0xff]  }
 0x5d3   :  { %12194 = vmatmul.mubr.msk.bf16.vlgmr.msra.gmra.mrb[68].mxu1 %vm3064_vm1, %v12582_v20  ;;  %v12655_v20 = vld [vmem:[#allocation12 + $0x160] ss:$8 sps:$4 sm:$0xff]  }
 0x5d4   :  { %12197 = vmatprep.mubr.msk.bf16.mxu1 %vm3064_vm1, %v12583_v35  ;;  %3302 = vmatpush1.bf16.msra.mxu1 %v12585_v52  ;;  %v12660_v35 = vld [vmem:[#allocation12 + $0x174] ss:$8 sps:$4 sm:$0xff]   ;;  %v12658_v52 = vld [vmem:[#allocation12 + $0x170] ss:$8 sps:$4 sm:$0xff]  }
 0x5d5   :  { %3303 = vmatprep.subr.bf16.mxu1 %v12590_v55  ;;  %v12663_v55 = vld [vmem:[#allocation12 + $0x184] ss:$8 sps:$4 sm:$0xff]  }
 0x5d8   :  { %3304 = vmatpush1.bf16.msra.mxu1 %v12588_v56  ;;  %v12661_v56 = vld [vmem:[#allocation12 + $0x180] ss:$8 sps:$4 sm:$0xff]  }
 0x5d9   :  { %3305 = vmatprep.subr.bf16.mxu1 %v12593_v60 }
 0x5db   :  { %12198 = vmatmul.mubr.msk.bf16.gmra.mrb[72].mxu1 %vm3064_vm1, %v12584_v0  ;;  %v12666_v0 = vld [vmem:[#allocation12 + $0x194] ss:$8 sps:$4 sm:$0xff]  }
 0x5dc   :  { %3306 = vmatpush1.bf16.msra.mxu1 %v12591_v1  ;;  %12201 = vmatprep.mubr.msk.bf16.mxu1 %vm3064_vm1, %v12597_v38  ;;  %v12664_v38 = vld [vmem:[#allocation12 + $0x190] ss:$8 sps:$4 sm:$0xff]  }
 0x5dd   :  { %3307 = vmatprep.subr.bf16.mxu1 %v12596_v39 }
 0x5e0   :  { %3308 = vmatpush1.bf16.msra.mxu1 %v12594_v16  ;;  %v12669_v16 = vld [vmem:[#allocation12 + $0x1a4] ss:$8 sps:$4 sm:$0xff]  }
 0x5e1   :  { %3309 = vmatprep.subr.bf16.mxu1 %v12601_v41 }
 0x5e3   :  { %12202 = vmatmul.mubr.msk.bf16.gmra.mrb[76].mxu1 %vm3064_vm1, %v12598_v59 }
 0x5e4   :  { %3310 = vmatpush1.bf16.msra.mxu1 %v12599_v62  ;;  %12205 = vmatprep.mubr.msk.bf16.mxu1 %vm3064_vm1, %v12605_v63  ;;  %v12667_v62 = vld [vmem:[#allocation12 + $0x1a0] ss:$8 sps:$4 sm:$0xff]   ;;  %v12672_v63 = vld [vmem:[#allocation12 + $0x1b4] ss:$8 sps:$4 sm:$0xff]  }
 0x5e5   :  { %3311 = vmatprep.subr.bf16.mxu1 %v12604_v3 }
 0x5e8   :  { %3312 = vmatpush1.bf16.msra.mxu1 %v12602_v7  ;;  %v12670_v7 = vld [vmem:[#allocation12 + $0x1b0] ss:$8 sps:$4 sm:$0xff]  }
 0x5e9   :  { %3313 = vmatprep.subr.bf16.mxu1 %v12609_v8 }
 0x5eb   :  { %12206 = vmatmul.mubr.msk.bf16.gmra.mrb[80].mxu1 %vm3064_vm1, %v12606_v53  ;;  %v12675_v53 = vld [vmem:[#allocation12 + $0x1c4] ss:$8 sps:$4 sm:$0xff]  }
 0x5ec   :  { %3314 = vmatpush1.bf16.msra.mxu1 %v12607_v17  ;;  %3333 = vmatprep.mubr.bf16.mxu1 %v14255_v5 }
 0x5ed   :  { %3315 = vmatprep.subr.bf16.mxu1 %v12612_v54 }
 0x5f0   :  { %3316 = vmatpush1.bf16.msra.mxu1 %v12610_v57  ;;  %v12673_v57 = vld [vmem:[#allocation12 + $0x1c0] ss:$8 sps:$4 sm:$0xff]  }
 0x5f1   :  { %3422 = vmatprep.subr.bf16.mxu1 %v12615_v2  ;;  %v12678_v2 = vld [vmem:[#allocation12 + $0x1d4] ss:$8 sps:$4 sm:$0xff]  }
 0x6a6   :  { %v14828_v58 = vpop.f32.mrb[68].mxu1 }
 0x6a7   :  { %v3123_v6 = vpop.f32.mrb[69].mxu1  ;;  %v3463_v60 = vpack.c.bf16 %v14828_v58, %v14828_v58  ;;  %v12676_v58 = vld [vmem:[#allocation12 + $0x1d0] ss:$8 sps:$4 sm:$0xff]  }
 0x6a8   :  { %v14830_v11 = vpop.f32.mrb[70].mxu1  ;;  %v3186_v48 = vpack.c.bf16 %v3123_v6, %v3123_v6  ;;  %v12681_v6 = vld [vmem:[#allocation12 + $0x1e4] ss:$8 sps:$4 sm:$0xff]  }
 0x6a9   :  { %v3126_v4 = vpop.f32.mrb[71].mxu1 }
 0x6aa   :  { %v3203_v15 = vpack.c.bf16 %v3126_v4, %v3126_v4  ;;  %v12679_v4 = vld [vmem:[#allocation12 + $0x1e0] ss:$8 sps:$4 sm:$0xff]  }
 0x6ac   :  { %3334 = vmatmul.mubr.bf16.vlgmr.msra.gmra.mrb[84].mxu1 %v3203_v15  ;;  %v12682_v15 = vld [vmem:[#allocation12 + $0x1f0] ss:$8 sps:$4 sm:$0xff]  }
 0x6ad   :  { %3423 = vmatpush1.bf16.msra.mxu1 %v12613_v14  ;;  %3454 = vmatprep.mubr.bf16.mxu1 %v14255_v5  ;;  %v12684_v14 = vld [vmem:[#allocation12 + $0x1f4] ss:$8 sps:$4 sm:$0xff]  }
 0x6ae   :  { %3424 = vmatprep.subr.bf16.mxu1 %v12618_v33  ;;  %v14833_v12 = vpop.f32.mrb[72].mxu1  ;;  %v12687_v33 = vld [vmem:[#allocation12 + $0x204] ss:$8 sps:$4 sm:$0xff]  }
 0x6af   :  { %v14835_v13 = vpop.f32.mrb[73].mxu1 }
 0x6b0   :  { %v14837_v22 = vpop.f32.mrb[74].mxu1 }
 0x6b1   :  { %3425 = vmatpush1.bf16.msra.mxu1 %v12616_v36  ;;  %v14839_v32 = vpop.f32.mrb[75].mxu1  ;;  %v12685_v36 = vld [vmem:[#allocation12 + $0x200] ss:$8 sps:$4 sm:$0xff]  }
 0x6b2   :  { %3426 = vmatprep.subr.bf16.mxu1 %v12621_v9  ;;  %v3604_v9 = vpack.c.bf16 %v14830_v11, %v14830_v11  ;;  %v12702_v11 = vld [vmem:[#allocation12 + $0x254] ss:$8 sps:$4 sm:$0xff]  }
 0x6b5   :  { %3427 = vmatpush1.bf16.msra.mxu1 %v12619_v26  ;;  %v12690_v26 = vld [vmem:[#allocation12 + $0x214] ss:$8 sps:$4 sm:$0xff]  }
 0x6b6   :  { %3428 = vmatprep.subr.bf16.mxu1 %v12624_v44  ;;  %v14844_v1 = vpop.f32.mrb[76].mxu1  ;;  %v12688_v44 = vld [vmem:[#allocation12 + $0x210] ss:$8 sps:$4 sm:$0xff]  }
 0x6b7   :  { %v14847_v39 = vpop.f32.mrb[77].mxu1 }
 0x6b8   :  { %v14849_v41 = vpop.f32.mrb[78].mxu1 }
 0x6b9   :  { %3429 = vmatpush1.bf16.msra.mxu1 %v12622_v18  ;;  %v14851_v59 = vpop.f32.mrb[79].mxu1  ;;  %v12693_v18 = vld [vmem:[#allocation12 + $0x224] ss:$8 sps:$4 sm:$0xff]  }
 0x6ba   :  { %3430 = vmatprep.subr.bf16.mxu1 %v12627_v23  ;;  %v12691_v23 = vld [vmem:[#allocation12 + $0x220] ss:$8 sps:$4 sm:$0xff]  }
 0x6bd   :  { %3431 = vmatpush1.bf16.msra.mxu1 %v12625_v24  ;;  %v12696_v24 = vld [vmem:[#allocation12 + $0x234] ss:$8 sps:$4 sm:$0xff]  }
 0x6be   :  { %3432 = vmatprep.subr.bf16.mxu1 %v12630_v43  ;;  %v14853_v3 = vpop.f32.mrb[80].mxu1  ;;  %v12694_v43 = vld [vmem:[#allocation12 + $0x230] ss:$8 sps:$4 sm:$0xff]  }
 0x6bf   :  { %v14855_v8 = vpop.f32.mrb[81].mxu1 }
 0x6c0   :  { %v14857_v17 = vpop.f32.mrb[82].mxu1 }
 0x6c1   :  { %3433 = vmatpush1.bf16.msra.mxu1 %v12628_v51  ;;  %v14859_v54 = vpop.f32.mrb[83].mxu1  ;;  %v12699_v51 = vld [vmem:[#allocation12 + $0x244] ss:$8 sps:$4 sm:$0xff]  }
 0x6c2   :  { %3434 = vmatprep.subr.bf16.mxu1 %v12633_v49  ;;  %v12697_v49 = vld [vmem:[#allocation12 + $0x240] ss:$8 sps:$4 sm:$0xff]  }
 0x6c5   :  { %3435 = vmatpush1.bf16.msra.mxu1 %v12631_v27  ;;  %v12700_v27 = vld [vmem:[#allocation12 + $0x250] ss:$8 sps:$4 sm:$0xff]  }
 0x6c6   :  { %3436 = vmatprep.subr.bf16.mxu1 %v12636_v10  ;;  %v12705_v10 = vld [vmem:[#allocation12 + $0x264] ss:$8 sps:$4 sm:$0xff]  }
 0x6c9   :  { %3437 = vmatpush1.bf16.msra.mxu1 %v12634_v42  ;;  %v12703_v42 = vld [vmem:[#allocation12 + $0x260] ss:$8 sps:$4 sm:$0xff]  }
 0x6ca   :  { %3561 = vmatprep.subr.bf16.mxu1 %v12639_v45  ;;  %v12708_v45 = vld [vmem:[#allocation12 + $0x274] ss:$8 sps:$4 sm:$0xff]  }
 0x6cc   :  { %3455 = vmatmul.mubr.bf16.vlgmr.msra.gmra.mrb[84].mxu1 %v3186_v48  ;;  %v12711_v48 = vld [vmem:[#allocation12 + $0x284] ss:$8 sps:$4 sm:$0xff]  }
 0x6cd   :  { %3562 = vmatpush1.bf16.msra.mxu1 %v12637_v40  ;;  %3593 = vmatprep.mubr.bf16.mxu1 %v14255_v5  ;;  %v12706_v40 = vld [vmem:[#allocation12 + $0x270] ss:$8 sps:$4 sm:$0xff]  }
 0x6ce   :  { %3563 = vmatprep.subr.bf16.mxu1 %v12642_v30  ;;  %v3745_v30 = vpack.c.bf16 %v14835_v13, %v14835_v13  ;;  %v12721_v13 = vld [vmem:[#allocation12 + $0x2c0] ss:$8 sps:$4 sm:$0xff]  }
 0x6d1   :  { %3564 = vmatpush1.bf16.msra.mxu1 %v12640_v61  ;;  %v12709_v61 = vld [vmem:[#allocation12 + $0x280] ss:$8 sps:$4 sm:$0xff]  }
 0x6d2   :  { %3565 = vmatprep.subr.bf16.mxu1 %v12645_v46  ;;  %v12714_v46 = vld [vmem:[#allocation12 + $0x294] ss:$8 sps:$4 sm:$0xff]  }
 0x6d5   :  { %3566 = vmatpush1.bf16.msra.mxu1 %v12643_v19  ;;  %v12712_v19 = vld [vmem:[#allocation12 + $0x290] ss:$8 sps:$4 sm:$0xff]  }
 0x6d6   :  { %3567 = vmatprep.subr.bf16.mxu1 %v12648_v25  ;;  %v12717_v25 = vld [vmem:[#allocation12 + $0x2a4] ss:$8 sps:$4 sm:$0xff]  }
 0x6d9   :  { %3568 = vmatpush1.bf16.msra.mxu1 %v12646_v28  ;;  %v12715_v28 = vld [vmem:[#allocation12 + $0x2a0] ss:$8 sps:$4 sm:$0xff]  }
 0x6da   :  { %3569 = vmatprep.subr.bf16.mxu1 %v12651_v29  ;;  %v12720_v29 = vld [vmem:[#allocation12 + $0x2b4] ss:$8 sps:$4 sm:$0xff]  }
 0x6dd   :  { %3570 = vmatpush1.bf16.msra.mxu1 %v12649_v21  ;;  %v12718_v21 = vld [vmem:[#allocation12 + $0x2b0] ss:$8 sps:$4 sm:$0xff]  }
 0x6de   :  { %3571 = vmatprep.subr.bf16.mxu1 %v12654_v31  ;;  %v12723_v31 = vld [vmem:[#allocation12 + $0x2c4] ss:$8 sps:$4 sm:$0xff]  }
 0x6e1   :  { %3572 = vmatpush1.bf16.msra.mxu1 %v12652_v50  ;;  %v12726_v50 = vld [vmem:[#allocation12 + $0x2d4] ss:$8 sps:$4 sm:$0xff]  }
 0x6e2   :  { %3573 = vmatprep.subr.bf16.mxu1 %v12657_v34  ;;  %v12724_v34 = vld [vmem:[#allocation12 + $0x2d0] ss:$8 sps:$4 sm:$0xff]  }
 0x6e5   :  { %3574 = vmatpush1.bf16.msra.mxu1 %v12655_v20  ;;  %v12729_v20 = vld [vmem:[#allocation12 + $0x2e4] ss:$8 sps:$4 sm:$0xff]  }
 0x6e6   :  { %3575 = vmatprep.subr.bf16.mxu1 %v12660_v35  ;;  %v12727_v35 = vld [vmem:[#allocation12 + $0x2e0] ss:$8 sps:$4 sm:$0xff]  }
 0x6e9   :  { %3576 = vmatpush1.bf16.msra.mxu1 %v12658_v52  ;;  %v12732_v52 = vld [vmem:[#allocation12 + $0x2f4] ss:$8 sps:$4 sm:$0xff]  }
 0x6ea   :  { %3702 = vmatprep.subr.bf16.mxu1 %v12663_v55  ;;  %v12730_v55 = vld [vmem:[#allocation12 + $0x2f0] ss:$8 sps:$4 sm:$0xff]  }
 0x6ec   :  { %3594 = vmatmul.mubr.bf16.vlgmr.msra.gmra.mrb[84].mxu1 %v3463_v60  ;;  %v12733_v60 = vld [vmem:[#allocation12 + $0x300] ss:$8 sps:$4 sm:$0xff]  }
 0x6ed   :  { %3703 = vmatpush1.bf16.msra.mxu1 %v12661_v56  ;;  %3734 = vmatprep.mubr.bf16.mxu1 %v14255_v5  ;;  %v12735_v56 = vld [vmem:[#allocation12 + $0x304] ss:$8 sps:$4 sm:$0xff]  }
 0x6ee   :  { %3704 = vmatprep.subr.bf16.mxu1 %v12666_v0  ;;  %v3886_v0 = vpack.c.bf16 %v14839_v32, %v14839_v32  ;;  %v12750_v32 = vld [vmem:[#allocation12 + $0x354] ss:$8 sps:$4 sm:$0xff]  }
 0x6f1   :  { %3705 = vmatpush1.bf16.msra.mxu1 %v12664_v38  ;;  %v12738_v38 = vld [vmem:[#allocation12 + $0x314] ss:$8 sps:$4 sm:$0xff]  }
 0x6f2   :  { %3706 = vmatprep.subr.bf16.mxu1 %v12669_v16  ;;  %v12736_v16 = vld [vmem:[#allocation12 + $0x310] ss:$8 sps:$4 sm:$0xff]  }
 0x6f5   :  { %3707 = vmatpush1.bf16.msra.mxu1 %v12667_v62  ;;  %v12741_v62 = vld [vmem:[#allocation12 + $0x324] ss:$8 sps:$4 sm:$0xff]  }
 0x6f6   :  { %3708 = vmatprep.subr.bf16.mxu1 %v12672_v63  ;;  %v12739_v63 = vld [vmem:[#allocation12 + $0x320] ss:$8 sps:$4 sm:$0xff]  }
 0x6f9   :  { %3709 = vmatpush1.bf16.msra.mxu1 %v12670_v7  ;;  %v12744_v7 = vld [vmem:[#allocation12 + $0x334] ss:$8 sps:$4 sm:$0xff]  }
 0x6fa   :  { %3710 = vmatprep.subr.bf16.mxu1 %v12675_v53  ;;  %v12742_v53 = vld [vmem:[#allocation12 + $0x330] ss:$8 sps:$4 sm:$0xff]  }
 0x6fd   :  { %3711 = vmatpush1.bf16.msra.mxu1 %v12673_v57  ;;  %v12747_v57 = vld [vmem:[#allocation12 + $0x344] ss:$8 sps:$4 sm:$0xff]  }
 0x6fe   :  { %3712 = vmatprep.subr.bf16.mxu1 %v12678_v2  ;;  %v12745_v2 = vld [vmem:[#allocation12 + $0x340] ss:$8 sps:$4 sm:$0xff]  }
 0x701   :  { %3713 = vmatpush1.bf16.msra.mxu1 %v12676_v58  ;;  %v12748_v58 = vld [vmem:[#allocation12 + $0x350] ss:$8 sps:$4 sm:$0xff]  }
 0x702   :  { %3714 = vmatprep.subr.bf16.mxu1 %v12681_v6  ;;  %v12753_v6 = vld [vmem:[#allocation12 + $0x364] ss:$8 sps:$4 sm:$0xff]  }
 0x705   :  { %3715 = vmatpush1.bf16.msra.mxu1 %v12679_v4  ;;  %v12751_v4 = vld [vmem:[#allocation12 + $0x360] ss:$8 sps:$4 sm:$0xff]  }
 0x706   :  { %3716 = vmatprep.subr.bf16.mxu1 %v12684_v14  ;;  %v12756_v14 = vld [vmem:[#allocation12 + $0x374] ss:$8 sps:$4 sm:$0xff]  }
 0x709   :  { %3717 = vmatpush1.bf16.msra.mxu1 %v12682_v15  ;;  %v12754_v15 = vld [vmem:[#allocation12 + $0x370] ss:$8 sps:$4 sm:$0xff]  }
 0x70a   :  { %3843 = vmatprep.subr.bf16.mxu1 %v12687_v33  ;;  %v12759_v33 = vld [vmem:[#allocation12 + $0x384] ss:$8 sps:$4 sm:$0xff]  }
 0x70c   :  { %3735 = vmatmul.mubr.bf16.vlgmr.msra.gmra.mrb[84].mxu1 %v3604_v9  ;;  %v4027_v9 = vpack.c.bf16 %v14833_v12, %v14833_v12  ;;  %v12774_v12 = vld [vmem:[#allocation12 + $0x3d4] ss:$8 sps:$4 sm:$0xff]  }
 0x70d   :  { %3844 = vmatpush1.bf16.msra.mxu1 %v12685_v36  ;;  %3875 = vmatprep.mubr.bf16.mxu1 %v14255_v5  ;;  %v12757_v36 = vld [vmem:[#allocation12 + $0x380] ss:$8 sps:$4 sm:$0xff]  }
 0x70e   :  { %3845 = vmatprep.subr.bf16.mxu1 %v12690_v26  ;;  %v12762_v26 = vld [vmem:[#allocation12 + $0x394] ss:$8 sps:$4 sm:$0xff]  }
 0x711   :  { %3846 = vmatpush1.bf16.msra.mxu1 %v12688_v44  ;;  %v12760_v44 = vld [vmem:[#allocation12 + $0x390] ss:$8 sps:$4 sm:$0xff]  }
 0x712   :  { %3847 = vmatprep.subr.bf16.mxu1 %v12693_v18  ;;  %v12765_v18 = vld [vmem:[#allocation12 + $0x3a4] ss:$8 sps:$4 sm:$0xff]  }
 0x715   :  { %3848 = vmatpush1.bf16.msra.mxu1 %v12691_v23  ;;  %v12763_v23 = vld [vmem:[#allocation12 + $0x3a0] ss:$8 sps:$4 sm:$0xff]  }
 0x716   :  { %3849 = vmatprep.subr.bf16.mxu1 %v12696_v24  ;;  %v12768_v24 = vld [vmem:[#allocation12 + $0x3b4] ss:$8 sps:$4 sm:$0xff]  }
 0x719   :  { %3850 = vmatpush1.bf16.msra.mxu1 %v12694_v43  ;;  %v12766_v43 = vld [vmem:[#allocation12 + $0x3b0] ss:$8 sps:$4 sm:$0xff]  }
 0x71a   :  { %3851 = vmatprep.subr.bf16.mxu1 %v12699_v51  ;;  %v12771_v51 = vld [vmem:[#allocation12 + $0x3c4] ss:$8 sps:$4 sm:$0xff]  }
 0x71d   :  { %3852 = vmatpush1.bf16.msra.mxu1 %v12697_v49  ;;  %v12769_v49 = vld [vmem:[#allocation12 + $0x3c0] ss:$8 sps:$4 sm:$0xff]  }
 0x71e   :  { %3853 = vmatprep.subr.bf16.mxu1 %v12702_v11  ;;  %v12772_v11 = vld [vmem:[#allocation12 + $0x3d0] ss:$8 sps:$4 sm:$0xff]  }
 0x721   :  { %3854 = vmatpush1.bf16.msra.mxu1 %v12700_v27  ;;  %v12777_v27 = vld [vmem:[#allocation12 + $0x3e4] ss:$8 sps:$4 sm:$0xff]  }
 0x722   :  { %3855 = vmatprep.subr.bf16.mxu1 %v12705_v10  ;;  %v12775_v10 = vld [vmem:[#allocation12 + $0x3e0] ss:$8 sps:$4 sm:$0xff]  }
 0x725   :  { %3856 = vmatpush1.bf16.msra.mxu1 %v12703_v42  ;;  %v12780_v42 = vld [vmem:[#allocation12 + $0x3f4] ss:$8 sps:$4 sm:$0xff]  }
 0x726   :  { %3857 = vmatprep.subr.bf16.mxu1 %v12708_v45  ;;  %v12778_v45 = vld [vmem:[#allocation12 + $0x3f0] ss:$8 sps:$4 sm:$0xff]  }
 0x729   :  { %3858 = vmatpush1.bf16.msra.mxu1 %v12706_v40  ;;  %v12783_v40 = vld [vmem:[#allocation12 + $0x404] ss:$8 sps:$4 sm:$0xff]  }
 0x72a   :  { %3984 = vmatprep.subr.bf16.mxu1 %v12711_v48  ;;  %v12781_v48 = vld [vmem:[#allocation12 + $0x400] ss:$8 sps:$4 sm:$0xff]  }
 0x72c   :  { %3876 = vmatmul.mubr.bf16.vlgmr.msra.gmra.mrb[84].mxu1 %v3745_v30  ;;  %v4168_v30 = vpack.c.bf16 %v14837_v22, %v14837_v22  ;;  %v12798_v22 = vld [vmem:[#allocation12 + $0x454] ss:$8 sps:$4 sm:$0xff]  }
 0x72d   :  { %3985 = vmatpush1.bf16.msra.mxu1 %v12709_v61  ;;  %4016 = vmatprep.mubr.bf16.mxu1 %v14255_v5  ;;  %v12786_v61 = vld [vmem:[#allocation12 + $0x414] ss:$8 sps:$4 sm:$0xff]  }
 0x72e   :  { %3986 = vmatprep.subr.bf16.mxu1 %v12714_v46  ;;  %v12784_v46 = vld [vmem:[#allocation12 + $0x410] ss:$8 sps:$4 sm:$0xff]  }
 0x731   :  { %3987 = vmatpush1.bf16.msra.mxu1 %v12712_v19  ;;  %v12789_v19 = vld [vmem:[#allocation12 + $0x424] ss:$8 sps:$4 sm:$0xff]  }
 0x732   :  { %3988 = vmatprep.subr.bf16.mxu1 %v12717_v25  ;;  %v12787_v25 = vld [vmem:[#allocation12 + $0x420] ss:$8 sps:$4 sm:$0xff]  }
 0x735   :  { %3989 = vmatpush1.bf16.msra.mxu1 %v12715_v28  ;;  %v12792_v28 = vld [vmem:[#allocation12 + $0x434] ss:$8 sps:$4 sm:$0xff]  }
 0x736   :  { %3990 = vmatprep.subr.bf16.mxu1 %v12720_v29  ;;  %v12790_v29 = vld [vmem:[#allocation12 + $0x430] ss:$8 sps:$4 sm:$0xff]  }
 0x739   :  { %3991 = vmatpush1.bf16.msra.mxu1 %v12718_v21  ;;  %v12795_v21 = vld [vmem:[#allocation12 + $0x444] ss:$8 sps:$4 sm:$0xff]  }
 0x73a   :  { %3992 = vmatprep.subr.bf16.mxu1 %v12723_v31  ;;  %v12793_v31 = vld [vmem:[#allocation12 + $0x440] ss:$8 sps:$4 sm:$0xff]  }
 0x73d   :  { %3993 = vmatpush1.bf16.msra.mxu1 %v12721_v13  ;;  %v12796_v13 = vld [vmem:[#allocation12 + $0x450] ss:$8 sps:$4 sm:$0xff]  }
 0x73e   :  { %3994 = vmatprep.subr.bf16.mxu1 %v12726_v50  ;;  %v12801_v50 = vld [vmem:[#allocation12 + $0x464] ss:$8 sps:$4 sm:$0xff]  }
 0x741   :  { %3995 = vmatpush1.bf16.msra.mxu1 %v12724_v34  ;;  %v12799_v34 = vld [vmem:[#allocation12 + $0x460] ss:$8 sps:$4 sm:$0xff]  }
 0x742   :  { %3996 = vmatprep.subr.bf16.mxu1 %v12729_v20  ;;  %v12804_v20 = vld [vmem:[#allocation12 + $0x474] ss:$8 sps:$4 sm:$0xff]  }
 0x745   :  { %3997 = vmatpush1.bf16.msra.mxu1 %v12727_v35  ;;  %v12802_v35 = vld [vmem:[#allocation12 + $0x470] ss:$8 sps:$4 sm:$0xff]  }
 0x746   :  { %3998 = vmatprep.subr.bf16.mxu1 %v12732_v52  ;;  %v12807_v52 = vld [vmem:[#allocation12 + $0x484] ss:$8 sps:$4 sm:$0xff]  }
 0x749   :  { %3999 = vmatpush1.bf16.msra.mxu1 %v12730_v55  ;;  %v12805_v55 = vld [vmem:[#allocation12 + $0x480] ss:$8 sps:$4 sm:$0xff]  }
 0x74a   :  { %4125 = vmatprep.subr.bf16.mxu1 %v12735_v56  ;;  %v4309_v56 = vpack.c.bf16 %v14847_v39, %v14847_v39  ;;  %v12822_v39 = vld [vmem:[#allocation12 + $0x4d4] ss:$8 sps:$4 sm:$0xff]  }
 0x74c   :  { %4017 = vmatmul.mubr.bf16.vlgmr.msra.gmra.mrb[84].mxu1 %v3886_v0  ;;  %v12808_v0 = vld [vmem:[#allocation12 + $0x490] ss:$8 sps:$4 sm:$0xff]  }
 0x74d   :  { %4126 = vmatpush1.bf16.msra.mxu1 %v12733_v60  ;;  %4157 = vmatprep.mubr.bf16.mxu1 %v14255_v5  ;;  %v12810_v60 = vld [vmem:[#allocation12 + $0x494] ss:$8 sps:$4 sm:$0xff]  }
 0x74e   :  { %4127 = vmatprep.subr.bf16.mxu1 %v12738_v38  ;;  %v12813_v38 = vld [vmem:[#allocation12 + $0x4a4] ss:$8 sps:$4 sm:$0xff]  }
 0x751   :  { %4128 = vmatpush1.bf16.msra.mxu1 %v12736_v16  ;;  %v12811_v16 = vld [vmem:[#allocation12 + $0x4a0] ss:$8 sps:$4 sm:$0xff]  }
 0x752   :  { %4129 = vmatprep.subr.bf16.mxu1 %v12741_v62  ;;  %v12816_v62 = vld [vmem:[#allocation12 + $0x4b4] ss:$8 sps:$4 sm:$0xff]  }
 0x755   :  { %4130 = vmatpush1.bf16.msra.mxu1 %v12739_v63  ;;  %v12814_v63 = vld [vmem:[#allocation12 + $0x4b0] ss:$8 sps:$4 sm:$0xff]  }
 0x756   :  { %4131 = vmatprep.subr.bf16.mxu1 %v12744_v7  ;;  %v12819_v7 = vld [vmem:[#allocation12 + $0x4c4] ss:$8 sps:$4 sm:$0xff]  }
 0x759   :  { %4132 = vmatpush1.bf16.msra.mxu1 %v12742_v53  ;;  %v12817_v53 = vld [vmem:[#allocation12 + $0x4c0] ss:$8 sps:$4 sm:$0xff]  }
 0x75a   :  { %4133 = vmatprep.subr.bf16.mxu1 %v12747_v57  ;;  %v12820_v57 = vld [vmem:[#allocation12 + $0x4d0] ss:$8 sps:$4 sm:$0xff]  }
 0x75d   :  { %4134 = vmatpush1.bf16.msra.mxu1 %v12745_v2  ;;  %v12825_v2 = vld [vmem:[#allocation12 + $0x4e4] ss:$8 sps:$4 sm:$0xff]  }
 0x75e   :  { %4135 = vmatprep.subr.bf16.mxu1 %v12750_v32  ;;  %v12823_v32 = vld [vmem:[#allocation12 + $0x4e0] ss:$8 sps:$4 sm:$0xff]  }
 0x761   :  { %4136 = vmatpush1.bf16.msra.mxu1 %v12748_v58  ;;  %v12828_v58 = vld [vmem:[#allocation12 + $0x4f4] ss:$8 sps:$4 sm:$0xff]  }
 0x762   :  { %4137 = vmatprep.subr.bf16.mxu1 %v12753_v6  ;;  %v12826_v6 = vld [vmem:[#allocation12 + $0x4f0] ss:$8 sps:$4 sm:$0xff]  }
 0x765   :  { %4138 = vmatpush1.bf16.msra.mxu1 %v12751_v4  ;;  %v12831_v4 = vld [vmem:[#allocation12 + $0x504] ss:$8 sps:$4 sm:$0xff]  }
 0x766   :  { %4139 = vmatprep.subr.bf16.mxu1 %v12756_v14  ;;  %v12829_v14 = vld [vmem:[#allocation12 + $0x500] ss:$8 sps:$4 sm:$0xff]  }
 0x769   :  { %4140 = vmatpush1.bf16.msra.mxu1 %v12754_v15  ;;  %v4450_v15 = vpack.c.bf16 %v14851_v59, %v14851_v59  ;;  %v12846_v59 = vld [vmem:[#allocation12 + $0x554] ss:$8 sps:$4 sm:$0xff]  }
 0x76a   :  { %4266 = vmatprep.subr.bf16.mxu1 %v12759_v33  ;;  %v12834_v33 = vld [vmem:[#allocation12 + $0x514] ss:$8 sps:$4 sm:$0xff]  }
 0x76c   :  { %4158 = vmatmul.mubr.bf16.vlgmr.msra.gmra.mrb[84].mxu1 %v4027_v9  ;;  %v12837_v9 = vld [vmem:[#allocation12 + $0x524] ss:$8 sps:$4 sm:$0xff]  }
 0x76d   :  { %4267 = vmatpush1.bf16.msra.mxu1 %v12757_v36  ;;  %4298 = vmatprep.mubr.bf16.mxu1 %v14255_v5  ;;  %v12832_v36 = vld [vmem:[#allocation12 + $0x510] ss:$8 sps:$4 sm:$0xff]  }
 0x76e   :  { %4268 = vmatprep.subr.bf16.mxu1 %v12762_v26  ;;  %v12835_v26 = vld [vmem:[#allocation12 + $0x520] ss:$8 sps:$4 sm:$0xff]  }
 0x771   :  { %4269 = vmatpush1.bf16.msra.mxu1 %v12760_v44  ;;  %v12840_v44 = vld [vmem:[#allocation12 + $0x534] ss:$8 sps:$4 sm:$0xff]  }
 0x772   :  { %4270 = vmatprep.subr.bf16.mxu1 %v12765_v18  ;;  %v12838_v18 = vld [vmem:[#allocation12 + $0x530] ss:$8 sps:$4 sm:$0xff]  }
 0x775   :  { %4271 = vmatpush1.bf16.msra.mxu1 %v12763_v23  ;;  %v12843_v23 = vld [vmem:[#allocation12 + $0x544] ss:$8 sps:$4 sm:$0xff]  }
 0x776   :  { %4272 = vmatprep.subr.bf16.mxu1 %v12768_v24  ;;  %v12841_v24 = vld [vmem:[#allocation12 + $0x540] ss:$8 sps:$4 sm:$0xff]  }
 0x779   :  { %4273 = vmatpush1.bf16.msra.mxu1 %v12766_v43  ;;  %v12844_v43 = vld [vmem:[#allocation12 + $0x550] ss:$8 sps:$4 sm:$0xff]  }
 0x77a   :  { %4274 = vmatprep.subr.bf16.mxu1 %v12771_v51  ;;  %v12849_v51 = vld [vmem:[#allocation12 + $0x564] ss:$8 sps:$4 sm:$0xff]  }
 0x77d   :  { %4275 = vmatpush1.bf16.msra.mxu1 %v12769_v49  ;;  %v12847_v49 = vld [vmem:[#allocation12 + $0x560] ss:$8 sps:$4 sm:$0xff]  }
 0x77e   :  { %4276 = vmatprep.subr.bf16.mxu1 %v12774_v12  ;;  %v12852_v12 = vld [vmem:[#allocation12 + $0x574] ss:$8 sps:$4 sm:$0xff]  }
 0x781   :  { %4277 = vmatpush1.bf16.msra.mxu1 %v12772_v11  ;;  %v12850_v11 = vld [vmem:[#allocation12 + $0x570] ss:$8 sps:$4 sm:$0xff]  }
 0x782   :  { %4278 = vmatprep.subr.bf16.mxu1 %v12777_v27  ;;  %v12855_v27 = vld [vmem:[#allocation12 + $0x584] ss:$8 sps:$4 sm:$0xff]  }
 0x785   :  { %4279 = vmatpush1.bf16.msra.mxu1 %v12775_v10  ;;  %v12853_v10 = vld [vmem:[#allocation12 + $0x580] ss:$8 sps:$4 sm:$0xff]  }
 0x786   :  { %4280 = vmatprep.subr.bf16.mxu1 %v12780_v42  ;;  %v4591_v42 = vpack.c.bf16 %v14844_v1, %v14844_v1  ;;  %v12870_v1 = vld [vmem:[#allocation12 + $0x5d4] ss:$8 sps:$4 sm:$0xff]  }
 0x789   :  { %4281 = vmatpush1.bf16.msra.mxu1 %v12778_v45  ;;  %v12858_v45 = vld [vmem:[#allocation12 + $0x594] ss:$8 sps:$4 sm:$0xff]  }
 0x78a   :  { %4407 = vmatprep.subr.bf16.mxu1 %v12783_v40  ;;  %v12856_v40 = vld [vmem:[#allocation12 + $0x590] ss:$8 sps:$4 sm:$0xff]  }
 0x78c   :  { %4299 = vmatmul.mubr.bf16.vlgmr.msra.gmra.mrb[84].mxu1 %v4168_v30  ;;  %v12859_v30 = vld [vmem:[#allocation12 + $0x5a0] ss:$8 sps:$4 sm:$0xff]  }
 0x78d   :  { %4408 = vmatpush1.bf16.msra.mxu1 %v12781_v48  ;;  %4439 = vmatprep.mubr.bf16.mxu1 %v14255_v5  ;;  %v12861_v48 = vld [vmem:[#allocation12 + $0x5a4] ss:$8 sps:$4 sm:$0xff]  }
 0x78e   :  { %4409 = vmatprep.subr.bf16.mxu1 %v12786_v61  ;;  %v12864_v61 = vld [vmem:[#allocation12 + $0x5b4] ss:$8 sps:$4 sm:$0xff]  }
 0x791   :  { %4410 = vmatpush1.bf16.msra.mxu1 %v12784_v46  ;;  %v12862_v46 = vld [vmem:[#allocation12 + $0x5b0] ss:$8 sps:$4 sm:$0xff]  }
 0x792   :  { %4411 = vmatprep.subr.bf16.mxu1 %v12789_v19  ;;  %v12867_v19 = vld [vmem:[#allocation12 + $0x5c4] ss:$8 sps:$4 sm:$0xff]  }
 0x795   :  { %4412 = vmatpush1.bf16.msra.mxu1 %v12787_v25  ;;  %v12865_v25 = vld [vmem:[#allocation12 + $0x5c0] ss:$8 sps:$4 sm:$0xff]  }
 0x796   :  { %4413 = vmatprep.subr.bf16.mxu1 %v12792_v28  ;;  %v12868_v28 = vld [vmem:[#allocation12 + $0x5d0] ss:$8 sps:$4 sm:$0xff]  }
 0x799   :  { %4414 = vmatpush1.bf16.msra.mxu1 %v12790_v29  ;;  %v12873_v29 = vld [vmem:[#allocation12 + $0x5e4] ss:$8 sps:$4 sm:$0xff]  }
 0x79a   :  { %4415 = vmatprep.subr.bf16.mxu1 %v12795_v21  ;;  %v12871_v21 = vld [vmem:[#allocation12 + $0x5e0] ss:$8 sps:$4 sm:$0xff]  }
 0x79d   :  { %4416 = vmatpush1.bf16.msra.mxu1 %v12793_v31  ;;  %v12876_v31 = vld [vmem:[#allocation12 + $0x5f4] ss:$8 sps:$4 sm:$0xff]  }
 0x79e   :  { %4417 = vmatprep.subr.bf16.mxu1 %v12798_v22  ;;  %v12874_v22 = vld [vmem:[#allocation12 + $0x5f0] ss:$8 sps:$4 sm:$0xff]  }
 0x7a1   :  { %4418 = vmatpush1.bf16.msra.mxu1 %v12796_v13  ;;  %v12879_v13 = vld [vmem:[#allocation12 + $0x604] ss:$8 sps:$4 sm:$0xff]  }
 0x7a2   :  { %4419 = vmatprep.subr.bf16.mxu1 %v12801_v50  ;;  %v12877_v50 = vld [vmem:[#allocation12 + $0x600] ss:$8 sps:$4 sm:$0xff]  }
 0x7a5   :  { %4420 = vmatpush1.bf16.msra.mxu1 %v12799_v34  ;;  %v4732_v34 = vpack.c.bf16 %v14849_v41, %v14849_v41  ;;  %v12894_v41 = vld [vmem:[#allocation12 + $0x654] ss:$8 sps:$4 sm:$0xff]  }
 0x7a6   :  { %4421 = vmatprep.subr.bf16.mxu1 %v12804_v20  ;;  %v12882_v20 = vld [vmem:[#allocation12 + $0x614] ss:$8 sps:$4 sm:$0xff]  }
 0x7a9   :  { %4422 = vmatpush1.bf16.msra.mxu1 %v12802_v35  ;;  %v12880_v35 = vld [vmem:[#allocation12 + $0x610] ss:$8 sps:$4 sm:$0xff]  }
 0x7aa   :  { %4548 = vmatprep.subr.bf16.mxu1 %v12807_v52  ;;  %v12885_v52 = vld [vmem:[#allocation12 + $0x624] ss:$8 sps:$4 sm:$0xff]  }
 0x7ac   :  { %4440 = vmatmul.mubr.bf16.vlgmr.msra.gmra.mrb[84].mxu1 %v4309_v56  ;;  %v12888_v56 = vld [vmem:[#allocation12 + $0x634] ss:$8 sps:$4 sm:$0xff]  }
 0x7ad   :  { %4549 = vmatpush1.bf16.msra.mxu1 %v12805_v55  ;;  %4580 = vmatprep.mubr.bf16.mxu1 %v14255_v5  ;;  %v12883_v55 = vld [vmem:[#allocation12 + $0x620] ss:$8 sps:$4 sm:$0xff]  }
 0x7ae   :  { %4550 = vmatprep.subr.bf16.mxu1 %v12810_v60  ;;  %v12886_v60 = vld [vmem:[#allocation12 + $0x630] ss:$8 sps:$4 sm:$0xff]  }
 0x7b1   :  { %4551 = vmatpush1.bf16.msra.mxu1 %v12808_v0  ;;  %v12891_v0 = vld [vmem:[#allocation12 + $0x644] ss:$8 sps:$4 sm:$0xff]  }
 0x7b2   :  { %4552 = vmatprep.subr.bf16.mxu1 %v12813_v38  ;;  %v12889_v38 = vld [vmem:[#allocation12 + $0x640] ss:$8 sps:$4 sm:$0xff]  }
 0x7b5   :  { %4553 = vmatpush1.bf16.msra.mxu1 %v12811_v16  ;;  %v12892_v16 = vld [vmem:[#allocation12 + $0x650] ss:$8 sps:$4 sm:$0xff]  }
 0x7b6   :  { %4554 = vmatprep.subr.bf16.mxu1 %v12816_v62  ;;  %v12897_v62 = vld [vmem:[#allocation12 + $0x664] ss:$8 sps:$4 sm:$0xff]  }
 0x7b9   :  { %4555 = vmatpush1.bf16.msra.mxu1 %v12814_v63  ;;  %v12895_v63 = vld [vmem:[#allocation12 + $0x660] ss:$8 sps:$4 sm:$0xff]  }
 0x7ba   :  { %4556 = vmatprep.subr.bf16.mxu1 %v12819_v7  ;;  %v12900_v7 = vld [vmem:[#allocation12 + $0x674] ss:$8 sps:$4 sm:$0xff]  }
 0x7bd   :  { %4557 = vmatpush1.bf16.msra.mxu1 %v12817_v53  ;;  %v12898_v53 = vld [vmem:[#allocation12 + $0x670] ss:$8 sps:$4 sm:$0xff]  }
 0x7be   :  { %4558 = vmatprep.subr.bf16.mxu1 %v12822_v39  ;;  %v12903_v39 = vld [vmem:[#allocation12 + $0x684] ss:$8 sps:$4 sm:$0xff]  }
 0x7c1   :  { %4559 = vmatpush1.bf16.msra.mxu1 %v12820_v57  ;;  %v12901_v57 = vld [vmem:[#allocation12 + $0x680] ss:$8 sps:$4 sm:$0xff]  }
 0x7c2   :  { %4560 = vmatprep.subr.bf16.mxu1 %v12825_v2  ;;  %v4873_v2 = vpack.c.bf16 %v14855_v8, %v14855_v8  ;;  %v12918_v8 = vld [vmem:[#allocation12 + $0x6d4] ss:$8 sps:$4 sm:$0xff]  }
 0x7c5   :  { %4561 = vmatpush1.bf16.msra.mxu1 %v12823_v32  ;;  %v12906_v32 = vld [vmem:[#allocation12 + $0x694] ss:$8 sps:$4 sm:$0xff]  }
 0x7c6   :  { %4562 = vmatprep.subr.bf16.mxu1 %v12828_v58  ;;  %v12904_v58 = vld [vmem:[#allocation12 + $0x690] ss:$8 sps:$4 sm:$0xff]  }
 0x7c9   :  { %4563 = vmatpush1.bf16.msra.mxu1 %v12826_v6  ;;  %v12909_v6 = vld [vmem:[#allocation12 + $0x6a4] ss:$8 sps:$4 sm:$0xff]  }
 0x7ca   :  { %4689 = vmatprep.subr.bf16.mxu1 %v12831_v4  ;;  %v12907_v4 = vld [vmem:[#allocation12 + $0x6a0] ss:$8 sps:$4 sm:$0xff]  }
 0x7cc   :  { %4581 = vmatmul.mubr.bf16.vlgmr.msra.gmra.mrb[84].mxu1 %v4450_v15  ;;  %v12910_v15 = vld [vmem:[#allocation12 + $0x6b0] ss:$8 sps:$4 sm:$0xff]  }
 0x7cd   :  { %4690 = vmatpush1.bf16.msra.mxu1 %v12829_v14  ;;  %4721 = vmatprep.mubr.bf16.mxu1 %v14255_v5  ;;  %v12912_v14 = vld [vmem:[#allocation12 + $0x6b4] ss:$8 sps:$4 sm:$0xff]  }
 0x7ce   :  { %4691 = vmatprep.subr.bf16.mxu1 %v12834_v33  ;;  %v12915_v33 = vld [vmem:[#allocation12 + $0x6c4] ss:$8 sps:$4 sm:$0xff]  }
 0x7d1   :  { %4692 = vmatpush1.bf16.msra.mxu1 %v12832_v36  ;;  %v12913_v36 = vld [vmem:[#allocation12 + $0x6c0] ss:$8 sps:$4 sm:$0xff]  }
 0x7d2   :  { %4693 = vmatprep.subr.bf16.mxu1 %v12837_v9  ;;  %v12916_v9 = vld [vmem:[#allocation12 + $0x6d0] ss:$8 sps:$4 sm:$0xff]  }
 0x7d5   :  { %4694 = vmatpush1.bf16.msra.mxu1 %v12835_v26  ;;  %v12921_v26 = vld [vmem:[#allocation12 + $0x6e4] ss:$8 sps:$4 sm:$0xff]  }
 0x7d6   :  { %4695 = vmatprep.subr.bf16.mxu1 %v12840_v44  ;;  %v12919_v44 = vld [vmem:[#allocation12 + $0x6e0] ss:$8 sps:$4 sm:$0xff]  }
 0x7d9   :  { %4696 = vmatpush1.bf16.msra.mxu1 %v12838_v18  ;;  %v12924_v18 = vld [vmem:[#allocation12 + $0x6f4] ss:$8 sps:$4 sm:$0xff]  }
 0x7da   :  { %4697 = vmatprep.subr.bf16.mxu1 %v12843_v23  ;;  %v12922_v23 = vld [vmem:[#allocation12 + $0x6f0] ss:$8 sps:$4 sm:$0xff]  }
 0x7dd   :  { %4698 = vmatpush1.bf16.msra.mxu1 %v12841_v24  ;;  %v12927_v24 = vld [vmem:[#allocation12 + $0x704] ss:$8 sps:$4 sm:$0xff]  }
 0x7de   :  { %4699 = vmatprep.subr.bf16.mxu1 %v12846_v59  ;;  %v12925_v59 = vld [vmem:[#allocation12 + $0x700] ss:$8 sps:$4 sm:$0xff]  }
 0x7e1   :  { %4700 = vmatpush1.bf16.msra.mxu1 %v12844_v43  ;;  %v5014_v43 = vpack.c.bf16 %v14859_v54, %v14859_v54  ;;  %v12942_v54 = vld [vmem:[#allocation12 + $0x754] ss:$8 sps:$4 sm:$0xff]  }
 0x7e2   :  { %4701 = vmatprep.subr.bf16.mxu1 %v12849_v51  ;;  %v12930_v51 = vld [vmem:[#allocation12 + $0x714] ss:$8 sps:$4 sm:$0xff]  }
 0x7e5   :  { %4702 = vmatpush1.bf16.msra.mxu1 %v12847_v49  ;;  %v12928_v49 = vld [vmem:[#allocation12 + $0x710] ss:$8 sps:$4 sm:$0xff]  }
 0x7e6   :  { %4703 = vmatprep.subr.bf16.mxu1 %v12852_v12  ;;  %v12933_v12 = vld [vmem:[#allocation12 + $0x724] ss:$8 sps:$4 sm:$0xff]  }
 0x7e9   :  { %4704 = vmatpush1.bf16.msra.mxu1 %v12850_v11  ;;  %v12931_v11 = vld [vmem:[#allocation12 + $0x720] ss:$8 sps:$4 sm:$0xff]  }
 0x7ea   :  { %4830 = vmatprep.subr.bf16.mxu1 %v12855_v27  ;;  %v12936_v27 = vld [vmem:[#allocation12 + $0x734] ss:$8 sps:$4 sm:$0xff]  }
 0x7ec   :  { %4722 = vmatmul.mubr.bf16.vlgmr.msra.gmra.mrb[84].mxu1 %v4591_v42  ;;  %v12939_v42 = vld [vmem:[#allocation12 + $0x744] ss:$8 sps:$4 sm:$0xff]  }
 0x7ed   :  { %4831 = vmatpush1.bf16.msra.mxu1 %v12853_v10  ;;  %4862 = vmatprep.mubr.bf16.mxu1 %v14255_v5  ;;  %v12934_v10 = vld [vmem:[#allocation12 + $0x730] ss:$8 sps:$4 sm:$0xff]  }
 0x7ee   :  { %4832 = vmatprep.subr.bf16.mxu1 %v12858_v45  ;;  %v12937_v45 = vld [vmem:[#allocation12 + $0x740] ss:$8 sps:$4 sm:$0xff]  }
 0x7f1   :  { %4833 = vmatpush1.bf16.msra.mxu1 %v12856_v40  ;;  %v12940_v40 = vld [vmem:[#allocation12 + $0x750] ss:$8 sps:$4 sm:$0xff]  }
 0x7f2   :  { %4834 = vmatprep.subr.bf16.mxu1 %v12861_v48  ;;  %v12945_v48 = vld [vmem:[#allocation12 + $0x764] ss:$8 sps:$4 sm:$0xff]  }
 0x7f5   :  { %4835 = vmatpush1.bf16.msra.mxu1 %v12859_v30  ;;  %v12943_v30 = vld [vmem:[#allocation12 + $0x760] ss:$8 sps:$4 sm:$0xff]  }
 0x7f6   :  { %4836 = vmatprep.subr.bf16.mxu1 %v12864_v61  ;;  %v12948_v61 = vld [vmem:[#allocation12 + $0x774] ss:$8 sps:$4 sm:$0xff]  }
 0x7f9   :  { %4837 = vmatpush1.bf16.msra.mxu1 %v12862_v46  ;;  %v12946_v46 = vld [vmem:[#allocation12 + $0x770] ss:$8 sps:$4 sm:$0xff]  }
 0x7fa   :  { %4838 = vmatprep.subr.bf16.mxu1 %v12867_v19  ;;  %v12951_v19 = vld [vmem:[#allocation12 + $0x784] ss:$8 sps:$4 sm:$0xff]  }
 0x7fd   :  { %4839 = vmatpush1.bf16.msra.mxu1 %v12865_v25  ;;  %v12949_v25 = vld [vmem:[#allocation12 + $0x780] ss:$8 sps:$4 sm:$0xff]  }
 0x7fe   :  { %4840 = vmatprep.subr.bf16.mxu1 %v12870_v1  ;;  %v5155_v1 = vpack.c.bf16 %v14853_v3, %v14853_v3  ;;  %v12966_v3 = vld [vmem:[#allocation12 + $0x7d4] ss:$8 sps:$4 sm:$0xff]  }
 0x801   :  { %4841 = vmatpush1.bf16.msra.mxu1 %v12868_v28  ;;  %v12954_v28 = vld [vmem:[#allocation12 + $0x794] ss:$8 sps:$4 sm:$0xff]  }
 0x802   :  { %4842 = vmatprep.subr.bf16.mxu1 %v12873_v29  ;;  %v12952_v29 = vld [vmem:[#allocation12 + $0x790] ss:$8 sps:$4 sm:$0xff]  }
 0x805   :  { %4843 = vmatpush1.bf16.msra.mxu1 %v12871_v21  ;;  %v12957_v21 = vld [vmem:[#allocation12 + $0x7a4] ss:$8 sps:$4 sm:$0xff]  }
 0x806   :  { %4844 = vmatprep.subr.bf16.mxu1 %v12876_v31  ;;  %v12955_v31 = vld [vmem:[#allocation12 + $0x7a0] ss:$8 sps:$4 sm:$0xff]  }
 0x809   :  { %4845 = vmatpush1.bf16.msra.mxu1 %v12874_v22  ;;  %v12960_v22 = vld [vmem:[#allocation12 + $0x7b4] ss:$8 sps:$4 sm:$0xff]  }
 0x80a   :  { %4971 = vmatprep.subr.bf16.mxu1 %v12879_v13  ;;  %v12958_v13 = vld [vmem:[#allocation12 + $0x7b0] ss:$8 sps:$4 sm:$0xff]  }
 0x80c   :  { %4863 = vmatmul.mubr.bf16.vlgmr.msra.gmra.mrb[84].mxu1 %v4732_v34  ;;  %v12961_v34 = vld [vmem:[#allocation12 + $0x7c0] ss:$8 sps:$4 sm:$0xff]  }
 0x80d   :  { %4972 = vmatpush1.bf16.msra.mxu1 %v12877_v50  ;;  %5003 = vmatprep.mubr.bf16.mxu1 %v14255_v5  ;;  %v12963_v50 = vld [vmem:[#allocation12 + $0x7c4] ss:$8 sps:$4 sm:$0xff]  }
 0x80e   :  { %4973 = vmatprep.subr.bf16.mxu1 %v12882_v20  ;;  %v12964_v20 = vld [vmem:[#allocation12 + $0x7d0] ss:$8 sps:$4 sm:$0xff]  }
 0x811   :  { %4974 = vmatpush1.bf16.msra.mxu1 %v12880_v35  ;;  %v12969_v35 = vld [vmem:[#allocation12 + $0x7e4] ss:$8 sps:$4 sm:$0xff]  }
 0x812   :  { %4975 = vmatprep.subr.bf16.mxu1 %v12885_v52  ;;  %v12967_v52 = vld [vmem:[#allocation12 + $0x7e0] ss:$8 sps:$4 sm:$0xff]  }
 0x815   :  { %4976 = vmatpush1.bf16.msra.mxu1 %v12883_v55  ;;  %v12972_v55 = vld [vmem:[#allocation12 + $0x7f4] ss:$8 sps:$4 sm:$0xff]  }
 0x816   :  { %4977 = vmatprep.subr.bf16.mxu1 %v12888_v56  ;;  %v12970_v56 = vld [vmem:[#allocation12 + $0x7f0] ss:$8 sps:$4 sm:$0xff]  }
 0x819   :  { %4978 = vmatpush1.bf16.msra.mxu1 %v12886_v60  ;;  %v5296_v60 = vpack.c.bf16 %v14857_v17, %v14857_v17  ;;  %v13002_v17 = vld [vmem:[#allocation18 + $0x2a4] ss:$16 sps:$4 sm:$0xff]  }
 0x81a   :  { %4979 = vmatprep.subr.bf16.mxu1 %v12891_v0  ;;  %v12976_v0 = vld [vmem:[#allocation18 + $0x200] ss:$16 sps:$4 sm:$0xff]  }
 0x81d   :  { %4980 = vmatpush1.bf16.msra.mxu1 %v12889_v38  ;;  %v12978_v38 = vld [vmem:[#allocation18 + $0x204] ss:$16 sps:$4 sm:$0xff]  }
 0x81e   :  { %4981 = vmatprep.subr.bf16.mxu1 %v12894_v41  ;;  %v12981_v41 = vld [vmem:[#allocation18 + $0x224] ss:$16 sps:$4 sm:$0xff]  }
 0x821   :  { %4982 = vmatpush1.bf16.msra.mxu1 %v12892_v16  ;;  %v12979_v16 = vld [vmem:[#allocation18 + $0x220] ss:$16 sps:$4 sm:$0xff]  }
 0x822   :  { %4983 = vmatprep.subr.bf16.mxu1 %v12897_v62  ;;  %v12984_v62 = vld [vmem:[#allocation18 + $0x244] ss:$16 sps:$4 sm:$0xff]  }
 0x825   :  { %4984 = vmatpush1.bf16.msra.mxu1 %v12895_v63  ;;  %v12982_v63 = vld [vmem:[#allocation18 + $0x240] ss:$16 sps:$4 sm:$0xff]  }
 0x826   :  { %4985 = vmatprep.subr.bf16.mxu1 %v12900_v7  ;;  %v12990_v7 = vld [vmem:[#allocation18 + $0x264] ss:$16 sps:$4 sm:$0xff]  }
 0x829   :  { %4986 = vmatpush1.bf16.msra.mxu1 %v12898_v53  ;;  %v12988_v53 = vld [vmem:[#allocation18 + $0x260] ss:$16 sps:$4 sm:$0xff]  }
 0x82a   :  { %5112 = vmatprep.subr.bf16.mxu1 %v12903_v39  ;;  %v12996_v39 = vld [vmem:[#allocation18 + $0x284] ss:$16 sps:$4 sm:$0xff]  }
 0x82c   :  { %5004 = vmatmul.mubr.bf16.vlgmr.msra.gmra.mrb[84].mxu1 %v4873_v2  ;;  %v13000_v2 = vld [vmem:[#allocation18 + $0x2a0] ss:$16 sps:$4 sm:$0xff]  }
 0x82d   :  { %5113 = vmatpush1.bf16.msra.mxu1 %v12901_v57  ;;  %5144 = vmatprep.mubr.bf16.mxu1 %v14255_v5  ;;  %v12994_v57 = vld [vmem:[#allocation18 + $0x280] ss:$16 sps:$4 sm:$0xff]  }
 0x82e   :  { %5114 = vmatprep.subr.bf16.mxu1 %v12906_v32  ;;  %v13008_v32 = vld [vmem:[#allocation18 + $0x2c4] ss:$16 sps:$4 sm:$0xff]  }
 0x831   :  { %5115 = vmatpush1.bf16.msra.mxu1 %v12904_v58  ;;  %v13006_v58 = vld [vmem:[#allocation18 + $0x2c0] ss:$16 sps:$4 sm:$0xff]  }
 0x832   :  { %5116 = vmatprep.subr.bf16.mxu1 %v12909_v6  ;;  %v13014_v6 = vld [vmem:[#allocation18 + $0x2e4] ss:$16 sps:$4 sm:$0xff]  }
 0x835   :  { %5117 = vmatpush1.bf16.msra.mxu1 %v12907_v4  ;;  %v13012_v4 = vld [vmem:[#allocation18 + $0x2e0] ss:$16 sps:$4 sm:$0xff]  }
 0x836   :  { %5118 = vmatprep.subr.bf16.mxu1 %v12912_v14  ;;  %v13020_v14 = vld [vmem:[#allocation18 + $0x304] ss:$16 sps:$4 sm:$0xff]  }
 0x839   :  { %5119 = vmatpush1.bf16.msra.mxu1 %v12910_v15  ;;  %v13018_v15 = vld [vmem:[#allocation18 + $0x300] ss:$16 sps:$4 sm:$0xff]  }
 0x83a   :  { %5120 = vmatprep.subr.bf16.mxu1 %v12915_v33  ;;  %v13026_v33 = vld [vmem:[#allocation18 + $0x324] ss:$16 sps:$4 sm:$0xff]  }
 0x83d   :  { %5121 = vmatpush1.bf16.msra.mxu1 %v12913_v36  ;;  %v13024_v36 = vld [vmem:[#allocation18 + $0x320] ss:$16 sps:$4 sm:$0xff]  }
 0x83e   :  { %5122 = vmatprep.subr.bf16.mxu1 %v12918_v8  ;;  %v13032_v8 = vld [vmem:[#allocation18 + $0x344] ss:$16 sps:$4 sm:$0xff]  }
 0x841   :  { %5123 = vmatpush1.bf16.msra.mxu1 %v12916_v9  ;;  %v13030_v9 = vld [vmem:[#allocation18 + $0x340] ss:$16 sps:$4 sm:$0xff]  }
 0x842   :  { %5124 = vmatprep.subr.bf16.mxu1 %v12921_v26  ;;  %v13038_v26 = vld [vmem:[#allocation18 + $0x364] ss:$16 sps:$4 sm:$0xff]  }
 0x845   :  { %5125 = vmatpush1.bf16.msra.mxu1 %v12919_v44 }
 0x846   :  { %5126 = vmatprep.subr.bf16.mxu1 %v12924_v18 }
 0x849   :  { %5127 = vmatpush1.bf16.msra.mxu1 %v12922_v23 }
 0x84a   :  { %5253 = vmatprep.subr.bf16.mxu1 %v12927_v24  ;;  %v13036_v24 = vld [vmem:[#allocation18 + $0x360] ss:$16 sps:$4 sm:$0xff]  }
 0x84c   :  { %5145 = vmatmul.mubr.bf16.vlgmr.msra.gmra.mrb[84].mxu1 %v5014_v43 }
 0x84d   :  { %5254 = vmatpush1.bf16.msra.mxu1 %v12925_v59  ;;  %5285 = vmatprep.mubr.bf16.mxu1 %v14255_v5 }
 0x84e   :  { %5255 = vmatprep.subr.bf16.mxu1 %v12930_v51  ;;  %v13044_v51 = vld [vmem:[#allocation18 + $0x384] ss:$16 sps:$4 sm:$0xff]  }
 0x851   :  { %5256 = vmatpush1.bf16.msra.mxu1 %v12928_v49 }
 0x852   :  { %5257 = vmatprep.subr.bf16.mxu1 %v12933_v12 }
 0x855   :  { %5258 = vmatpush1.bf16.msra.mxu1 %v12931_v11 }
 0x856   :  { %5259 = vmatprep.subr.bf16.mxu1 %v12936_v27 }
 0x859   :  { %5260 = vmatpush1.bf16.msra.mxu1 %v12934_v10  ;;  %v13042_v10 = vld [vmem:[#allocation18 + $0x380] ss:$16 sps:$4 sm:$0xff]  }
 0x85a   :  { %5261 = vmatprep.subr.bf16.mxu1 %v12939_v42 }
 0x85d   :  { %5262 = vmatpush1.bf16.msra.mxu1 %v12937_v45  ;;  %v13050_v45 = vld [vmem:[#allocation18 + $0x3a4] ss:$16 sps:$4 sm:$0xff]  }
 0x85e   :  { %5263 = vmatprep.subr.bf16.mxu1 %v12942_v54 }
 0x861   :  { %5264 = vmatpush1.bf16.msra.mxu1 %v12940_v40 }
 0x862   :  { %5265 = vmatprep.subr.bf16.mxu1 %v12945_v48 }
 0x865   :  { %5266 = vmatpush1.bf16.msra.mxu1 %v12943_v30  ;;  %v13048_v30 = vld [vmem:[#allocation18 + $0x3a0] ss:$16 sps:$4 sm:$0xff]  }
 0x866   :  { %5267 = vmatprep.subr.bf16.mxu1 %v12948_v61 }
 0x869   :  { %5268 = vmatpush1.bf16.msra.mxu1 %v12946_v46  ;;  %v13056_v46 = vld [vmem:[#allocation18 + $0x3c4] ss:$16 sps:$4 sm:$0xff]  }
 0x86a   :  { %5394 = vmatprep.subr.bf16.mxu1 %v12951_v19 }
 0x86c   :  { %5286 = vmatmul.mubr.bf16.vlgmr.msra.gmra.mrb[84].mxu1 %v5155_v1 }
 0x86d   :  { %5395 = vmatpush1.bf16.msra.mxu1 %v12949_v25  ;;  %5426 = vmatprep.mubr.bf16.mxu1 %v14255_v5 }
 0x86e   :  { %5396 = vmatprep.subr.bf16.mxu1 %v12954_v28  ;;  %v13054_v28 = vld [vmem:[#allocation18 + $0x3c0] ss:$16 sps:$4 sm:$0xff]  }
 0x871   :  { %5397 = vmatpush1.bf16.msra.mxu1 %v12952_v29 }
 0x872   :  { %5398 = vmatprep.subr.bf16.mxu1 %v12957_v21 }
 0x875   :  { %5399 = vmatpush1.bf16.msra.mxu1 %v12955_v31 }
 0x876   :  { %5400 = vmatprep.subr.bf16.mxu1 %v12960_v22 }
 0x879   :  { %5401 = vmatpush1.bf16.msra.mxu1 %v12958_v13 }
 0x87a   :  { %5402 = vmatprep.subr.bf16.mxu1 %v12963_v50 }
 0x87d   :  { %5403 = vmatpush1.bf16.msra.mxu1 %v12961_v34 }
 0x87e   :  { %5404 = vmatprep.subr.bf16.mxu1 %v12966_v3 }
 0x881   :  { %5405 = vmatpush1.bf16.msra.mxu1 %v12964_v20 }
 0x882   :  { %5406 = vmatprep.subr.bf16.mxu1 %v12969_v35 }
 0x885   :  { %5407 = vmatpush1.bf16.msra.mxu1 %v12967_v52 }
 0x886   :  { %5408 = vmatprep.subr.bf16.mxu1 %v12972_v55 }
 0x889   :  { %5409 = vmatpush1.bf16.msra.mxu1 %v12970_v56 }
 0x88a   :  { %6117 = vmatprep.subr.bf16.mxu1 %v12978_v38 }
 0x88c   :  { %5427 = vmatmul.mubr.bf16.vlgmr.msra.gmra.mrb[84].mxu1 %v5296_v60 }
 0x88d   :  { %6118 = vmatpush1.bf16.msra.mxu1 %v12976_v0 }
 0x88e   :  { %6119 = vmatprep.subr.bf16.mxu1 %v12981_v41 }
 0x891   :  { %6120 = vmatpush1.bf16.msra.mxu1 %v12979_v16 }
 0x892   :  { %6121 = vmatprep.subr.bf16.mxu1 %v12984_v62 }
 0x895   :  { %6122 = vmatpush1.bf16.msra.mxu1 %v12982_v63 }
 0x896   :  { %6123 = vmatprep.subr.bf16.mxu1 %v12990_v7 }
 0x899   :  { %6124 = vmatpush1.bf16.msra.mxu1 %v12988_v53  ;;  %v14256_v53 = vmov 1966171168  }
 0x89a   :  { %6125 = vmatprep.subr.bf16.mxu1 %v12996_v39  ;;  %v5479_v39 = vunpack.c.l.s4 %v14256_v53  ;;  %v13073_v53 = vld [vmem:[#allocation16 + $0x20] ss:$0 sps:$4 sm:$0xff]  }
 0x89d   :  { %6126 = vmatpush1.bf16.msra.mxu1 %v12994_v57  ;;  %v5480_v57 = vunpack.c.0.s8 %v5479_v39  ;;  %v13069_v39 = vld [vmem:[#allocation18 + $0x20c] ss:$16 sps:$4 sm:$0xff]  }
 0x89e   :  { %6127 = vmatprep.subr.bf16.mxu1 %v13002_v17 }
 0x8a1   :  { %6128 = vmatpush1.bf16.msra.mxu1 %v13000_v2  ;;  %v14900_v2 = vsub.s32 %v5480_v57, %v14813_v37  ;;  %v13072_v57 = vld [vmem:[#allocation18 + $0x7cc] ss:$16 sps:$4 sm:$0xff]  }
 0x8a2   :  { %6129 = vmatprep.subr.bf16.mxu1 %v13008_v32 }
 0x8a5   :  { %6130 = vmatpush1.bf16.msra.mxu1 %v13006_v58 }
 0x8a6   :  { %6131 = vmatprep.subr.bf16.mxu1 %v13014_v6 }
 0x8a9   :  { %6132 = vmatpush1.bf16.msra.mxu1 %v13012_v4  ;;  %v5437_v4 = vld [vmem:[#allocation13] sm:$0x3] }
 0x8aa   :  { %6133 = vmatprep.subr.bf16.mxu1 %v13020_v14 }
 0x8ad   :  { %6134 = vmatpush1.bf16.msra.mxu1 %v13018_v15  ;;  %v14905_v15 = vsub.s32 1, %v14813_v37 }
 0x8ae   :  { %6135 = vmatprep.subr.bf16.mxu1 %v13026_v33  ;;  %v5438_v33 = vld [vmem:[#allocation15] sm:$0x3] }
 0x8b1   :  { %6136 = vmatpush1.bf16.msra.mxu1 %v13024_v36 }
 0x8b2   :  { %6137 = vmatprep.subr.bf16.mxu1 %v13032_v8 }
 0x8b5   :  { %6138 = vmatpush1.bf16.msra.mxu1 %v13030_v9 }
 0x8b6   :  { %6139 = vmatprep.subr.bf16.mxu1 %v13038_v26  ;;  %v5511_v26 = vrot.slane %v5438_v33, %v14816_v47 }
 0x8b9   :  { %6140 = vmatpush1.bf16.msra.mxu1 %v13036_v24 }
 0x8ba   :  { %6141 = vmatprep.subr.bf16.mxu1 %v13044_v51 }
 0x8bd   :  { %6142 = vmatpush1.bf16.msra.mxu1 %v13042_v10  ;;  %v12987_v10 = vld [vmem:[#allocation18 + $0x60c] ss:$16 sps:$4 sm:$0xff]  }
 0x8be   :  { %6143 = vmatprep.subr.bf16.mxu1 %v13050_v45  ;;  %v12973_v45 = vld [vmem:[#allocation16] sm:$0xff]  }
 0x8c1   :  { %6144 = vmatpush1.bf16.msra.mxu1 %v13048_v30  ;;  %v12999_v30 = vld [vmem:[#allocation18 + $0x64c] ss:$16 sps:$4 sm:$0xff]  }
 0x8c2   :  { %6145 = vmatprep.subr.bf16.mxu1 %v13056_v46  ;;  %v12997_v46 = vld [vmem:[#allocation18 + $0x648] ss:$16 sps:$4 sm:$0xff]  }
 0x8c5   :  { %6146 = vmatpush1.bf16.msra.mxu1 %v13054_v28  ;;  %v12975_v28 = vld [vmem:[#allocation16 + $0x10] sm:$0xff]  }
 0x95f   :  { %v5428_v44 = vpop.f32.mrb[84].mxu1 }
 0x960   :  { %v5439_v18 = vrot.slane %v5428_v44, 4  ;;  %v5430_v23 = vpop.f32.mrb[85].mxu1 }
 0x961   :  { %v5445_v59 = vrot.slane %v5430_v23, 4  ;;  %v5432_v43 = vpop.f32.mrb[86].mxu1 }
 0x962   :  { %v5440_v49 = vadd.f32 %v5439_v18, %v5428_v44  ;;  %v5433_v12 = vpop.f32.mrb[87].mxu1 }
 0x963   :  { %v5446_v11 = vadd.f32 %v5445_v59, %v5430_v23 }
 0x964   :  { %v5441_v27 = vrot.slane %v5440_v49, 2 }
 0x965   :  { %v5447_v42 = vrot.slane %v5446_v11, 2 }
 0x966   :  { %v5442_v54 = vadd.f32 %v5441_v27, %v5440_v49 }
 0x967   :  { %v5448_v40 = vadd.f32 %v5447_v42, %v5446_v11 }
 0x968   :  { %v5443_v48 = vrot.slane %v5442_v54, 1 }
 0x969   :  { %v5449_v61 = vrot.slane %v5448_v40, 1 }
 0x96a   :  { %v5444_v19 = vadd.f32 %v5443_v48, %v5442_v54  ;;  %v12985_v54 = vld [vmem:[#allocation18 + $0x608] ss:$16 sps:$4 sm:$0xff]  }
 0x96b   :  { %v5450_v25 = vadd.f32 %v5449_v61, %v5448_v40  ;;  %v12993_v40 = vld [vmem:[#allocation18 + $0x62c] ss:$16 sps:$4 sm:$0xff]   ;;  %v12991_v48 = vld [vmem:[#allocation18 + $0x628] ss:$16 sps:$4 sm:$0xff]  }
 0x96c   :  { %v5451_v1 = vmul.f32 0.125, %v5444_v19  ;;  %v12974_v61 = vld [vmem:[#allocation16 + $0x8] sm:$0xff]   ;;  %v13005_v19 = vld [vmem:[#allocation18 + $0x66c] ss:$16 sps:$4 sm:$0xff]  }
 0x96d   :  { %v5452_v29 = vmul.f32 0.125, %v5450_v25  ;;  %v13003_v25 = vld [vmem:[#allocation18 + $0x668] ss:$16 sps:$4 sm:$0xff]  }
 0x96e   :  { %v5453_v21 = vsub.f32 %v5428_v44, %v5451_v1  ;;  %v5515_v44 = vrot.slane %v5438_v33, %v14905_v15  ;;  %v13011_v1 = vld [vmem:[#allocation18 + $0x68c] ss:$16 sps:$4 sm:$0xff]  }
 0x96f   :  { %v5454_v31 = vsub.f32 %v5430_v23, %v5452_v29  ;;  %v13009_v29 = vld [vmem:[#allocation18 + $0x688] ss:$16 sps:$4 sm:$0xff]  }
 0x970   :  { %v5455_v22 = vmul.f32 %v5453_v21, %v5453_v21 }
 0x971   :  { %v5456_v13 = vmul.f32 %v5454_v31, %v5454_v31 }
 0x972   :  { %v5457_v50 = vrot.slane %v5455_v22, 4 }
 0x973   :  { %v5463_v34 = vrot.slane %v5456_v13, 4 }
 0x974   :  { %v5458_v3 = vadd.f32 %v5457_v50, %v5455_v22  ;;  %v13023_v22 = vld [vmem:[#allocation18 + $0x6cc] ss:$16 sps:$4 sm:$0xff]   ;;  %v13021_v50 = vld [vmem:[#allocation18 + $0x6c8] ss:$16 sps:$4 sm:$0xff]  }
 0x975   :  { %v5464_v20 = vadd.f32 %v5463_v34, %v5456_v13  ;;  %v13060_v13 = vld [vmem:[#allocation16 + $0x18] sm:$0xff]   ;;  %v13029_v34 = vld [vmem:[#allocation18 + $0x6ec] ss:$16 sps:$4 sm:$0xff]  }
 0x976   :  { %v5459_v35 = vrot.slane %v5458_v3, 2 }
 0x977   :  { %v5465_v52 = vrot.slane %v5464_v20, 2 }
 0x978   :  { %v5460_v55 = vadd.f32 %v5459_v35, %v5458_v3  ;;  %v13027_v3 = vld [vmem:[#allocation18 + $0x6e8] ss:$16 sps:$4 sm:$0xff]  }
 0x979   :  { %v5466_v56 = vadd.f32 %v5465_v52, %v5464_v20  ;;  %v13035_v20 = vld [vmem:[#allocation18 + $0x70c] ss:$16 sps:$4 sm:$0xff]   ;;  %v13033_v35 = vld [vmem:[#allocation18 + $0x708] ss:$16 sps:$4 sm:$0xff]  }
 0x97a   :  { %v5461_v60 = vrot.slane %v5460_v55, 1  ;;  %v13041_v52 = vld [vmem:[#allocation18 + $0x72c] ss:$16 sps:$4 sm:$0xff]  }
 0x97b   :  { %v5467_v0 = vrot.slane %v5466_v56, 1 }
 0x97c   :  { %v5462_v38 = vadd.f32 %v5461_v60, %v5460_v55  ;;  %v13039_v55 = vld [vmem:[#allocation18 + $0x728] ss:$16 sps:$4 sm:$0xff]  }
 0x97d   :  { %v5468_v41 = vadd.f32 %v5467_v0, %v5466_v56  ;;  %v13047_v56 = vld [vmem:[#allocation18 + $0x74c] ss:$16 sps:$4 sm:$0xff]   ;;  %v13045_v60 = vld [vmem:[#allocation18 + $0x748] ss:$16 sps:$4 sm:$0xff]  }
 0x97e   :  { %v5469_v16 = vmul.f32 0.125, %v5462_v38  ;;  %v13053_v0 = vld [vmem:[#allocation18 + $0x76c] ss:$16 sps:$4 sm:$0xff]   ;;  %v13051_v38 = vld [vmem:[#allocation18 + $0x768] ss:$16 sps:$4 sm:$0xff]  }
 0x97f   :  { %v5470_v62 = vmul.f32 0.125, %v5468_v41  ;;  %v13059_v41 = vld [vmem:[#allocation18 + $0x78c] ss:$16 sps:$4 sm:$0xff]  }
 0x980   :  { %v5471_v63 = vadd.f32 1e-05, %v5469_v16  ;;  %v13063_v16 = vld [vmem:[#allocation18 + $0x3e4] ss:$16 sps:$4 sm:$0xff]  }
 0x981   :  { %v5472_v7 = vadd.f32 1e-05, %v5470_v62  ;;  %v13066_v62 = vld [vmem:[#allocation18 + $0x7ac] ss:$16 sps:$4 sm:$0xff]   ;;  %6147 = vmatprep.subr.bf16.mxu1 %v13063_v16  ;;  %v13122_v16 = vld [vmem:[#allocation18 + $0x328] ss:$16 sps:$4 sm:$0xff]  }
 0x982   :  { %13876 = vrsqrt.f32 %v5471_v63  ;;  %v13061_v63 = vld [vmem:[#allocation18 + $0x3e0] ss:$16 sps:$4 sm:$0xff]  }
 0x983   :  { %13878 = vrsqrt.f32 %v5472_v7  ;;  %v13064_v7 = vld [vmem:[#allocation18 + $0x7a8] ss:$16 sps:$4 sm:$0xff]   ;;  %6148 = vmatpush1.bf16.msra.mxu1 %v13061_v63  ;;  %v13130_v63 = vld [vmem:[#allocation18 + $0x34c] ss:$16 sps:$4 sm:$0xff]  }
 0x984   :  { %6158 = vmatprep.subr.bf16.mxu1 %v13069_v39  ;;  %v13131_v39 = vld [vmem:[#allocation18 + $0x900] ss:$16 sps:$4 sm:$0xff]  }
 0x98c   :  { %v13877_v17 = vpop.eup %13876 }
 0x98d   :  { %v13879_v32 = vpop.eup %13878 }
 0x98e   :  { %v5477_v58 = vcombine.low %v13877_v17, %v13879_v32  ;;  %v13070_v17 = vld [vmem:[#allocation18 + $0x7c8] ss:$16 sps:$4 sm:$0xff]   ;;  %v13079_v32 = vld [vmem:[#allocation18 + $0x7ec] ss:$16 sps:$4 sm:$0xff]  }
 0x990   :  { %v5484_v6 = vrot.slane %v5477_v58, %v14900_v2  ;;  %v13077_v58 = vld [vmem:[#allocation18 + $0x7e8] ss:$16 sps:$4 sm:$0xff]  }
 0x992   :  { %v5491_v14 = vrot.slane %v5484_v6, %v14900_v2  ;;  %v13085_v6 = vld [vmem:[#allocation18 + $0x804] ss:$16 sps:$4 sm:$0xff]  }
 0x994   :  { %v5493_v36 = vmul.f32 %v5491_v14, %v5437_v4 }
 0x996   :  { %v5498_v8 = vrot.slane %v5493_v36, %v14816_v47  ;;  %v5502_v9 = vrot.slane %v5493_v36, %v14905_v15 }
 0x998   :  { %v5506_v18 = vmul.f32 %v5502_v9, %v5454_v31  ;;  %v5505_v23 = vmul.f32 %v5498_v8, %v5453_v21  ;;  %v13017_v21 = vld [vmem:[#allocation18 + $0x6ac] ss:$16 sps:$4 sm:$0xff]   ;;  %v13015_v31 = vld [vmem:[#allocation18 + $0x6a8] ss:$16 sps:$4 sm:$0xff]  }
 0x999   :  { %v13067_v9 = vld [vmem:[#allocation18 + $0x208] ss:$16 sps:$4 sm:$0xff]  }
 0x99a   :  { %v5519_v24 = vadd.f32 %v5515_v44, %v5506_v18  ;;  %v5518_v59 = vadd.f32 %v5511_v26, %v5505_v23  ;;  %v13076_v44 = vld [vmem:[#allocation18 + $0x22c] ss:$16 sps:$4 sm:$0xff]   ;;  %v13074_v23 = vld [vmem:[#allocation18 + $0x228] ss:$16 sps:$4 sm:$0xff]  }
 0x99c   :  { %v5523_v43 = vmul.f32 0.2, %v5519_v24  ;;  %vm5521_vm6 = vcmp.ge.f32.partialorder %v5519_v24, 0.0  ;;  %vm5520_vm7 = vcmp.ge.f32.partialorder %v5518_v59, 0.0  ;;  %v5522_v51 = vmul.f32 0.2, %v5518_v59 }
 0x99e   :  { %v5525_v49 = vsel %vm5521_vm6, %v5519_v24, %v5523_v43  ;;  %v5524_v12 = vsel %vm5520_vm7, %v5518_v59, %v5522_v51  ;;  %v13082_v59 = vld [vmem:[#allocation18 + $0x24c] ss:$16 sps:$4 sm:$0xff]  }
 0x99f   :  { %v5527_v11 = vpack.c.bf16 %v5525_v49, %v5525_v49  ;;  %v5526_v27 = vpack.c.bf16 %v5524_v12, %v5524_v12  ;;  %v13080_v12 = vld [vmem:[#allocation18 + $0x248] ss:$16 sps:$4 sm:$0xff]  }
 0x9a1   :  { %10893 = vmatprep.subr.msk.bf16.mxu0 %vm5576_vm8, %v5527_v11  ;;  %v5578_v42 = vsel %vm5576_vm8, %v5526_v27, 0  ;;  %v13083_v11 = vld [vmem:[#allocation18 + $0x800] ss:$16 sps:$4 sm:$0xff]  }
 0x9a2   :  { %5584 = vmatpush1.bf16.msra.mxu0 %v5578_v42  ;;  %v13091_v42 = vld [vmem:[#allocation18 + $0x824] ss:$16 sps:$4 sm:$0xff]  }
 0x9a3   :  { %7502 = vmatprep.subr.bf16.mxu0 %v12987_v10  ;;  %v13088_v10 = vld [vmem:[#allocation18 + $0x26c] ss:$16 sps:$4 sm:$0xff]  }
 0x9a5   :  { %10894 = vmatmul.mubr.msk.bf16.vlgmr.msra.gmra.mrb[20].mxu0 %vm5560_vm9, %v12973_v45  ;;  %v13086_v45 = vld [vmem:[#allocation18 + $0x268] ss:$16 sps:$4 sm:$0xff]  }
 0x9a6   :  { %5625 = vmatprep.mubr.bf16.mxu0 %v14255_v5  ;;  %7503 = vmatpush1.bf16.msra.mxu0 %v12985_v54  ;;  %v13089_v54 = vld [vmem:[#allocation18 + $0x820] ss:$16 sps:$4 sm:$0xff]  }
 0x9a7   :  { %7504 = vmatprep.subr.bf16.mxu0 %v12993_v40 }
 0x9aa   :  { %7505 = vmatpush1.bf16.msra.mxu0 %v12991_v48  ;;  %v13094_v48 = vld [vmem:[#allocation18 + $0x28c] ss:$16 sps:$4 sm:$0xff]  }
 0x9ab   :  { %7506 = vmatprep.subr.bf16.mxu0 %v12999_v30  ;;  %v13097_v30 = vld [vmem:[#allocation18 + $0x844] ss:$16 sps:$4 sm:$0xff]  }
 0x9ad   :  { %10895 = vmatmul.mubr.msk.bf16.gmra.mrb[24].mxu0 %vm5560_vm9, %v12974_v61 }
 0x9ae   :  { %5635 = vmatprep.mubr.bf16.mxu0 %v14255_v5  ;;  %7507 = vmatpush1.bf16.msra.mxu0 %v12997_v46 }
 0x9af   :  { %7508 = vmatprep.subr.bf16.mxu0 %v13005_v19 }
 0x9b2   :  { %7509 = vmatpush1.bf16.msra.mxu0 %v13003_v25 }
 0x9b3   :  { %7510 = vmatprep.subr.bf16.mxu0 %v13011_v1  ;;  %v13092_v1 = vld [vmem:[#allocation18 + $0x288] ss:$16 sps:$4 sm:$0xff]  }
 0x9b5   :  { %10896 = vmatmul.mubr.msk.bf16.gmra.mrb[28].mxu0 %vm5560_vm9, %v12975_v28  ;;  %v13095_v28 = vld [vmem:[#allocation18 + $0x840] ss:$16 sps:$4 sm:$0xff]  }
 0x9b6   :  { %7511 = vmatpush1.bf16.msra.mxu0 %v13009_v29  ;;  %5645 = vmatprep.mubr.bf16.mxu0 %v14255_v5  ;;  %v13100_v29 = vld [vmem:[#allocation18 + $0x2ac] ss:$16 sps:$4 sm:$0xff]  }
 0x9b7   :  { %7512 = vmatprep.subr.bf16.mxu0 %v13017_v21  ;;  %v13103_v21 = vld [vmem:[#allocation18 + $0x864] ss:$16 sps:$4 sm:$0xff]  }
 0x9ba   :  { %7513 = vmatpush1.bf16.msra.mxu0 %v13015_v31  ;;  %v13098_v31 = vld [vmem:[#allocation18 + $0x2a8] ss:$16 sps:$4 sm:$0xff]  }
 0x9bb   :  { %7514 = vmatprep.subr.bf16.mxu0 %v13023_v22  ;;  %v13101_v22 = vld [vmem:[#allocation18 + $0x860] ss:$16 sps:$4 sm:$0xff]  }
 0x9bd   :  { %10897 = vmatmul.mubr.msk.bf16.gmra.mrb[32].mxu0 %vm5560_vm9, %v13060_v13  ;;  %v13106_v13 = vld [vmem:[#allocation18 + $0x2cc] ss:$16 sps:$4 sm:$0xff]  }
 0x9be   :  { %7515 = vmatpush1.bf16.msra.mxu0 %v13021_v50  ;;  %5655 = vmatprep.mubr.bf16.mxu0 %v14255_v5  ;;  %v13057_v5 = vld [vmem:[#allocation18 + $0x788] ss:$16 sps:$4 sm:$0xff]   ;;  %v13109_v50 = vld [vmem:[#allocation18 + $0x884] ss:$16 sps:$4 sm:$0xff]  }
 0x9bf   :  { %7516 = vmatprep.subr.bf16.mxu0 %v13029_v34  ;;  %v13104_v34 = vld [vmem:[#allocation18 + $0x2c8] ss:$16 sps:$4 sm:$0xff]  }
 0x9c2   :  { %7517 = vmatpush1.bf16.msra.mxu0 %v13027_v3  ;;  %v13107_v3 = vld [vmem:[#allocation18 + $0x880] ss:$16 sps:$4 sm:$0xff]  }
 0x9c3   :  { %7518 = vmatprep.subr.bf16.mxu0 %v13035_v20  ;;  %v13112_v20 = vld [vmem:[#allocation18 + $0x2ec] ss:$16 sps:$4 sm:$0xff]  }
 0x9c5   :  { %10898 = vmatmul.mubr.msk.bf16.gmra.mrb[36].mxu0 %vm5560_vm9, %v13073_v53  ;;  %v13128_v53 = vld [vmem:[#allocation18 + $0x348] ss:$16 sps:$4 sm:$0xff]  }
 0x9c6   :  { %7519 = vmatpush1.bf16.msra.mxu0 %v13033_v35  ;;  %v13115_v35 = vld [vmem:[#allocation18 + $0x8a4] ss:$16 sps:$4 sm:$0xff]  }
 0x9c7   :  { %7520 = vmatprep.subr.bf16.mxu0 %v13041_v52  ;;  %v13110_v52 = vld [vmem:[#allocation18 + $0x2e8] ss:$16 sps:$4 sm:$0xff]  }
 0x9ca   :  { %7521 = vmatpush1.bf16.msra.mxu0 %v13039_v55  ;;  %v13113_v55 = vld [vmem:[#allocation18 + $0x8a0] ss:$16 sps:$4 sm:$0xff]  }
 0x9cb   :  { %7522 = vmatprep.subr.bf16.mxu0 %v13047_v56  ;;  %v13118_v56 = vld [vmem:[#allocation18 + $0x30c] ss:$16 sps:$4 sm:$0xff]  }
 0x9ce   :  { %7523 = vmatpush1.bf16.msra.mxu0 %v13045_v60  ;;  %v13121_v60 = vld [vmem:[#allocation18 + $0x8c4] ss:$16 sps:$4 sm:$0xff]  }
 0x9cf   :  { %7524 = vmatprep.subr.bf16.mxu0 %v13053_v0  ;;  %v13116_v0 = vld [vmem:[#allocation18 + $0x308] ss:$16 sps:$4 sm:$0xff]  }
 0x9d2   :  { %7525 = vmatpush1.bf16.msra.mxu0 %v13051_v38  ;;  %v13119_v38 = vld [vmem:[#allocation18 + $0x8c0] ss:$16 sps:$4 sm:$0xff]  }
 0x9d3   :  { %7526 = vmatprep.subr.bf16.mxu0 %v13059_v41  ;;  %v13124_v41 = vld [vmem:[#allocation18 + $0x32c] ss:$16 sps:$4 sm:$0xff]  }
 0x9d6   :  { %7527 = vmatpush1.bf16.msra.mxu0 %v13057_v5  ;;  %v13127_v5 = vld [vmem:[#allocation18 + $0x8e4] ss:$16 sps:$4 sm:$0xff]  }
 0x9d7   :  { %7528 = vmatprep.subr.bf16.mxu0 %v13066_v62  ;;  %v13125_v62 = vld [vmem:[#allocation18 + $0x8e0] ss:$16 sps:$4 sm:$0xff]  }
 0x9da   :  { %7529 = vmatpush1.bf16.msra.mxu0 %v13064_v7  ;;  %v13133_v7 = vld [vmem:[#allocation18 + $0x904] ss:$16 sps:$4 sm:$0xff]  }
 0x9db   :  { %7530 = vmatprep.subr.bf16.mxu0 %v13072_v57  ;;  %v13136_v57 = vld [vmem:[#allocation18 + $0x36c] ss:$16 sps:$4 sm:$0xff]  }
 0x9de   :  { %7531 = vmatpush1.bf16.msra.mxu0 %v13070_v17  ;;  %v13139_v17 = vld [vmem:[#allocation18 + $0x924] ss:$16 sps:$4 sm:$0xff]  }
 0x9df   :  { %7532 = vmatprep.subr.bf16.mxu0 %v13079_v32  ;;  %v13134_v32 = vld [vmem:[#allocation18 + $0x368] ss:$16 sps:$4 sm:$0xff]  }
 0x9e2   :  { %7533 = vmatpush1.bf16.msra.mxu0 %v13077_v58  ;;  %v13137_v58 = vld [vmem:[#allocation18 + $0x920] ss:$16 sps:$4 sm:$0xff]  }
 0x9e3   :  { %7934 = vmatprep.subr.bf16.mxu0 %v13085_v6  ;;  %v13142_v6 = vld [vmem:[#allocation18 + $0x38c] ss:$16 sps:$4 sm:$0xff]  }
 0xa78   :  { %v14920_v4 = vpop.f32.mrb[20].mxu0 }
 0xa79   :  { %v14922_v14 = vpop.f32.mrb[21].mxu0 }
 0xa7a   :  { %v5621_v33 = vpop.f32.mrb[22].mxu0 }
 0xa7b   :  { %v5623_v36 = vpop.f32.mrb[23].mxu0  ;;  %v14924_v26 = vpack.c.bf16 %v5621_v33, %v5621_v33  ;;  %v13145_v33 = vld [vmem:[#allocation18 + $0x944] ss:$16 sps:$4 sm:$0xff]  }
 0xa7c   :  { %v5731_v8 = vpack.c.bf16 %v5623_v36, %v5623_v36  ;;  %v13140_v36 = vld [vmem:[#allocation18 + $0x388] ss:$16 sps:$4 sm:$0xff]  }
 0xa7e   :  { %6149 = vmatprep.mubr.bf16.mxu1 %v5731_v8 }
 0xa7f   :  { %6150 = vmatmul.mubr.bf16.vlgmr.msra.gmra.mrb[88].mxu1 %v14924_v26 }
 0xa80   :  { %6159 = vmatpush1.bf16.msra.mxu1 %v13067_v9  ;;  %v14927_v18 = vpop.f32.mrb[24].mxu0  ;;  %6190 = vmatprep.mubr.bf16.mxu1 %v5731_v8  ;;  %v13143_v8 = vld [vmem:[#allocation18 + $0x940] ss:$16 sps:$4 sm:$0xff]   ;;  %v13148_v9 = vld [vmem:[#allocation18 + $0x3ac] ss:$16 sps:$4 sm:$0xff]  }
 0xa81   :  { %v14929_v24 = vpop.f32.mrb[25].mxu0  ;;  %6160 = vmatprep.subr.bf16.mxu1 %v13076_v44  ;;  %v13151_v44 = vld [vmem:[#allocation18 + $0x964] ss:$16 sps:$4 sm:$0xff]  }
 0xa82   :  { %v5631_v43 = vpop.f32.mrb[26].mxu0 }
 0xa83   :  { %v5633_v51 = vpop.f32.mrb[27].mxu0  ;;  %v14933_v27 = vpack.c.bf16 %v5631_v43, %v5631_v43  ;;  %v13154_v43 = vld [vmem:[#allocation18 + $0x3cc] ss:$16 sps:$4 sm:$0xff]  }
 0xa84   :  { %v14931_v49 = vpack.c.bf16 %v5633_v51, %v5633_v51  ;;  %6161 = vmatpush1.bf16.msra.mxu1 %v13074_v23  ;;  %v13146_v23 = vld [vmem:[#allocation18 + $0x3a8] ss:$16 sps:$4 sm:$0xff]   ;;  %v13157_v51 = vld [vmem:[#allocation18 + $0x984] ss:$16 sps:$4 sm:$0xff]  }
 0xa85   :  { %6162 = vmatprep.subr.bf16.mxu1 %v13082_v59  ;;  %v13149_v59 = vld [vmem:[#allocation18 + $0x960] ss:$16 sps:$4 sm:$0xff]  }
 0xa86   :  { %7534 = vmatprep.mubr.bf16.mxu0 %v14931_v49 }
 0xa87   :  { %7535 = vmatmul.mubr.bf16.vlgmr.msra.gmra.mrb[40].mxu0 %v14933_v27 }
 0xa88   :  { %6163 = vmatpush1.bf16.msra.mxu1 %v13080_v12  ;;  %7935 = vmatpush1.bf16.msra.mxu0 %v13083_v11  ;;  %v14937_v40 = vpop.f32.mrb[28].mxu0  ;;  %v13152_v12 = vld [vmem:[#allocation18 + $0x3c8] ss:$16 sps:$4 sm:$0xff]   ;;  %v13155_v11 = vld [vmem:[#allocation18 + $0x980] ss:$16 sps:$4 sm:$0xff]  }
 0xa89   :  { %6164 = vmatprep.subr.bf16.mxu1 %v13088_v10  ;;  %7936 = vmatprep.subr.bf16.mxu0 %v13091_v42  ;;  %v5639_v61 = vpop.f32.mrb[29].mxu0  ;;  %v13160_v10 = vld [vmem:[#allocation18 + $0x3ec] ss:$16 sps:$4 sm:$0xff]   ;;  %v13163_v42 = vld [vmem:[#allocation18 + $0x9a4] ss:$16 sps:$4 sm:$0xff]  }
 0xa8a   :  { %v14939_v46 = vpack.c.bf16 %v5639_v61, %v5639_v61  ;;  %v14941_v19 = vpop.f32.mrb[30].mxu0  ;;  %v13164_v61 = vld [vmem:[#allocation18] ss:$16 sps:$4 sm:$0xff]  }
 0xa8b   :  { %v14943_v25 = vpop.f32.mrb[31].mxu0 }
 0xa8c   :  { %6165 = vmatpush1.bf16.msra.mxu1 %v13086_v45  ;;  %7937 = vmatpush1.bf16.msra.mxu0 %v13089_v54  ;;  %v13158_v45 = vld [vmem:[#allocation18 + $0x3e8] ss:$16 sps:$4 sm:$0xff]   ;;  %v13161_v54 = vld [vmem:[#allocation18 + $0x9a0] ss:$16 sps:$4 sm:$0xff]  }
 0xa8d   :  { %6166 = vmatprep.subr.bf16.mxu1 %v13094_v48  ;;  %7938 = vmatprep.subr.bf16.mxu0 %v13097_v30  ;;  %v13166_v48 = vld [vmem:[#allocation18 + $0x4] ss:$16 sps:$4 sm:$0xff]  }
 0xa8e   :  { %7966 = vmatprep.mubr.bf16.mxu0 %v14939_v46  ;;  %v13169_v30 = vld [vmem:[#allocation18 + $0x9c4] ss:$16 sps:$4 sm:$0xff]  }
 0xa90   :  { %6167 = vmatpush1.bf16.msra.mxu1 %v13092_v1  ;;  %7939 = vmatpush1.bf16.msra.mxu0 %v13095_v28  ;;  %v13167_v1 = vld [vmem:[#allocation18 + $0x9c0] ss:$16 sps:$4 sm:$0xff]   ;;  %v13172_v28 = vld [vmem:[#allocation18 + $0x24] ss:$16 sps:$4 sm:$0xff]  }
 0xa91   :  { %6168 = vmatprep.subr.bf16.mxu1 %v13100_v29  ;;  %7940 = vmatprep.subr.bf16.mxu0 %v13103_v21  ;;  %v14948_v29 = vpack.c.bf16 %v14922_v14, %v14922_v14  ;;  %v13175_v21 = vld [vmem:[#allocation18 + $0x9e4] ss:$16 sps:$4 sm:$0xff]   ;;  %v13176_v14 = vld [vmem:[#allocation18 + $0x40] ss:$16 sps:$4 sm:$0xff]  }
 0xa94   :  { %6169 = vmatpush1.bf16.msra.mxu1 %v13098_v31  ;;  %7941 = vmatpush1.bf16.msra.mxu0 %v13101_v22  ;;  %v13170_v31 = vld [vmem:[#allocation18 + $0x20] ss:$16 sps:$4 sm:$0xff]  }
 0xa95   :  { %6170 = vmatprep.subr.bf16.mxu1 %v13106_v13  ;;  %7942 = vmatprep.subr.bf16.mxu0 %v13109_v50  ;;  %v13173_v22 = vld [vmem:[#allocation18 + $0x9e0] ss:$16 sps:$4 sm:$0xff]   ;;  %v13178_v13 = vld [vmem:[#allocation18 + $0x44] ss:$16 sps:$4 sm:$0xff]   ;;  %v13181_v50 = vld [vmem:[#allocation18 + $0x80c] ss:$16 sps:$4 sm:$0xff]  }
 0xa98   :  { %6171 = vmatpush1.bf16.msra.mxu1 %v13104_v34  ;;  %7943 = vmatpush1.bf16.msra.mxu0 %v13107_v3  ;;  %v14954_v34 = vpack.c.bf16 %v14937_v40, %v14937_v40  ;;  %v13179_v3 = vld [vmem:[#allocation18 + $0x808] ss:$16 sps:$4 sm:$0xff]   ;;  %v13193_v40 = vld [vmem:[#allocation18 + $0x84c] ss:$16 sps:$4 sm:$0xff]  }
 0xa99   :  { %6172 = vmatprep.subr.bf16.mxu1 %v13112_v20  ;;  %7944 = vmatprep.subr.bf16.mxu0 %v13115_v35  ;;  %v13187_v20 = vld [vmem:[#allocation18 + $0x82c] ss:$16 sps:$4 sm:$0xff]   ;;  %v13182_v35 = vld [vmem:[#allocation18 + $0x60] ss:$16 sps:$4 sm:$0xff]  }
 0xa9c   :  { %6173 = vmatpush1.bf16.msra.mxu1 %v13110_v52  ;;  %7945 = vmatpush1.bf16.msra.mxu0 %v13113_v55  ;;  %v13185_v52 = vld [vmem:[#allocation18 + $0x828] ss:$16 sps:$4 sm:$0xff]   ;;  %v13190_v55 = vld [vmem:[#allocation18 + $0x84] ss:$16 sps:$4 sm:$0xff]  }
 0xa9d   :  { %6174 = vmatprep.subr.bf16.mxu1 %v13118_v56  ;;  %7946 = vmatprep.subr.bf16.mxu0 %v13121_v60  ;;  %v14958_v56 = vpop.f32.mrb[32].mxu0 }
 0xa9e   :  { %v14960_v60 = vpop.f32.mrb[33].mxu0 }
 0xaa0   :  { %6175 = vmatpush1.bf16.msra.mxu1 %v13116_v0  ;;  %7947 = vmatpush1.bf16.msra.mxu0 %v13119_v38  ;;  %v13188_v0 = vld [vmem:[#allocation18 + $0x80] ss:$16 sps:$4 sm:$0xff]   ;;  %v14962_v38 = vpop.f32.mrb[34].mxu0 }
 0xaa1   :  { %6176 = vmatprep.subr.bf16.mxu1 %v13124_v41  ;;  %7948 = vmatprep.subr.bf16.mxu0 %v13127_v5  ;;  %v13191_v41 = vld [vmem:[#allocation18 + $0x848] ss:$16 sps:$4 sm:$0xff]   ;;  %v13196_v5 = vld [vmem:[#allocation18 + $0xa4] ss:$16 sps:$4 sm:$0xff]  }
 0xaa4   :  { %6177 = vmatpush1.bf16.msra.mxu1 %v13122_v16  ;;  %7949 = vmatpush1.bf16.msra.mxu0 %v13125_v62  ;;  %v13199_v16 = vld [vmem:[#allocation18 + $0x86c] ss:$16 sps:$4 sm:$0xff]   ;;  %v14964_v62 = vpop.f32.mrb[35].mxu0 }
 0xaa5   :  { %6178 = vmatprep.subr.bf16.mxu1 %v13130_v63  ;;  %7950 = vmatprep.subr.bf16.mxu0 %v13133_v7  ;;  %v13194_v63 = vld [vmem:[#allocation18 + $0xa0] ss:$16 sps:$4 sm:$0xff]   ;;  %v13202_v7 = vld [vmem:[#allocation18 + $0xc4] ss:$16 sps:$4 sm:$0xff]  }
 0xaa8   :  { %6179 = vmatpush1.bf16.msra.mxu1 %v13128_v53  ;;  %7951 = vmatpush1.bf16.msra.mxu0 %v13131_v39  ;;  %v13205_v53 = vld [vmem:[#allocation18 + $0x88c] ss:$16 sps:$4 sm:$0xff]   ;;  %v14966_v39 = vpop.f32.mrb[36].mxu0 }
 0xaa9   :  { %6180 = vmatprep.subr.bf16.mxu1 %v13136_v57  ;;  %7952 = vmatprep.subr.bf16.mxu0 %v13139_v17  ;;  %v14968_v57 = vpop.f32.mrb[37].mxu0  ;;  %v13200_v17 = vld [vmem:[#allocation18 + $0xc0] ss:$16 sps:$4 sm:$0xff]  }
 0xaac   :  { %6181 = vmatpush1.bf16.msra.mxu1 %v13134_v32  ;;  %7953 = vmatpush1.bf16.msra.mxu0 %v13137_v58  ;;  %v5661_v32 = vpop.f32.mrb[38].mxu0  ;;  %v13203_v58 = vld [vmem:[#allocation18 + $0x888] ss:$16 sps:$4 sm:$0xff]  }
 0xaad   :  { %6182 = vmatprep.subr.bf16.mxu1 %v13142_v6  ;;  %7954 = vmatprep.subr.bf16.mxu0 %v13145_v33  ;;  %v13208_v6 = vld [vmem:[#allocation18 + $0xe4] ss:$16 sps:$4 sm:$0xff]   ;;  %v13211_v33 = vld [vmem:[#allocation18 + $0x8ac] ss:$16 sps:$4 sm:$0xff]  }
 0xaae   :  { %v13271_v32 = vld [vmem:[#allocation18 + $0x9ec] ss:$16 sps:$4 sm:$0xff]  }
 0xab0   :  { %6183 = vmatpush1.bf16.msra.mxu1 %v13140_v36  ;;  %7955 = vmatpush1.bf16.msra.mxu0 %v13143_v8  ;;  %v5662_v36 = vpop.f32.mrb[39].mxu0  ;;  %v13206_v8 = vld [vmem:[#allocation18 + $0xe0] ss:$16 sps:$4 sm:$0xff]  }
 0xab1   :  { %6184 = vmatprep.subr.bf16.mxu1 %v13148_v9  ;;  %7956 = vmatprep.subr.bf16.mxu0 %v13151_v44  ;;  %v13209_v9 = vld [vmem:[#allocation18 + $0x8a8] ss:$16 sps:$4 sm:$0xff]   ;;  %v13214_v44 = vld [vmem:[#allocation18 + $0x104] ss:$16 sps:$4 sm:$0xff]  }
 0xab2   :  { %v13277_v36 = vld [vmem:[#allocation18 + $0xa04] ss:$16 sps:$4 sm:$0xff]  }
 0xab4   :  { %6185 = vmatpush1.bf16.msra.mxu1 %v13146_v23  ;;  %7957 = vmatpush1.bf16.msra.mxu0 %v13149_v59  ;;  %v13217_v23 = vld [vmem:[#allocation18 + $0x8cc] ss:$16 sps:$4 sm:$0xff]   ;;  %v13212_v59 = vld [vmem:[#allocation18 + $0x100] ss:$16 sps:$4 sm:$0xff]  }
 0xab5   :  { %6186 = vmatprep.subr.bf16.mxu1 %v13154_v43  ;;  %7958 = vmatprep.subr.bf16.mxu0 %v13157_v51  ;;  %v13215_v43 = vld [vmem:[#allocation18 + $0x8c8] ss:$16 sps:$4 sm:$0xff]   ;;  %v13220_v51 = vld [vmem:[#allocation18 + $0x124] ss:$16 sps:$4 sm:$0xff]  }
 0xab8   :  { %6187 = vmatpush1.bf16.msra.mxu1 %v13152_v12  ;;  %7959 = vmatpush1.bf16.msra.mxu0 %v13155_v11  ;;  %v13223_v12 = vld [vmem:[#allocation18 + $0x8ec] ss:$16 sps:$4 sm:$0xff]   ;;  %v13218_v11 = vld [vmem:[#allocation18 + $0x120] ss:$16 sps:$4 sm:$0xff]  }
 0xab9   :  { %6188 = vmatprep.subr.bf16.mxu1 %v13160_v10  ;;  %7960 = vmatprep.subr.bf16.mxu0 %v13163_v42  ;;  %v13221_v10 = vld [vmem:[#allocation18 + $0x8e8] ss:$16 sps:$4 sm:$0xff]   ;;  %v13226_v42 = vld [vmem:[#allocation18 + $0x144] ss:$16 sps:$4 sm:$0xff]  }
 0xabc   :  { %6189 = vmatpush1.bf16.msra.mxu1 %v13158_v45  ;;  %7961 = vmatpush1.bf16.msra.mxu0 %v13161_v54  ;;  %v13229_v45 = vld [vmem:[#allocation18 + $0x90c] ss:$16 sps:$4 sm:$0xff]   ;;  %v13224_v54 = vld [vmem:[#allocation18 + $0x140] ss:$16 sps:$4 sm:$0xff]  }
 0xabd   :  { %6519 = vmatprep.subr.bf16.mxu1 %v13166_v48  ;;  %7962 = vmatprep.subr.bf16.mxu0 %v13169_v30  ;;  %v13227_v48 = vld [vmem:[#allocation18 + $0x908] ss:$16 sps:$4 sm:$0xff]   ;;  %v13232_v30 = vld [vmem:[#allocation18 + $0x164] ss:$16 sps:$4 sm:$0xff]  }
 0xabf   :  { %6191 = vmatmul.mubr.bf16.vlgmr.msra.gmra.mrb[92].mxu1 %v14924_v26  ;;  %v13184_v26 = vld [vmem:[#allocation18 + $0x64] ss:$16 sps:$4 sm:$0xff]  }
 0xac0   :  { %6520 = vmatpush1.bf16.msra.mxu1 %v13164_v61  ;;  %6551 = vmatprep.mubr.bf16.mxu1 %v14948_v29  ;;  %v13235_v61 = vld [vmem:[#allocation18 + $0x92c] ss:$16 sps:$4 sm:$0xff]  }
 0xac1   :  { %7963 = vmatpush1.bf16.msra.mxu0 %v13167_v1  ;;  %6521 = vmatprep.subr.bf16.mxu1 %v13172_v28  ;;  %v13230_v1 = vld [vmem:[#allocation18 + $0x160] ss:$16 sps:$4 sm:$0xff]   ;;  %v13233_v28 = vld [vmem:[#allocation18 + $0x928] ss:$16 sps:$4 sm:$0xff]  }
 0xac2   :  { %7964 = vmatprep.subr.bf16.mxu0 %v13175_v21  ;;  %v13238_v21 = vld [vmem:[#allocation18 + $0x184] ss:$16 sps:$4 sm:$0xff]  }
 0xac4   :  { %6522 = vmatpush1.bf16.msra.mxu1 %v13170_v31  ;;  %v13241_v31 = vld [vmem:[#allocation18 + $0x94c] ss:$16 sps:$4 sm:$0xff]  }
 0xac5   :  { %7965 = vmatpush1.bf16.msra.mxu0 %v13173_v22  ;;  %6523 = vmatprep.subr.bf16.mxu1 %v13178_v13  ;;  %v13236_v22 = vld [vmem:[#allocation18 + $0x180] ss:$16 sps:$4 sm:$0xff]   ;;  %v13239_v13 = vld [vmem:[#allocation18 + $0x948] ss:$16 sps:$4 sm:$0xff]  }
 0xac6   :  { %7975 = vmatprep.subr.bf16.mxu0 %v13181_v50  ;;  %v13244_v50 = vld [vmem:[#allocation18 + $0x1a4] ss:$16 sps:$4 sm:$0xff]  }
 0xac8   :  { %6524 = vmatpush1.bf16.msra.mxu1 %v13176_v14  ;;  %7967 = vmatmul.mubr.bf16.vlgmr.msra.gmra.mrb[44].mxu0 %v14954_v34  ;;  %v13247_v14 = vld [vmem:[#allocation18 + $0x96c] ss:$16 sps:$4 sm:$0xff]  }
 0xac9   :  { %7976 = vmatpush1.bf16.msra.mxu0 %v13179_v3  ;;  %6525 = vmatprep.subr.bf16.mxu1 %v13184_v26  ;;  %v13242_v3 = vld [vmem:[#allocation18 + $0x1a0] ss:$16 sps:$4 sm:$0xff]   ;;  %v13245_v26 = vld [vmem:[#allocation18 + $0x968] ss:$16 sps:$4 sm:$0xff]  }
 0xaca   :  { %7977 = vmatprep.subr.bf16.mxu0 %v13187_v20  ;;  %8007 = vmatprep.mubr.bf16.mxu0 %v14939_v46  ;;  %v13197_v46 = vld [vmem:[#allocation18 + $0x868] ss:$16 sps:$4 sm:$0xff]   ;;  %v13250_v20 = vld [vmem:[#allocation18 + $0x1c4] ss:$16 sps:$4 sm:$0xff]  }
 0xacc   :  { %6526 = vmatpush1.bf16.msra.mxu1 %v13182_v35  ;;  %v13253_v35 = vld [vmem:[#allocation18 + $0x98c] ss:$16 sps:$4 sm:$0xff]  }
 0xacd   :  { %7978 = vmatpush1.bf16.msra.mxu0 %v13185_v52  ;;  %6527 = vmatprep.subr.bf16.mxu1 %v13190_v55  ;;  %v13248_v52 = vld [vmem:[#allocation18 + $0x1c0] ss:$16 sps:$4 sm:$0xff]   ;;  %v13251_v55 = vld [vmem:[#allocation18 + $0x988] ss:$16 sps:$4 sm:$0xff]  }
 0xace   :  { %7979 = vmatprep.subr.bf16.mxu0 %v13193_v40  ;;  %v13256_v40 = vld [vmem:[#allocation18 + $0x1e4] ss:$16 sps:$4 sm:$0xff]  }
 0xad0   :  { %6528 = vmatpush1.bf16.msra.mxu1 %v13188_v0  ;;  %v13259_v0 = vld [vmem:[#allocation18 + $0x9ac] ss:$16 sps:$4 sm:$0xff]  }
 0xad1   :  { %7980 = vmatpush1.bf16.msra.mxu0 %v13191_v41  ;;  %6529 = vmatprep.subr.bf16.mxu1 %v13196_v5  ;;  %v13254_v41 = vld [vmem:[#allocation18 + $0x1e0] ss:$16 sps:$4 sm:$0xff]   ;;  %v13257_v5 = vld [vmem:[#allocation18 + $0x9a8] ss:$16 sps:$4 sm:$0xff]  }
 0xad2   :  { %7981 = vmatprep.subr.bf16.mxu0 %v13199_v16  ;;  %v13262_v16 = vld [vmem:[#allocation18 + $0xc] ss:$16 sps:$4 sm:$0xff]  }
 0xad4   :  { %6530 = vmatpush1.bf16.msra.mxu1 %v13194_v63  ;;  %v13265_v63 = vld [vmem:[#allocation18 + $0x9cc] ss:$16 sps:$4 sm:$0xff]  }
 0xad5   :  { %7982 = vmatpush1.bf16.msra.mxu0 %v13197_v46  ;;  %6531 = vmatprep.subr.bf16.mxu1 %v13202_v7  ;;  %v13260_v46 = vld [vmem:[#allocation18 + $0x8] ss:$16 sps:$4 sm:$0xff]   ;;  %v14972_v7 = vpack.c.bf16 %v14920_v4, %v14920_v4 }
 0xad6   :  { %7983 = vmatprep.subr.bf16.mxu0 %v13205_v53  ;;  %v13263_v53 = vld [vmem:[#allocation18 + $0x9c8] ss:$16 sps:$4 sm:$0xff]  }
 0xad7   :  { %v13272_v4 = vld [vmem:[#allocation18 + $0x48] ss:$16 sps:$4 sm:$0xff]  }
 0xad8   :  { %6532 = vmatpush1.bf16.msra.mxu1 %v13200_v17  ;;  %v13268_v17 = vld [vmem:[#allocation18 + $0x2c] ss:$16 sps:$4 sm:$0xff]  }
 0xad9   :  { %7984 = vmatpush1.bf16.msra.mxu0 %v13203_v58  ;;  %6533 = vmatprep.subr.bf16.mxu1 %v13208_v6  ;;  %v13266_v58 = vld [vmem:[#allocation18 + $0x28] ss:$16 sps:$4 sm:$0xff]  }
 0xada   :  { %7985 = vmatprep.subr.bf16.mxu0 %v13211_v33  ;;  %v13269_v6 = vld [vmem:[#allocation18 + $0x9e8] ss:$16 sps:$4 sm:$0xff]   ;;  %v13274_v33 = vld [vmem:[#allocation18 + $0x4c] ss:$16 sps:$4 sm:$0xff]  }
 0xadc   :  { %6534 = vmatpush1.bf16.msra.mxu1 %v13206_v8  ;;  %v13275_v8 = vld [vmem:[#allocation18 + $0xa00] ss:$16 sps:$4 sm:$0xff]  }
 0xadd   :  { %7986 = vmatpush1.bf16.msra.mxu0 %v13209_v9  ;;  %6535 = vmatprep.subr.bf16.mxu1 %v13214_v44  ;;  %v13280_v9 = vld [vmem:[#allocation18 + $0x6c] ss:$16 sps:$4 sm:$0xff]   ;;  %v13283_v44 = vld [vmem:[#allocation18 + $0xa24] ss:$16 sps:$4 sm:$0xff]  }
 0xade   :  { %7987 = vmatprep.subr.bf16.mxu0 %v13217_v23  ;;  %v14978_v23 = vpack.c.bf16 %v14943_v25, %v14943_v25  ;;  %v13295_v25 = vld [vmem:[#allocation18 + $0xa64] ss:$16 sps:$4 sm:$0xff]  }
 0xae0   :  { %6536 = vmatpush1.bf16.msra.mxu1 %v13212_v59  ;;  %v13281_v59 = vld [vmem:[#allocation18 + $0xa20] ss:$16 sps:$4 sm:$0xff]  }
 0xae1   :  { %7988 = vmatpush1.bf16.msra.mxu0 %v13215_v43  ;;  %6537 = vmatprep.subr.bf16.mxu1 %v13220_v51  ;;  %v13286_v43 = vld [vmem:[#allocation18 + $0x8c] ss:$16 sps:$4 sm:$0xff]   ;;  %v13289_v51 = vld [vmem:[#allocation18 + $0xa44] ss:$16 sps:$4 sm:$0xff]  }
 0xae2   :  { %7989 = vmatprep.subr.bf16.mxu0 %v13223_v12  ;;  %v13284_v12 = vld [vmem:[#allocation18 + $0x88] ss:$16 sps:$4 sm:$0xff]  }
 0xae4   :  { %6538 = vmatpush1.bf16.msra.mxu1 %v13218_v11  ;;  %v13287_v11 = vld [vmem:[#allocation18 + $0xa40] ss:$16 sps:$4 sm:$0xff]  }
 0xae5   :  { %7990 = vmatpush1.bf16.msra.mxu0 %v13221_v10  ;;  %6539 = vmatprep.subr.bf16.mxu1 %v13226_v42  ;;  %v13292_v10 = vld [vmem:[#allocation18 + $0xac] ss:$16 sps:$4 sm:$0xff]   ;;  %v13293_v42 = vld [vmem:[#allocation18 + $0xa60] ss:$16 sps:$4 sm:$0xff]  }
 0xae6   :  { %7991 = vmatprep.subr.bf16.mxu0 %v13229_v45  ;;  %v13298_v45 = vld [vmem:[#allocation18 + $0xcc] ss:$16 sps:$4 sm:$0xff]  }
 0xae8   :  { %6540 = vmatpush1.bf16.msra.mxu1 %v13224_v54  ;;  %v13301_v54 = vld [vmem:[#allocation18 + $0xa84] ss:$16 sps:$4 sm:$0xff]  }
 0xae9   :  { %7992 = vmatpush1.bf16.msra.mxu0 %v13227_v48  ;;  %6541 = vmatprep.subr.bf16.mxu1 %v13232_v30  ;;  %v13296_v48 = vld [vmem:[#allocation18 + $0xc8] ss:$16 sps:$4 sm:$0xff]   ;;  %v13299_v30 = vld [vmem:[#allocation18 + $0xa80] ss:$16 sps:$4 sm:$0xff]  }
 0xaea   :  { %7993 = vmatprep.subr.bf16.mxu0 %v13235_v61  ;;  %v13304_v61 = vld [vmem:[#allocation18 + $0xec] ss:$16 sps:$4 sm:$0xff]  }
 0xaec   :  { %6542 = vmatpush1.bf16.msra.mxu1 %v13230_v1  ;;  %v13307_v1 = vld [vmem:[#allocation18 + $0xaa4] ss:$16 sps:$4 sm:$0xff]  }
 0xaed   :  { %7994 = vmatpush1.bf16.msra.mxu0 %v13233_v28  ;;  %6543 = vmatprep.subr.bf16.mxu1 %v13238_v21  ;;  %v13302_v28 = vld [vmem:[#allocation18 + $0xe8] ss:$16 sps:$4 sm:$0xff]   ;;  %v13305_v21 = vld [vmem:[#allocation18 + $0xaa0] ss:$16 sps:$4 sm:$0xff]  }
 0xaee   :  { %7995 = vmatprep.subr.bf16.mxu0 %v13241_v31  ;;  %v13310_v31 = vld [vmem:[#allocation18 + $0x10c] ss:$16 sps:$4 sm:$0xff]  }
 0xaf0   :  { %6544 = vmatpush1.bf16.msra.mxu1 %v13236_v22  ;;  %v13313_v22 = vld [vmem:[#allocation18 + $0xac4] ss:$16 sps:$4 sm:$0xff]  }
 0xaf1   :  { %7996 = vmatpush1.bf16.msra.mxu0 %v13239_v13  ;;  %6545 = vmatprep.subr.bf16.mxu1 %v13244_v50  ;;  %v13308_v13 = vld [vmem:[#allocation18 + $0x108] ss:$16 sps:$4 sm:$0xff]   ;;  %v13311_v50 = vld [vmem:[#allocation18 + $0xac0] ss:$16 sps:$4 sm:$0xff]  }
 0xaf2   :  { %7997 = vmatprep.subr.bf16.mxu0 %v13247_v14  ;;  %v13316_v14 = vld [vmem:[#allocation18 + $0x12c] ss:$16 sps:$4 sm:$0xff]  }
 0xaf4   :  { %6546 = vmatpush1.bf16.msra.mxu1 %v13242_v3  ;;  %v13319_v3 = vld [vmem:[#allocation18 + $0xae4] ss:$16 sps:$4 sm:$0xff]  }
 0xaf5   :  { %7998 = vmatpush1.bf16.msra.mxu0 %v13245_v26  ;;  %6547 = vmatprep.subr.bf16.mxu1 %v13250_v20  ;;  %v13314_v26 = vld [vmem:[#allocation18 + $0x128] ss:$16 sps:$4 sm:$0xff]   ;;  %v13317_v20 = vld [vmem:[#allocation18 + $0xae0] ss:$16 sps:$4 sm:$0xff]  }
 0xaf6   :  { %7999 = vmatprep.subr.bf16.mxu0 %v13253_v35  ;;  %v13322_v35 = vld [vmem:[#allocation18 + $0x14c] ss:$16 sps:$4 sm:$0xff]  }
 0xaf8   :  { %6548 = vmatpush1.bf16.msra.mxu1 %v13248_v52  ;;  %v13325_v52 = vld [vmem:[#allocation18 + $0xb04] ss:$16 sps:$4 sm:$0xff]  }
 0xaf9   :  { %8000 = vmatpush1.bf16.msra.mxu0 %v13251_v55  ;;  %6549 = vmatprep.subr.bf16.mxu1 %v13256_v40  ;;  %v13320_v55 = vld [vmem:[#allocation18 + $0x148] ss:$16 sps:$4 sm:$0xff]   ;;  %v13323_v40 = vld [vmem:[#allocation18 + $0xb00] ss:$16 sps:$4 sm:$0xff]  }
 0xafa   :  { %8001 = vmatprep.subr.bf16.mxu0 %v13259_v0  ;;  %v13328_v0 = vld [vmem:[#allocation18 + $0x16c] ss:$16 sps:$4 sm:$0xff]  }
 0xafc   :  { %6550 = vmatpush1.bf16.msra.mxu1 %v13254_v41  ;;  %v13331_v41 = vld [vmem:[#allocation18 + $0xb24] ss:$16 sps:$4 sm:$0xff]  }
 0xafd   :  { %8002 = vmatpush1.bf16.msra.mxu0 %v13257_v5  ;;  %6560 = vmatprep.subr.bf16.mxu1 %v13262_v16  ;;  %v13326_v5 = vld [vmem:[#allocation18 + $0x168] ss:$16 sps:$4 sm:$0xff]   ;;  %v13329_v16 = vld [vmem:[#allocation18 + $0xb20] ss:$16 sps:$4 sm:$0xff]  }
 0xafe   :  { %8003 = vmatprep.subr.bf16.mxu0 %v13265_v63  ;;  %v13334_v63 = vld [vmem:[#allocation18 + $0x18c] ss:$16 sps:$4 sm:$0xff]  }
 0xaff   :  { %6552 = vmatmul.mubr.bf16.vlgmr.msra.gmra.mrb[88].mxu1 %v14972_v7 }
 0xb00   :  { %6561 = vmatpush1.bf16.msra.mxu1 %v13260_v46  ;;  %6592 = vmatprep.mubr.bf16.mxu1 %v14948_v29  ;;  %v13278_v29 = vld [vmem:[#allocation18 + $0x68] ss:$16 sps:$4 sm:$0xff]   ;;  %v13337_v46 = vld [vmem:[#allocation18 + $0xb44] ss:$16 sps:$4 sm:$0xff]  }
 0xb01   :  { %8004 = vmatpush1.bf16.msra.mxu0 %v13263_v53  ;;  %6562 = vmatprep.subr.bf16.mxu1 %v13268_v17  ;;  %v13332_v53 = vld [vmem:[#allocation18 + $0x188] ss:$16 sps:$4 sm:$0xff]   ;;  %v13335_v17 = vld [vmem:[#allocation18 + $0xb40] ss:$16 sps:$4 sm:$0xff]  }
 0xb02   :  { %8005 = vmatprep.subr.bf16.mxu0 %v13271_v32  ;;  %v13340_v32 = vld [vmem:[#allocation18 + $0x1ac] ss:$16 sps:$4 sm:$0xff]  }
 0xb04   :  { %6563 = vmatpush1.bf16.msra.mxu1 %v13266_v58  ;;  %v13343_v58 = vld [vmem:[#allocation18 + $0xb64] ss:$16 sps:$4 sm:$0xff]  }
 0xb05   :  { %8006 = vmatpush1.bf16.msra.mxu0 %v13269_v6  ;;  %6564 = vmatprep.subr.bf16.mxu1 %v13274_v33  ;;  %v13338_v6 = vld [vmem:[#allocation18 + $0x1a8] ss:$16 sps:$4 sm:$0xff]   ;;  %v13341_v33 = vld [vmem:[#allocation18 + $0xb60] ss:$16 sps:$4 sm:$0xff]  }
 0xb06   :  { %8407 = vmatprep.subr.bf16.mxu0 %v13277_v36  ;;  %v13346_v36 = vld [vmem:[#allocation18 + $0x1cc] ss:$16 sps:$4 sm:$0xff]  }
 0xb08   :  { %8008 = vmatmul.mubr.bf16.vlgmr.msra.gmra.mrb[40].mxu0 %v14954_v34  ;;  %6565 = vmatpush1.bf16.msra.mxu1 %v13272_v4  ;;  %v13290_v34 = vld [vmem:[#allocation18 + $0xa8] ss:$16 sps:$4 sm:$0xff]   ;;  %v13349_v4 = vld [vmem:[#allocation18 + $0xb84] ss:$16 sps:$4 sm:$0xff]  }
 0xb09   :  { %8408 = vmatpush1.bf16.msra.mxu0 %v13275_v8  ;;  %8439 = vmatprep.mubr.bf16.mxu0 %v14978_v23  ;;  %v13344_v8 = vld [vmem:[#allocation18 + $0x1c8] ss:$16 sps:$4 sm:$0xff]  }
 0xb0a   :  { %6566 = vmatprep.subr.bf16.mxu1 %v13280_v9  ;;  %8409 = vmatprep.subr.bf16.mxu0 %v13283_v44  ;;  %v13347_v9 = vld [vmem:[#allocation18 + $0xb80] ss:$16 sps:$4 sm:$0xff]   ;;  %v13352_v44 = vld [vmem:[#allocation18 + $0x1ec] ss:$16 sps:$4 sm:$0xff]  }
 0xb0c   :  { %6567 = vmatpush1.bf16.msra.mxu1 %v13278_v29  ;;  %v13355_v29 = vld [vmem:[#allocation18 + $0xba4] ss:$16 sps:$4 sm:$0xff]  }
 0xb0d   :  { %8410 = vmatpush1.bf16.msra.mxu0 %v13281_v59  ;;  %6568 = vmatprep.subr.bf16.mxu1 %v13286_v43  ;;  %v13350_v59 = vld [vmem:[#allocation18 + $0x1e8] ss:$16 sps:$4 sm:$0xff]   ;;  %v13353_v43 = vld [vmem:[#allocation18 + $0xba0] ss:$16 sps:$4 sm:$0xff]  }
 0xb0e   :  { %8411 = vmatprep.subr.bf16.mxu0 %v13289_v51  ;;  %v13358_v51 = vld [vmem:[#allocation18 + $0x404] ss:$16 sps:$4 sm:$0xff]  }
 0xb10   :  { %6569 = vmatpush1.bf16.msra.mxu1 %v13284_v12  ;;  %v13361_v12 = vld [vmem:[#allocation18 + $0xbc4] ss:$16 sps:$4 sm:$0xff]  }
 0xb11   :  { %8412 = vmatpush1.bf16.msra.mxu0 %v13287_v11  ;;  %6570 = vmatprep.subr.bf16.mxu1 %v13292_v10  ;;  %v13356_v11 = vld [vmem:[#allocation18 + $0x400] ss:$16 sps:$4 sm:$0xff]  }
 0xb12   :  { %8413 = vmatprep.subr.bf16.mxu0 %v13295_v25  ;;  %v13359_v10 = vld [vmem:[#allocation18 + $0xbc0] ss:$16 sps:$4 sm:$0xff]   ;;  %v13364_v25 = vld [vmem:[#allocation18 + $0x424] ss:$16 sps:$4 sm:$0xff]  }
 0xb14   :  { %6571 = vmatpush1.bf16.msra.mxu1 %v13290_v34  ;;  %v14984_v34 = vpack.c.bf16 %v14929_v24, %v14929_v24  ;;  %v13371_v24 = vld [vmem:[#allocation18 + $0xa08] ss:$16 sps:$4 sm:$0xff]  }
 0xb15   :  { %8414 = vmatpush1.bf16.msra.mxu0 %v13293_v42  ;;  %6572 = vmatprep.subr.bf16.mxu1 %v13298_v45  ;;  %v13367_v42 = vld [vmem:[#allocation18 + $0xbe4] ss:$16 sps:$4 sm:$0xff]   ;;  %v13362_v45 = vld [vmem:[#allocation18 + $0x420] ss:$16 sps:$4 sm:$0xff]  }
 0xb16   :  { %8415 = vmatprep.subr.bf16.mxu0 %v13301_v54  ;;  %v13365_v54 = vld [vmem:[#allocation18 + $0xbe0] ss:$16 sps:$4 sm:$0xff]  }
 0xb18   :  { %6573 = vmatpush1.bf16.msra.mxu1 %v13296_v48  ;;  %v13370_v48 = vld [vmem:[#allocation18 + $0x444] ss:$16 sps:$4 sm:$0xff]  }
 0xb19   :  { %8416 = vmatpush1.bf16.msra.mxu0 %v13299_v30  ;;  %6574 = vmatprep.subr.bf16.mxu1 %v13304_v61  ;;  %v13373_v30 = vld [vmem:[#allocation18 + $0xa0c] ss:$16 sps:$4 sm:$0xff]   ;;  %v13368_v61 = vld [vmem:[#allocation18 + $0x440] ss:$16 sps:$4 sm:$0xff]  }
 0xb1a   :  { %8417 = vmatprep.subr.bf16.mxu0 %v13307_v1  ;;  %v14990_v1 = vpack.c.bf16 %v14941_v19, %v14941_v19  ;;  %v13383_v19 = vld [vmem:[#allocation18 + $0xa48] ss:$16 sps:$4 sm:$0xff]  }
 0xb1c   :  { %6575 = vmatpush1.bf16.msra.mxu1 %v13302_v28  ;;  %v13379_v28 = vld [vmem:[#allocation18 + $0xa2c] ss:$16 sps:$4 sm:$0xff]  }
 0xb1d   :  { %8418 = vmatpush1.bf16.msra.mxu0 %v13305_v21  ;;  %6576 = vmatprep.subr.bf16.mxu1 %v13310_v31  ;;  %v13374_v21 = vld [vmem:[#allocation18 + $0x460] ss:$16 sps:$4 sm:$0xff]   ;;  %v13377_v31 = vld [vmem:[#allocation18 + $0xa28] ss:$16 sps:$4 sm:$0xff]  }
 0xb1e   :  { %8419 = vmatprep.subr.bf16.mxu0 %v13313_v22  ;;  %v13382_v22 = vld [vmem:[#allocation18 + $0x484] ss:$16 sps:$4 sm:$0xff]  }
 0xb20   :  { %6577 = vmatpush1.bf16.msra.mxu1 %v13308_v13  ;;  %v13385_v13 = vld [vmem:[#allocation18 + $0xa4c] ss:$16 sps:$4 sm:$0xff]  }
 0xb21   :  { %8420 = vmatpush1.bf16.msra.mxu0 %v13311_v50  ;;  %6578 = vmatprep.subr.bf16.mxu1 %v13316_v14  ;;  %v13380_v50 = vld [vmem:[#allocation18 + $0x480] ss:$16 sps:$4 sm:$0xff]   ;;  %v13388_v14 = vld [vmem:[#allocation18 + $0x4a4] ss:$16 sps:$4 sm:$0xff]  }
 0xb22   :  { %8421 = vmatprep.subr.bf16.mxu0 %v13319_v3  ;;  %v13391_v3 = vld [vmem:[#allocation18 + $0xa6c] ss:$16 sps:$4 sm:$0xff]  }
 0xb24   :  { %6579 = vmatpush1.bf16.msra.mxu1 %v13314_v26  ;;  %v13386_v26 = vld [vmem:[#allocation18 + $0x4a0] ss:$16 sps:$4 sm:$0xff]  }
 0xb25   :  { %8422 = vmatpush1.bf16.msra.mxu0 %v13317_v20  ;;  %6580 = vmatprep.subr.bf16.mxu1 %v13322_v35  ;;  %v13389_v20 = vld [vmem:[#allocation18 + $0xa68] ss:$16 sps:$4 sm:$0xff]   ;;  %v13394_v35 = vld [vmem:[#allocation18 + $0x4c4] ss:$16 sps:$4 sm:$0xff]  }
 0xb26   :  { %8423 = vmatprep.subr.bf16.mxu0 %v13325_v52  ;;  %v13392_v52 = vld [vmem:[#allocation18 + $0x4c0] ss:$16 sps:$4 sm:$0xff]  }
 0xb28   :  { %6581 = vmatpush1.bf16.msra.mxu1 %v13320_v55  ;;  %v13395_v55 = vld [vmem:[#allocation18 + $0xa88] ss:$16 sps:$4 sm:$0xff]  }
 0xb29   :  { %8424 = vmatpush1.bf16.msra.mxu0 %v13323_v40  ;;  %6582 = vmatprep.subr.bf16.mxu1 %v13328_v0  ;;  %v13400_v40 = vld [vmem:[#allocation18 + $0x4e4] ss:$16 sps:$4 sm:$0xff]   ;;  %v13403_v0 = vld [vmem:[#allocation18 + $0xaac] ss:$16 sps:$4 sm:$0xff]  }
 0xb2a   :  { %8425 = vmatprep.subr.bf16.mxu0 %v13331_v41  ;;  %v13398_v41 = vld [vmem:[#allocation18 + $0x4e0] ss:$16 sps:$4 sm:$0xff]  }
 0xb2c   :  { %6583 = vmatpush1.bf16.msra.mxu1 %v13326_v5  ;;  %v13401_v5 = vld [vmem:[#allocation18 + $0xaa8] ss:$16 sps:$4 sm:$0xff]  }
 0xb2d   :  { %8426 = vmatpush1.bf16.msra.mxu0 %v13329_v16  ;;  %6584 = vmatprep.subr.bf16.mxu1 %v13334_v63  ;;  %v13406_v16 = vld [vmem:[#allocation18 + $0x504] ss:$16 sps:$4 sm:$0xff]   ;;  %v13409_v63 = vld [vmem:[#allocation18 + $0xacc] ss:$16 sps:$4 sm:$0xff]  }
 0xb2e   :  { %8427 = vmatprep.subr.bf16.mxu0 %v13337_v46  ;;  %v13404_v46 = vld [vmem:[#allocation18 + $0x500] ss:$16 sps:$4 sm:$0xff]  }
 0xb30   :  { %6585 = vmatpush1.bf16.msra.mxu1 %v13332_v53  ;;  %v13407_v53 = vld [vmem:[#allocation18 + $0xac8] ss:$16 sps:$4 sm:$0xff]  }
 0xb31   :  { %8428 = vmatpush1.bf16.msra.mxu0 %v13335_v17  ;;  %6586 = vmatprep.subr.bf16.mxu1 %v13340_v32  ;;  %v13412_v17 = vld [vmem:[#allocation18 + $0x524] ss:$16 sps:$4 sm:$0xff]   ;;  %v13415_v32 = vld [vmem:[#allocation18 + $0xaec] ss:$16 sps:$4 sm:$0xff]  }
 0xb32   :  { %8429 = vmatprep.subr.bf16.mxu0 %v13343_v58  ;;  %v13410_v58 = vld [vmem:[#allocation18 + $0x520] ss:$16 sps:$4 sm:$0xff]  }
 0xb34   :  { %6587 = vmatpush1.bf16.msra.mxu1 %v13338_v6  ;;  %v13413_v6 = vld [vmem:[#allocation18 + $0xae8] ss:$16 sps:$4 sm:$0xff]  }
 0xb35   :  { %8430 = vmatpush1.bf16.msra.mxu0 %v13341_v33  ;;  %6588 = vmatprep.subr.bf16.mxu1 %v13346_v36  ;;  %v13418_v33 = vld [vmem:[#allocation18 + $0x544] ss:$16 sps:$4 sm:$0xff]   ;;  %v13421_v36 = vld [vmem:[#allocation18 + $0xb0c] ss:$16 sps:$4 sm:$0xff]  }
 0xb36   :  { %8431 = vmatprep.subr.bf16.mxu0 %v13349_v4  ;;  %v13416_v4 = vld [vmem:[#allocation18 + $0x540] ss:$16 sps:$4 sm:$0xff]  }
 0xb38   :  { %6589 = vmatpush1.bf16.msra.mxu1 %v13344_v8  ;;  %v13419_v8 = vld [vmem:[#allocation18 + $0xb08] ss:$16 sps:$4 sm:$0xff]  }
 0xb39   :  { %8432 = vmatpush1.bf16.msra.mxu0 %v13347_v9  ;;  %6590 = vmatprep.subr.bf16.mxu1 %v13352_v44  ;;  %v13424_v9 = vld [vmem:[#allocation18 + $0x564] ss:$16 sps:$4 sm:$0xff]   ;;  %v13427_v44 = vld [vmem:[#allocation18 + $0xb2c] ss:$16 sps:$4 sm:$0xff]  }
 0xb3a   :  { %8433 = vmatprep.subr.bf16.mxu0 %v13355_v29  ;;  %v13422_v29 = vld [vmem:[#allocation18 + $0x560] ss:$16 sps:$4 sm:$0xff]  }
 0xb3c   :  { %6591 = vmatpush1.bf16.msra.mxu1 %v13350_v59  ;;  %v13425_v59 = vld [vmem:[#allocation18 + $0xb28] ss:$16 sps:$4 sm:$0xff]  }
 0xb3d   :  { %8434 = vmatpush1.bf16.msra.mxu0 %v13353_v43  ;;  %6988 = vmatprep.subr.bf16.mxu1 %v13358_v51  ;;  %v13430_v43 = vld [vmem:[#allocation18 + $0x584] ss:$16 sps:$4 sm:$0xff]   ;;  %v13433_v51 = vld [vmem:[#allocation18 + $0xb4c] ss:$16 sps:$4 sm:$0xff]  }
 0xb3e   :  { %8435 = vmatprep.subr.bf16.mxu0 %v13361_v12  ;;  %v13428_v12 = vld [vmem:[#allocation18 + $0x580] ss:$16 sps:$4 sm:$0xff]  }
 0xb3f   :  { %6593 = vmatmul.mubr.bf16.vlgmr.msra.gmra.mrb[92].mxu1 %v14972_v7  ;;  %v13376_v7 = vld [vmem:[#allocation18 + $0x464] ss:$16 sps:$4 sm:$0xff]  }
 0xb40   :  { %6989 = vmatpush1.bf16.msra.mxu1 %v13356_v11  ;;  %7020 = vmatprep.mubr.bf16.mxu1 %v14984_v34  ;;  %v13431_v11 = vld [vmem:[#allocation18 + $0xb48] ss:$16 sps:$4 sm:$0xff]  }
 0xb41   :  { %8436 = vmatpush1.bf16.msra.mxu0 %v13359_v10  ;;  %6990 = vmatprep.subr.bf16.mxu1 %v13364_v25  ;;  %v13436_v10 = vld [vmem:[#allocation18 + $0x5a4] ss:$16 sps:$4 sm:$0xff]   ;;  %v13439_v25 = vld [vmem:[#allocation18 + $0xb6c] ss:$16 sps:$4 sm:$0xff]  }
 0xb42   :  { %8437 = vmatprep.subr.bf16.mxu0 %v13367_v42  ;;  %v13434_v42 = vld [vmem:[#allocation18 + $0x5a0] ss:$16 sps:$4 sm:$0xff]  }
 0xb44   :  { %6991 = vmatpush1.bf16.msra.mxu1 %v13362_v45  ;;  %v13437_v45 = vld [vmem:[#allocation18 + $0xb68] ss:$16 sps:$4 sm:$0xff]  }
 0xb45   :  { %8438 = vmatpush1.bf16.msra.mxu0 %v13365_v54  ;;  %6992 = vmatprep.subr.bf16.mxu1 %v13370_v48  ;;  %v13442_v54 = vld [vmem:[#allocation18 + $0x5c4] ss:$16 sps:$4 sm:$0xff]   ;;  %v13445_v48 = vld [vmem:[#allocation18 + $0xb8c] ss:$16 sps:$4 sm:$0xff]  }
 0xb46   :  { %8448 = vmatprep.subr.bf16.mxu0 %v13373_v30  ;;  %v13440_v30 = vld [vmem:[#allocation18 + $0x5c0] ss:$16 sps:$4 sm:$0xff]  }
 0xb48   :  { %8440 = vmatmul.mubr.bf16.vlgmr.msra.gmra.mrb[44].mxu0 %v14990_v1  ;;  %6993 = vmatpush1.bf16.msra.mxu1 %v13368_v61  ;;  %v13443_v61 = vld [vmem:[#allocation18 + $0xb88] ss:$16 sps:$4 sm:$0xff]  }
 0xb49   :  { %8449 = vmatpush1.bf16.msra.mxu0 %v13371_v24  ;;  %8480 = vmatprep.mubr.bf16.mxu0 %v14978_v23  ;;  %v13397_v23 = vld [vmem:[#allocation18 + $0xa8c] ss:$16 sps:$4 sm:$0xff]   ;;  %v13448_v24 = vld [vmem:[#allocation18 + $0x5e4] ss:$16 sps:$4 sm:$0xff]  }
 0xb4a   :  { %6994 = vmatprep.subr.bf16.mxu1 %v13376_v7  ;;  %8450 = vmatprep.subr.bf16.mxu0 %v13379_v28  ;;  %v13451_v7 = vld [vmem:[#allocation18 + $0xbac] ss:$16 sps:$4 sm:$0xff]   ;;  %v13446_v28 = vld [vmem:[#allocation18 + $0x5e0] ss:$16 sps:$4 sm:$0xff]  }
 0xb4c   :  { %6995 = vmatpush1.bf16.msra.mxu1 %v13374_v21  ;;  %v13449_v21 = vld [vmem:[#allocation18 + $0xba8] ss:$16 sps:$4 sm:$0xff]  }
 0xb4d   :  { %8451 = vmatpush1.bf16.msra.mxu0 %v13377_v31  ;;  %6996 = vmatprep.subr.bf16.mxu1 %v13382_v22  ;;  %v13454_v31 = vld [vmem:[#allocation18 + $0x40c] ss:$16 sps:$4 sm:$0xff]  }
 0xb4e   :  { %8452 = vmatprep.subr.bf16.mxu0 %v13385_v13  ;;  %v13457_v22 = vld [vmem:[#allocation18 + $0xbcc] ss:$16 sps:$4 sm:$0xff]   ;;  %v13452_v13 = vld [vmem:[#allocation18 + $0x408] ss:$16 sps:$4 sm:$0xff]  }
 0xb50   :  { %6997 = vmatpush1.bf16.msra.mxu1 %v13380_v50  ;;  %v14996_v50 = vpack.c.bf16 %v14927_v18, %v14927_v18  ;;  %v13464_v18 = vld [vmem:[#allocation18 + $0x448] ss:$16 sps:$4 sm:$0xff]  }
 0xb51   :  { %8453 = vmatpush1.bf16.msra.mxu0 %v13383_v19  ;;  %6998 = vmatprep.subr.bf16.mxu1 %v13388_v14  ;;  %v13455_v19 = vld [vmem:[#allocation18 + $0xbc8] ss:$16 sps:$4 sm:$0xff]   ;;  %v13460_v14 = vld [vmem:[#allocation18 + $0x42c] ss:$16 sps:$4 sm:$0xff]  }
 0xb52   :  { %8454 = vmatprep.subr.bf16.mxu0 %v13391_v3  ;;  %v13463_v3 = vld [vmem:[#allocation18 + $0xbec] ss:$16 sps:$4 sm:$0xff]  }
 0xb54   :  { %6999 = vmatpush1.bf16.msra.mxu1 %v13386_v26  ;;  %v13458_v26 = vld [vmem:[#allocation18 + $0x428] ss:$16 sps:$4 sm:$0xff]  }
 0xb55   :  { %8455 = vmatpush1.bf16.msra.mxu0 %v13389_v20  ;;  %7000 = vmatprep.subr.bf16.mxu1 %v13394_v35  ;;  %v13461_v20 = vld [vmem:[#allocation18 + $0xbe8] ss:$16 sps:$4 sm:$0xff]   ;;  %v13466_v35 = vld [vmem:[#allocation18 + $0x44c] ss:$16 sps:$4 sm:$0xff]  }
 0xb56   :  { %8456 = vmatprep.subr.bf16.mxu0 %v13397_v23  ;;  %v13469_v23 = vld [vmem:[#allocation18 + $0xc04] ss:$16 sps:$4 sm:$0xff]  }
 0xb58   :  { %7001 = vmatpush1.bf16.msra.mxu1 %v13392_v52  ;;  %v13467_v52 = vld [vmem:[#allocation18 + $0xc00] ss:$16 sps:$4 sm:$0xff]  }
 0xb59   :  { %8457 = vmatpush1.bf16.msra.mxu0 %v13395_v55  ;;  %7002 = vmatprep.subr.bf16.mxu1 %v13400_v40  ;;  %v13472_v55 = vld [vmem:[#allocation18 + $0x46c] ss:$16 sps:$4 sm:$0xff]   ;;  %v13475_v40 = vld [vmem:[#allocation18 + $0xc24] ss:$16 sps:$4 sm:$0xff]  }
 0xb5a   :  { %8458 = vmatprep.subr.bf16.mxu0 %v13403_v0  ;;  %v15002_v0 = vpack.c.bf16 %v14960_v60, %v14960_v60  ;;  %v13487_v60 = vld [vmem:[#allocation18 + $0xc64] ss:$16 sps:$4 sm:$0xff]  }
 0xb5c   :  { %7003 = vmatpush1.bf16.msra.mxu1 %v13398_v41  ;;  %v13473_v41 = vld [vmem:[#allocation18 + $0xc20] ss:$16 sps:$4 sm:$0xff]  }
 0xb5d   :  { %8459 = vmatpush1.bf16.msra.mxu0 %v13401_v5  ;;  %7004 = vmatprep.subr.bf16.mxu1 %v13406_v16  ;;  %v13478_v5 = vld [vmem:[#allocation18 + $0x48c] ss:$16 sps:$4 sm:$0xff]   ;;  %v13481_v16 = vld [vmem:[#allocation18 + $0xc44] ss:$16 sps:$4 sm:$0xff]  }
 0xb5e   :  { %8460 = vmatprep.subr.bf16.mxu0 %v13409_v63  ;;  %v13476_v63 = vld [vmem:[#allocation18 + $0x488] ss:$16 sps:$4 sm:$0xff]  }
 0xb60   :  { %7005 = vmatpush1.bf16.msra.mxu1 %v13404_v46  ;;  %v13479_v46 = vld [vmem:[#allocation18 + $0xc40] ss:$16 sps:$4 sm:$0xff]  }
 0xb61   :  { %8461 = vmatpush1.bf16.msra.mxu0 %v13407_v53  ;;  %7006 = vmatprep.subr.bf16.mxu1 %v13412_v17  ;;  %v13484_v53 = vld [vmem:[#allocation18 + $0x4ac] ss:$16 sps:$4 sm:$0xff]   ;;  %v13485_v17 = vld [vmem:[#allocation18 + $0xc60] ss:$16 sps:$4 sm:$0xff]  }
 0xb62   :  { %8462 = vmatprep.subr.bf16.mxu0 %v13415_v32  ;;  %v13490_v32 = vld [vmem:[#allocation18 + $0x4cc] ss:$16 sps:$4 sm:$0xff]  }
 0xb64   :  { %7007 = vmatpush1.bf16.msra.mxu1 %v13410_v58  ;;  %v13493_v58 = vld [vmem:[#allocation18 + $0xc84] ss:$16 sps:$4 sm:$0xff]  }
 0xb65   :  { %8463 = vmatpush1.bf16.msra.mxu0 %v13413_v6  ;;  %7008 = vmatprep.subr.bf16.mxu1 %v13418_v33  ;;  %v13488_v6 = vld [vmem:[#allocation18 + $0x4c8] ss:$16 sps:$4 sm:$0xff]   ;;  %v13491_v33 = vld [vmem:[#allocation18 + $0xc80] ss:$16 sps:$4 sm:$0xff]  }
 0xb66   :  { %8464 = vmatprep.subr.bf16.mxu0 %v13421_v36  ;;  %v13496_v36 = vld [vmem:[#allocation18 + $0x4ec] ss:$16 sps:$4 sm:$0xff]  }
 0xb68   :  { %7009 = vmatpush1.bf16.msra.mxu1 %v13416_v4  ;;  %v13499_v4 = vld [vmem:[#allocation18 + $0xca4] ss:$16 sps:$4 sm:$0xff]  }
 0xb69   :  { %8465 = vmatpush1.bf16.msra.mxu0 %v13419_v8  ;;  %7010 = vmatprep.subr.bf16.mxu1 %v13424_v9  ;;  %v13494_v8 = vld [vmem:[#allocation18 + $0x4e8] ss:$16 sps:$4 sm:$0xff]   ;;  %v13497_v9 = vld [vmem:[#allocation18 + $0xca0] ss:$16 sps:$4 sm:$0xff]  }
 0xb6a   :  { %8466 = vmatprep.subr.bf16.mxu0 %v13427_v44  ;;  %v13502_v44 = vld [vmem:[#allocation18 + $0x50c] ss:$16 sps:$4 sm:$0xff]  }
 0xb6c   :  { %7011 = vmatpush1.bf16.msra.mxu1 %v13422_v29  ;;  %v13505_v29 = vld [vmem:[#allocation18 + $0xcc4] ss:$16 sps:$4 sm:$0xff]  }
 0xb6d   :  { %8467 = vmatpush1.bf16.msra.mxu0 %v13425_v59  ;;  %7012 = vmatprep.subr.bf16.mxu1 %v13430_v43  ;;  %v13500_v59 = vld [vmem:[#allocation18 + $0x508] ss:$16 sps:$4 sm:$0xff]   ;;  %v13503_v43 = vld [vmem:[#allocation18 + $0xcc0] ss:$16 sps:$4 sm:$0xff]  }
 0xb6e   :  { %8468 = vmatprep.subr.bf16.mxu0 %v13433_v51  ;;  %v13508_v51 = vld [vmem:[#allocation18 + $0x52c] ss:$16 sps:$4 sm:$0xff]  }
 0xb70   :  { %7013 = vmatpush1.bf16.msra.mxu1 %v13428_v12  ;;  %v13511_v12 = vld [vmem:[#allocation18 + $0xce4] ss:$16 sps:$4 sm:$0xff]  }
 0xb71   :  { %8469 = vmatpush1.bf16.msra.mxu0 %v13431_v11  ;;  %7014 = vmatprep.subr.bf16.mxu1 %v13436_v10  ;;  %v13506_v11 = vld [vmem:[#allocation18 + $0x528] ss:$16 sps:$4 sm:$0xff]   ;;  %v13509_v10 = vld [vmem:[#allocation18 + $0xce0] ss:$16 sps:$4 sm:$0xff]  }
 0xb72   :  { %8470 = vmatprep.subr.bf16.mxu0 %v13439_v25  ;;  %v13514_v25 = vld [vmem:[#allocation18 + $0x54c] ss:$16 sps:$4 sm:$0xff]  }
 0xb74   :  { %7015 = vmatpush1.bf16.msra.mxu1 %v13434_v42  ;;  %v13517_v42 = vld [vmem:[#allocation18 + $0xd04] ss:$16 sps:$4 sm:$0xff]  }
 0xb75   :  { %8471 = vmatpush1.bf16.msra.mxu0 %v13437_v45  ;;  %7016 = vmatprep.subr.bf16.mxu1 %v13442_v54  ;;  %v13512_v45 = vld [vmem:[#allocation18 + $0x548] ss:$16 sps:$4 sm:$0xff]   ;;  %v13515_v54 = vld [vmem:[#allocation18 + $0xd00] ss:$16 sps:$4 sm:$0xff]  }
 0xb76   :  { %8472 = vmatprep.subr.bf16.mxu0 %v13445_v48  ;;  %v13520_v48 = vld [vmem:[#allocation18 + $0x56c] ss:$16 sps:$4 sm:$0xff]  }
 0xb78   :  { %7017 = vmatpush1.bf16.msra.mxu1 %v13440_v30  ;;  %v13523_v30 = vld [vmem:[#allocation18 + $0xd24] ss:$16 sps:$4 sm:$0xff]  }
 0xb79   :  { %8473 = vmatpush1.bf16.msra.mxu0 %v13443_v61  ;;  %7018 = vmatprep.subr.bf16.mxu1 %v13448_v24  ;;  %v13518_v61 = vld [vmem:[#allocation18 + $0x568] ss:$16 sps:$4 sm:$0xff]   ;;  %v13521_v24 = vld [vmem:[#allocation18 + $0xd20] ss:$16 sps:$4 sm:$0xff]  }
 0xb7a   :  { %8474 = vmatprep.subr.bf16.mxu0 %v13451_v7  ;;  %v13526_v7 = vld [vmem:[#allocation18 + $0x58c] ss:$16 sps:$4 sm:$0xff]  }
 0xb7c   :  { %7019 = vmatpush1.bf16.msra.mxu1 %v13446_v28  ;;  %v13529_v28 = vld [vmem:[#allocation18 + $0xd44] ss:$16 sps:$4 sm:$0xff]  }
 0xb7d   :  { %8475 = vmatpush1.bf16.msra.mxu0 %v13449_v21  ;;  %7029 = vmatprep.subr.bf16.mxu1 %v13454_v31  ;;  %v13524_v21 = vld [vmem:[#allocation18 + $0x588] ss:$16 sps:$4 sm:$0xff]   ;;  %v13527_v31 = vld [vmem:[#allocation18 + $0xd40] ss:$16 sps:$4 sm:$0xff]  }
 0xb7e   :  { %8476 = vmatprep.subr.bf16.mxu0 %v13457_v22  ;;  %v13532_v22 = vld [vmem:[#allocation18 + $0x5ac] ss:$16 sps:$4 sm:$0xff]  }
 0xb7f   :  { %7021 = vmatmul.mubr.bf16.vlgmr.msra.gmra.mrb[88].mxu1 %v14996_v50 }
 0xb80   :  { %7030 = vmatpush1.bf16.msra.mxu1 %v13452_v13  ;;  %7061 = vmatprep.mubr.bf16.mxu1 %v14984_v34  ;;  %v13470_v34 = vld [vmem:[#allocation18 + $0x468] ss:$16 sps:$4 sm:$0xff]   ;;  %v13535_v13 = vld [vmem:[#allocation18 + $0xd64] ss:$16 sps:$4 sm:$0xff]  }
 0xb81   :  { %8477 = vmatpush1.bf16.msra.mxu0 %v13455_v19  ;;  %7031 = vmatprep.subr.bf16.mxu1 %v13460_v14  ;;  %v13530_v19 = vld [vmem:[#allocation18 + $0x5a8] ss:$16 sps:$4 sm:$0xff]   ;;  %v13533_v14 = vld [vmem:[#allocation18 + $0xd60] ss:$16 sps:$4 sm:$0xff]  }
 0xb82   :  { %8478 = vmatprep.subr.bf16.mxu0 %v13463_v3  ;;  %v13538_v3 = vld [vmem:[#allocation18 + $0x5cc] ss:$16 sps:$4 sm:$0xff]  }
 0xb84   :  { %7032 = vmatpush1.bf16.msra.mxu1 %v13458_v26  ;;  %v13541_v26 = vld [vmem:[#allocation18 + $0xd84] ss:$16 sps:$4 sm:$0xff]  }
 0xb85   :  { %8479 = vmatpush1.bf16.msra.mxu0 %v13461_v20  ;;  %7033 = vmatprep.subr.bf16.mxu1 %v13466_v35  ;;  %v13536_v20 = vld [vmem:[#allocation18 + $0x5c8] ss:$16 sps:$4 sm:$0xff]   ;;  %v13539_v35 = vld [vmem:[#allocation18 + $0xd80] ss:$16 sps:$4 sm:$0xff]  }
 0xb86   :  { %8880 = vmatprep.subr.bf16.mxu0 %v13469_v23  ;;  %v13544_v23 = vld [vmem:[#allocation18 + $0x5ec] ss:$16 sps:$4 sm:$0xff]  }
 0xb88   :  { %8481 = vmatmul.mubr.bf16.vlgmr.msra.gmra.mrb[40].mxu0 %v14990_v1  ;;  %7034 = vmatpush1.bf16.msra.mxu1 %v13464_v18  ;;  %v13482_v1 = vld [vmem:[#allocation18 + $0x4a8] ss:$16 sps:$4 sm:$0xff]   ;;  %v13547_v18 = vld [vmem:[#allocation18 + $0xda4] ss:$16 sps:$4 sm:$0xff]  }
 0xb89   :  { %8881 = vmatpush1.bf16.msra.mxu0 %v13467_v52  ;;  %8912 = vmatprep.mubr.bf16.mxu0 %v15002_v0  ;;  %v13542_v52 = vld [vmem:[#allocation18 + $0x5e8] ss:$16 sps:$4 sm:$0xff]  }
 0xb8a   :  { %7035 = vmatprep.subr.bf16.mxu1 %v13472_v55  ;;  %8882 = vmatprep.subr.bf16.mxu0 %v13475_v40  ;;  %v13545_v55 = vld [vmem:[#allocation18 + $0xda0] ss:$16 sps:$4 sm:$0xff]   ;;  %v13550_v40 = vld [vmem:[#allocation18 + $0x604] ss:$16 sps:$4 sm:$0xff]  }
 0xb8c   :  { %7036 = vmatpush1.bf16.msra.mxu1 %v13470_v34  ;;  %v13553_v34 = vld [vmem:[#allocation18 + $0xdc4] ss:$16 sps:$4 sm:$0xff]  }
 0xb8d   :  { %8883 = vmatpush1.bf16.msra.mxu0 %v13473_v41  ;;  %7037 = vmatprep.subr.bf16.mxu1 %v13478_v5  ;;  %v13548_v41 = vld [vmem:[#allocation18 + $0x600] ss:$16 sps:$4 sm:$0xff]  }
 0xb8e   :  { %8884 = vmatprep.subr.bf16.mxu0 %v13481_v16  ;;  %v13551_v5 = vld [vmem:[#allocation18 + $0xdc0] ss:$16 sps:$4 sm:$0xff]   ;;  %v13556_v16 = vld [vmem:[#allocation18 + $0x624] ss:$16 sps:$4 sm:$0xff]  }
 0xb90   :  { %7038 = vmatpush1.bf16.msra.mxu1 %v13476_v63  ;;  %v13559_v63 = vld [vmem:[#allocation18 + $0xde4] ss:$16 sps:$4 sm:$0xff]  }
 0xb91   :  { %8885 = vmatpush1.bf16.msra.mxu0 %v13479_v46  ;;  %7039 = vmatprep.subr.bf16.mxu1 %v13484_v53  ;;  %v13554_v46 = vld [vmem:[#allocation18 + $0x620] ss:$16 sps:$4 sm:$0xff]  }
 0xb92   :  { %8886 = vmatprep.subr.bf16.mxu0 %v13487_v60  ;;  %v13557_v53 = vld [vmem:[#allocation18 + $0xde0] ss:$16 sps:$4 sm:$0xff]   ;;  %v13562_v60 = vld [vmem:[#allocation18 + $0x644] ss:$16 sps:$4 sm:$0xff]  }
 0xb94   :  { %7040 = vmatpush1.bf16.msra.mxu1 %v13482_v1  ;;  %v13565_v1 = vld [vmem:[#allocation18 + $0xc0c] ss:$16 sps:$4 sm:$0xff]  }
 0xb95   :  { %8887 = vmatpush1.bf16.msra.mxu0 %v13485_v17  ;;  %7041 = vmatprep.subr.bf16.mxu1 %v13490_v32  ;;  %v13560_v17 = vld [vmem:[#allocation18 + $0x640] ss:$16 sps:$4 sm:$0xff]   ;;  %v13563_v32 = vld [vmem:[#allocation18 + $0xc08] ss:$16 sps:$4 sm:$0xff]  }
 0xb96   :  { %8888 = vmatprep.subr.bf16.mxu0 %v13493_v58  ;;  %v15010_v58 = vpack.c.bf16 %v14958_v56, %v14958_v56  ;;  %v13575_v56 = vld [vmem:[#allocation18 + $0xc48] ss:$16 sps:$4 sm:$0xff]  }
 0xb98   :  { %7042 = vmatpush1.bf16.msra.mxu1 %v13488_v6  ;;  %v13571_v6 = vld [vmem:[#allocation18 + $0xc2c] ss:$16 sps:$4 sm:$0xff]  }
 0xb99   :  { %8889 = vmatpush1.bf16.msra.mxu0 %v13491_v33  ;;  %7043 = vmatprep.subr.bf16.mxu1 %v13496_v36  ;;  %v13569_v33 = vld [vmem:[#allocation18 + $0xc28] ss:$16 sps:$4 sm:$0xff]   ;;  %v13574_v36 = vld [vmem:[#allocation18 + $0x684] ss:$16 sps:$4 sm:$0xff]  }
 0xb9a   :  { %8890 = vmatprep.subr.bf16.mxu0 %v13499_v4  ;;  %v13577_v4 = vld [vmem:[#allocation18 + $0xc4c] ss:$16 sps:$4 sm:$0xff]  }
 0xb9c   :  { %7044 = vmatpush1.bf16.msra.mxu1 %v13494_v8  ;;  %v13572_v8 = vld [vmem:[#allocation18 + $0x680] ss:$16 sps:$4 sm:$0xff]  }
 0xb9d   :  { %8891 = vmatpush1.bf16.msra.mxu0 %v13497_v9  ;;  %7045 = vmatprep.subr.bf16.mxu1 %v13502_v44  ;;  %v13580_v9 = vld [vmem:[#allocation18 + $0x6a4] ss:$16 sps:$4 sm:$0xff]   ;;  %v13583_v44 = vld [vmem:[#allocation18 + $0xc6c] ss:$16 sps:$4 sm:$0xff]  }
 0xb9e   :  { %8892 = vmatprep.subr.bf16.mxu0 %v13505_v29  ;;  %v13578_v29 = vld [vmem:[#allocation18 + $0x6a0] ss:$16 sps:$4 sm:$0xff]  }
 0xba0   :  { %7046 = vmatpush1.bf16.msra.mxu1 %v13500_v59  ;;  %v13581_v59 = vld [vmem:[#allocation18 + $0xc68] ss:$16 sps:$4 sm:$0xff]  }
 0xba1   :  { %8893 = vmatpush1.bf16.msra.mxu0 %v13503_v43  ;;  %7047 = vmatprep.subr.bf16.mxu1 %v13508_v51  ;;  %v13586_v43 = vld [vmem:[#allocation18 + $0x6c4] ss:$16 sps:$4 sm:$0xff]   ;;  %v13584_v51 = vld [vmem:[#allocation18 + $0x6c0] ss:$16 sps:$4 sm:$0xff]  }
 0xba2   :  { %8894 = vmatprep.subr.bf16.mxu0 %v13511_v12  ;;  %v13587_v12 = vld [vmem:[#allocation18 + $0xc88] ss:$16 sps:$4 sm:$0xff]  }
 0xba4   :  { %7048 = vmatpush1.bf16.msra.mxu1 %v13506_v11  ;;  %v13592_v11 = vld [vmem:[#allocation18 + $0x6e4] ss:$16 sps:$4 sm:$0xff]  }
 0xba5   :  { %8895 = vmatpush1.bf16.msra.mxu0 %v13509_v10  ;;  %7049 = vmatprep.subr.bf16.mxu1 %v13514_v25  ;;  %v13595_v10 = vld [vmem:[#allocation18 + $0xcac] ss:$16 sps:$4 sm:$0xff]   ;;  %v13590_v25 = vld [vmem:[#allocation18 + $0x6e0] ss:$16 sps:$4 sm:$0xff]  }
 0xba6   :  { %8896 = vmatprep.subr.bf16.mxu0 %v13517_v42  ;;  %v13593_v42 = vld [vmem:[#allocation18 + $0xca8] ss:$16 sps:$4 sm:$0xff]  }
 0xba8   :  { %7050 = vmatpush1.bf16.msra.mxu1 %v13512_v45  ;;  %v13598_v45 = vld [vmem:[#allocation18 + $0x704] ss:$16 sps:$4 sm:$0xff]  }
 0xba9   :  { %8897 = vmatpush1.bf16.msra.mxu0 %v13515_v54  ;;  %7051 = vmatprep.subr.bf16.mxu1 %v13520_v48  ;;  %v13601_v54 = vld [vmem:[#allocation18 + $0xccc] ss:$16 sps:$4 sm:$0xff]   ;;  %v13596_v48 = vld [vmem:[#allocation18 + $0x700] ss:$16 sps:$4 sm:$0xff]  }
 0xbaa   :  { %8898 = vmatprep.subr.bf16.mxu0 %v13523_v30  ;;  %v13599_v30 = vld [vmem:[#allocation18 + $0xcc8] ss:$16 sps:$4 sm:$0xff]  }
 0xbac   :  { %7052 = vmatpush1.bf16.msra.mxu1 %v13518_v61  ;;  %v13604_v61 = vld [vmem:[#allocation18 + $0x724] ss:$16 sps:$4 sm:$0xff]  }
 0xbad   :  { %8899 = vmatpush1.bf16.msra.mxu0 %v13521_v24  ;;  %7053 = vmatprep.subr.bf16.mxu1 %v13526_v7  ;;  %v13607_v24 = vld [vmem:[#allocation18 + $0xcec] ss:$16 sps:$4 sm:$0xff]   ;;  %v13602_v7 = vld [vmem:[#allocation18 + $0x720] ss:$16 sps:$4 sm:$0xff]  }
 0xbae   :  { %8900 = vmatprep.subr.bf16.mxu0 %v13529_v28  ;;  %v13605_v28 = vld [vmem:[#allocation18 + $0xce8] ss:$16 sps:$4 sm:$0xff]  }
 0xbb0   :  { %7054 = vmatpush1.bf16.msra.mxu1 %v13524_v21  ;;  %v13610_v21 = vld [vmem:[#allocation18 + $0x744] ss:$16 sps:$4 sm:$0xff]  }
 0xbb1   :  { %8901 = vmatpush1.bf16.msra.mxu0 %v13527_v31  ;;  %7055 = vmatprep.subr.bf16.mxu1 %v13532_v22  ;;  %v13613_v31 = vld [vmem:[#allocation18 + $0xd0c] ss:$16 sps:$4 sm:$0xff]   ;;  %v13608_v22 = vld [vmem:[#allocation18 + $0x740] ss:$16 sps:$4 sm:$0xff]  }
 0xbb2   :  { %8902 = vmatprep.subr.bf16.mxu0 %v13535_v13  ;;  %v13611_v13 = vld [vmem:[#allocation18 + $0xd08] ss:$16 sps:$4 sm:$0xff]  }
 0xbb4   :  { %7056 = vmatpush1.bf16.msra.mxu1 %v13530_v19  ;;  %v13616_v19 = vld [vmem:[#allocation18 + $0x764] ss:$16 sps:$4 sm:$0xff]  }
 0xbb5   :  { %8903 = vmatpush1.bf16.msra.mxu0 %v13533_v14  ;;  %7057 = vmatprep.subr.bf16.mxu1 %v13538_v3  ;;  %v13619_v14 = vld [vmem:[#allocation18 + $0xd2c] ss:$16 sps:$4 sm:$0xff]   ;;  %v13614_v3 = vld [vmem:[#allocation18 + $0x760] ss:$16 sps:$4 sm:$0xff]  }
 0xbb6   :  { %8904 = vmatprep.subr.bf16.mxu0 %v13541_v26  ;;  %v13617_v26 = vld [vmem:[#allocation18 + $0xd28] ss:$16 sps:$4 sm:$0xff]  }
 0xbb8   :  { %7058 = vmatpush1.bf16.msra.mxu1 %v13536_v20  ;;  %v13622_v20 = vld [vmem:[#allocation18 + $0x784] ss:$16 sps:$4 sm:$0xff]  }
 0xbb9   :  { %8905 = vmatpush1.bf16.msra.mxu0 %v13539_v35  ;;  %7059 = vmatprep.subr.bf16.mxu1 %v13544_v23  ;;  %v13625_v35 = vld [vmem:[#allocation18 + $0xd4c] ss:$16 sps:$4 sm:$0xff]   ;;  %v13620_v23 = vld [vmem:[#allocation18 + $0x780] ss:$16 sps:$4 sm:$0xff]  }
 0xbba   :  { %8906 = vmatprep.subr.bf16.mxu0 %v13547_v18  ;;  %v13623_v18 = vld [vmem:[#allocation18 + $0xd48] ss:$16 sps:$4 sm:$0xff]  }
 0xbbc   :  { %7060 = vmatpush1.bf16.msra.mxu1 %v13542_v52  ;;  %v13628_v52 = vld [vmem:[#allocation18 + $0x7a4] ss:$16 sps:$4 sm:$0xff]  }
 0xbbd   :  { %8907 = vmatpush1.bf16.msra.mxu0 %v13545_v55  ;;  %7461 = vmatprep.subr.bf16.mxu1 %v13550_v40  ;;  %v13631_v55 = vld [vmem:[#allocation18 + $0xd6c] ss:$16 sps:$4 sm:$0xff]   ;;  %v13626_v40 = vld [vmem:[#allocation18 + $0x7a0] ss:$16 sps:$4 sm:$0xff]  }
 0xbbe   :  { %8908 = vmatprep.subr.bf16.mxu0 %v13553_v34  ;;  %v13629_v34 = vld [vmem:[#allocation18 + $0xd68] ss:$16 sps:$4 sm:$0xff]  }
 0xbbf   :  { %7062 = vmatmul.mubr.bf16.vlgmr.msra.gmra.mrb[92].mxu1 %v14996_v50  ;;  %v13568_v50 = vld [vmem:[#allocation18 + $0x664] ss:$16 sps:$4 sm:$0xff]  }
 0xbc0   :  { %7462 = vmatpush1.bf16.msra.mxu1 %v13548_v41  ;;  %7493 = vmatprep.mubr.bf16.mxu1 %v14931_v49  ;;  %v13566_v49 = vld [vmem:[#allocation18 + $0x660] ss:$16 sps:$4 sm:$0xff]   ;;  %v13634_v41 = vld [vmem:[#allocation18 + $0x7c4] ss:$16 sps:$4 sm:$0xff]  }
 0xbc1   :  { %8909 = vmatpush1.bf16.msra.mxu0 %v13551_v5  ;;  %7463 = vmatprep.subr.bf16.mxu1 %v13556_v16  ;;  %v13637_v5 = vld [vmem:[#allocation18 + $0xd8c] ss:$16 sps:$4 sm:$0xff]   ;;  %v13632_v16 = vld [vmem:[#allocation18 + $0x7c0] ss:$16 sps:$4 sm:$0xff]  }
 0xbc2   :  { %8910 = vmatprep.subr.bf16.mxu0 %v13559_v63  ;;  %v13635_v63 = vld [vmem:[#allocation18 + $0xd88] ss:$16 sps:$4 sm:$0xff]  }
 0xbc4   :  { %7464 = vmatpush1.bf16.msra.mxu1 %v13554_v46  ;;  %v13640_v46 = vld [vmem:[#allocation18 + $0x7e4] ss:$16 sps:$4 sm:$0xff]  }
 0xbc5   :  { %8911 = vmatpush1.bf16.msra.mxu0 %v13557_v53  ;;  %7465 = vmatprep.subr.bf16.mxu1 %v13562_v60  ;;  %v13643_v53 = vld [vmem:[#allocation18 + $0xdac] ss:$16 sps:$4 sm:$0xff]   ;;  %v13638_v60 = vld [vmem:[#allocation18 + $0x7e0] ss:$16 sps:$4 sm:$0xff]  }
 0xbc6   :  { %8921 = vmatprep.subr.bf16.mxu0 %v13565_v1  ;;  %v13641_v1 = vld [vmem:[#allocation18 + $0xda8] ss:$16 sps:$4 sm:$0xff]  }
 0xbc8   :  { %8913 = vmatmul.mubr.bf16.vlgmr.msra.gmra.mrb[44].mxu0 %v15010_v58  ;;  %7466 = vmatpush1.bf16.msra.mxu1 %v13560_v17  ;;  %v13646_v17 = vld [vmem:[#allocation18 + $0xdcc] ss:$16 sps:$4 sm:$0xff]  }
 0xbc9   :  { %8922 = vmatpush1.bf16.msra.mxu0 %v13563_v32  ;;  %8953 = vmatprep.mubr.bf16.mxu0 %v15002_v0  ;;  %v13589_v0 = vld [vmem:[#allocation18 + $0xc8c] ss:$16 sps:$4 sm:$0xff]   ;;  %v13644_v32 = vld [vmem:[#allocation18 + $0xdc8] ss:$16 sps:$4 sm:$0xff]  }
 0xbca   :  { %7467 = vmatprep.subr.bf16.mxu1 %v13568_v50  ;;  %8923 = vmatprep.subr.bf16.mxu0 %v13571_v6  ;;  %v13649_v50 = vld [vmem:[#allocation18 + $0xdec] ss:$16 sps:$4 sm:$0xff]   ;;  %v13647_v6 = vld [vmem:[#allocation18 + $0xde8] ss:$16 sps:$4 sm:$0xff]  }
 0xbcc   :  { %7468 = vmatpush1.bf16.msra.mxu1 %v13566_v49  ;;  %v13652_v49 = vld [vmem:[#allocation18 + $0xe04] ss:$16 sps:$4 sm:$0xff]  }
 0xbcd   :  { %8924 = vmatpush1.bf16.msra.mxu0 %v13569_v33  ;;  %7469 = vmatprep.subr.bf16.mxu1 %v13574_v36  ;;  %v13650_v33 = vld [vmem:[#allocation18 + $0xe00] ss:$16 sps:$4 sm:$0xff]   ;;  %v13655_v36 = vld [vmem:[#allocation18 + $0xe24] ss:$16 sps:$4 sm:$0xff]  }
 0xbce   :  { %8925 = vmatprep.subr.bf16.mxu0 %v13577_v4  ;;  %v15017_v4 = vpack.c.bf16 %v14964_v62, %v14964_v62  ;;  %v13667_v62 = vld [vmem:[#allocation18 + $0xea4] ss:$16 sps:$4 sm:$0xff]  }
 0xbd0   :  { %7470 = vmatpush1.bf16.msra.mxu1 %v13572_v8  ;;  %v13653_v8 = vld [vmem:[#allocation18 + $0xe20] ss:$16 sps:$4 sm:$0xff]  }
 0xbd1   :  { %8926 = vmatpush1.bf16.msra.mxu0 %v13575_v56  ;;  %7471 = vmatprep.subr.bf16.mxu1 %v13580_v9  ;;  %v13656_v56 = vld [vmem:[#allocation18 + $0xe40] ss:$16 sps:$4 sm:$0xff]   ;;  %v13661_v9 = vld [vmem:[#allocation18 + $0xe64] ss:$16 sps:$4 sm:$0xff]  }
 0xbd2   :  { %8927 = vmatprep.subr.bf16.mxu0 %v13583_v44  ;;  %v13659_v44 = vld [vmem:[#allocation18 + $0xe60] ss:$16 sps:$4 sm:$0xff]  }
 0xbd4   :  { %7472 = vmatpush1.bf16.msra.mxu1 %v13578_v29  ;;  %v13664_v29 = vld [vmem:[#allocation18 + $0xe84] ss:$16 sps:$4 sm:$0xff]  }
 0xbd5   :  { %8928 = vmatpush1.bf16.msra.mxu0 %v13581_v59  ;;  %7473 = vmatprep.subr.bf16.mxu1 %v13586_v43  ;;  %v13662_v59 = vld [vmem:[#allocation18 + $0xe80] ss:$16 sps:$4 sm:$0xff]   ;;  %v13670_v43 = vld [vmem:[#allocation18 + $0xec4] ss:$16 sps:$4 sm:$0xff]  }
 0xbd6   :  { %8929 = vmatprep.subr.bf16.mxu0 %v13589_v0  ;;  %v13668_v0 = vld [vmem:[#allocation18 + $0xec0] ss:$16 sps:$4 sm:$0xff]  }
 0xbd8   :  { %7474 = vmatpush1.bf16.msra.mxu1 %v13584_v51  ;;  %v13673_v51 = vld [vmem:[#allocation18 + $0xee4] ss:$16 sps:$4 sm:$0xff]  }
 0xbd9   :  { %8930 = vmatpush1.bf16.msra.mxu0 %v13587_v12  ;;  %7475 = vmatprep.subr.bf16.mxu1 %v13592_v11  ;;  %v13671_v12 = vld [vmem:[#allocation18 + $0xee0] ss:$16 sps:$4 sm:$0xff]   ;;  %v13676_v11 = vld [vmem:[#allocation18 + $0xf04] ss:$16 sps:$4 sm:$0xff]  }
 0xbda   :  { %8931 = vmatprep.subr.bf16.mxu0 %v13595_v10  ;;  %v13674_v10 = vld [vmem:[#allocation18 + $0xf00] ss:$16 sps:$4 sm:$0xff]  }
 0xbdc   :  { %7476 = vmatpush1.bf16.msra.mxu1 %v13590_v25  ;;  %v13679_v25 = vld [vmem:[#allocation18 + $0xf24] ss:$16 sps:$4 sm:$0xff]  }
 0xbdd   :  { %8932 = vmatpush1.bf16.msra.mxu0 %v13593_v42  ;;  %7477 = vmatprep.subr.bf16.mxu1 %v13598_v45  ;;  %v13677_v42 = vld [vmem:[#allocation18 + $0xf20] ss:$16 sps:$4 sm:$0xff]   ;;  %v13682_v45 = vld [vmem:[#allocation18 + $0xf44] ss:$16 sps:$4 sm:$0xff]  }
 0xbde   :  { %8933 = vmatprep.subr.bf16.mxu0 %v13601_v54  ;;  %v13680_v54 = vld [vmem:[#allocation18 + $0xf40] ss:$16 sps:$4 sm:$0xff]  }
 0xbe0   :  { %7478 = vmatpush1.bf16.msra.mxu1 %v13596_v48  ;;  %v13685_v48 = vld [vmem:[#allocation18 + $0xf64] ss:$16 sps:$4 sm:$0xff]  }
 0xbe1   :  { %8934 = vmatpush1.bf16.msra.mxu0 %v13599_v30  ;;  %7479 = vmatprep.subr.bf16.mxu1 %v13604_v61  ;;  %v13683_v30 = vld [vmem:[#allocation18 + $0xf60] ss:$16 sps:$4 sm:$0xff]   ;;  %v13688_v61 = vld [vmem:[#allocation18 + $0xf84] ss:$16 sps:$4 sm:$0xff]  }
 0xbe2   :  { %8935 = vmatprep.subr.bf16.mxu0 %v13607_v24  ;;  %v13686_v24 = vld [vmem:[#allocation18 + $0xf80] ss:$16 sps:$4 sm:$0xff]  }
 0xbe4   :  { %7480 = vmatpush1.bf16.msra.mxu1 %v13602_v7  ;;  %v13691_v7 = vld [vmem:[#allocation18 + $0xfa4] ss:$16 sps:$4 sm:$0xff]  }
 0xbe5   :  { %8936 = vmatpush1.bf16.msra.mxu0 %v13605_v28  ;;  %7481 = vmatprep.subr.bf16.mxu1 %v13610_v21  ;;  %v13689_v28 = vld [vmem:[#allocation18 + $0xfa0] ss:$16 sps:$4 sm:$0xff]   ;;  %v13694_v21 = vld [vmem:[#allocation18 + $0xfc4] ss:$16 sps:$4 sm:$0xff]  }
 0xbe6   :  { %8937 = vmatprep.subr.bf16.mxu0 %v13613_v31  ;;  %v13692_v31 = vld [vmem:[#allocation18 + $0xfc0] ss:$16 sps:$4 sm:$0xff]  }
 0xbe8   :  { %7482 = vmatpush1.bf16.msra.mxu1 %v13608_v22  ;;  %v13697_v22 = vld [vmem:[#allocation18 + $0xfe4] ss:$16 sps:$4 sm:$0xff]  }
 0xbe9   :  { %8938 = vmatpush1.bf16.msra.mxu0 %v13611_v13  ;;  %7483 = vmatprep.subr.bf16.mxu1 %v13616_v19  ;;  %v13695_v13 = vld [vmem:[#allocation18 + $0xfe0] ss:$16 sps:$4 sm:$0xff]   ;;  %v13700_v19 = vld [vmem:[#allocation18 + $0xe0c] ss:$16 sps:$4 sm:$0xff]  }
 0xbea   :  { %8939 = vmatprep.subr.bf16.mxu0 %v13619_v14  ;;  %v13698_v14 = vld [vmem:[#allocation18 + $0xe08] ss:$16 sps:$4 sm:$0xff]  }
 0xbec   :  { %7484 = vmatpush1.bf16.msra.mxu1 %v13614_v3  ;;  %v15023_v3 = vpack.c.bf16 %v14962_v38, %v14962_v38  ;;  %v13710_v38 = vld [vmem:[#allocation18 + $0xe88] ss:$16 sps:$4 sm:$0xff]  }
 0xbed   :  { %8940 = vmatpush1.bf16.msra.mxu0 %v13617_v26  ;;  %7485 = vmatprep.subr.bf16.mxu1 %v13622_v20  ;;  %v13703_v26 = vld [vmem:[#allocation18 + $0xe2c] ss:$16 sps:$4 sm:$0xff]   ;;  %v13701_v20 = vld [vmem:[#allocation18 + $0xe28] ss:$16 sps:$4 sm:$0xff]  }
 0xbee   :  { %8941 = vmatprep.subr.bf16.mxu0 %v13625_v35  ;;  %v13706_v35 = vld [vmem:[#allocation18 + $0xe4c] ss:$16 sps:$4 sm:$0xff]  }
 0xbf0   :  { %7486 = vmatpush1.bf16.msra.mxu1 %v13620_v23  ;;  %v13704_v23 = vld [vmem:[#allocation18 + $0xe48] ss:$16 sps:$4 sm:$0xff]  }
 0xbf1   :  { %8942 = vmatpush1.bf16.msra.mxu0 %v13623_v18  ;;  %7487 = vmatprep.subr.bf16.mxu1 %v13628_v52  ;;  %v13709_v18 = vld [vmem:[#allocation18 + $0xe6c] ss:$16 sps:$4 sm:$0xff]   ;;  %v13707_v52 = vld [vmem:[#allocation18 + $0xe68] ss:$16 sps:$4 sm:$0xff]  }
 0xbf2   :  { %8943 = vmatprep.subr.bf16.mxu0 %v13631_v55  ;;  %v13712_v55 = vld [vmem:[#allocation18 + $0xe8c] ss:$16 sps:$4 sm:$0xff]  }
 0xbf4   :  { %7488 = vmatpush1.bf16.msra.mxu1 %v13626_v40  ;;  %v13715_v40 = vld [vmem:[#allocation18 + $0xeac] ss:$16 sps:$4 sm:$0xff]  }
 0xbf5   :  { %8944 = vmatpush1.bf16.msra.mxu0 %v13629_v34  ;;  %7489 = vmatprep.subr.bf16.mxu1 %v13634_v41  ;;  %v13713_v34 = vld [vmem:[#allocation18 + $0xea8] ss:$16 sps:$4 sm:$0xff]   ;;  %v13718_v41 = vld [vmem:[#allocation18 + $0xecc] ss:$16 sps:$4 sm:$0xff]  }
 0xbf6   :  { %8945 = vmatprep.subr.bf16.mxu0 %v13637_v5  ;;  %v13716_v5 = vld [vmem:[#allocation18 + $0xec8] ss:$16 sps:$4 sm:$0xff]  }
 0xbf8   :  { %7490 = vmatpush1.bf16.msra.mxu1 %v13632_v16  ;;  %v13721_v16 = vld [vmem:[#allocation18 + $0xeec] ss:$16 sps:$4 sm:$0xff]  }
 0xbf9   :  { %8946 = vmatpush1.bf16.msra.mxu0 %v13635_v63  ;;  %7491 = vmatprep.subr.bf16.mxu1 %v13640_v46  ;;  %v13719_v63 = vld [vmem:[#allocation18 + $0xee8] ss:$16 sps:$4 sm:$0xff]   ;;  %v13724_v46 = vld [vmem:[#allocation18 + $0xf0c] ss:$16 sps:$4 sm:$0xff]  }
 0xbfa   :  { %8947 = vmatprep.subr.bf16.mxu0 %v13643_v53  ;;  %v13722_v53 = vld [vmem:[#allocation18 + $0xf08] ss:$16 sps:$4 sm:$0xff]  }
 0xbfc   :  { %7492 = vmatpush1.bf16.msra.mxu1 %v13638_v60  ;;  %v13727_v60 = vld [vmem:[#allocation18 + $0xf2c] ss:$16 sps:$4 sm:$0xff]  }
 0xbfd   :  { %8948 = vmatpush1.bf16.msra.mxu0 %v13641_v1  ;;  %v13725_v1 = vld [vmem:[#allocation18 + $0xf28] ss:$16 sps:$4 sm:$0xff]  }
 0xbfe   :  { %8949 = vmatprep.subr.bf16.mxu0 %v13646_v17  ;;  %v13730_v17 = vld [vmem:[#allocation18 + $0xf4c] ss:$16 sps:$4 sm:$0xff]  }
 0xbff   :  { %7494 = vmatmul.mubr.bf16.vlgmr.msra.gmra.mrb[88].mxu1 %v14933_v27  ;;  %v13658_v27 = vld [vmem:[#allocation18 + $0xe44] ss:$16 sps:$4 sm:$0xff]  }
 0xc01   :  { %8950 = vmatpush1.bf16.msra.mxu0 %v13644_v32  ;;  %v13728_v32 = vld [vmem:[#allocation18 + $0xf48] ss:$16 sps:$4 sm:$0xff]  }
 0xc02   :  { %8951 = vmatprep.subr.bf16.mxu0 %v13649_v50  ;;  %v13733_v50 = vld [vmem:[#allocation18 + $0xf6c] ss:$16 sps:$4 sm:$0xff]  }
 0xc05   :  { %8952 = vmatpush1.bf16.msra.mxu0 %v13647_v6  ;;  %v13731_v6 = vld [vmem:[#allocation18 + $0xf68] ss:$16 sps:$4 sm:$0xff]  }
 0xc06   :  { %9353 = vmatprep.subr.bf16.mxu0 %v13652_v49  ;;  %v13736_v49 = vld [vmem:[#allocation18 + $0xf8c] ss:$16 sps:$4 sm:$0xff]  }
 0xc08   :  { %8954 = vmatmul.mubr.bf16.vlgmr.msra.gmra.mrb[40].mxu0 %v15010_v58  ;;  %v13665_v58 = vld [vmem:[#allocation18 + $0xea0] ss:$16 sps:$4 sm:$0xff]  }
 0xc09   :  { %9354 = vmatpush1.bf16.msra.mxu0 %v13650_v33  ;;  %9385 = vmatprep.mubr.bf16.mxu0 %v15017_v4  ;;  %v13734_v33 = vld [vmem:[#allocation18 + $0xf88] ss:$16 sps:$4 sm:$0xff]  }
 0xc0a   :  { %9355 = vmatprep.subr.bf16.mxu0 %v13655_v36  ;;  %v13739_v36 = vld [vmem:[#allocation18 + $0xfac] ss:$16 sps:$4 sm:$0xff]  }
 0xc0d   :  { %9356 = vmatpush1.bf16.msra.mxu0 %v13653_v8  ;;  %v13742_v8 = vld [vmem:[#allocation18 + $0xfcc] ss:$16 sps:$4 sm:$0xff]  }
 0xc0e   :  { %9357 = vmatprep.subr.bf16.mxu0 %v13658_v27  ;;  %v13740_v27 = vld [vmem:[#allocation18 + $0xfc8] ss:$16 sps:$4 sm:$0xff]  }
 0xc11   :  { %9358 = vmatpush1.bf16.msra.mxu0 %v13656_v56  ;;  %v13745_v56 = vld [vmem:[#allocation18 + $0xfec] ss:$16 sps:$4 sm:$0xff]  }
 0xc12   :  { %9359 = vmatprep.subr.bf16.mxu0 %v13661_v9  ;;  %v13743_v9 = vld [vmem:[#allocation18 + $0xfe8] ss:$16 sps:$4 sm:$0xff]  }
 0xc15   :  { %9360 = vmatpush1.bf16.msra.mxu0 %v13659_v44  ;;  %v13748_v44 = vld [vmem:[#allocation18 + $0x1004] ss:$16 sps:$4 sm:$0xff]  }
 0xc16   :  { %9361 = vmatprep.subr.bf16.mxu0 %v13664_v29  ;;  %v13746_v29 = vld [vmem:[#allocation18 + $0x1000] ss:$16 sps:$4 sm:$0xff]  }
 0xc19   :  { %9362 = vmatpush1.bf16.msra.mxu0 %v13662_v59  ;;  %v13751_v59 = vld [vmem:[#allocation18 + $0x1024] ss:$16 sps:$4 sm:$0xff]  }
 0xc1a   :  { %9363 = vmatprep.subr.bf16.mxu0 %v13667_v62  ;;  %v15029_v62 = vpack.c.bf16 %v14968_v57, %v14968_v57 }
 0xc1d   :  { %9364 = vmatpush1.bf16.msra.mxu0 %v13665_v58  ;;  %v13749_v58 = vld [vmem:[#allocation18 + $0x1020] ss:$16 sps:$4 sm:$0xff]  }
 0xc1e   :  { %9365 = vmatprep.subr.bf16.mxu0 %v13670_v43  ;;  %v13754_v43 = vld [vmem:[#allocation18 + $0x1044] ss:$16 sps:$4 sm:$0xff]  }
 0xc21   :  { %9366 = vmatpush1.bf16.msra.mxu0 %v13668_v0  ;;  %v13752_v0 = vld [vmem:[#allocation18 + $0x1040] ss:$16 sps:$4 sm:$0xff]  }
 0xc22   :  { %9367 = vmatprep.subr.bf16.mxu0 %v13673_v51  ;;  %v13757_v51 = vld [vmem:[#allocation18 + $0x1064] ss:$16 sps:$4 sm:$0xff]  }
 0xc25   :  { %9368 = vmatpush1.bf16.msra.mxu0 %v13671_v12  ;;  %v13755_v12 = vld [vmem:[#allocation18 + $0x1060] ss:$16 sps:$4 sm:$0xff]  }
 0xc26   :  { %9369 = vmatprep.subr.bf16.mxu0 %v13676_v11 }
 0xc29   :  { %9370 = vmatpush1.bf16.msra.mxu0 %v13674_v10  ;;  %v13760_v10 = vld [vmem:[#allocation18 + $0x1084] ss:$16 sps:$4 sm:$0xff]  }
 0xc2a   :  { %9371 = vmatprep.subr.bf16.mxu0 %v13679_v25 }
 0xc2d   :  { %9372 = vmatpush1.bf16.msra.mxu0 %v13677_v42 }
 0xc2e   :  { %9373 = vmatprep.subr.bf16.mxu0 %v13682_v45  ;;  %v13758_v45 = vld [vmem:[#allocation18 + $0x1080] ss:$16 sps:$4 sm:$0xff]  }
 0xc31   :  { %9374 = vmatpush1.bf16.msra.mxu0 %v13680_v54  ;;  %v13763_v54 = vld [vmem:[#allocation18 + $0x10a4] ss:$16 sps:$4 sm:$0xff]  }
 0xc32   :  { %9375 = vmatprep.subr.bf16.mxu0 %v13685_v48  ;;  %v13761_v48 = vld [vmem:[#allocation18 + $0x10a0] ss:$16 sps:$4 sm:$0xff]  }
 0xc35   :  { %9376 = vmatpush1.bf16.msra.mxu0 %v13683_v30  ;;  %v13766_v30 = vld [vmem:[#allocation18 + $0x10c4] ss:$16 sps:$4 sm:$0xff]  }
 0xc36   :  { %9377 = vmatprep.subr.bf16.mxu0 %v13688_v61  ;;  %v13764_v61 = vld [vmem:[#allocation18 + $0x10c0] ss:$16 sps:$4 sm:$0xff]  }
 0xc39   :  { %9378 = vmatpush1.bf16.msra.mxu0 %v13686_v24  ;;  %v13769_v24 = vld [vmem:[#allocation18 + $0x10e4] ss:$16 sps:$4 sm:$0xff]  }
 0xc3a   :  { %9379 = vmatprep.subr.bf16.mxu0 %v13691_v7  ;;  %v13767_v7 = vld [vmem:[#allocation18 + $0x10e0] ss:$16 sps:$4 sm:$0xff]  }
 0xc3d   :  { %9380 = vmatpush1.bf16.msra.mxu0 %v13689_v28  ;;  %v13772_v28 = vld [vmem:[#allocation18 + $0x1104] ss:$16 sps:$4 sm:$0xff]  }
 0xc3e   :  { %9381 = vmatprep.subr.bf16.mxu0 %v13694_v21  ;;  %v13770_v21 = vld [vmem:[#allocation18 + $0x1100] ss:$16 sps:$4 sm:$0xff]  }
 0xc41   :  { %9382 = vmatpush1.bf16.msra.mxu0 %v13692_v31  ;;  %v13775_v31 = vld [vmem:[#allocation18 + $0x1124] ss:$16 sps:$4 sm:$0xff]  }
 0xc42   :  { %9383 = vmatprep.subr.bf16.mxu0 %v13697_v22  ;;  %v13773_v22 = vld [vmem:[#allocation18 + $0x1120] ss:$16 sps:$4 sm:$0xff]  }
 0xc45   :  { %9384 = vmatpush1.bf16.msra.mxu0 %v13695_v13  ;;  %v13778_v13 = vld [vmem:[#allocation18 + $0x1144] ss:$16 sps:$4 sm:$0xff]  }
 0xc46   :  { %9394 = vmatprep.subr.bf16.mxu0 %v13700_v19  ;;  %v13776_v19 = vld [vmem:[#allocation18 + $0x1140] ss:$16 sps:$4 sm:$0xff]  }
 0xc48   :  { %9386 = vmatmul.mubr.bf16.vlgmr.msra.gmra.mrb[44].mxu0 %v15023_v3 }
 0xc49   :  { %9395 = vmatpush1.bf16.msra.mxu0 %v13698_v14  ;;  %9426 = vmatprep.mubr.bf16.mxu0 %v15017_v4  ;;  %v13737_v4 = vld [vmem:[#allocation18 + $0xfa8] ss:$16 sps:$4 sm:$0xff]   ;;  %v13781_v14 = vld [vmem:[#allocation18 + $0x1164] ss:$16 sps:$4 sm:$0xff]  }
 0xc4a   :  { %9396 = vmatprep.subr.bf16.mxu0 %v13703_v26  ;;  %v13784_v26 = vld [vmem:[#allocation18 + $0x1184] ss:$16 sps:$4 sm:$0xff]  }
 0xc4d   :  { %9397 = vmatpush1.bf16.msra.mxu0 %v13701_v20  ;;  %v13782_v20 = vld [vmem:[#allocation18 + $0x1180] ss:$16 sps:$4 sm:$0xff]  }
 0xc4e   :  { %9398 = vmatprep.subr.bf16.mxu0 %v13706_v35  ;;  %v13787_v35 = vld [vmem:[#allocation18 + $0x11a4] ss:$16 sps:$4 sm:$0xff]  }
 0xc51   :  { %9399 = vmatpush1.bf16.msra.mxu0 %v13704_v23  ;;  %v13785_v23 = vld [vmem:[#allocation18 + $0x11a0] ss:$16 sps:$4 sm:$0xff]  }
 0xc52   :  { %9400 = vmatprep.subr.bf16.mxu0 %v13709_v18  ;;  %v13790_v18 = vld [vmem:[#allocation18 + $0x11c4] ss:$16 sps:$4 sm:$0xff]  }
 0xc55   :  { %9401 = vmatpush1.bf16.msra.mxu0 %v13707_v52  ;;  %v13788_v52 = vld [vmem:[#allocation18 + $0x11c0] ss:$16 sps:$4 sm:$0xff]  }
 0xc56   :  { %9402 = vmatprep.subr.bf16.mxu0 %v13712_v55  ;;  %v13793_v55 = vld [vmem:[#allocation18 + $0x11e4] ss:$16 sps:$4 sm:$0xff]  }
 0xc59   :  { %9403 = vmatpush1.bf16.msra.mxu0 %v13710_v38  ;;  %v13791_v38 = vld [vmem:[#allocation18 + $0x11e0] ss:$16 sps:$4 sm:$0xff]  }
 0xc5a   :  { %9404 = vmatprep.subr.bf16.mxu0 %v13715_v40  ;;  %v13796_v40 = vld [vmem:[#allocation18 + $0x100c] ss:$16 sps:$4 sm:$0xff]  }
 0xc5d   :  { %9405 = vmatpush1.bf16.msra.mxu0 %v13713_v34  ;;  %v13794_v34 = vld [vmem:[#allocation18 + $0x1008] ss:$16 sps:$4 sm:$0xff]  }
 0xc5e   :  { %9406 = vmatprep.subr.bf16.mxu0 %v13718_v41  ;;  %v15039_v41 = vpack.c.bf16 %v14966_v39, %v14966_v39  ;;  %v13808_v39 = vld [vmem:[#allocation18 + $0x108c] ss:$16 sps:$4 sm:$0xff]  }
 0xc61   :  { %9407 = vmatpush1.bf16.msra.mxu0 %v13716_v5  ;;  %v13799_v5 = vld [vmem:[#allocation18 + $0x102c] ss:$16 sps:$4 sm:$0xff]  }
 0xc62   :  { %9408 = vmatprep.subr.bf16.mxu0 %v13721_v16  ;;  %v13797_v16 = vld [vmem:[#allocation18 + $0x1028] ss:$16 sps:$4 sm:$0xff]  }
 0xc65   :  { %9409 = vmatpush1.bf16.msra.mxu0 %v13719_v63  ;;  %v13802_v63 = vld [vmem:[#allocation18 + $0x104c] ss:$16 sps:$4 sm:$0xff]  }
 0xc66   :  { %9410 = vmatprep.subr.bf16.mxu0 %v13724_v46  ;;  %v13800_v46 = vld [vmem:[#allocation18 + $0x1048] ss:$16 sps:$4 sm:$0xff]  }
 0xc69   :  { %9411 = vmatpush1.bf16.msra.mxu0 %v13722_v53  ;;  %v13805_v53 = vld [vmem:[#allocation18 + $0x106c] ss:$16 sps:$4 sm:$0xff]  }
 0xc6a   :  { %9412 = vmatprep.subr.bf16.mxu0 %v13727_v60  ;;  %v13803_v60 = vld [vmem:[#allocation18 + $0x1068] ss:$16 sps:$4 sm:$0xff]  }
 0xc6d   :  { %9413 = vmatpush1.bf16.msra.mxu0 %v13725_v1 }
 0xc6e   :  { %9414 = vmatprep.subr.bf16.mxu0 %v13730_v17 }
 0xc71   :  { %9415 = vmatpush1.bf16.msra.mxu0 %v13728_v32 }
 0xc72   :  { %9416 = vmatprep.subr.bf16.mxu0 %v13733_v50 }
 0xc75   :  { %9417 = vmatpush1.bf16.msra.mxu0 %v13731_v6  ;;  %v13806_v6 = vld [vmem:[#allocation18 + $0x1088] ss:$16 sps:$4 sm:$0xff]  }
 0xc76   :  { %9418 = vmatprep.subr.bf16.mxu0 %v13736_v49  ;;  %v13811_v49 = vld [vmem:[#allocation18 + $0x10ac] ss:$16 sps:$4 sm:$0xff]  }
 0xc79   :  { %9419 = vmatpush1.bf16.msra.mxu0 %v13734_v33  ;;  %v13809_v33 = vld [vmem:[#allocation18 + $0x10a8] ss:$16 sps:$4 sm:$0xff]  }
 0xc7a   :  { %9420 = vmatprep.subr.bf16.mxu0 %v13739_v36  ;;  %v13814_v36 = vld [vmem:[#allocation18 + $0x10cc] ss:$16 sps:$4 sm:$0xff]  }
 0xc7d   :  { %9421 = vmatpush1.bf16.msra.mxu0 %v13737_v4  ;;  %v13812_v4 = vld [vmem:[#allocation18 + $0x10c8] ss:$16 sps:$4 sm:$0xff]  }
 0xc7e   :  { %9422 = vmatprep.subr.bf16.mxu0 %v13742_v8  ;;  %v13817_v8 = vld [vmem:[#allocation18 + $0x10ec] ss:$16 sps:$4 sm:$0xff]  }
 0xc81   :  { %9423 = vmatpush1.bf16.msra.mxu0 %v13740_v27  ;;  %v13815_v27 = vld [vmem:[#allocation18 + $0x10e8] ss:$16 sps:$4 sm:$0xff]  }
 0xc82   :  { %9424 = vmatprep.subr.bf16.mxu0 %v13745_v56  ;;  %v13820_v56 = vld [vmem:[#allocation18 + $0x110c] ss:$16 sps:$4 sm:$0xff]  }
 0xc85   :  { %9425 = vmatpush1.bf16.msra.mxu0 %v13743_v9  ;;  %v13818_v9 = vld [vmem:[#allocation18 + $0x1108] ss:$16 sps:$4 sm:$0xff]  }
 0xc86   :  { %9826 = vmatprep.subr.bf16.mxu0 %v13748_v44  ;;  %v13823_v44 = vld [vmem:[#allocation18 + $0x112c] ss:$16 sps:$4 sm:$0xff]  }
 0xc88   :  { %9427 = vmatmul.mubr.bf16.vlgmr.msra.gmra.mrb[40].mxu0 %v15023_v3  ;;  %v13779_v3 = vld [vmem:[#allocation18 + $0x1160] ss:$16 sps:$4 sm:$0xff]  }
 0xc89   :  { %9827 = vmatpush1.bf16.msra.mxu0 %v13746_v29  ;;  %9858 = vmatprep.mubr.bf16.mxu0 %v15029_v62  ;;  %v13821_v29 = vld [vmem:[#allocation18 + $0x1128] ss:$16 sps:$4 sm:$0xff]  }
 0xc8a   :  { %9828 = vmatprep.subr.bf16.mxu0 %v13751_v59  ;;  %v13826_v59 = vld [vmem:[#allocation18 + $0x114c] ss:$16 sps:$4 sm:$0xff]  }
 0xc8d   :  { %9829 = vmatpush1.bf16.msra.mxu0 %v13749_v58  ;;  %v13829_v58 = vld [vmem:[#allocation18 + $0x116c] ss:$16 sps:$4 sm:$0xff]  }
 0xc8e   :  { %9830 = vmatprep.subr.bf16.mxu0 %v13754_v43  ;;  %v13827_v43 = vld [vmem:[#allocation18 + $0x1168] ss:$16 sps:$4 sm:$0xff]  }
 0xc91   :  { %9831 = vmatpush1.bf16.msra.mxu0 %v13752_v0  ;;  %v13832_v0 = vld [vmem:[#allocation18 + $0x118c] ss:$16 sps:$4 sm:$0xff]  }
 0xc92   :  { %v15033_v11 = vpop.f32.mrb[92].mxu1  ;;  %9832 = vmatprep.subr.bf16.mxu0 %v13757_v51  ;;  %v13830_v51 = vld [vmem:[#allocation18 + $0x1188] ss:$16 sps:$4 sm:$0xff]  }
 0xc93   :  { %v15035_v57 = vpop.f32.mrb[93].mxu1 }
 0xc94   :  { %v7067_v25 = vpop.f32.mrb[94].mxu1 }
 0xc95   :  { %9833 = vmatpush1.bf16.msra.mxu0 %v13755_v12  ;;  %v7068_v42 = vpop.f32.mrb[95].mxu1  ;;  %v13835_v12 = vld [vmem:[#allocation18 + $0x11ac] ss:$16 sps:$4 sm:$0xff]  }
 0xc96   :  { %9834 = vmatprep.subr.bf16.mxu0 %v13760_v10  ;;  %v13833_v10 = vld [vmem:[#allocation18 + $0x11a8] ss:$16 sps:$4 sm:$0xff]   ;;  %v13838_v25 = vld [vmem:[#allocation18 + $0x11cc] ss:$16 sps:$4 sm:$0xff]  }
 0xc97   :  { %v13836_v42 = vld [vmem:[#allocation18 + $0x11c8] ss:$16 sps:$4 sm:$0xff]  }
 0xc99   :  { %9835 = vmatpush1.bf16.msra.mxu0 %v13758_v45  ;;  %v13841_v45 = vld [vmem:[#allocation18 + $0x11ec] ss:$16 sps:$4 sm:$0xff]  }
 0xc9a   :  { %9836 = vmatprep.subr.bf16.mxu0 %v13763_v54  ;;  %v13839_v54 = vld [vmem:[#allocation18 + $0x11e8] ss:$16 sps:$4 sm:$0xff]  }
 0xc9d   :  { %9837 = vmatpush1.bf16.msra.mxu0 %v13761_v48  ;;  %v13842_v48 = vld [vmem:[#allocation22 + $0x40] sm:$0xff]  }
 0xc9e   :  { %9838 = vmatprep.subr.bf16.mxu0 %v13766_v30  ;;  %v13843_v30 = vld [vmem:[#allocation22] sm:$0xff]   ;;  %11727 = vmatprep.subr.bf16.mxu1 %v13842_v48 }
 0xc9f   :  { %11728 = vmatpush3.bf16.msra.mxu1 %v13843_v30 }
 0xca1   :  { %9839 = vmatpush1.bf16.msra.mxu0 %v13764_v61  ;;  %v13844_v61 = vld [vmem:[#allocation22 + $0x48] sm:$0xff]  }
 0xca2   :  { %9840 = vmatprep.subr.bf16.mxu0 %v13769_v24  ;;  %v13845_v24 = vld [vmem:[#allocation22 + $0x8] sm:$0xff]   ;;  %11729 = vmatprep.subr.bf16.mxu1 %v13844_v61 }
 0xca3   :  { %11730 = vmatpush3.bf16.msra.mxu1 %v13845_v24 }
 0xca5   :  { %9841 = vmatpush1.bf16.msra.mxu0 %v13767_v7  ;;  %v13846_v7 = vld [vmem:[#allocation22 + $0x50] sm:$0xff]  }
 0xca6   :  { %9842 = vmatprep.subr.bf16.mxu0 %v13772_v28  ;;  %v13847_v28 = vld [vmem:[#allocation22 + $0x10] sm:$0xff]   ;;  %11731 = vmatprep.subr.bf16.mxu1 %v13846_v7 }
 0xca7   :  { %11732 = vmatpush3.bf16.msra.mxu1 %v13847_v28 }
 0xca9   :  { %9843 = vmatpush1.bf16.msra.mxu0 %v13770_v21  ;;  %v13848_v21 = vld [vmem:[#allocation22 + $0x58] sm:$0xff]  }
 0xcaa   :  { %9844 = vmatprep.subr.bf16.mxu0 %v13775_v31  ;;  %v13849_v31 = vld [vmem:[#allocation22 + $0x18] sm:$0xff]   ;;  %11733 = vmatprep.subr.bf16.mxu1 %v13848_v21 }
 0xcab   :  { %11734 = vmatpush3.bf16.msra.mxu1 %v13849_v31 }
 0xcad   :  { %9845 = vmatpush1.bf16.msra.mxu0 %v13773_v22  ;;  %v13850_v22 = vld [vmem:[#allocation22 + $0x60] sm:$0xff]  }
 0xcae   :  { %9846 = vmatprep.subr.bf16.mxu0 %v13778_v13  ;;  %v13851_v13 = vld [vmem:[#allocation22 + $0x20] sm:$0xff]   ;;  %11735 = vmatprep.subr.bf16.mxu1 %v13850_v22 }
 0xcaf   :  { %11736 = vmatpush3.bf16.msra.mxu1 %v13851_v13 }
 0xcb1   :  { %9847 = vmatpush1.bf16.msra.mxu0 %v13776_v19  ;;  %v13852_v19 = vld [vmem:[#allocation22 + $0x68] sm:$0xff]  }
 0xcb2   :  { %9848 = vmatprep.subr.bf16.mxu0 %v13781_v14  ;;  %v13853_v14 = vld [vmem:[#allocation22 + $0x28] sm:$0xff]   ;;  %11737 = vmatprep.subr.bf16.mxu1 %v13852_v19 }
 0xcb3   :  { %11738 = vmatpush3.bf16.msra.mxu1 %v13853_v14 }
 0xcb5   :  { %9849 = vmatpush1.bf16.msra.mxu0 %v13779_v3  ;;  %v13854_v3 = vld [vmem:[#allocation22 + $0x70] sm:$0xff]  }
 0xcb6   :  { %9850 = vmatprep.subr.bf16.mxu0 %v13784_v26  ;;  %v13855_v26 = vld [vmem:[#allocation22 + $0x30] sm:$0xff]   ;;  %11739 = vmatprep.subr.bf16.mxu1 %v13854_v3 }
 0xcb7   :  { %11740 = vmatpush3.bf16.msra.mxu1 %v13855_v26 }
 0xcb9   :  { %9851 = vmatpush1.bf16.msra.mxu0 %v13782_v20  ;;  %v13856_v20 = vld [vmem:[#allocation22 + $0x78] sm:$0xff]  }
 0xcba   :  { %9852 = vmatprep.subr.bf16.mxu0 %v13787_v35  ;;  %11741 = vmatprep.subr.bf16.mxu1 %v13856_v20 }
 0xcbd   :  { %9853 = vmatpush1.bf16.msra.mxu0 %v13785_v23  ;;  %v13857_v23 = vld [vmem:[#allocation22 + $0x38] sm:$0xff]  }
 0xcbe   :  { %9854 = vmatprep.subr.bf16.mxu0 %v13790_v18  ;;  %11742 = vmatpush3.bf16.msra.mxu1 %v13857_v23 }
 0xcc1   :  { %9855 = vmatpush1.bf16.msra.mxu0 %v13788_v52 }
 0xcc2   :  { %9856 = vmatprep.subr.bf16.mxu0 %v13793_v55 }
 0xcc5   :  { %9857 = vmatpush1.bf16.msra.mxu0 %v13791_v38 }
 0xcc6   :  { %9867 = vmatprep.subr.bf16.mxu0 %v13796_v40 }
 0xcc8   :  { %9859 = vmatmul.mubr.bf16.vlgmr.msra.gmra.mrb[44].mxu0 %v15039_v41 }
 0xcc9   :  { %9868 = vmatpush1.bf16.msra.mxu0 %v13794_v34  ;;  %9899 = vmatprep.mubr.bf16.mxu0 %v15029_v62  ;;  %v13824_v62 = vld [vmem:[#allocation18 + $0x1148] ss:$16 sps:$4 sm:$0xff]  }
 0xcca   :  { %9869 = vmatprep.subr.bf16.mxu0 %v13799_v5 }
 0xccd   :  { %9870 = vmatpush1.bf16.msra.mxu0 %v13797_v16  ;;  %v13858_v16 = vld [vmem:[#allocation22 + $0xc0] sm:$0xff]  }
 0xcce   :  { %9871 = vmatprep.subr.bf16.mxu0 %v13802_v63  ;;  %11749 = vmatprep.subr.bf16.mxu1 %v13858_v16 }
 0xcd1   :  { %9872 = vmatpush1.bf16.msra.mxu0 %v13800_v46 }
 0xcd2   :  { %v15043_v1 = vpop.f32.mrb[88].mxu1  ;;  %9873 = vmatprep.subr.bf16.mxu0 %v13805_v53 }
 0xcd3   :  { %v15045_v17 = vpop.f32.mrb[89].mxu1 }
 0xcd4   :  { %v7499_v32 = vpop.f32.mrb[90].mxu1 }
 0xcd5   :  { %9874 = vmatpush1.bf16.msra.mxu0 %v13803_v60  ;;  %v7500_v50 = vpop.f32.mrb[91].mxu1 }
 0xcd6   :  { %9875 = vmatprep.subr.bf16.mxu0 %v13808_v39 }
 0xcd9   :  { %9876 = vmatpush1.bf16.msra.mxu0 %v13806_v6 }
 0xcda   :  { %9877 = vmatprep.subr.bf16.mxu0 %v13811_v49 }
 0xcdd   :  { %9878 = vmatpush1.bf16.msra.mxu0 %v13809_v33 }
 0xcde   :  { %9879 = vmatprep.subr.bf16.mxu0 %v13814_v36 }
 0xce1   :  { %9880 = vmatpush1.bf16.msra.mxu0 %v13812_v4 }
 0xce2   :  { %9881 = vmatprep.subr.bf16.mxu0 %v13817_v8 }
 0xce5   :  { %9882 = vmatpush1.bf16.msra.mxu0 %v13815_v27 }
 0xce6   :  { %9883 = vmatprep.subr.bf16.mxu0 %v13820_v56 }
 0xce9   :  { %9884 = vmatpush1.bf16.msra.mxu0 %v13818_v9 }
 0xcea   :  { %9885 = vmatprep.subr.bf16.mxu0 %v13823_v44 }
 0xced   :  { %9886 = vmatpush1.bf16.msra.mxu0 %v13821_v29 }
 0xcee   :  { %9887 = vmatprep.subr.bf16.mxu0 %v13826_v59 }
 0xcf1   :  { %9888 = vmatpush1.bf16.msra.mxu0 %v13824_v62 }
 0xcf2   :  { %9889 = vmatprep.subr.bf16.mxu0 %v13829_v58 }
 0xcf5   :  { %9890 = vmatpush1.bf16.msra.mxu0 %v13827_v43 }
 0xcf6   :  { %9891 = vmatprep.subr.bf16.mxu0 %v13832_v0 }
 0xcf9   :  { %9892 = vmatpush1.bf16.msra.mxu0 %v13830_v51 }
 0xcfa   :  { %9893 = vmatprep.subr.bf16.mxu0 %v13835_v12 }
 0xcfd   :  { %9894 = vmatpush1.bf16.msra.mxu0 %v13833_v10 }
 0xcfe   :  { %9895 = vmatprep.subr.bf16.mxu0 %v13838_v25 }
 0xd01   :  { %9896 = vmatpush1.bf16.msra.mxu0 %v13836_v42 }
 0xd02   :  { %9897 = vmatprep.subr.bf16.mxu0 %v13841_v45 }
 0xd05   :  { %9898 = vmatpush1.bf16.msra.mxu0 %v13839_v54 }
 0xd08   :  { %9900 = vmatmul.mubr.bf16.vlgmr.msra.gmra.mrb[40].mxu0 %v15039_v41 }
 0xd9b   :  { %v9860_v35 = vpop.f32.mrb[44].mxu0 }
 0xd9c   :  { %v12213_v18 = vadd.f32 %v9860_v35, %v15043_v1  ;;  %v9862_v52 = vpop.f32.mrb[45].mxu0 }
 0xd9d   :  { %v12214_v55 = vadd.f32 %v9862_v52, %v15045_v17  ;;  %v9864_v38 = vpop.f32.mrb[46].mxu0 }
 0xd9e   :  { %v9914_v40 = vrot.slane %v12213_v18, 4  ;;  %v9865_v34 = vpop.f32.mrb[47].mxu0 }
 0xd9f   :  { %v9920_v41 = vrot.slane %v12214_v55, 4 }
 0xda0   :  { %v9915_v5 = vadd.f32 %v12213_v18, %v9914_v40 }
 0xda1   :  { %v9921_v63 = vadd.f32 %v12214_v55, %v9920_v41 }
 0xda2   :  { %v9916_v46 = vrot.slane %v9915_v5, 2 }
 0xda3   :  { %v9922_v53 = vrot.slane %v9921_v63, 2 }
 0xda4   :  { %v9917_v60 = vadd.f32 %v9916_v46, %v9915_v5 }
 0xda5   :  { %v9923_v39 = vadd.f32 %v9922_v53, %v9921_v63 }
 0xda6   :  { %v9918_v32 = vrot.slane %v9917_v60, 1 }
 0xda7   :  { %v9924_v50 = vrot.slane %v9923_v39, 1 }
 0xda8   :  { %v9919_v1 = vadd.f32 %v9918_v32, %v9917_v60 }
 0xda9   :  { %v9925_v6 = vadd.f32 %v9924_v50, %v9923_v39 }
 0xdaa   :  { %v9938_v49 = vmul.f32 0.125, %v9919_v1 }
 0xdab   :  { %v9939_v33 = vmul.f32 0.125, %v9925_v6 }
 0xdac   :  { %v15050_v17 = vsub.f32 %v12213_v18, %v9938_v49 }
 0xdad   :  { %v15052_v36 = vsub.f32 %v12214_v55, %v9939_v33 }
 0xdae   :  { %v9946_v4 = vmul.f32 %v15050_v17, %v15050_v17 }
 0xdaf   :  { %v9947_v8 = vmul.f32 %v15052_v36, %v15052_v36 }
 0xdb0   :  { %v9950_v27 = vrot.slane %v9946_v4, 4 }
 0xdb1   :  { %v9956_v56 = vrot.slane %v9947_v8, 4 }
 0xdb2   :  { %v9951_v9 = vadd.f32 %v9950_v27, %v9946_v4 }
 0xdb3   :  { %v9957_v44 = vadd.f32 %v9956_v56, %v9947_v8 }
 0xdb4   :  { %v9952_v29 = vrot.slane %v9951_v9, 2 }
 0xdb5   :  { %v9958_v59 = vrot.slane %v9957_v44, 2 }
 0xdb6   :  { %v9953_v62 = vadd.f32 %v9952_v29, %v9951_v9 }
 0xdb7   :  { %v9959_v58 = vadd.f32 %v9958_v59, %v9957_v44 }
 0xdb8   :  { %v9954_v43 = vrot.slane %v9953_v62, 1 }
 0xdb9   :  { %v9960_v0 = vrot.slane %v9959_v58, 1 }
 0xdba   :  { %v9955_v51 = vadd.f32 %v9954_v43, %v9953_v62 }
 0xdbb   :  { %v9961_v12 = vadd.f32 %v9960_v0, %v9959_v58  ;;  %v9912_v58 = vld [vmem:[#allocation19] sm:$0xf]  ;;  %v10031_v0 = vsub.s32 3, %v14813_v37 }
 0xdbc   :  { %v9974_v10 = vmul.f32 0.125, %v9955_v51  ;;  %v9913_v51 = vld [vmem:[#allocation21] sm:$0xf] }
 0xdbd   :  { %v9975_v25 = vmul.f32 0.125, %v9961_v12  ;;  %v10027_v12 = vsub.s32 2, %v14813_v37 }
 0xdbe   :  { %v9978_v42 = vadd.f32 1e-05, %v9974_v10 }
 0xdbf   :  { %v9979_v45 = vadd.f32 1e-05, %v9975_v25  ;;  %v10049_v25 = vrot.slane %v9913_v51, %v14905_v15 }
 0xdc0   :  { %13880 = vrsqrt.f32 %v9978_v42  ;;  %v10045_v42 = vrot.slane %v9913_v51, %v14816_v47 }
 0xdc1   :  { %13882 = vrsqrt.f32 %v9979_v45  ;;  %v10057_v45 = vrot.slane %v9913_v51, %v10031_v0 }
 0xdca   :  { %v13881_v54 = vpop.eup %13880 }
 0xdcb   :  { %v13883_v48 = vpop.eup %13882 }
 0xdcc   :  { %v9990_v30 = vcombine.low %v13881_v54, %v13883_v48 }
 0xdce   :  { %v9998_v29 = vrot.slane %v9990_v30, %v14900_v2 }
 0xddb   :  { %v9901_v61 = vpop.f32.mrb[40].mxu0 }
 0xddc   :  { %v12215_v24 = vadd.f32 %v9901_v61, %v15033_v11  ;;  %v9903_v7 = vpop.f32.mrb[41].mxu0 }
 0xddd   :  { %v12216_v28 = vadd.f32 %v9903_v7, %v15035_v57  ;;  %v9905_v21 = vpop.f32.mrb[42].mxu0 }
 0xdde   :  { %v9926_v31 = vrot.slane %v12215_v24, 4  ;;  %v9906_v22 = vpop.f32.mrb[43].mxu0 }
 0xddf   :  { %v9932_v13 = vrot.slane %v12216_v28, 4 }
 0xde0   :  { %v9927_v19 = vadd.f32 %v12215_v24, %v9926_v31 }
 0xde1   :  { %v9933_v14 = vadd.f32 %v12216_v28, %v9932_v13 }
 0xde2   :  { %v9928_v3 = vrot.slane %v9927_v19, 2 }
 0xde3   :  { %v9934_v26 = vrot.slane %v9933_v14, 2 }
 0xde4   :  { %v9929_v20 = vadd.f32 %v9928_v3, %v9927_v19 }
 0xde5   :  { %v9935_v35 = vadd.f32 %v9934_v26, %v9933_v14  ;;  %v13859_v26 = vld [vmem:[#allocation22 + $0x80] sm:$0xff]  }
 0xde6   :  { %v9930_v23 = vrot.slane %v9929_v20, 1 }
 0xde7   :  { %v9936_v18 = vrot.slane %v9935_v35, 1 }
 0xde8   :  { %v9931_v52 = vadd.f32 %v9930_v23, %v9929_v20  ;;  %v13862_v23 = vld [vmem:[#allocation22 + $0xd0] sm:$0xff]  }
 0xde9   :  { %v9937_v55 = vadd.f32 %v9936_v18, %v9935_v35  ;;  %v13860_v35 = vld [vmem:[#allocation22 + $0xc8] sm:$0xff]   ;;  %v13863_v18 = vld [vmem:[#allocation22 + $0x90] sm:$0xff]  }
 0xdea   :  { %v9940_v38 = vmul.f32 0.125, %v9931_v52  ;;  %v13864_v52 = vld [vmem:[#allocation22 + $0xd8] sm:$0xff]  }
 0xdeb   :  { %v9941_v40 = vmul.f32 0.125, %v9937_v55  ;;  %v13865_v55 = vld [vmem:[#allocation22 + $0x98] sm:$0xff]  }
 0xdec   :  { %v9944_v11 = vsub.f32 %v12215_v24, %v9940_v38  ;;  %v13866_v38 = vld [vmem:[#allocation22 + $0xe0] sm:$0xff]  }
 0xded   :  { %v9945_v34 = vsub.f32 %v12216_v28, %v9941_v40  ;;  %v13867_v40 = vld [vmem:[#allocation22 + $0xa0] sm:$0xff]  }
 0xdee   :  { %v9948_v41 = vmul.f32 %v9944_v11, %v9944_v11 }
 0xdef   :  { %v9949_v57 = vmul.f32 %v9945_v34, %v9945_v34 }
 0xdf0   :  { %v9962_v5 = vrot.slane %v9948_v41, 4 }
 0xdf1   :  { %v9968_v16 = vrot.slane %v9949_v57, 4 }
 0xdf2   :  { %v9963_v63 = vadd.f32 %v9962_v5, %v9948_v41  ;;  %v13869_v41 = vld [vmem:[#allocation22 + $0xa8] sm:$0xff]  }
 0xdf3   :  { %v9969_v46 = vadd.f32 %v9968_v16, %v9949_v57  ;;  %v13870_v57 = vld [vmem:[#allocation22 + $0xf0] sm:$0xff]  }
 0xdf4   :  { %v9964_v53 = vrot.slane %v9963_v63, 2  ;;  %v13871_v16 = vld [vmem:[#allocation22 + $0xb0] sm:$0xff]  }
 0xdf5   :  { %v9970_v60 = vrot.slane %v9969_v46, 2 }
 0xdf6   :  { %v9965_v39 = vadd.f32 %v9964_v53, %v9963_v63  ;;  %v13872_v63 = vld [vmem:[#allocation22 + $0xf8] sm:$0xff]  }
 0xdf7   :  { %v9971_v32 = vadd.f32 %v9970_v60, %v9969_v46  ;;  %v13873_v53 = vld [vmem:[#allocation22 + $0xb8] sm:$0xff]  }
 0xdf8   :  { %v9966_v50 = vrot.slane %v9965_v39, 1 }
 0xdf9   :  { %v9972_v1 = vrot.slane %v9971_v32, 1 }
 0xdfa   :  { %v9967_v6 = vadd.f32 %v9966_v50, %v9965_v39 }
 0xdfb   :  { %v9973_v49 = vadd.f32 %v9972_v1, %v9971_v32 }
 0xdfc   :  { %v9976_v33 = vmul.f32 0.125, %v9967_v6 }
 0xdfd   :  { %v9977_v4 = vmul.f32 0.125, %v9973_v49 }
 0xdfe   :  { %v9980_v8 = vadd.f32 1e-05, %v9976_v33  ;;  %v11475_v33 = vld [vmem:[#allocation24] ss:$0 sm:$0xff] }
 0xdff   :  { %v9981_v27 = vadd.f32 1e-05, %v9977_v4 }
 0xe00   :  { %13884 = vrsqrt.f32 %v9980_v8 }
 0xe01   :  { %13886 = vrsqrt.f32 %v9981_v27 }
 0xe0a   :  { %v13885_v56 = vpop.eup %13884 }
 0xe0b   :  { %v13887_v9 = vpop.eup %13886 }
 0xe0c   :  { %v9991_v44 = vcombine.low %v13885_v56, %v13887_v9 }
 0xe0e   :  { %v10005_v59 = vrot.slane %v9991_v44, %v14900_v2 }
 0xe10   :  { %v10006_v62 = vcombine.low %v9998_v29, %v10005_v59 }
 0xe12   :  { %v10013_v43 = vrot.slane %v10006_v62, %v14900_v2 }
 0xe14   :  { %v10015_v10 = vmul.f32 %v10013_v43, %v9912_v58 }
 0xe16   :  { %v10032_v54 = vrot.slane %v10015_v10, %v10031_v0  ;;  %v10024_v48 = vrot.slane %v10015_v10, %v14905_v15  ;;  %v10020_v30 = vrot.slane %v10015_v10, %v14816_v47  ;;  %v10028_v61 = vrot.slane %v10015_v10, %v10027_v12 }
 0xe18   :  { %v10040_v24 = vmul.f32 %v10032_v54, %v9945_v34  ;;  %v10038_v2 = vmul.f32 %v10024_v48, %v15052_v36  ;;  %v10037_v7 = vmul.f32 %v10020_v30, %v15050_v17  ;;  %v10039_v28 = vmul.f32 %v10028_v61, %v9944_v11  ;;  %v13861_v17 = vld [vmem:[#allocation22 + $0x88] sm:$0xff]  }
 0xe19   :  { %v13868_v11 = vld [vmem:[#allocation22 + $0xe8] sm:$0xff]   ;;  %v10053_v34 = vrot.slane %v9913_v51, %v10027_v12 }
 0xe1a   :  { %v10063_v21 = vadd.f32 %v10049_v25, %v10038_v2  ;;  %v10062_v37 = vadd.f32 %v10045_v42, %v10037_v7  ;;  %v10065_v31 = vadd.f32 %v10057_v45, %v10040_v24 }
 0xe1b   :  { %v10064_v5 = vadd.f32 %v10053_v34, %v10039_v28 }
 0xe1c   :  { %vm10067_vm10 = vcmp.ge.f32.partialorder %v10063_v21, 0.0  ;;  %v10071_v22 = vmul.f32 0.2, %v10063_v21  ;;  %vm10066_vm11 = vcmp.ge.f32.partialorder %v10062_v37, 0.0  ;;  %v10070_v13 = vmul.f32 0.2, %v10062_v37 }
 0xe1d   :  { %vm10069_vm12 = vcmp.ge.f32.partialorder %v10065_v31, 0.0  ;;  %v10073_v19 = vmul.f32 0.2, %v10065_v31  ;;  %v10072_v46 = vmul.f32 0.2, %v10064_v5  ;;  %vm10068_vm13 = vcmp.ge.f32.partialorder %v10064_v5, 0.0 }
 0xe1e   :  { %v10075_v14 = vsel %vm10067_vm10, %v10063_v21, %v10071_v22  ;;  %v10074_v15 = vsel %vm10066_vm11, %v10062_v37, %v10070_v13 }
 0xe1f   :  { %v10079_v3 = vpack.c.bf16 %v10075_v14, %v10075_v14  ;;  %v10078_v47 = vpack.c.bf16 %v10074_v15, %v10074_v15  ;;  %v10077_v20 = vsel %vm10069_vm12, %v10065_v31, %v10073_v19  ;;  %v10076_v60 = vsel %vm10068_vm13, %v10064_v5, %v10072_v46 }
 0xe20   :  { %v10081_v36 = vpack.c.bf16 %v10077_v20, %v10077_v20  ;;  %v10080_v39 = vpack.c.bf16 %v10076_v60, %v10076_v60 }
 0xe21   :  { %10377 = vmatprep.mubr.bf16.mxu1 %v10079_v3 }
 0xe22   :  { %10378 = vmatmul.mubr.bf16.vlgmr.msra.gmra.mrb[96].mxu1 %v10078_v47 }
 0xe23   :  { %11750 = vmatpush3.bf16.msra.mxu1 %v13859_v26  ;;  %10417 = vmatprep.mubr.bf16.mxu1 %v10081_v36 }
 0xe24   :  { %11751 = vmatprep.subr.bf16.mxu1 %v13860_v35 }
 0xe27   :  { %11752 = vmatpush3.bf16.msra.mxu1 %v13861_v17 }
 0xe28   :  { %11753 = vmatprep.subr.bf16.mxu1 %v13862_v23 }
 0xe2b   :  { %11754 = vmatpush3.bf16.msra.mxu1 %v13863_v18 }
 0xe2c   :  { %11755 = vmatprep.subr.bf16.mxu1 %v13864_v52 }
 0xe2f   :  { %11756 = vmatpush3.bf16.msra.mxu1 %v13865_v55 }
 0xe30   :  { %11757 = vmatprep.subr.bf16.mxu1 %v13866_v38 }
 0xe33   :  { %11758 = vmatpush3.bf16.msra.mxu1 %v13867_v40 }
 0xe34   :  { %11759 = vmatprep.subr.bf16.mxu1 %v13868_v11 }
 0xe37   :  { %11760 = vmatpush3.bf16.msra.mxu1 %v13869_v41 }
 0xe38   :  { %11761 = vmatprep.subr.bf16.mxu1 %v13870_v57 }
 0xe3b   :  { %11762 = vmatpush3.bf16.msra.mxu1 %v13871_v16 }
 0xe3c   :  { %11763 = vmatprep.subr.bf16.mxu1 %v13872_v63 }
 0xe3f   :  { %11764 = vmatpush3.bf16.msra.mxu1 %v13873_v53 }
 0xe42   :  { %10418 = vmatmul.mubr.bf16.vlgmr.msra.gmra.mrb[100].mxu1 %v10080_v39 }
 0xef5   :  { %v11743_v32 = vpop.f32.mrb[96].mxu1 }
 0xef6   :  { %v11744_v50 = vpop.f32.mrb[97].mxu1 }
 0xef7   :  { %v11745_v1 = vadd.f32 %v11744_v50, %v11743_v32  ;;  %v11746_v6 = vpop.f32.mrb[98].mxu1 }
 0xef8   :  { %v11747_v49 = vpop.f32.mrb[99].mxu1 }
 0xef9   :  { %v10380_v27 = vadd.f32 %v11745_v1, %v11475_v33 }
 0xf15   :  { %v11765_v4 = vpop.f32.mrb[100].mxu1 }
 0xf16   :  { %v11766_v8 = vpop.f32.mrb[101].mxu1 }
 0xf17   :  { %v11767_v56 = vadd.f32 %v11766_v8, %v11765_v4  ;;  %v11768_v9 = vpop.f32.mrb[102].mxu1 }
 0xf18   :  { %v11769_v44 = vpop.f32.mrb[103].mxu1 }
 0xf19   :  { %v10420_v29 = vadd.f32 %v11767_v56, %v10380_v27 }
 0xf1b   :  { %10425 = vst [vmem:[%s15090_s16] sm:$0xff] %v10420_v29 }
 0xf1c   :  { %10430 = vsyncpa [#allocation3], 1 }
 0xf1d   :  { %10431 = vsyncpa [#allocation5], 1 }
 0xf1e   :  { %10432 = vsyncpa [#allocation8], 1 }
 0xf1f   :  { %10433 = vsyncpa [#allocation11], 1 }
 0xf20   :  { %10434 = vsyncpa [#allocation14], 1 }
 0xf21   :  { %10435 = vsyncpa [#allocation17], 1 }
 0xf22   :  { %10436 = vsyncpa [#allocation20], 1 }
 0xf23   :  { %10437 = vsyncpa [#allocation23], 1 }

</bundles_post_ra>
